<compile_context>
chip_gen: v7x
topology: tpu7x:2x2x1
jax: 0.10.0
libtpu: 0.0.40
codegen_flags: <defaults>
</compile_context>

<pallas_src>
import jax
import jax.numpy as jnp
from jax import lax
from jax.experimental import pallas as pl
from jax.experimental.pallas import tpu as pltpu

# Hyperparameters matching the PyTorch script: NLGNet(10, 3, 15, 100)
WORD_DIM = 10
WINDOW = 3
RNN_DIM = 15
VOCAB = 100
BATCH = 30
SEQ_X = 10
SEQ_Y = 8

LANE = 128   # padded lane width used for rnn_dim (Hp) and vocab (Vp)


def nlg_kernel(ids_ref, embed_ref, convw_ref, convb_ref,
               wih_ref, whh_ref, bih_ref, bhhn_ref, linw_ref, linb_ref,
               out_ref, hslab_ref):
    Sy, Bt, Vp = out_ref.shape              # (8, Bt, 128)
    Rt = ids_ref.shape[1]                   # Bt*Sx + Sy*Bt
    Vemb, D = embed_ref.shape               # (128, 10)
    Hp = convb_ref.shape[1]                 # 128
    W = convw_ref.shape[1] // Hp            # window size (3)
    nx = Rt - Sy * Bt                       # number of x-id rows = Bt*Sx
    Sx = nx // Bt
    n_pos = Sx - W + 1

    # ---- merged embedding lookup: a single one-hot matmul over all ids ----
    # ids are packed by the wrapper as [x batch-major ; y time-major] per shard.
    ids = ids_ref[0]                                            # (Rt, 1) int32
    iota = lax.broadcasted_iota(jnp.int32, (Rt, Vemb), 1)
    onehot = (ids == iota).astype(jnp.float32)                  # (Rt, 128)
    emb = jnp.dot(onehot, embed_ref[...],
                  preferred_element_type=jnp.float32)           # (Rt, D)

    # ---- CNN_Maxpool: one matmul + W shifted (lane-aligned) adds + max ----
    proj = jnp.dot(emb[:nx, :], convw_ref[...],
                   preferred_element_type=jnp.float32)          # (Bt*Sx, W*Hp)
    proj = proj.reshape(Bt, Sx, W * Hp)
    conv = proj[:, 0:n_pos, 0:Hp]
    for k in range(1, W):
        conv = conv + proj[:, k:k + n_pos, k * Hp:(k + 1) * Hp]
    # bias is position-independent -> add once after the max
    doc = jnp.max(conv, axis=1) + convb_ref[...]                # (Bt, Hp) == h0

    # ---- GRU: input-to-hidden for ALL Sy steps in one matmul (time-major) ----
    # bih_ref already contains b_ih for all gates PLUS b_hh for the r/z gates
    # (merged in the wrapper), so the recurrence only adds the n-gate hidden bias.
    gi_all = jnp.dot(emb[nx:, :], wih_ref[...],
                     preferred_element_type=jnp.float32) + bih_ref[...]  # (Sy*Bt, 3Hp)

    whh = whh_ref[...]                                          # (Hp, 3*Hp)
    bhh_n = bhhn_ref[...]                                       # (1, Hp)
    h = doc
    for t in range(Sy):
        gi = gi_all[t * Bt:(t + 1) * Bt, :]                     # (Bt, 3*Hp), aligned
        gh = jnp.dot(h, whh, preferred_element_type=jnp.float32)
        r = jax.nn.sigmoid(gi[:, 0:Hp] + gh[:, 0:Hp])
        z = jax.nn.sigmoid(gi[:, Hp:2 * Hp] + gh[:, Hp:2 * Hp])
        n = jnp.tanh(gi[:, 2 * Hp:] + r * (gh[:, 2 * Hp:] + bhh_n))
        h = (1.0 - z) * n + z * h
        hslab_ref[t * Bt:(t + 1) * Bt, :] = h                   # time-major slab

    # ---- vocab projection: ONE matmul + ONE lane-dense contiguous store ----
    logits = jnp.dot(hslab_ref[...], linw_ref[...],
                     preferred_element_type=jnp.float32) + linb_ref[...]  # (Sy*Bt, Vp)
    out_ref[...] = logits.reshape(Sy, Bt, Vp)


def nlg_forward(x_id, y_id, params):
    B, Sx = x_id.shape
    Sy = y_id.shape[1]
    H, D, V, W = RNN_DIM, WORD_DIM, VOCAB, WINDOW
    Hp = Vp = LANE
    f32 = jnp.float32

    # 2-way batch sharding across the two TensorCores on v7x; 1 shard elsewhere.
    try:
        kind = jax.devices()[0].device_kind.lower()
    except Exception:
        kind = ""
    n_shards = 2 if ("v7" in kind or "tpu7" in kind) else 1
    per = (B + n_shards - 1) // n_shards
    Bt = ((per + 7) // 8) * 8               # per-shard batch, sublane aligned
    Bpad = Bt * n_shards

    # --- token ids: pad batch, repack per shard as [x batch-major ; y time-major] ---
    xp = jnp.zeros((Bpad, Sx), jnp.int32).at[:B].set(x_id)
    yp = jnp.zeros((Bpad, Sy), jnp.int32).at[:B].set(y_id)
    x_sh = xp.reshape(n_shards, Bt * Sx)
    y_tm = jnp.transpose(yp.reshape(n_shards, Bt, Sy),
                         (0, 2, 1)).reshape(n_shards, Sy * Bt)
    ids_all = jnp.concatenate([x_sh, y_tm], axis=1)[..., None]  # (n_shards, Rt, 1)
    Rt = Bt * Sx + Sy * Bt

    # --- weights: transpose, fuse gates, zero-pad every output block to 128 lanes ---
    embed_p = jnp.zeros((Vp, D), f32).at[:V].set(params["embed"])
    cw = jnp.transpose(params["conv_w"], (2, 1, 0))                       # (D, W, H)
    cw = jnp.pad(cw, ((0, 0), (0, 0), (0, Hp - H))).reshape(D, W * Hp)
    cb = jnp.pad(params["conv_b"], (0, Hp - H)).reshape(1, Hp)
    wih = jnp.transpose(params["w_ih"].reshape(3, H, D), (2, 0, 1))       # (D, 3, H)
    wih = jnp.pad(wih, ((0, 0), (0, 0), (0, Hp - H))).reshape(D, 3 * Hp)
    whh = jnp.transpose(params["w_hh"].reshape(3, H, H), (2, 0, 1))       # (Hin, 3, Hout)
    whh = jnp.pad(whh, ((0, Hp - H), (0, 0), (0, Hp - H))).reshape(Hp, 3 * Hp)
    # Merge hidden biases of r/z gates into the hoisted input bias; keep only the
    # n-gate hidden bias (which must stay inside r*(...)) for the recurrence.
    bih3 = params["b_ih"].reshape(3, H)
    bhh3 = params["b_hh"].reshape(3, H)
    bih_fused = bih3.at[0:2].add(bhh3[0:2])
    bih = jnp.pad(bih_fused, ((0, 0), (0, Hp - H))).reshape(1, 3 * Hp)
    bhh_n = jnp.pad(bhh3[2], (0, Hp - H)).reshape(1, Hp)
    linw = jnp.pad(params["lin_w"].T, ((0, Hp - H), (0, Vp - V)))         # (Hp, Vp)
    linb = jnp.pad(params["lin_b"], (0, Vp - V)).reshape(1, Vp)

    weights = (embed_p, cw, cb, wih, whh, bih, bhh_n, linw, linb)
    in_specs = ([pl.BlockSpec((1, Rt, 1), lambda i: (i, 0, 0))] +
                [pl.BlockSpec(w.shape, lambda i: (0, 0)) for w in weights])
    out_specs = pl.BlockSpec((Sy, Bt, Vp), lambda i: (0, i, 0))

    out = pl.pallas_call(
        nlg_kernel,
        out_shape=jax.ShapeDtypeStruct((Sy, Bpad, Vp), f32),
        grid=(n_shards,),
        in_specs=in_specs,
        out_specs=out_specs,
        scratch_shapes=[pltpu.VMEM((Sy * Bt, Hp), f32)],
        compiler_params=pltpu.CompilerParams(
            dimension_semantics=("parallel",)),
    )(ids_all, *weights)

    # (Sy, Bpad, Vp) -> (B, Sy, V): layout plumbing + un-padding in the wrapper.
    return jnp.transpose(out, (1, 0, 2))[:B, :, :V]


def nlg_reference(x_id, y_id, p):
    """Pure-JAX reference with PyTorch semantics (Embedding/CNN_Maxpool/GRU/Linear)."""
    x = p["embed"][x_id]                                            # (B, Sx, D)
    y = p["embed"][y_id]                                            # (B, Sy, D)
    B, Sx, D = x.shape
    n_pos = Sx - WINDOW + 1
    conv = jnp.zeros((B * n_pos, RNN_DIM), jnp.float32) + p["conv_b"][None, :]
    for k in range(WINDOW):
        xk = x[:, k:k + n_pos, :].reshape(B * n_pos, D)
        conv = conv + xk @ p["conv_w"][:, k, :].T
    h = conv.reshape(B, n_pos, RNN_DIM).max(axis=1)                 # h0 (B, H)
    w_ih = p["w_ih"].reshape(3, RNN_DIM, WORD_DIM)
    w_hh = p["w_hh"].reshape(3, RNN_DIM, RNN_DIM)
    b_ih = p["b_ih"].reshape(3, RNN_DIM)
    b_hh = p["b_hh"].reshape(3, RNN_DIM)
    outs = []
    for t in range(y.shape[1]):
        x_t = y[:, t, :]
        r = jax.nn.sigmoid(x_t @ w_ih[0].T + b_ih[0] + h @ w_hh[0].T + b_hh[0])
        z = jax.nn.sigmoid(x_t @ w_ih[1].T + b_ih[1] + h @ w_hh[1].T + b_hh[1])
        n = jnp.tanh(x_t @ w_ih[2].T + b_ih[2]
                     + r * (h @ w_hh[2].T + b_hh[2]))
        h = (1.0 - z) * n + z * h
        outs.append(h @ p["lin_w"].T + p["lin_b"])
    return jnp.stack(outs, axis=1)                                  # (B, Sy, V)


def init_params(key):
    ks = jax.random.split(key, 9)

    def nrm(k, shape, scale):
        return (scale * jax.random.normal(k, shape)).astype(jnp.float32)

    return {
        "embed": nrm(ks[0], (VOCAB, WORD_DIM), 1.0),
        # Conv2d(1, H, (WINDOW, WORD_DIM)) weight, stored as (H, WINDOW, D)
        "conv_w": nrm(ks[1], (RNN_DIM, WINDOW, WORD_DIM), 0.2),
        "conv_b": nrm(ks[2], (RNN_DIM,), 0.1),
        # GRU weights, PyTorch layout: (3H, in) / (3H, H), gate order r,z,n
        "w_ih": nrm(ks[3], (3 * RNN_DIM, WORD_DIM), 0.2),
        "w_hh": nrm(ks[4], (3 * RNN_DIM, RNN_DIM), 0.2),
        "b_ih": nrm(ks[5], (3 * RNN_DIM,), 0.1),
        "b_hh": nrm(ks[6], (3 * RNN_DIM,), 0.1),
        "lin_w": nrm(ks[7], (VOCAB, RNN_DIM), 0.2),
        "lin_b": nrm(ks[8], (VOCAB,), 0.1),
    }


if __name__ == "__main__":
    key = jax.random.PRNGKey(0)
    kp, kx, ky = jax.random.split(key, 3)
    params = init_params(kp)
    x_id = jax.random.randint(kx, (BATCH, SEQ_X), 0, VOCAB, dtype=jnp.int32)
    y_id = jax.random.randint(ky, (BATCH, SEQ_Y), 0, VOCAB, dtype=jnp.int32)

    word_scores = jax.block_until_ready(nlg_forward(x_id, y_id, params))
    assert word_scores.shape == (BATCH, SEQ_Y, VOCAB)
    assert word_scores.dtype == jnp.float32

    ref = jax.block_until_ready(nlg_reference(x_id, y_id, params))
    assert jnp.allclose(word_scores, ref, rtol=1e-4, atol=1e-4), (
        float(jnp.max(jnp.abs(word_scores - ref))))

    print("KERNEL_OK")
</pallas_src>

<mosaic_0001>
module attributes {stable_mosaic.version = 11 : i64} {
  func.func @nlg_kernel(%arg0: i32, %arg1: memref<1x576x1xi32, #tpu.memory_space<vmem>>, %arg2: memref<128x10xf32, #tpu.memory_space<vmem>>, %arg3: memref<10x384xf32, #tpu.memory_space<vmem>>, %arg4: memref<1x128xf32, #tpu.memory_space<vmem>>, %arg5: memref<10x384xf32, #tpu.memory_space<vmem>>, %arg6: memref<128x384xf32, #tpu.memory_space<vmem>>, %arg7: memref<1x384xf32, #tpu.memory_space<vmem>>, %arg8: memref<1x128xf32, #tpu.memory_space<vmem>>, %arg9: memref<128x128xf32, #tpu.memory_space<vmem>>, %arg10: memref<1x128xf32, #tpu.memory_space<vmem>>, %arg11: memref<8x32x128xf32, #tpu.memory_space<vmem>>, %arg12: memref<256x128xf32, #tpu.memory_space<vmem>>) attributes {dimension_semantics = [#tpu.dimension_semantics<parallel>], iteration_bounds = array<i64: 1>, scalar_prefetch = 0 : i64, scratch_operands = 1 : i64, tpu.core_type = #tpu.core_type<tc>, window_params = [{transform_indices = @transform_0, window_bounds = array<i64: 1, 576, 1>}, {pipeline_mode = #tpu.pipeline_mode<synchronous>, transform_indices = @transform_1, window_bounds = array<i64: 128, 10>}, {pipeline_mode = #tpu.pipeline_mode<synchronous>, transform_indices = @transform_2, window_bounds = array<i64: 10, 384>}, {pipeline_mode = #tpu.pipeline_mode<synchronous>, transform_indices = @transform_3, window_bounds = array<i64: 1, 128>}, {pipeline_mode = #tpu.pipeline_mode<synchronous>, transform_indices = @transform_4, window_bounds = array<i64: 10, 384>}, {pipeline_mode = #tpu.pipeline_mode<synchronous>, transform_indices = @transform_5, window_bounds = array<i64: 128, 384>}, {pipeline_mode = #tpu.pipeline_mode<synchronous>, transform_indices = @transform_6, window_bounds = array<i64: 1, 384>}, {pipeline_mode = #tpu.pipeline_mode<synchronous>, transform_indices = @transform_7, window_bounds = array<i64: 1, 128>}, {pipeline_mode = #tpu.pipeline_mode<synchronous>, transform_indices = @transform_8, window_bounds = array<i64: 128, 128>}, {pipeline_mode = #tpu.pipeline_mode<synchronous>, transform_indices = @transform_9, window_bounds = array<i64: 1, 128>}, {transform_indices = @transform_10, window_bounds = array<i64: 8, 32, 128>}]} {
    %c0 = arith.constant 0 : index
    %c0_0 = arith.constant 0 : index
    %c0_1 = arith.constant 0 : index
    %0 = vector.load %arg1[%c0, %c0_0, %c0_1] : memref<1x576x1xi32, #tpu.memory_space<vmem>>, vector<1x576x1xi32>
    %1 = vector.shape_cast %0 : vector<1x576x1xi32> to vector<576x1xi32>
    %2 = tpu.iota {dimensions = array<i32: 1>} : vector<576x128xi32>
    %3 = vector.broadcast %1 : vector<576x1xi32> to vector<576x128xi32>
    %4 = arith.cmpi eq, %3, %2 : vector<576x128xi32>
    %5 = arith.extui %4 : vector<576x128xi1> to vector<576x128xi32>
    %6 = arith.sitofp %5 : vector<576x128xi32> to vector<576x128xf32>
    %c0_2 = arith.constant 0 : index
    %c0_3 = arith.constant 0 : index
    %7 = vector.load %arg2[%c0_2, %c0_3] : memref<128x10xf32, #tpu.memory_space<vmem>>, vector<128x10xf32>
    %cst = arith.constant dense<0.000000e+00> : vector<576x10xf32>
    %8 = tpu.matmul %6, %7, %cst {dimension_numbers = #tpu.dot_dimension_numbers<[1], [0], [0], [1], [0, 0, 1, 1], [], []>} : vector<576x128xf32>, vector<128x10xf32>, vector<576x10xf32> -> vector<576x10xf32>
    %9 = vector.extract_strided_slice %8 {offsets = [0, 0], sizes = [320, 10], strides = [1, 1]} : vector<576x10xf32> to vector<320x10xf32>
    %c0_4 = arith.constant 0 : index
    %c0_5 = arith.constant 0 : index
    %10 = vector.load %arg3[%c0_4, %c0_5] : memref<10x384xf32, #tpu.memory_space<vmem>>, vector<10x384xf32>
    %cst_6 = arith.constant dense<0.000000e+00> : vector<320x384xf32>
    %11 = tpu.matmul %9, %10, %cst_6 {dimension_numbers = #tpu.dot_dimension_numbers<[1], [0], [0], [1], [0, 0, 1, 1], [], []>} : vector<320x10xf32>, vector<10x384xf32>, vector<320x384xf32> -> vector<320x384xf32>
    %12 = vector.shape_cast %11 : vector<320x384xf32> to vector<32x10x384xf32>
    %13 = vector.extract_strided_slice %12 {offsets = [0, 0, 0], sizes = [32, 8, 128], strides = [1, 1, 1]} : vector<32x10x384xf32> to vector<32x8x128xf32>
    %14 = vector.extract_strided_slice %12 {offsets = [0, 1, 128], sizes = [32, 8, 128], strides = [1, 1, 1]} : vector<32x10x384xf32> to vector<32x8x128xf32>
    %15 = arith.addf %13, %14 : vector<32x8x128xf32>
    %16 = vector.extract_strided_slice %12 {offsets = [0, 2, 256], sizes = [32, 8, 128], strides = [1, 1, 1]} : vector<32x10x384xf32> to vector<32x8x128xf32>
    %17 = arith.addf %15, %16 : vector<32x8x128xf32>
    %cst_7 = arith.constant dense<0xFF800000> : vector<32x128xf32>
    %18 = vector.multi_reduction <maximumf>, %17, %cst_7 [1] : vector<32x8x128xf32> to vector<32x128xf32>
    %c0_8 = arith.constant 0 : index
    %c0_9 = arith.constant 0 : index
    %19 = vector.load %arg4[%c0_8, %c0_9] : memref<1x128xf32, #tpu.memory_space<vmem>>, vector<1x128xf32>
    %20 = vector.broadcast %19 : vector<1x128xf32> to vector<32x128xf32>
    %21 = arith.addf %18, %20 : vector<32x128xf32>
    %22 = vector.extract_strided_slice %8 {offsets = [320, 0], sizes = [256, 10], strides = [1, 1]} : vector<576x10xf32> to vector<256x10xf32>
    %c0_10 = arith.constant 0 : index
    %c0_11 = arith.constant 0 : index
    %23 = vector.load %arg5[%c0_10, %c0_11] : memref<10x384xf32, #tpu.memory_space<vmem>>, vector<10x384xf32>
    %cst_12 = arith.constant dense<0.000000e+00> : vector<256x384xf32>
    %24 = tpu.matmul %22, %23, %cst_12 {dimension_numbers = #tpu.dot_dimension_numbers<[1], [0], [0], [1], [0, 0, 1, 1], [], []>} : vector<256x10xf32>, vector<10x384xf32>, vector<256x384xf32> -> vector<256x384xf32>
    %c0_13 = arith.constant 0 : index
    %c0_14 = arith.constant 0 : index
    %25 = vector.load %arg7[%c0_13, %c0_14] : memref<1x384xf32, #tpu.memory_space<vmem>>, vector<1x384xf32>
    %26 = vector.broadcast %25 : vector<1x384xf32> to vector<256x384xf32>
    %27 = arith.addf %24, %26 : vector<256x384xf32>
    %c0_15 = arith.constant 0 : index
    %c0_16 = arith.constant 0 : index
    %28 = vector.load %arg6[%c0_15, %c0_16] : memref<128x384xf32, #tpu.memory_space<vmem>>, vector<128x384xf32>
    %c0_17 = arith.constant 0 : index
    %c0_18 = arith.constant 0 : index
    %29 = vector.load %arg8[%c0_17, %c0_18] : memref<1x128xf32, #tpu.memory_space<vmem>>, vector<1x128xf32>
    %30 = vector.extract_strided_slice %27 {offsets = [0, 0], sizes = [32, 384], strides = [1, 1]} : vector<256x384xf32> to vector<32x384xf32>
    %cst_19 = arith.constant dense<0.000000e+00> : vector<32x384xf32>
    %31 = tpu.matmul %21, %28, %cst_19 {dimension_numbers = #tpu.dot_dimension_numbers<[1], [0], [0], [1], [0, 0, 1, 1], [], []>} : vector<32x128xf32>, vector<128x384xf32>, vector<32x384xf32> -> vector<32x384xf32>
    %32 = vector.extract_strided_slice %30 {offsets = [0, 0], sizes = [32, 128], strides = [1, 1]} : vector<32x384xf32> to vector<32x128xf32>
    %33 = vector.extract_strided_slice %31 {offsets = [0, 0], sizes = [32, 128], strides = [1, 1]} : vector<32x384xf32> to vector<32x128xf32>
    %34 = arith.addf %32, %33 : vector<32x128xf32>
    %35 = arith.negf %34 : vector<32x128xf32>
    %36 = math.exp %35 : vector<32x128xf32>
    %cst_20 = arith.constant 1.000000e+00 : f32
    %37 = vector.broadcast %cst_20 : f32 to vector<32x128xf32>
    %38 = arith.addf %37, %36 : vector<32x128xf32>
    %39 = arith.divf %37, %38 : vector<32x128xf32>
    %40 = vector.extract_strided_slice %30 {offsets = [0, 128], sizes = [32, 128], strides = [1, 1]} : vector<32x384xf32> to vector<32x128xf32>
    %41 = vector.extract_strided_slice %31 {offsets = [0, 128], sizes = [32, 128], strides = [1, 1]} : vector<32x384xf32> to vector<32x128xf32>
    %42 = arith.addf %40, %41 : vector<32x128xf32>
    %43 = arith.negf %42 : vector<32x128xf32>
    %44 = math.exp %43 : vector<32x128xf32>
    %cst_21 = arith.constant 1.000000e+00 : f32
    %45 = vector.broadcast %cst_21 : f32 to vector<32x128xf32>
    %46 = arith.addf %45, %44 : vector<32x128xf32>
    %47 = arith.divf %45, %46 : vector<32x128xf32>
    %48 = vector.extract_strided_slice %30 {offsets = [0, 256], sizes = [32, 128], strides = [1, 1]} : vector<32x384xf32> to vector<32x128xf32>
    %49 = vector.extract_strided_slice %31 {offsets = [0, 256], sizes = [32, 128], strides = [1, 1]} : vector<32x384xf32> to vector<32x128xf32>
    %50 = vector.broadcast %29 : vector<1x128xf32> to vector<32x128xf32>
    %51 = arith.addf %49, %50 : vector<32x128xf32>
    %52 = arith.mulf %39, %51 : vector<32x128xf32>
    %53 = arith.addf %48, %52 : vector<32x128xf32>
    %54 = math.tanh %53 : vector<32x128xf32>
    %cst_22 = arith.constant 1.000000e+00 : f32
    %55 = vector.broadcast %cst_22 : f32 to vector<32x128xf32>
    %56 = arith.subf %55, %47 : vector<32x128xf32>
    %57 = arith.mulf %56, %54 : vector<32x128xf32>
    %58 = arith.mulf %47, %21 : vector<32x128xf32>
    %59 = arith.addf %57, %58 : vector<32x128xf32>
    %c0_23 = arith.constant 0 : index
    %c0_24 = arith.constant 0 : index
    %60 = vector.load %arg12[%c0_23, %c0_24] : memref<256x128xf32, #tpu.memory_space<vmem>>, vector<32x128xf32>
    tpu.vector_store %arg12[%c0_23, %c0_24], %59 {strides = array<i32>} : memref<256x128xf32, #tpu.memory_space<vmem>>, vector<32x128xf32>,
    %61 = vector.extract_strided_slice %27 {offsets = [32, 0], sizes = [32, 384], strides = [1, 1]} : vector<256x384xf32> to vector<32x384xf32>
    %cst_25 = arith.constant dense<0.000000e+00> : vector<32x384xf32>
    %62 = tpu.matmul %59, %28, %cst_25 {dimension_numbers = #tpu.dot_dimension_numbers<[1], [0], [0], [1], [0, 0, 1, 1], [], []>} : vector<32x128xf32>, vector<128x384xf32>, vector<32x384xf32> -> vector<32x384xf32>
    %63 = vector.extract_strided_slice %61 {offsets = [0, 0], sizes = [32, 128], strides = [1, 1]} : vector<32x384xf32> to vector<32x128xf32>
    %64 = vector.extract_strided_slice %62 {offsets = [0, 0], sizes = [32, 128], strides = [1, 1]} : vector<32x384xf32> to vector<32x128xf32>
    %65 = arith.addf %63, %64 : vector<32x128xf32>
    %66 = arith.negf %65 : vector<32x128xf32>
    %67 = math.exp %66 : vector<32x128xf32>
    %cst_26 = arith.constant 1.000000e+00 : f32
    %68 = vector.broadcast %cst_26 : f32 to vector<32x128xf32>
    %69 = arith.addf %68, %67 : vector<32x128xf32>
    %70 = arith.divf %68, %69 : vector<32x128xf32>
    %71 = vector.extract_strided_slice %61 {offsets = [0, 128], sizes = [32, 128], strides = [1, 1]} : vector<32x384xf32> to vector<32x128xf32>
    %72 = vector.extract_strided_slice %62 {offsets = [0, 128], sizes = [32, 128], strides = [1, 1]} : vector<32x384xf32> to vector<32x128xf32>
    %73 = arith.addf %71, %72 : vector<32x128xf32>
    %74 = arith.negf %73 : vector<32x128xf32>
    %75 = math.exp %74 : vector<32x128xf32>
    %cst_27 = arith.constant 1.000000e+00 : f32
    %76 = vector.broadcast %cst_27 : f32 to vector<32x128xf32>
    %77 = arith.addf %76, %75 : vector<32x128xf32>
    %78 = arith.divf %76, %77 : vector<32x128xf32>
    %79 = vector.extract_strided_slice %61 {offsets = [0, 256], sizes = [32, 128], strides = [1, 1]} : vector<32x384xf32> to vector<32x128xf32>
    %80 = vector.extract_strided_slice %62 {offsets = [0, 256], sizes = [32, 128], strides = [1, 1]} : vector<32x384xf32> to vector<32x128xf32>
    %81 = vector.broadcast %29 : vector<1x128xf32> to vector<32x128xf32>
    %82 = arith.addf %80, %81 : vector<32x128xf32>
    %83 = arith.mulf %70, %82 : vector<32x128xf32>
    %84 = arith.addf %79, %83 : vector<32x128xf32>
    %85 = math.tanh %84 : vector<32x128xf32>
    %cst_28 = arith.constant 1.000000e+00 : f32
    %86 = vector.broadcast %cst_28 : f32 to vector<32x128xf32>
    %87 = arith.subf %86, %78 : vector<32x128xf32>
    %88 = arith.mulf %87, %85 : vector<32x128xf32>
    %89 = arith.mulf %78, %59 : vector<32x128xf32>
    %90 = arith.addf %88, %89 : vector<32x128xf32>
    %c32 = arith.constant 32 : index
    %c0_29 = arith.constant 0 : index
    %91 = vector.load %arg12[%c32, %c0_29] : memref<256x128xf32, #tpu.memory_space<vmem>>, vector<32x128xf32>
    tpu.vector_store %arg12[%c32, %c0_29], %90 {strides = array<i32>} : memref<256x128xf32, #tpu.memory_space<vmem>>, vector<32x128xf32>,
    %92 = vector.extract_strided_slice %27 {offsets = [64, 0], sizes = [32, 384], strides = [1, 1]} : vector<256x384xf32> to vector<32x384xf32>
    %cst_30 = arith.constant dense<0.000000e+00> : vector<32x384xf32>
    %93 = tpu.matmul %90, %28, %cst_30 {dimension_numbers = #tpu.dot_dimension_numbers<[1], [0], [0], [1], [0, 0, 1, 1], [], []>} : vector<32x128xf32>, vector<128x384xf32>, vector<32x384xf32> -> vector<32x384xf32>
    %94 = vector.extract_strided_slice %92 {offsets = [0, 0], sizes = [32, 128], strides = [1, 1]} : vector<32x384xf32> to vector<32x128xf32>
    %95 = vector.extract_strided_slice %93 {offsets = [0, 0], sizes = [32, 128], strides = [1, 1]} : vector<32x384xf32> to vector<32x128xf32>
    %96 = arith.addf %94, %95 : vector<32x128xf32>
    %97 = arith.negf %96 : vector<32x128xf32>
    %98 = math.exp %97 : vector<32x128xf32>
    %cst_31 = arith.constant 1.000000e+00 : f32
    %99 = vector.broadcast %cst_31 : f32 to vector<32x128xf32>
    %100 = arith.addf %99, %98 : vector<32x128xf32>
    %101 = arith.divf %99, %100 : vector<32x128xf32>
    %102 = vector.extract_strided_slice %92 {offsets = [0, 128], sizes = [32, 128], strides = [1, 1]} : vector<32x384xf32> to vector<32x128xf32>
    %103 = vector.extract_strided_slice %93 {offsets = [0, 128], sizes = [32, 128], strides = [1, 1]} : vector<32x384xf32> to vector<32x128xf32>
    %104 = arith.addf %102, %103 : vector<32x128xf32>
    %105 = arith.negf %104 : vector<32x128xf32>
    %106 = math.exp %105 : vector<32x128xf32>
    %cst_32 = arith.constant 1.000000e+00 : f32
    %107 = vector.broadcast %cst_32 : f32 to vector<32x128xf32>
    %108 = arith.addf %107, %106 : vector<32x128xf32>
    %109 = arith.divf %107, %108 : vector<32x128xf32>
    %110 = vector.extract_strided_slice %92 {offsets = [0, 256], sizes = [32, 128], strides = [1, 1]} : vector<32x384xf32> to vector<32x128xf32>
    %111 = vector.extract_strided_slice %93 {offsets = [0, 256], sizes = [32, 128], strides = [1, 1]} : vector<32x384xf32> to vector<32x128xf32>
    %112 = vector.broadcast %29 : vector<1x128xf32> to vector<32x128xf32>
    %113 = arith.addf %111, %112 : vector<32x128xf32>
    %114 = arith.mulf %101, %113 : vector<32x128xf32>
    %115 = arith.addf %110, %114 : vector<32x128xf32>
    %116 = math.tanh %115 : vector<32x128xf32>
    %cst_33 = arith.constant 1.000000e+00 : f32
    %117 = vector.broadcast %cst_33 : f32 to vector<32x128xf32>
    %118 = arith.subf %117, %109 : vector<32x128xf32>
    %119 = arith.mulf %118, %116 : vector<32x128xf32>
    %120 = arith.mulf %109, %90 : vector<32x128xf32>
    %121 = arith.addf %119, %120 : vector<32x128xf32>
    %c64 = arith.constant 64 : index
    %c0_34 = arith.constant 0 : index
    %122 = vector.load %arg12[%c64, %c0_34] : memref<256x128xf32, #tpu.memory_space<vmem>>, vector<32x128xf32>
    tpu.vector_store %arg12[%c64, %c0_34], %121 {strides = array<i32>} : memref<256x128xf32, #tpu.memory_space<vmem>>, vector<32x128xf32>,
    %123 = vector.extract_strided_slice %27 {offsets = [96, 0], sizes = [32, 384], strides = [1, 1]} : vector<256x384xf32> to vector<32x384xf32>
    %cst_35 = arith.constant dense<0.000000e+00> : vector<32x384xf32>
    %124 = tpu.matmul %121, %28, %cst_35 {dimension_numbers = #tpu.dot_dimension_numbers<[1], [0], [0], [1], [0, 0, 1, 1], [], []>} : vector<32x128xf32>, vector<128x384xf32>, vector<32x384xf32> -> vector<32x384xf32>
    %125 = vector.extract_strided_slice %123 {offsets = [0, 0], sizes = [32, 128], strides = [1, 1]} : vector<32x384xf32> to vector<32x128xf32>
    %126 = vector.extract_strided_slice %124 {offsets = [0, 0], sizes = [32, 128], strides = [1, 1]} : vector<32x384xf32> to vector<32x128xf32>
    %127 = arith.addf %125, %126 : vector<32x128xf32>
    %128 = arith.negf %127 : vector<32x128xf32>
    %129 = math.exp %128 : vector<32x128xf32>
    %cst_36 = arith.constant 1.000000e+00 : f32
    %130 = vector.broadcast %cst_36 : f32 to vector<32x128xf32>
    %131 = arith.addf %130, %129 : vector<32x128xf32>
    %132 = arith.divf %130, %131 : vector<32x128xf32>
    %133 = vector.extract_strided_slice %123 {offsets = [0, 128], sizes = [32, 128], strides = [1, 1]} : vector<32x384xf32> to vector<32x128xf32>
    %134 = vector.extract_strided_slice %124 {offsets = [0, 128], sizes = [32, 128], strides = [1, 1]} : vector<32x384xf32> to vector<32x128xf32>
    %135 = arith.addf %133, %134 : vector<32x128xf32>
    %136 = arith.negf %135 : vector<32x128xf32>
    %137 = math.exp %136 : vector<32x128xf32>
    %cst_37 = arith.constant 1.000000e+00 : f32
    %138 = vector.broadcast %cst_37 : f32 to vector<32x128xf32>
    %139 = arith.addf %138, %137 : vector<32x128xf32>
    %140 = arith.divf %138, %139 : vector<32x128xf32>
    %141 = vector.extract_strided_slice %123 {offsets = [0, 256], sizes = [32, 128], strides = [1, 1]} : vector<32x384xf32> to vector<32x128xf32>
    %142 = vector.extract_strided_slice %124 {offsets = [0, 256], sizes = [32, 128], strides = [1, 1]} : vector<32x384xf32> to vector<32x128xf32>
    %143 = vector.broadcast %29 : vector<1x128xf32> to vector<32x128xf32>
    %144 = arith.addf %142, %143 : vector<32x128xf32>
    %145 = arith.mulf %132, %144 : vector<32x128xf32>
    %146 = arith.addf %141, %145 : vector<32x128xf32>
    %147 = math.tanh %146 : vector<32x128xf32>
    %cst_38 = arith.constant 1.000000e+00 : f32
    %148 = vector.broadcast %cst_38 : f32 to vector<32x128xf32>
    %149 = arith.subf %148, %140 : vector<32x128xf32>
    %150 = arith.mulf %149, %147 : vector<32x128xf32>
    %151 = arith.mulf %140, %121 : vector<32x128xf32>
    %152 = arith.addf %150, %151 : vector<32x128xf32>
    %c96 = arith.constant 96 : index
    %c0_39 = arith.constant 0 : index
    %153 = vector.load %arg12[%c96, %c0_39] : memref<256x128xf32, #tpu.memory_space<vmem>>, vector<32x128xf32>
    tpu.vector_store %arg12[%c96, %c0_39], %152 {strides = array<i32>} : memref<256x128xf32, #tpu.memory_space<vmem>>, vector<32x128xf32>,
    %154 = vector.extract_strided_slice %27 {offsets = [128, 0], sizes = [32, 384], strides = [1, 1]} : vector<256x384xf32> to vector<32x384xf32>
    %cst_40 = arith.constant dense<0.000000e+00> : vector<32x384xf32>
    %155 = tpu.matmul %152, %28, %cst_40 {dimension_numbers = #tpu.dot_dimension_numbers<[1], [0], [0], [1], [0, 0, 1, 1], [], []>} : vector<32x128xf32>, vector<128x384xf32>, vector<32x384xf32> -> vector<32x384xf32>
    %156 = vector.extract_strided_slice %154 {offsets = [0, 0], sizes = [32, 128], strides = [1, 1]} : vector<32x384xf32> to vector<32x128xf32>
    %157 = vector.extract_strided_slice %155 {offsets = [0, 0], sizes = [32, 128], strides = [1, 1]} : vector<32x384xf32> to vector<32x128xf32>
    %158 = arith.addf %156, %157 : vector<32x128xf32>
    %159 = arith.negf %158 : vector<32x128xf32>
    %160 = math.exp %159 : vector<32x128xf32>
    %cst_41 = arith.constant 1.000000e+00 : f32
    %161 = vector.broadcast %cst_41 : f32 to vector<32x128xf32>
    %162 = arith.addf %161, %160 : vector<32x128xf32>
    %163 = arith.divf %161, %162 : vector<32x128xf32>
    %164 = vector.extract_strided_slice %154 {offsets = [0, 128], sizes = [32, 128], strides = [1, 1]} : vector<32x384xf32> to vector<32x128xf32>
    %165 = vector.extract_strided_slice %155 {offsets = [0, 128], sizes = [32, 128], strides = [1, 1]} : vector<32x384xf32> to vector<32x128xf32>
    %166 = arith.addf %164, %165 : vector<32x128xf32>
    %167 = arith.negf %166 : vector<32x128xf32>
    %168 = math.exp %167 : vector<32x128xf32>
    %cst_42 = arith.constant 1.000000e+00 : f32
    %169 = vector.broadcast %cst_42 : f32 to vector<32x128xf32>
    %170 = arith.addf %169, %168 : vector<32x128xf32>
    %171 = arith.divf %169, %170 : vector<32x128xf32>
    %172 = vector.extract_strided_slice %154 {offsets = [0, 256], sizes = [32, 128], strides = [1, 1]} : vector<32x384xf32> to vector<32x128xf32>
    %173 = vector.extract_strided_slice %155 {offsets = [0, 256], sizes = [32, 128], strides = [1, 1]} : vector<32x384xf32> to vector<32x128xf32>
    %174 = vector.broadcast %29 : vector<1x128xf32> to vector<32x128xf32>
    %175 = arith.addf %173, %174 : vector<32x128xf32>
    %176 = arith.mulf %163, %175 : vector<32x128xf32>
    %177 = arith.addf %172, %176 : vector<32x128xf32>
    %178 = math.tanh %177 : vector<32x128xf32>
    %cst_43 = arith.constant 1.000000e+00 : f32
    %179 = vector.broadcast %cst_43 : f32 to vector<32x128xf32>
    %180 = arith.subf %179, %171 : vector<32x128xf32>
    %181 = arith.mulf %180, %178 : vector<32x128xf32>
    %182 = arith.mulf %171, %152 : vector<32x128xf32>
    %183 = arith.addf %181, %182 : vector<32x128xf32>
    %c128 = arith.constant 128 : index
    %c0_44 = arith.constant 0 : index
    %184 = vector.load %arg12[%c128, %c0_44] : memref<256x128xf32, #tpu.memory_space<vmem>>, vector<32x128xf32>
    tpu.vector_store %arg12[%c128, %c0_44], %183 {strides = array<i32>} : memref<256x128xf32, #tpu.memory_space<vmem>>, vector<32x128xf32>,
    %185 = vector.extract_strided_slice %27 {offsets = [160, 0], sizes = [32, 384], strides = [1, 1]} : vector<256x384xf32> to vector<32x384xf32>
    %cst_45 = arith.constant dense<0.000000e+00> : vector<32x384xf32>
    %186 = tpu.matmul %183, %28, %cst_45 {dimension_numbers = #tpu.dot_dimension_numbers<[1], [0], [0], [1], [0, 0, 1, 1], [], []>} : vector<32x128xf32>, vector<128x384xf32>, vector<32x384xf32> -> vector<32x384xf32>
    %187 = vector.extract_strided_slice %185 {offsets = [0, 0], sizes = [32, 128], strides = [1, 1]} : vector<32x384xf32> to vector<32x128xf32>
    %188 = vector.extract_strided_slice %186 {offsets = [0, 0], sizes = [32, 128], strides = [1, 1]} : vector<32x384xf32> to vector<32x128xf32>
    %189 = arith.addf %187, %188 : vector<32x128xf32>
    %190 = arith.negf %189 : vector<32x128xf32>
    %191 = math.exp %190 : vector<32x128xf32>
    %cst_46 = arith.constant 1.000000e+00 : f32
    %192 = vector.broadcast %cst_46 : f32 to vector<32x128xf32>
    %193 = arith.addf %192, %191 : vector<32x128xf32>
    %194 = arith.divf %192, %193 : vector<32x128xf32>
    %195 = vector.extract_strided_slice %185 {offsets = [0, 128], sizes = [32, 128], strides = [1, 1]} : vector<32x384xf32> to vector<32x128xf32>
    %196 = vector.extract_strided_slice %186 {offsets = [0, 128], sizes = [32, 128], strides = [1, 1]} : vector<32x384xf32> to vector<32x128xf32>
    %197 = arith.addf %195, %196 : vector<32x128xf32>
    %198 = arith.negf %197 : vector<32x128xf32>
    %199 = math.exp %198 : vector<32x128xf32>
    %cst_47 = arith.constant 1.000000e+00 : f32
    %200 = vector.broadcast %cst_47 : f32 to vector<32x128xf32>
    %201 = arith.addf %200, %199 : vector<32x128xf32>
    %202 = arith.divf %200, %201 : vector<32x128xf32>
    %203 = vector.extract_strided_slice %185 {offsets = [0, 256], sizes = [32, 128], strides = [1, 1]} : vector<32x384xf32> to vector<32x128xf32>
    %204 = vector.extract_strided_slice %186 {offsets = [0, 256], sizes = [32, 128], strides = [1, 1]} : vector<32x384xf32> to vector<32x128xf32>
    %205 = vector.broadcast %29 : vector<1x128xf32> to vector<32x128xf32>
    %206 = arith.addf %204, %205 : vector<32x128xf32>
    %207 = arith.mulf %194, %206 : vector<32x128xf32>
    %208 = arith.addf %203, %207 : vector<32x128xf32>
    %209 = math.tanh %208 : vector<32x128xf32>
    %cst_48 = arith.constant 1.000000e+00 : f32
    %210 = vector.broadcast %cst_48 : f32 to vector<32x128xf32>
    %211 = arith.subf %210, %202 : vector<32x128xf32>
    %212 = arith.mulf %211, %209 : vector<32x128xf32>
    %213 = arith.mulf %202, %183 : vector<32x128xf32>
    %214 = arith.addf %212, %213 : vector<32x128xf32>
    %c160 = arith.constant 160 : index
    %c0_49 = arith.constant 0 : index
    %215 = vector.load %arg12[%c160, %c0_49] : memref<256x128xf32, #tpu.memory_space<vmem>>, vector<32x128xf32>
    tpu.vector_store %arg12[%c160, %c0_49], %214 {strides = array<i32>} : memref<256x128xf32, #tpu.memory_space<vmem>>, vector<32x128xf32>,
    %216 = vector.extract_strided_slice %27 {offsets = [192, 0], sizes = [32, 384], strides = [1, 1]} : vector<256x384xf32> to vector<32x384xf32>
    %cst_50 = arith.constant dense<0.000000e+00> : vector<32x384xf32>
    %217 = tpu.matmul %214, %28, %cst_50 {dimension_numbers = #tpu.dot_dimension_numbers<[1], [0], [0], [1], [0, 0, 1, 1], [], []>} : vector<32x128xf32>, vector<128x384xf32>, vector<32x384xf32> -> vector<32x384xf32>
    %218 = vector.extract_strided_slice %216 {offsets = [0, 0], sizes = [32, 128], strides = [1, 1]} : vector<32x384xf32> to vector<32x128xf32>
    %219 = vector.extract_strided_slice %217 {offsets = [0, 0], sizes = [32, 128], strides = [1, 1]} : vector<32x384xf32> to vector<32x128xf32>
    %220 = arith.addf %218, %219 : vector<32x128xf32>
    %221 = arith.negf %220 : vector<32x128xf32>
    %222 = math.exp %221 : vector<32x128xf32>
    %cst_51 = arith.constant 1.000000e+00 : f32
    %223 = vector.broadcast %cst_51 : f32 to vector<32x128xf32>
    %224 = arith.addf %223, %222 : vector<32x128xf32>
    %225 = arith.divf %223, %224 : vector<32x128xf32>
    %226 = vector.extract_strided_slice %216 {offsets = [0, 128], sizes = [32, 128], strides = [1, 1]} : vector<32x384xf32> to vector<32x128xf32>
    %227 = vector.extract_strided_slice %217 {offsets = [0, 128], sizes = [32, 128], strides = [1, 1]} : vector<32x384xf32> to vector<32x128xf32>
    %228 = arith.addf %226, %227 : vector<32x128xf32>
    %229 = arith.negf %228 : vector<32x128xf32>
    %230 = math.exp %229 : vector<32x128xf32>
    %cst_52 = arith.constant 1.000000e+00 : f32
    %231 = vector.broadcast %cst_52 : f32 to vector<32x128xf32>
    %232 = arith.addf %231, %230 : vector<32x128xf32>
    %233 = arith.divf %231, %232 : vector<32x128xf32>
    %234 = vector.extract_strided_slice %216 {offsets = [0, 256], sizes = [32, 128], strides = [1, 1]} : vector<32x384xf32> to vector<32x128xf32>
    %235 = vector.extract_strided_slice %217 {offsets = [0, 256], sizes = [32, 128], strides = [1, 1]} : vector<32x384xf32> to vector<32x128xf32>
    %236 = vector.broadcast %29 : vector<1x128xf32> to vector<32x128xf32>
    %237 = arith.addf %235, %236 : vector<32x128xf32>
    %238 = arith.mulf %225, %237 : vector<32x128xf32>
    %239 = arith.addf %234, %238 : vector<32x128xf32>
    %240 = math.tanh %239 : vector<32x128xf32>
    %cst_53 = arith.constant 1.000000e+00 : f32
    %241 = vector.broadcast %cst_53 : f32 to vector<32x128xf32>
    %242 = arith.subf %241, %233 : vector<32x128xf32>
    %243 = arith.mulf %242, %240 : vector<32x128xf32>
    %244 = arith.mulf %233, %214 : vector<32x128xf32>
    %245 = arith.addf %243, %244 : vector<32x128xf32>
    %c192 = arith.constant 192 : index
    %c0_54 = arith.constant 0 : index
    %246 = vector.load %arg12[%c192, %c0_54] : memref<256x128xf32, #tpu.memory_space<vmem>>, vector<32x128xf32>
    tpu.vector_store %arg12[%c192, %c0_54], %245 {strides = array<i32>} : memref<256x128xf32, #tpu.memory_space<vmem>>, vector<32x128xf32>,
    %247 = vector.extract_strided_slice %27 {offsets = [224, 0], sizes = [32, 384], strides = [1, 1]} : vector<256x384xf32> to vector<32x384xf32>
    %cst_55 = arith.constant dense<0.000000e+00> : vector<32x384xf32>
    %248 = tpu.matmul %245, %28, %cst_55 {dimension_numbers = #tpu.dot_dimension_numbers<[1], [0], [0], [1], [0, 0, 1, 1], [], []>} : vector<32x128xf32>, vector<128x384xf32>, vector<32x384xf32> -> vector<32x384xf32>
    %249 = vector.extract_strided_slice %247 {offsets = [0, 0], sizes = [32, 128], strides = [1, 1]} : vector<32x384xf32> to vector<32x128xf32>
    %250 = vector.extract_strided_slice %248 {offsets = [0, 0], sizes = [32, 128], strides = [1, 1]} : vector<32x384xf32> to vector<32x128xf32>
    %251 = arith.addf %249, %250 : vector<32x128xf32>
    %252 = arith.negf %251 : vector<32x128xf32>
    %253 = math.exp %252 : vector<32x128xf32>
    %cst_56 = arith.constant 1.000000e+00 : f32
    %254 = vector.broadcast %cst_56 : f32 to vector<32x128xf32>
    %255 = arith.addf %254, %253 : vector<32x128xf32>
    %256 = arith.divf %254, %255 : vector<32x128xf32>
    %257 = vector.extract_strided_slice %247 {offsets = [0, 128], sizes = [32, 128], strides = [1, 1]} : vector<32x384xf32> to vector<32x128xf32>
    %258 = vector.extract_strided_slice %248 {offsets = [0, 128], sizes = [32, 128], strides = [1, 1]} : vector<32x384xf32> to vector<32x128xf32>
    %259 = arith.addf %257, %258 : vector<32x128xf32>
    %260 = arith.negf %259 : vector<32x128xf32>
    %261 = math.exp %260 : vector<32x128xf32>
    %cst_57 = arith.constant 1.000000e+00 : f32
    %262 = vector.broadcast %cst_57 : f32 to vector<32x128xf32>
    %263 = arith.addf %262, %261 : vector<32x128xf32>
    %264 = arith.divf %262, %263 : vector<32x128xf32>
    %265 = vector.extract_strided_slice %247 {offsets = [0, 256], sizes = [32, 128], strides = [1, 1]} : vector<32x384xf32> to vector<32x128xf32>
    %266 = vector.extract_strided_slice %248 {offsets = [0, 256], sizes = [32, 128], strides = [1, 1]} : vector<32x384xf32> to vector<32x128xf32>
    %267 = vector.broadcast %29 : vector<1x128xf32> to vector<32x128xf32>
    %268 = arith.addf %266, %267 : vector<32x128xf32>
    %269 = arith.mulf %256, %268 : vector<32x128xf32>
    %270 = arith.addf %265, %269 : vector<32x128xf32>
    %271 = math.tanh %270 : vector<32x128xf32>
    %cst_58 = arith.constant 1.000000e+00 : f32
    %272 = vector.broadcast %cst_58 : f32 to vector<32x128xf32>
    %273 = arith.subf %272, %264 : vector<32x128xf32>
    %274 = arith.mulf %273, %271 : vector<32x128xf32>
    %275 = arith.mulf %264, %245 : vector<32x128xf32>
    %276 = arith.addf %274, %275 : vector<32x128xf32>
    %c224 = arith.constant 224 : index
    %c0_59 = arith.constant 0 : index
    %277 = vector.load %arg12[%c224, %c0_59] : memref<256x128xf32, #tpu.memory_space<vmem>>, vector<32x128xf32>
    tpu.vector_store %arg12[%c224, %c0_59], %276 {strides = array<i32>} : memref<256x128xf32, #tpu.memory_space<vmem>>, vector<32x128xf32>,
    %c0_60 = arith.constant 0 : index
    %c0_61 = arith.constant 0 : index
    %278 = vector.load %arg12[%c0_60, %c0_61] : memref<256x128xf32, #tpu.memory_space<vmem>>, vector<256x128xf32>
    %c0_62 = arith.constant 0 : index
    %c0_63 = arith.constant 0 : index
    %279 = vector.load %arg9[%c0_62, %c0_63] : memref<128x128xf32, #tpu.memory_space<vmem>>, vector<128x128xf32>
    %cst_64 = arith.constant dense<0.000000e+00> : vector<256x128xf32>
    %280 = tpu.matmul %278, %279, %cst_64 {dimension_numbers = #tpu.dot_dimension_numbers<[1], [0], [0], [1], [0, 0, 1, 1], [], []>} : vector<256x128xf32>, vector<128x128xf32>, vector<256x128xf32> -> vector<256x128xf32>
    %c0_65 = arith.constant 0 : index
    %c0_66 = arith.constant 0 : index
    %281 = vector.load %arg10[%c0_65, %c0_66] : memref<1x128xf32, #tpu.memory_space<vmem>>, vector<1x128xf32>
    %282 = vector.broadcast %281 : vector<1x128xf32> to vector<256x128xf32>
    %283 = arith.addf %280, %282 : vector<256x128xf32>
    %284 = vector.shape_cast %283 : vector<256x128xf32> to vector<8x32x128xf32>
    %c0_67 = arith.constant 0 : index
    %c0_68 = arith.constant 0 : index
    %c0_69 = arith.constant 0 : index
    %285 = vector.load %arg11[%c0_67, %c0_68, %c0_69] : memref<8x32x128xf32, #tpu.memory_space<vmem>>, vector<8x32x128xf32>
    tpu.vector_store %arg11[%c0_67, %c0_68, %c0_69], %284 {strides = array<i32>} : memref<8x32x128xf32, #tpu.memory_space<vmem>>, vector<8x32x128xf32>,
    return
  }
  func.func @transform_0(%arg0: i32) -> (i32, i32, i32) {
    %c0_i32 = arith.constant 0 : i32
    %c0_i32_0 = arith.constant 0 : i32
    %c0_i32_1 = arith.constant 0 : i32
    return %arg0, %c0_i32, %c0_i32_0 : i32, i32, i32
  }
  func.func @transform_1(%arg0: i32) -> (i32, i32) {
    %c0_i32 = arith.constant 0 : i32
    %c0_i32_0 = arith.constant 0 : i32
    %c0_i32_1 = arith.constant 0 : i32
    return %c0_i32, %c0_i32_0 : i32, i32
  }
  func.func @transform_2(%arg0: i32) -> (i32, i32) {
    %c0_i32 = arith.constant 0 : i32
    %c0_i32_0 = arith.constant 0 : i32
    %c0_i32_1 = arith.constant 0 : i32
    return %c0_i32, %c0_i32_0 : i32, i32
  }
  func.func @transform_3(%arg0: i32) -> (i32, i32) {
    %c0_i32 = arith.constant 0 : i32
    %c0_i32_0 = arith.constant 0 : i32
    %c0_i32_1 = arith.constant 0 : i32
    return %c0_i32, %c0_i32_0 : i32, i32
  }
  func.func @transform_4(%arg0: i32) -> (i32, i32) {
    %c0_i32 = arith.constant 0 : i32
    %c0_i32_0 = arith.constant 0 : i32
    %c0_i32_1 = arith.constant 0 : i32
    return %c0_i32, %c0_i32_0 : i32, i32
  }
  func.func @transform_5(%arg0: i32) -> (i32, i32) {
    %c0_i32 = arith.constant 0 : i32
    %c0_i32_0 = arith.constant 0 : i32
    %c0_i32_1 = arith.constant 0 : i32
    return %c0_i32, %c0_i32_0 : i32, i32
  }
  func.func @transform_6(%arg0: i32) -> (i32, i32) {
    %c0_i32 = arith.constant 0 : i32
    %c0_i32_0 = arith.constant 0 : i32
    %c0_i32_1 = arith.constant 0 : i32
    return %c0_i32, %c0_i32_0 : i32, i32
  }
  func.func @transform_7(%arg0: i32) -> (i32, i32) {
    %c0_i32 = arith.constant 0 : i32
    %c0_i32_0 = arith.constant 0 : i32
    %c0_i32_1 = arith.constant 0 : i32
    return %c0_i32, %c0_i32_0 : i32, i32
  }
  func.func @transform_8(%arg0: i32) -> (i32, i32) {
    %c0_i32 = arith.constant 0 : i32
    %c0_i32_0 = arith.constant 0 : i32
    %c0_i32_1 = arith.constant 0 : i32
    return %c0_i32, %c0_i32_0 : i32, i32
  }
  func.func @transform_9(%arg0: i32) -> (i32, i32) {
    %c0_i32 = arith.constant 0 : i32
    %c0_i32_0 = arith.constant 0 : i32
    %c0_i32_1 = arith.constant 0 : i32
    return %c0_i32, %c0_i32_0 : i32, i32
  }
  func.func @transform_10(%arg0: i32) -> (i32, i32, i32) {
    %c0_i32 = arith.constant 0 : i32
    %c0_i32_0 = arith.constant 0 : i32
    %c0_i32_1 = arith.constant 0 : i32
    return %c0_i32, %arg0, %c0_i32_0 : i32, i32, i32
  }
}

</mosaic_0001>

<bundles_post_ra>
// kernel: tpu_custom_call.1
= control target key start
LH: loop header
LB: loop body
LE: loop exit
PB: predicated region body
PF: predicated region fallthrough
CT: control target
= control target key end

     0   :  { %v11174_v2 = vmov 0   ;;  %s15710_s0 = inlined_call_operand.vmem [shape: s32[1,576,1], index: 0, kind: input, shape index: {}]   ;;  %s15711_s1 = inlined_call_operand.vmem [shape: f32[128,10], index: 1, kind: input, shape index: {}]   ;;  %s15712_s2 = inlined_call_operand.vmem [shape: f32[10,384], index: 2, kind: input, shape index: {}]   ;;  %s15713_s3 = inlined_call_operand.vmem [shape: f32[1,128], index: 3, kind: input, shape index: {}]   ;;  %s15714_s4 = inlined_call_operand.vmem [shape: f32[10,384], index: 4, kind: input, shape index: {}]   ;;  %s15715_s5 = inlined_call_operand.vmem [shape: f32[128,384], index: 5, kind: input, shape index: {}]   ;;  %s15716_s6 = inlined_call_operand.vmem [shape: f32[1,384], index: 6, kind: input, shape index: {}]   ;;  %s15717_s7 = inlined_call_operand.vmem [shape: f32[1,128], index: 7, kind: input, shape index: {}]   ;;  %s15718_s8 = inlined_call_operand.vmem [shape: f32[128,128], index: 8, kind: input, shape index: {}]   ;;  %s15719_s9 = inlined_call_operand.vmem [shape: f32[1,128], index: 9, kind: input, shape index: {}]   ;;  %s15720_s10 = inlined_call_operand.hbm [shape: f32[8,32,128], index: 10, kind: output, shape index: {}]  }
   0x1   :  { %v38_v0 = vld [vmem:[%s15710_s0 + $0x10] sm:$0xff]  ;;  %v36_v1 = vld [vmem:[%s15710_s0] sm:$0xff]  ;;  %10825 = vset.pattern.permute.xlu1 %v11174_v2  ;;  %10824 = vset.pattern.permute.xlu0 %v11174_v2  ;;  %v39_v3 = vld [vmem:[%s15710_s0 + $0x18] sm:$0xff] }
   0x2   :  { %117 = vperm.xlu1 %10825, %v38_v0   ;;  %111 = vperm.xlu0 %10824, %v36_v1   ;;  %v37_v4 = vld [vmem:[%s15710_s0 + $0x8] sm:$0xff]  ;;  %v40_v6 = vld [vmem:[%s15710_s0 + $0x20] sm:$0xff]  ;;  %v43_v7 = vld [vmem:[%s15710_s0 + $0x38] sm:$0xff] }
   0x3   :  { %v41_v5 = vld [vmem:[%s15710_s0 + $0x28] sm:$0xff]  ;;  %v42_v8 = vld [vmem:[%s15710_s0 + $0x30] sm:$0xff]  ;;  %v44_v10 = vld [vmem:[%s15710_s0 + $0x40] sm:$0xff] }
   0x4   :  { %v45_v9 = vld [vmem:[%s15710_s0 + $0x48] sm:$0xff]  ;;  %v542_v11 = vld [vmem:[%s15711_s1] sm:$0xff]  ;;  %v544_v14 = vld [vmem:[%s15711_s1 + $0x10] sm:$0xff] }
   0x5   :  { %v543_v12 = vld [vmem:[%s15711_s1 + $0x8] sm:$0xff]  ;;  %v47_v15 = vld [vmem:[%s15710_s0 + $0x58] sm:$0xff]  ;;  %v46_v16 = vld [vmem:[%s15710_s0 + $0x50] sm:$0xff] }
   0x6   :  { %120 = vperm.xlu1 %10825, %v39_v3   ;;  %114 = vperm.xlu0 %10824, %v37_v4   ;;  %v10086_v13 = vpack.c.bf16 %v543_v12, %v542_v11  ;;  %v545_v17 = vld [vmem:[%s15711_s1 + $0x18] sm:$0xff]  ;;  %v546_v19 = vld [vmem:[%s15711_s1 + $0x20] sm:$0xff]  ;;  %v547_v20 = vld [vmem:[%s15711_s1 + $0x28] sm:$0xff] }
   0x7   :  { %v10090_v18 = vpack.c.bf16 %v545_v17, %v544_v14  ;;  %v49_v21 = vld [vmem:[%s15710_s0 + $0x68] sm:$0xff]  ;;  %v48_v22 = vld [vmem:[%s15710_s0 + $0x60] sm:$0xff]  ;;  %v10094_v23 = vpack.c.bf16 %v547_v20, %v546_v19  ;;  %v548_v24 = vld [vmem:[%s15711_s1 + $0x30] sm:$0xff] }
   0x8   :  { %10087 = vmatprep.subr.bf16.mxu0 %v10086_v13  ;;  %v549_v25 = vld [vmem:[%s15711_s1 + $0x38] sm:$0xff]  ;;  %v50_v27 = vld [vmem:[%s15710_s0 + $0x70] sm:$0xff]  ;;  %v550_v29 = vld [vmem:[%s15711_s1 + $0x40] sm:$0xff] }
   0x9   :  { %10089 = vmatpush3.bf16.msra.mxu0 %v10086_v13  ;;  %v51_v26 = vld [vmem:[%s15710_s0 + $0x78] sm:$0xff]  ;;  %v10098_v28 = vpack.c.bf16 %v549_v25, %v548_v24  ;;  %v551_v30 = vld [vmem:[%s15711_s1 + $0x48] sm:$0xff] }
   0xa   :  { %126 = vperm.xlu1 %10825, %v41_v5   ;;  %123 = vperm.xlu0 %10824, %v40_v6  }
   0xb   :  { %10091 = vmatprep.subr.bf16.mxu0 %v10090_v18 }
   0xd   :  { %10093 = vmatpush3.bf16.msra.mxu0 %v10090_v18 }
   0xe   :  { %132 = vperm.xlu1 %10825, %v43_v7   ;;  %129 = vperm.xlu0 %10824, %v42_v8  }
   0xf   :  { %10095 = vmatprep.subr.bf16.mxu0 %v10094_v23 }
  0x11   :  { %10097 = vmatpush3.bf16.msra.mxu0 %v10094_v23 }
  0x12   :  { %138 = vperm.xlu1 %10825, %v45_v9   ;;  %135 = vperm.xlu0 %10824, %v44_v10  }
  0x16   :  { %144 = vperm.xlu1 %10825, %v47_v15   ;;  %141 = vperm.xlu0 %10824, %v46_v16  }
  0x1a   :  { %150 = vperm.xlu1 %10825, %v49_v21   ;;  %147 = vperm.xlu0 %10824, %v48_v22  }
  0x1b   :  { %15 = vsyncpa [#allocation4], 0  ;;  %v53_v31 = vld [vmem:[%s15710_s0 + $0x88] sm:$0xff]  ;;  %v52_v32 = vld [vmem:[%s15710_s0 + $0x80] sm:$0xff]  ;;  %10099 = vmatprep.subr.bf16.mxu0 %v10098_v28  ;;  %v10102_v33 = vpack.c.bf16 %v551_v30, %v550_v29  ;;  %v15721_v23 = vlaneseq  ;;  %vm1110_vm9 = vcmask 1041408   ;;  %vm11176_vm10 = vmmov 1  }
  0x1c   :  { %v552_v34 = vld [vmem:[%s15711_s1 + $0x50] sm:$0xff]  ;;  %v553_v35 = vld [vmem:[%s15711_s1 + $0x58] sm:$0xff]  ;;  %10101 = vmatpush3.bf16.msra.mxu0 %v10098_v28  ;;  %v554_v39 = vld [vmem:[%s15711_s1 + $0x60] sm:$0xff] }
  0x1d   :  { %v55_v36 = vld [vmem:[%s15710_s0 + $0x98] sm:$0xff]  ;;  %v54_v37 = vld [vmem:[%s15710_s0 + $0x90] sm:$0xff]  ;;  %10103 = vmatprep.subr.bf16.mxu0 %v10102_v33  ;;  %v10106_v38 = vpack.c.bf16 %v553_v35, %v552_v34  ;;  %v555_v40 = vld [vmem:[%s15711_s1 + $0x68] sm:$0xff] }
  0x1e   :  { %156 = vperm.xlu1 %10825, %v51_v26   ;;  %153 = vperm.xlu0 %10824, %v50_v27   ;;  %v57_v41 = vld [vmem:[%s15710_s0 + $0xa8] sm:$0xff]  ;;  %v56_v42 = vld [vmem:[%s15710_s0 + $0xa0] sm:$0xff]  ;;  %v10110_v43 = vpack.c.bf16 %v555_v40, %v554_v39  ;;  %v556_v44 = vld [vmem:[%s15711_s1 + $0x70] sm:$0xff]  ;;  %v11478_v26 = vand.u32 127, %v15721_v23 }
  0x1f   :  { %v557_v45 = vld [vmem:[%s15711_s1 + $0x78] sm:$0xff]  ;;  %v58_v47 = vld [vmem:[%s15710_s0 + $0xb0] sm:$0xff]  ;;  %v61_v49 = vld [vmem:[%s15710_s0 + $0xc8] sm:$0xff] }
  0x20   :  { %10105 = vmatpush3.bf16.msra.mxu0 %v10102_v33  ;;  %v59_v46 = vld [vmem:[%s15710_s0 + $0xb8] sm:$0xff]  ;;  %v10114_v48 = vpack.c.bf16 %v557_v45, %v556_v44  ;;  %v60_v50 = vld [vmem:[%s15710_s0 + $0xc0] sm:$0xff]  ;;  %v62_v52 = vld [vmem:[%s15710_s0 + $0xd0] sm:$0xff] }
  0x21   :  { %10107 = vmatprep.subr.bf16.mxu0 %v10106_v38  ;;  %v63_v51 = vld [vmem:[%s15710_s0 + $0xd8] sm:$0xff]  ;;  %v65_v53 = vld [vmem:[%s15710_s0 + $0xe8] sm:$0xff]  ;;  %v64_v54 = vld [vmem:[%s15710_s0 + $0xe0] sm:$0xff] }
  0x22   :  { %162 = vperm.xlu1 %10825, %v53_v31   ;;  %159 = vperm.xlu0 %10824, %v52_v32   ;;  %v67_v55 = vld [vmem:[%s15710_s0 + $0xf8] sm:$0xff]  ;;  %v66_v56 = vld [vmem:[%s15710_s0 + $0xf0] sm:$0xff]  ;;  %v69_v57 = vld [vmem:[%s15710_s0 + $0x108] sm:$0xff]  ;;  %v11175_v31 = vmov 1.0  }
  0x23   :  { %v68_v58 = vld [vmem:[%s15710_s0 + $0x100] sm:$0xff]  ;;  %v71_v59 = vld [vmem:[%s15710_s0 + $0x118] sm:$0xff]  ;;  %v70_v60 = vld [vmem:[%s15710_s0 + $0x110] sm:$0xff] }
  0x24   :  { %10109 = vmatpush3.bf16.msra.mxu0 %v10106_v38  ;;  %v73_v61 = vld [vmem:[%s15710_s0 + $0x128] sm:$0xff]  ;;  %v72_v62 = vld [vmem:[%s15710_s0 + $0x120] sm:$0xff]  ;;  %v75_v63 = vld [vmem:[%s15710_s0 + $0x138] sm:$0xff] }
  0x25   :  { %10111 = vmatprep.subr.bf16.mxu0 %v10110_v43  ;;  %v74_v0 = vld [vmem:[%s15710_s0 + $0x130] sm:$0xff]  ;;  %v77_v1 = vld [vmem:[%s15710_s0 + $0x148] sm:$0xff]  ;;  %v76_v2 = vld [vmem:[%s15710_s0 + $0x140] sm:$0xff] }
  0x26   :  { %168 = vperm.xlu1 %10825, %v55_v36   ;;  %165 = vperm.xlu0 %10824, %v54_v37   ;;  %v79_v3 = vld [vmem:[%s15710_s0 + $0x158] sm:$0xff]  ;;  %v78_v4 = vld [vmem:[%s15710_s0 + $0x150] sm:$0xff]  ;;  %v81_v5 = vld [vmem:[%s15710_s0 + $0x168] sm:$0xff] }
  0x27   :  { %v80_v6 = vld [vmem:[%s15710_s0 + $0x160] sm:$0xff]  ;;  %v83_v7 = vld [vmem:[%s15710_s0 + $0x178] sm:$0xff]  ;;  %v82_v8 = vld [vmem:[%s15710_s0 + $0x170] sm:$0xff] }
  0x28   :  { %10113 = vmatpush3.bf16.msra.mxu0 %v10110_v43  ;;  %v85_v9 = vld [vmem:[%s15710_s0 + $0x188] sm:$0xff]  ;;  %v84_v10 = vld [vmem:[%s15710_s0 + $0x180] sm:$0xff]  ;;  %v87_v11 = vld [vmem:[%s15710_s0 + $0x198] sm:$0xff] }
  0x29   :  { %10115 = vmatprep.subr.bf16.mxu0 %v10114_v48  ;;  %v86_v12 = vld [vmem:[%s15710_s0 + $0x190] sm:$0xff]  ;;  %v89_v13 = vld [vmem:[%s15710_s0 + $0x1a8] sm:$0xff]  ;;  %v88_v14 = vld [vmem:[%s15710_s0 + $0x1a0] sm:$0xff] }
  0x2a   :  { %174 = vperm.xlu1 %10825, %v57_v41   ;;  %171 = vperm.xlu0 %10824, %v56_v42   ;;  %v91_v15 = vld [vmem:[%s15710_s0 + $0x1b8] sm:$0xff]  ;;  %v90_v16 = vld [vmem:[%s15710_s0 + $0x1b0] sm:$0xff]  ;;  %v93_v17 = vld [vmem:[%s15710_s0 + $0x1c8] sm:$0xff] }
  0x2b   :  { %v92_v18 = vld [vmem:[%s15710_s0 + $0x1c0] sm:$0xff]  ;;  %v95_v19 = vld [vmem:[%s15710_s0 + $0x1d8] sm:$0xff]  ;;  %v94_v20 = vld [vmem:[%s15710_s0 + $0x1d0] sm:$0xff] }
  0x2c   :  { %10117 = vmatpush3.bf16.msra.mxu0 %v10114_v48  ;;  %v97_v21 = vld [vmem:[%s15710_s0 + $0x1e8] sm:$0xff]  ;;  %v96_v22 = vld [vmem:[%s15710_s0 + $0x1e0] sm:$0xff]  ;;  %v99_v24 = vld [vmem:[%s15710_s0 + $0x1f8] sm:$0xff] }
  0x2d   :  { %v98_v25 = vld [vmem:[%s15710_s0 + $0x1f0] sm:$0xff]  ;;  %v101_v27 = vld [vmem:[%s15710_s0 + $0x208] sm:$0xff]  ;;  %v100_v28 = vld [vmem:[%s15710_s0 + $0x200] sm:$0xff] }
  0x2e   :  { %180 = vperm.xlu1 %10825, %v59_v46   ;;  %177 = vperm.xlu0 %10824, %v58_v47   ;;  %v103_v32 = vld [vmem:[%s15710_s0 + $0x218] sm:$0xff]  ;;  %v102_v33 = vld [vmem:[%s15710_s0 + $0x210] sm:$0xff]  ;;  %v105_v36 = vld [vmem:[%s15710_s0 + $0x228] sm:$0xff] }
  0x2f   :  { %v104_v37 = vld [vmem:[%s15710_s0 + $0x220] sm:$0xff]  ;;  %v107_v40 = vld [vmem:[%s15710_s0 + $0x238] sm:$0xff]  ;;  %v106_v41 = vld [vmem:[%s15710_s0 + $0x230] sm:$0xff] }
  0x30   :  { %v984_v46 = vld [vmem:[%s15712_s2 + $0x8] sm:$0xff]  ;;  %v987_v47 = vld [vmem:[%s15712_s2 + $0x20] sm:$0x3]  ;;  %vm11531_vm11 = vmpackc.low %vm1110_vm9, %vm11176_vm10 }
  0x31   :  { %v983_v48 = vld [vmem:[%s15712_s2] sm:$0xff] }
  0x32   :  { %186 = vperm.xlu1 %10825, %v61_v49   ;;  %183 = vperm.xlu0 %10824, %v60_v50   ;;  %v10118_v49 = vpack.c.bf16 %v987_v47, %v984_v46 }
  0x34   :  { %10120 = vmatprep.subr.msk.bf16.mxu1 %vm11531_vm11, %v10118_v49 }
  0x36   :  { %192 = vperm.xlu1 %10825, %v63_v51   ;;  %189 = vperm.xlu0 %10824, %v62_v52   ;;  %v986_v51 = vld [vmem:[%s15712_s2 + $0x18] sm:$0x3] }
  0x3a   :  { %198 = vperm.xlu1 %10825, %v65_v53   ;;  %195 = vperm.xlu0 %10824, %v64_v54   ;;  %v10121_v54 = vpack.c.bf16 %v986_v51, %v983_v48 }
  0x3c   :  { %10123 = vmatpush1.bf16.msk.msra.mxu1 %vm11531_vm11, %v10121_v54 }
  0x3e   :  { %204 = vperm.xlu1 %10825, %v67_v55   ;;  %201 = vperm.xlu0 %10824, %v66_v56  }
  0x42   :  { %210 = vperm.xlu1 %10825, %v69_v57   ;;  %207 = vperm.xlu0 %10824, %v68_v58  }
  0x46   :  { %216 = vperm.xlu1 %10825, %v71_v59   ;;  %213 = vperm.xlu0 %10824, %v70_v60  }
  0x4a   :  { %222 = vperm.xlu1 %10825, %v73_v61   ;;  %219 = vperm.xlu0 %10824, %v72_v62  }
  0x4e   :  { %228 = vperm.xlu1 %10825, %v75_v63   ;;  %225 = vperm.xlu0 %10824, %v74_v0  }
  0x52   :  { %234 = vperm.xlu1 %10825, %v77_v1   ;;  %231 = vperm.xlu0 %10824, %v76_v2  }
  0x56   :  { %240 = vperm.xlu1 %10825, %v79_v3   ;;  %237 = vperm.xlu0 %10824, %v78_v4  }
  0x5a   :  { %246 = vperm.xlu1 %10825, %v81_v5   ;;  %243 = vperm.xlu0 %10824, %v80_v6  }
  0x5e   :  { %252 = vperm.xlu1 %10825, %v83_v7   ;;  %249 = vperm.xlu0 %10824, %v82_v8  }
  0x62   :  { %258 = vperm.xlu1 %10825, %v85_v9   ;;  %255 = vperm.xlu0 %10824, %v84_v10  }
  0x66   :  { %264 = vperm.xlu1 %10825, %v87_v11   ;;  %261 = vperm.xlu0 %10824, %v86_v12  }
  0x6a   :  { %270 = vperm.xlu1 %10825, %v89_v13   ;;  %267 = vperm.xlu0 %10824, %v88_v14  }
  0x6e   :  { %276 = vperm.xlu1 %10825, %v91_v15   ;;  %273 = vperm.xlu0 %10824, %v90_v16  }
  0x72   :  { %282 = vperm.xlu1 %10825, %v93_v17   ;;  %279 = vperm.xlu0 %10824, %v92_v18  }
  0x76   :  { %288 = vperm.xlu1 %10825, %v95_v19   ;;  %285 = vperm.xlu0 %10824, %v94_v20  }
  0x7a   :  { %294 = vperm.xlu1 %10825, %v97_v21   ;;  %291 = vperm.xlu0 %10824, %v96_v22  }
  0x7e   :  { %300 = vperm.xlu1 %10825, %v99_v24   ;;  %297 = vperm.xlu0 %10824, %v98_v25  }
  0x81   :  { %v118_v29 = vpop.permute.xlu1 %117  ;;  %v112_v30 = vpop.permute.xlu0 %111 }
  0x82   :  { %306 = vperm.xlu1 %10825, %v101_v27   ;;  %303 = vperm.xlu0 %10824, %v100_v28   ;;  %vm326_vm0 = vcmp.eq.s32.totalorder %v112_v30, %v11478_v26  ;;  %vm328_vm1 = vcmp.eq.s32.totalorder %v118_v29, %v11478_v26  ;;  %v15736_v27 = vmov 0.0   ;;  %v985_v28 = vld [vmem:[%s15712_s2 + $0x10] sm:$0xff]  ;;  %v988_v29 = vld [vmem:[%s15712_s2 + $0x28] sm:$0x3] }
  0x83   :  { %9478 = vmatprep.mubr.msk.f32.mxu0 %vm326_vm0, %v11175_v31  ;;  %1184 = vmatprep.mubr.f32.mxu1 %v15736_v27  ;;  %v11621_v30 = vpack.c.bf16 %v988_v29, %v985_v28 }
  0x85   :  { %v121_v34 = vpop.permute.xlu1 %120  ;;  %v115_v35 = vpop.permute.xlu0 %114  ;;  %10126 = vmatprep.subr.msk.bf16.mxu1 %vm11531_vm11, %v11621_v30 }
  0x86   :  { %vm327_vm2 = vcmp.eq.s32.totalorder %v115_v35, %v11478_v26  ;;  %312 = vperm.xlu1 %10825, %v103_v32   ;;  %309 = vperm.xlu0 %10824, %v102_v33   ;;  %vm329_vm3 = vcmp.eq.s32.totalorder %v121_v34, %v11478_v26 }
  0x87   :  { %9479 = vmatmul.mubr.msk.f32.vlgmr.msra.gmra.mrb[0].mxu0 %vm327_vm2, %v11175_v31 }
  0x88   :  { %9481 = vmatprep.mubr.msk.f32.mxu0 %vm328_vm1, %v11175_v31 }
  0x89   :  { %v127_v38 = vpop.permute.xlu1 %126  ;;  %v124_v39 = vpop.permute.xlu0 %123 }
  0x8a   :  { %vm330_vm4 = vcmp.eq.s32.totalorder %v124_v39, %v11478_v26  ;;  %318 = vperm.xlu1 %10825, %v105_v36   ;;  %315 = vperm.xlu0 %10824, %v104_v37   ;;  %vm331_vm5 = vcmp.eq.s32.totalorder %v127_v38, %v11478_v26 }
  0x8b   :  { %9482 = vmatmul.mubr.msk.f32.gmra.mrb[2].mxu0 %vm329_vm3, %v11175_v31 }
  0x8c   :  { %9484 = vmatprep.mubr.msk.f32.mxu0 %vm330_vm4, %v11175_v31 }
  0x8d   :  { %v133_v42 = vpop.permute.xlu1 %132  ;;  %v130_v43 = vpop.permute.xlu0 %129 }
  0x8e   :  { %vm332_vm6 = vcmp.eq.s32.totalorder %v130_v43, %v11478_v26  ;;  %324 = vperm.xlu1 %10825, %v107_v40   ;;  %321 = vperm.xlu0 %10824, %v106_v41   ;;  %vm333_vm7 = vcmp.eq.s32.totalorder %v133_v42, %v11478_v26 }
  0x8f   :  { %9485 = vmatmul.mubr.msk.f32.gmra.mrb[4].mxu0 %vm331_vm5, %v11175_v31 }
  0x90   :  { %9487 = vmatprep.mubr.msk.f32.mxu0 %vm332_vm6, %v11175_v31 }
  0x91   :  { %v139_v44 = vpop.permute.xlu1 %138  ;;  %v136_v45 = vpop.permute.xlu0 %135 }
  0x92   :  { %vm334_vm8 = vcmp.eq.s32.totalorder %v136_v45, %v11478_v26  ;;  %vm335_vm12 = vcmp.eq.s32.totalorder %v139_v44, %v11478_v26 }
  0x93   :  { %9488 = vmatmul.mubr.msk.f32.gmra.mrb[6].mxu0 %vm333_vm7, %v11175_v31 }
  0x94   :  { %9490 = vmatprep.mubr.msk.f32.mxu0 %vm334_vm8, %v11175_v31 }
  0x95   :  { %v145_v52 = vpop.permute.xlu1 %144  ;;  %v142_v53 = vpop.permute.xlu0 %141 }
  0x96   :  { %vm336_vm13 = vcmp.eq.s32.totalorder %v142_v53, %v11478_v26  ;;  %vm337_vm14 = vcmp.eq.s32.totalorder %v145_v52, %v11478_v26 }
  0x97   :  { %9491 = vmatmul.mubr.msk.f32.gmra.mrb[8].mxu0 %vm335_vm12, %v11175_v31 }
  0x98   :  { %9493 = vmatprep.mubr.msk.f32.mxu0 %vm336_vm13, %v11175_v31 }
  0x99   :  { %v151_v55 = vpop.permute.xlu1 %150  ;;  %v148_v56 = vpop.permute.xlu0 %147 }
  0x9a   :  { %vm338_vm15 = vcmp.eq.s32.totalorder %v148_v56, %v11478_v26  ;;  %vm339_vm0 = vcmp.eq.s32.totalorder %v151_v55, %v11478_v26 }
  0x9b   :  { %9494 = vmatmul.mubr.msk.f32.gmra.mrb[10].mxu0 %vm337_vm14, %v11175_v31 }
  0x9c   :  { %9496 = vmatprep.mubr.msk.f32.mxu0 %vm338_vm15, %v11175_v31 }
  0x9d   :  { %v157_v57 = vpop.permute.xlu1 %156  ;;  %v154_v58 = vpop.permute.xlu0 %153 }
  0x9e   :  { %vm340_vm1 = vcmp.eq.s32.totalorder %v154_v58, %v11478_v26  ;;  %vm341_vm2 = vcmp.eq.s32.totalorder %v157_v57, %v11478_v26 }
  0x9f   :  { %9497 = vmatmul.mubr.msk.f32.gmra.mrb[12].mxu0 %vm339_vm0, %v11175_v31 }
  0xa0   :  { %9499 = vmatprep.mubr.msk.f32.mxu0 %vm340_vm1, %v11175_v31 }
  0xa1   :  { %v163_v59 = vpop.permute.xlu1 %162  ;;  %v160_v60 = vpop.permute.xlu0 %159 }
  0xa2   :  { %vm342_vm3 = vcmp.eq.s32.totalorder %v160_v60, %v11478_v26  ;;  %vm343_vm4 = vcmp.eq.s32.totalorder %v163_v59, %v11478_v26  ;;  %v5465_v59 = vld [vmem:[%s15714_s4 + $0x8] sm:$0xff]  ;;  %v5468_v60 = vld [vmem:[%s15714_s4 + $0x20] sm:$0x3] }
  0xa3   :  { %9500 = vmatmul.mubr.msk.f32.gmra.mrb[14].mxu0 %vm341_vm2, %v11175_v31 }
  0xa4   :  { %9502 = vmatprep.mubr.msk.f32.mxu0 %vm342_vm3, %v11175_v31 }
  0xa5   :  { %v169_v61 = vpop.permute.xlu1 %168  ;;  %v166_v62 = vpop.permute.xlu0 %165 }
  0xa6   :  { %vm344_vm5 = vcmp.eq.s32.totalorder %v166_v62, %v11478_v26  ;;  %vm345_vm6 = vcmp.eq.s32.totalorder %v169_v61, %v11478_v26  ;;  %v10130_v61 = vpack.c.bf16 %v5468_v60, %v5465_v59  ;;  %v5464_v62 = vld [vmem:[%s15714_s4] sm:$0xff] }
  0xa7   :  { %9503 = vmatmul.mubr.msk.f32.gmra.mrb[16].mxu0 %vm343_vm4, %v11175_v31 }
  0xa8   :  { %9505 = vmatprep.mubr.msk.f32.mxu0 %vm344_vm5, %v11175_v31  ;;  %10132 = vmatprep.subr.msk.bf16.mxu0 %vm11531_vm11, %v10130_v61 }
  0xa9   :  { %v175_v63 = vpop.permute.xlu1 %174  ;;  %v172_v0 = vpop.permute.xlu0 %171 }
  0xaa   :  { %vm346_vm7 = vcmp.eq.s32.totalorder %v172_v0, %v11478_v26  ;;  %vm347_vm8 = vcmp.eq.s32.totalorder %v175_v63, %v11478_v26 }
  0xab   :  { %9506 = vmatmul.mubr.msk.f32.gmra.mrb[18].mxu0 %vm345_vm6, %v11175_v31 }
  0xac   :  { %9508 = vmatprep.mubr.msk.f32.mxu0 %vm346_vm7, %v11175_v31 }
  0xad   :  { %v181_v1 = vpop.permute.xlu1 %180  ;;  %v178_v2 = vpop.permute.xlu0 %177 }
  0xae   :  { %vm348_vm9 = vcmp.eq.s32.totalorder %v178_v2, %v11478_v26  ;;  %vm349_vm10 = vcmp.eq.s32.totalorder %v181_v1, %v11478_v26 }
  0xaf   :  { %9509 = vmatmul.mubr.msk.f32.gmra.mrb[20].mxu0 %vm347_vm8, %v11175_v31 }
  0xb0   :  { %9511 = vmatprep.mubr.msk.f32.mxu0 %vm348_vm9, %v11175_v31 }
  0xb1   :  { %v187_v3 = vpop.permute.xlu1 %186  ;;  %v184_v4 = vpop.permute.xlu0 %183 }
  0xb2   :  { %vm350_vm12 = vcmp.eq.s32.totalorder %v184_v4, %v11478_v26  ;;  %vm351_vm13 = vcmp.eq.s32.totalorder %v187_v3, %v11478_v26 }
  0xb3   :  { %9512 = vmatmul.mubr.msk.f32.gmra.mrb[22].mxu0 %vm349_vm10, %v11175_v31 }
  0xb4   :  { %9514 = vmatprep.mubr.msk.f32.mxu0 %vm350_vm12, %v11175_v31 }
  0xb5   :  { %v193_v5 = vpop.permute.xlu1 %192  ;;  %v190_v6 = vpop.permute.xlu0 %189 }
  0xb6   :  { %vm352_vm14 = vcmp.eq.s32.totalorder %v190_v6, %v11478_v26  ;;  %vm353_vm15 = vcmp.eq.s32.totalorder %v193_v5, %v11478_v26 }
  0xb7   :  { %9515 = vmatmul.mubr.msk.f32.gmra.mrb[24].mxu0 %vm351_vm13, %v11175_v31 }
  0xb8   :  { %9517 = vmatprep.mubr.msk.f32.mxu0 %vm352_vm14, %v11175_v31 }
  0xb9   :  { %v199_v7 = vpop.permute.xlu1 %198  ;;  %v196_v8 = vpop.permute.xlu0 %195 }
  0xba   :  { %vm354_vm0 = vcmp.eq.s32.totalorder %v196_v8, %v11478_v26  ;;  %vm355_vm1 = vcmp.eq.s32.totalorder %v199_v7, %v11478_v26 }
  0xbb   :  { %9518 = vmatmul.mubr.msk.f32.gmra.mrb[26].mxu0 %vm353_vm15, %v11175_v31 }
  0xbc   :  { %9520 = vmatprep.mubr.msk.f32.mxu0 %vm354_vm0, %v11175_v31 }
  0xbd   :  { %v205_v9 = vpop.permute.xlu1 %204  ;;  %v202_v10 = vpop.permute.xlu0 %201 }
  0xbe   :  { %vm356_vm2 = vcmp.eq.s32.totalorder %v202_v10, %v11478_v26  ;;  %vm357_vm3 = vcmp.eq.s32.totalorder %v205_v9, %v11478_v26 }
  0xbf   :  { %9521 = vmatmul.mubr.msk.f32.gmra.mrb[28].mxu0 %vm355_vm1, %v11175_v31 }
  0xc0   :  { %9523 = vmatprep.mubr.msk.f32.mxu0 %vm356_vm2, %v11175_v31 }
  0xc1   :  { %v211_v11 = vpop.permute.xlu1 %210  ;;  %v208_v12 = vpop.permute.xlu0 %207 }
  0xc2   :  { %vm358_vm4 = vcmp.eq.s32.totalorder %v208_v12, %v11478_v26  ;;  %vm359_vm5 = vcmp.eq.s32.totalorder %v211_v11, %v11478_v26 }
  0xc3   :  { %9524 = vmatmul.mubr.msk.f32.gmra.mrb[30].mxu0 %vm357_vm3, %v11175_v31 }
  0xc4   :  { %9526 = vmatprep.mubr.msk.f32.mxu0 %vm358_vm4, %v11175_v31 }
  0xc5   :  { %v217_v13 = vpop.permute.xlu1 %216  ;;  %v214_v14 = vpop.permute.xlu0 %213 }
  0xc6   :  { %vm360_vm6 = vcmp.eq.s32.totalorder %v214_v14, %v11478_v26  ;;  %vm361_vm7 = vcmp.eq.s32.totalorder %v217_v13, %v11478_v26 }
  0xc7   :  { %9527 = vmatmul.mubr.msk.f32.gmra.mrb[32].mxu0 %vm359_vm5, %v11175_v31 }
  0xc8   :  { %9529 = vmatprep.mubr.msk.f32.mxu0 %vm360_vm6, %v11175_v31 }
  0xc9   :  { %v223_v15 = vpop.permute.xlu1 %222  ;;  %v220_v16 = vpop.permute.xlu0 %219 }
  0xca   :  { %vm362_vm8 = vcmp.eq.s32.totalorder %v220_v16, %v11478_v26  ;;  %vm363_vm9 = vcmp.eq.s32.totalorder %v223_v15, %v11478_v26 }
  0xcb   :  { %9530 = vmatmul.mubr.msk.f32.gmra.mrb[34].mxu0 %vm361_vm7, %v11175_v31 }
  0xcc   :  { %9532 = vmatprep.mubr.msk.f32.mxu0 %vm362_vm8, %v11175_v31 }
  0xcd   :  { %v229_v17 = vpop.permute.xlu1 %228  ;;  %v226_v18 = vpop.permute.xlu0 %225 }
  0xce   :  { %vm364_vm10 = vcmp.eq.s32.totalorder %v226_v18, %v11478_v26  ;;  %vm365_vm12 = vcmp.eq.s32.totalorder %v229_v17, %v11478_v26 }
  0xcf   :  { %9533 = vmatmul.mubr.msk.f32.gmra.mrb[36].mxu0 %vm363_vm9, %v11175_v31 }
  0xd0   :  { %9535 = vmatprep.mubr.msk.f32.mxu0 %vm364_vm10, %v11175_v31 }
  0xd1   :  { %v235_v19 = vpop.permute.xlu1 %234  ;;  %v232_v20 = vpop.permute.xlu0 %231 }
  0xd2   :  { %vm366_vm13 = vcmp.eq.s32.totalorder %v232_v20, %v11478_v26  ;;  %vm367_vm14 = vcmp.eq.s32.totalorder %v235_v19, %v11478_v26 }
  0xd3   :  { %9536 = vmatmul.mubr.msk.f32.gmra.mrb[38].mxu0 %vm365_vm12, %v11175_v31 }
  0xd4   :  { %9538 = vmatprep.mubr.msk.f32.mxu0 %vm366_vm13, %v11175_v31 }
  0xd5   :  { %v241_v21 = vpop.permute.xlu1 %240  ;;  %v238_v22 = vpop.permute.xlu0 %237 }
  0xd6   :  { %vm368_vm15 = vcmp.eq.s32.totalorder %v238_v22, %v11478_v26  ;;  %vm369_vm0 = vcmp.eq.s32.totalorder %v241_v21, %v11478_v26 }
  0xd7   :  { %9539 = vmatmul.mubr.msk.f32.gmra.mrb[40].mxu0 %vm367_vm14, %v11175_v31 }
  0xd8   :  { %9541 = vmatprep.mubr.msk.f32.mxu0 %vm368_vm15, %v11175_v31 }
  0xd9   :  { %v247_v24 = vpop.permute.xlu1 %246  ;;  %v244_v25 = vpop.permute.xlu0 %243 }
  0xda   :  { %vm370_vm1 = vcmp.eq.s32.totalorder %v244_v25, %v11478_v26  ;;  %vm371_vm2 = vcmp.eq.s32.totalorder %v247_v24, %v11478_v26 }
  0xdb   :  { %9542 = vmatmul.mubr.msk.f32.gmra.mrb[42].mxu0 %vm369_vm0, %v11175_v31 }
  0xdc   :  { %9544 = vmatprep.mubr.msk.f32.mxu0 %vm370_vm1, %v11175_v31 }
  0xdd   :  { %v253_v32 = vpop.permute.xlu1 %252  ;;  %v250_v33 = vpop.permute.xlu0 %249 }
  0xde   :  { %vm372_vm3 = vcmp.eq.s32.totalorder %v250_v33, %v11478_v26  ;;  %vm373_vm4 = vcmp.eq.s32.totalorder %v253_v32, %v11478_v26 }
  0xdf   :  { %9545 = vmatmul.mubr.msk.f32.gmra.mrb[44].mxu0 %vm371_vm2, %v11175_v31 }
  0xe0   :  { %9547 = vmatprep.mubr.msk.f32.mxu0 %vm372_vm3, %v11175_v31 }
  0xe1   :  { %v259_v34 = vpop.permute.xlu1 %258  ;;  %v256_v35 = vpop.permute.xlu0 %255 }
  0xe2   :  { %vm374_vm5 = vcmp.eq.s32.totalorder %v256_v35, %v11478_v26  ;;  %vm375_vm6 = vcmp.eq.s32.totalorder %v259_v34, %v11478_v26 }
  0xe3   :  { %9548 = vmatmul.mubr.msk.f32.gmra.mrb[46].mxu0 %vm373_vm4, %v11175_v31 }
  0xe4   :  { %9550 = vmatprep.mubr.msk.f32.mxu0 %vm374_vm5, %v11175_v31 }
  0xe5   :  { %v265_v36 = vpop.permute.xlu1 %264  ;;  %v262_v37 = vpop.permute.xlu0 %261 }
  0xe6   :  { %vm376_vm7 = vcmp.eq.s32.totalorder %v262_v37, %v11478_v26  ;;  %vm377_vm8 = vcmp.eq.s32.totalorder %v265_v36, %v11478_v26 }
  0xe7   :  { %9551 = vmatmul.mubr.msk.f32.gmra.mrb[48].mxu0 %vm375_vm6, %v11175_v31 }
  0xe8   :  { %9553 = vmatprep.mubr.msk.f32.mxu0 %vm376_vm7, %v11175_v31 }
  0xe9   :  { %v271_v38 = vpop.permute.xlu1 %270  ;;  %v268_v39 = vpop.permute.xlu0 %267 }
  0xea   :  { %vm378_vm9 = vcmp.eq.s32.totalorder %v268_v39, %v11478_v26  ;;  %vm379_vm10 = vcmp.eq.s32.totalorder %v271_v38, %v11478_v26 }
  0xeb   :  { %9554 = vmatmul.mubr.msk.f32.gmra.mrb[50].mxu0 %vm377_vm8, %v11175_v31 }
  0xec   :  { %9556 = vmatprep.mubr.msk.f32.mxu0 %vm378_vm9, %v11175_v31 }
  0xed   :  { %v277_v40 = vpop.permute.xlu1 %276  ;;  %v274_v41 = vpop.permute.xlu0 %273 }
  0xee   :  { %vm380_vm12 = vcmp.eq.s32.totalorder %v274_v41, %v11478_v26  ;;  %vm381_vm13 = vcmp.eq.s32.totalorder %v277_v40, %v11478_v26 }
  0xef   :  { %9557 = vmatmul.mubr.msk.f32.gmra.mrb[52].mxu0 %vm379_vm10, %v11175_v31 }
  0xf0   :  { %9559 = vmatprep.mubr.msk.f32.mxu0 %vm380_vm12, %v11175_v31 }
  0xf1   :  { %v283_v42 = vpop.permute.xlu1 %282  ;;  %v280_v43 = vpop.permute.xlu0 %279 }
  0xf2   :  { %vm382_vm14 = vcmp.eq.s32.totalorder %v280_v43, %v11478_v26  ;;  %vm383_vm15 = vcmp.eq.s32.totalorder %v283_v42, %v11478_v26 }
  0xf3   :  { %9560 = vmatmul.mubr.msk.f32.gmra.mrb[54].mxu0 %vm381_vm13, %v11175_v31 }
  0xf4   :  { %9562 = vmatprep.mubr.msk.f32.mxu0 %vm382_vm14, %v11175_v31 }
  0xf5   :  { %v289_v44 = vpop.permute.xlu1 %288  ;;  %v286_v45 = vpop.permute.xlu0 %285 }
  0xf6   :  { %vm384_vm0 = vcmp.eq.s32.totalorder %v286_v45, %v11478_v26  ;;  %vm385_vm1 = vcmp.eq.s32.totalorder %v289_v44, %v11478_v26 }
  0xf7   :  { %9563 = vmatmul.mubr.msk.f32.gmra.mrb[56].mxu0 %vm383_vm15, %v11175_v31  ;;  %vm989_vm15 = vcmask 80896  }
  0xf8   :  { %9565 = vmatprep.mubr.msk.f32.mxu0 %vm384_vm0, %v11175_v31  ;;  %vm3339_vm0 = vcmask 1042434  }
  0xf9   :  { %v295_v46 = vpop.permute.xlu1 %294  ;;  %v292_v47 = vpop.permute.xlu0 %291 }
  0xfa   :  { %vm386_vm2 = vcmp.eq.s32.totalorder %v292_v47, %v11478_v26  ;;  %vm387_vm3 = vcmp.eq.s32.totalorder %v295_v46, %v11478_v26 }
  0xfb   :  { %9566 = vmatmul.mubr.msk.f32.gmra.mrb[58].mxu0 %vm385_vm1, %v11175_v31  ;;  %vm3341_vm1 = vcmask 1044484  }
  0xfc   :  { %9568 = vmatprep.mubr.msk.f32.mxu0 %vm386_vm2, %v11175_v31  ;;  %vm3343_vm2 = vcmask 1046534  }
  0xfd   :  { %v301_v48 = vpop.permute.xlu1 %300  ;;  %v298_v49 = vpop.permute.xlu0 %297 }
  0xfe   :  { %vm388_vm4 = vcmp.eq.s32.totalorder %v298_v49, %v11478_v26  ;;  %vm389_vm5 = vcmp.eq.s32.totalorder %v301_v48, %v11478_v26 }
  0xff   :  { %9569 = vmatmul.mubr.msk.f32.gmra.mrb[60].mxu0 %vm387_vm3, %v11175_v31 }
 0x100   :  { %9571 = vmatprep.mubr.msk.f32.mxu0 %vm388_vm4, %v11175_v31 }
 0x101   :  { %v307_v51 = vpop.permute.xlu1 %306  ;;  %v304_v52 = vpop.permute.xlu0 %303 }
 0x102   :  { %vm390_vm6 = vcmp.eq.s32.totalorder %v304_v52, %v11478_v26  ;;  %vm391_vm7 = vcmp.eq.s32.totalorder %v307_v51, %v11478_v26 }
 0x103   :  { %9572 = vmatmul.mubr.msk.f32.gmra.mrb[62].mxu0 %vm389_vm5, %v11175_v31 }
 0x104   :  { %9574 = vmatprep.mubr.msk.f32.mxu0 %vm390_vm6, %v11175_v31  ;;  %vm6156_vm6 = vcmask 1041409  }
 0x105   :  { %v313_v53 = vpop.permute.xlu1 %312  ;;  %v310_v54 = vpop.permute.xlu0 %309 }
 0x106   :  { %vm392_vm8 = vcmp.eq.s32.totalorder %v310_v54, %v11478_v26  ;;  %vm393_vm9 = vcmp.eq.s32.totalorder %v313_v53, %v11478_v26 }
 0x107   :  { %9575 = vmatmul.mubr.msk.f32.gmra.mrb[64].mxu0 %vm391_vm7, %v11175_v31  ;;  %vm6161_vm7 = vcmask 1043459  }
 0x108   :  { %9577 = vmatprep.mubr.msk.f32.mxu0 %vm392_vm8, %v11175_v31  ;;  %vm6166_vm8 = vcmask 1045509  }
 0x109   :  { %v319_v55 = vpop.permute.xlu1 %318  ;;  %v316_v56 = vpop.permute.xlu0 %315 }
 0x10a   :  { %vm394_vm10 = vcmp.eq.s32.totalorder %v316_v56, %v11478_v26  ;;  %vm395_vm12 = vcmp.eq.s32.totalorder %v319_v55, %v11478_v26 }
 0x10b   :  { %9578 = vmatmul.mubr.msk.f32.gmra.mrb[66].mxu0 %vm393_vm9, %v11175_v31  ;;  %vm6171_vm9 = vcmask 1047559  }
 0x10c   :  { %9580 = vmatprep.mubr.msk.f32.mxu0 %vm394_vm10, %v11175_v31 }
 0x10d   :  { %v322_v57 = vpop.permute.xlu0 %321  ;;  %v325_v58 = vpop.permute.xlu1 %324 }
 0x10e   :  { %vm396_vm13 = vcmp.eq.s32.totalorder %v322_v57, %v11478_v26  ;;  %vm397_vm14 = vcmp.eq.s32.totalorder %v325_v58, %v11478_v26  ;;  %v5467_v26 = vld [vmem:[%s15714_s4 + $0x18] sm:$0x3] }
 0x10f   :  { %9581 = vmatmul.mubr.msk.f32.gmra.mrb[68].mxu0 %vm395_vm12, %v11175_v31 }
 0x110   :  { %9583 = vmatprep.mubr.msk.f32.mxu0 %vm396_vm13, %v11175_v31 }
 0x113   :  { %9584 = vmatmul.mubr.msk.f32.gmra.mrb[70].mxu0 %vm397_vm14, %v11175_v31  ;;  %v11693_v31 = vpack.c.bf16 %v5467_v26, %v5464_v62 }
 0x114   :  { %5656 = vmatprep.mubr.f32.mxu0 %v15736_v27 }
 0x115   :  { %10135 = vmatpush1.bf16.msk.msra.mxu0 %vm11531_vm11, %v11693_v31 }
 0x15a   :  { %v11700_v63 = vpop.f32.mrb[0].mxu0 }
 0x15b   :  { %v11702_v0 = vpop.f32.mrb[1].mxu0 }
 0x15c   :  { %8827 = vmatmul.mubr.msk.f32.vlgmr.msra.gmra.mrb[0].mxu1 %vm989_vm15, %v11702_v0 }
 0x15d   :  { %10129 = vmatpush3.bf16.msk.msra.mxu1 %vm11531_vm11, %v11621_v30  ;;  %1190 = vmatprep.mubr.f32.mxu1 %v15736_v27 }
 0x15e   :  { %v11710_v1 = vpop.f32.mrb[2].mxu0  ;;  %10686 = vmatprep.subr.msk.bf16.mxu1 %vm11531_vm11, %v10130_v61 }
 0x15f   :  { %v11714_v2 = vpop.f32.mrb[3].mxu0 }
 0x160   :  { %8828 = vmatmul.mubr.msk.f32.gmra.mrb[2].mxu1 %vm989_vm15, %v11700_v63 }
 0x161   :  { %1196 = vmatprep.mubr.f32.mxu1 %v15736_v27 }
 0x162   :  { %v11719_v3 = vpop.f32.mrb[4].mxu0 }
 0x163   :  { %v11721_v4 = vpop.f32.mrb[5].mxu0 }
 0x164   :  { %8829 = vmatmul.mubr.msk.f32.gmra.mrb[4].mxu1 %vm989_vm15, %v11714_v2 }
 0x165   :  { %1202 = vmatprep.mubr.f32.mxu1 %v15736_v27 }
 0x166   :  { %v11726_v5 = vpop.f32.mrb[6].mxu0 }
 0x167   :  { %v11728_v6 = vpop.f32.mrb[7].mxu0 }
 0x168   :  { %8830 = vmatmul.mubr.msk.f32.gmra.mrb[6].mxu1 %vm989_vm15, %v11710_v1 }
 0x169   :  { %1208 = vmatprep.mubr.f32.mxu1 %v15736_v27 }
 0x16a   :  { %v11733_v7 = vpop.f32.mrb[8].mxu0 }
 0x16b   :  { %v11735_v8 = vpop.f32.mrb[9].mxu0 }
 0x16c   :  { %8831 = vmatmul.mubr.msk.f32.gmra.mrb[8].mxu1 %vm989_vm15, %v11721_v4 }
 0x16d   :  { %1214 = vmatprep.mubr.f32.mxu1 %v15736_v27 }
 0x16e   :  { %v11740_v9 = vpop.f32.mrb[10].mxu0 }
 0x16f   :  { %v11742_v10 = vpop.f32.mrb[11].mxu0 }
 0x170   :  { %8832 = vmatmul.mubr.msk.f32.gmra.mrb[10].mxu1 %vm989_vm15, %v11719_v3 }
 0x171   :  { %1220 = vmatprep.mubr.f32.mxu1 %v15736_v27 }
 0x172   :  { %v11747_v11 = vpop.f32.mrb[12].mxu0 }
 0x173   :  { %v11749_v12 = vpop.f32.mrb[13].mxu0 }
 0x174   :  { %8833 = vmatmul.mubr.msk.f32.gmra.mrb[12].mxu1 %vm989_vm15, %v11728_v6 }
 0x175   :  { %1226 = vmatprep.mubr.f32.mxu1 %v15736_v27 }
 0x176   :  { %v11754_v13 = vpop.f32.mrb[14].mxu0 }
 0x177   :  { %v11756_v14 = vpop.f32.mrb[15].mxu0 }
 0x178   :  { %8834 = vmatmul.mubr.msk.f32.gmra.mrb[14].mxu1 %vm989_vm15, %v11726_v5 }
 0x179   :  { %1232 = vmatprep.mubr.f32.mxu1 %v15736_v27 }
 0x17a   :  { %v11761_v15 = vpop.f32.mrb[16].mxu0 }
 0x17b   :  { %v11763_v16 = vpop.f32.mrb[17].mxu0 }
 0x17c   :  { %8835 = vmatmul.mubr.msk.f32.gmra.mrb[16].mxu1 %vm989_vm15, %v11735_v8 }
 0x17d   :  { %1238 = vmatprep.mubr.f32.mxu1 %v15736_v27 }
 0x17e   :  { %v11768_v17 = vpop.f32.mrb[18].mxu0 }
 0x17f   :  { %v11770_v18 = vpop.f32.mrb[19].mxu0 }
 0x180   :  { %8836 = vmatmul.mubr.msk.f32.gmra.mrb[18].mxu1 %vm989_vm15, %v11733_v7 }
 0x181   :  { %1244 = vmatprep.mubr.f32.mxu1 %v15736_v27 }
 0x182   :  { %v11775_v19 = vpop.f32.mrb[20].mxu0 }
 0x183   :  { %v11777_v20 = vpop.f32.mrb[21].mxu0 }
 0x184   :  { %8837 = vmatmul.mubr.msk.f32.gmra.mrb[20].mxu1 %vm989_vm15, %v11742_v10 }
 0x185   :  { %1250 = vmatprep.mubr.f32.mxu1 %v15736_v27 }
 0x186   :  { %v11782_v21 = vpop.f32.mrb[22].mxu0 }
 0x187   :  { %v11784_v22 = vpop.f32.mrb[23].mxu0 }
 0x188   :  { %8838 = vmatmul.mubr.msk.f32.gmra.mrb[22].mxu1 %vm989_vm15, %v11740_v9 }
 0x189   :  { %1256 = vmatprep.mubr.f32.mxu1 %v15736_v27 }
 0x18a   :  { %v11789_v24 = vpop.f32.mrb[24].mxu0 }
 0x18b   :  { %v11791_v25 = vpop.f32.mrb[25].mxu0 }
 0x18c   :  { %8839 = vmatmul.mubr.msk.f32.gmra.mrb[24].mxu1 %vm989_vm15, %v11749_v12 }
 0x18d   :  { %1262 = vmatprep.mubr.f32.mxu1 %v15736_v27 }
 0x18e   :  { %v11796_v28 = vpop.f32.mrb[26].mxu0 }
 0x18f   :  { %v11798_v29 = vpop.f32.mrb[27].mxu0 }
 0x190   :  { %8840 = vmatmul.mubr.msk.f32.gmra.mrb[26].mxu1 %vm989_vm15, %v11747_v11 }
 0x191   :  { %1268 = vmatprep.mubr.f32.mxu1 %v15736_v27 }
 0x192   :  { %v11803_v30 = vpop.f32.mrb[28].mxu0 }
 0x193   :  { %v11805_v32 = vpop.f32.mrb[29].mxu0 }
 0x194   :  { %8841 = vmatmul.mubr.msk.f32.gmra.mrb[28].mxu1 %vm989_vm15, %v11756_v14 }
 0x195   :  { %1274 = vmatprep.mubr.f32.mxu1 %v15736_v27 }
 0x196   :  { %v11810_v33 = vpop.f32.mrb[30].mxu0 }
 0x197   :  { %v11812_v34 = vpop.f32.mrb[31].mxu0 }
 0x198   :  { %8842 = vmatmul.mubr.msk.f32.gmra.mrb[30].mxu1 %vm989_vm15, %v11754_v13 }
 0x199   :  { %1280 = vmatprep.mubr.f32.mxu1 %v15736_v27 }
 0x19a   :  { %v11817_v35 = vpop.f32.mrb[32].mxu0 }
 0x19b   :  { %v11819_v36 = vpop.f32.mrb[33].mxu0 }
 0x19c   :  { %8843 = vmatmul.mubr.msk.f32.gmra.mrb[32].mxu1 %vm989_vm15, %v11763_v16 }
 0x19d   :  { %1286 = vmatprep.mubr.f32.mxu1 %v15736_v27 }
 0x19e   :  { %v11824_v37 = vpop.f32.mrb[34].mxu0 }
 0x19f   :  { %v11826_v38 = vpop.f32.mrb[35].mxu0 }
 0x1a0   :  { %8844 = vmatmul.mubr.msk.f32.gmra.mrb[34].mxu1 %vm989_vm15, %v11761_v15 }
 0x1a1   :  { %1292 = vmatprep.mubr.f32.mxu1 %v15736_v27 }
 0x1a2   :  { %v11831_v39 = vpop.f32.mrb[36].mxu0 }
 0x1a3   :  { %v11833_v40 = vpop.f32.mrb[37].mxu0 }
 0x1a4   :  { %8845 = vmatmul.mubr.msk.f32.gmra.mrb[36].mxu1 %vm989_vm15, %v11770_v18 }
 0x1a5   :  { %1298 = vmatprep.mubr.f32.mxu1 %v15736_v27 }
 0x1a6   :  { %v11838_v41 = vpop.f32.mrb[38].mxu0 }
 0x1a7   :  { %v11840_v42 = vpop.f32.mrb[39].mxu0 }
 0x1a8   :  { %8846 = vmatmul.mubr.msk.f32.gmra.mrb[38].mxu1 %vm989_vm15, %v11768_v17 }
 0x1a9   :  { %1304 = vmatprep.mubr.f32.mxu1 %v15736_v27 }
 0x1aa   :  { %v11845_v43 = vpop.f32.mrb[40].mxu0 }
 0x1ab   :  { %v11847_v44 = vpop.f32.mrb[41].mxu0 }
 0x1ac   :  { %8847 = vmatmul.mubr.msk.f32.gmra.mrb[40].mxu1 %vm989_vm15, %v11777_v20  ;;  %8943 = vmatmul.mubr.msk.f32.vlgmr.msra.gmra.mrb[72].mxu0 %vm989_vm15, %v11847_v44 }
 0x1ad   :  { %1310 = vmatprep.mubr.f32.mxu1 %v15736_v27  ;;  %5662 = vmatprep.mubr.f32.mxu0 %v15736_v27 }
 0x1ae   :  { %v11855_v45 = vpop.f32.mrb[42].mxu0 }
 0x1af   :  { %15912 = vst [vmem:[#allocation6_spill] sm:$0xff] %v11855_v45  ;;  %v11857_v46 = vpop.f32.mrb[43].mxu0 }
 0x1b0   :  { %8848 = vmatmul.mubr.msk.f32.gmra.mrb[42].mxu1 %vm989_vm15, %v11775_v19  ;;  %8944 = vmatmul.mubr.msk.f32.gmra.mrb[74].mxu0 %vm989_vm15, %v11845_v43 }
 0x1b1   :  { %1316 = vmatprep.mubr.f32.mxu1 %v15736_v27  ;;  %5668 = vmatprep.mubr.f32.mxu0 %v15736_v27 }
 0x1b2   :  { %v11865_v47 = vpop.f32.mrb[44].mxu0 }
 0x1b3   :  { %15913 = vst [vmem:[#allocation7_spill] sm:$0xff] %v11865_v47  ;;  %v11867_v48 = vpop.f32.mrb[45].mxu0 }
 0x1b4   :  { %15914 = vst [vmem:[#allocation8_spill] sm:$0xff] %v11867_v48  ;;  %8849 = vmatmul.mubr.msk.f32.gmra.mrb[44].mxu1 %vm989_vm15, %v11784_v22  ;;  %8945 = vmatmul.mubr.msk.f32.gmra.mrb[76].mxu0 %vm989_vm15, %v11857_v46 }
 0x1b5   :  { %1322 = vmatprep.mubr.f32.mxu1 %v15736_v27  ;;  %5674 = vmatprep.mubr.f32.mxu0 %v15736_v27 }
 0x1b6   :  { %v11875_v49 = vpop.f32.mrb[46].mxu0 }
 0x1b7   :  { %15915 = vst [vmem:[#allocation9_spill] sm:$0xff] %v11875_v49  ;;  %v11877_v51 = vpop.f32.mrb[47].mxu0 }
 0x1b8   :  { %15916 = vst [vmem:[#allocation10_spill] sm:$0xff] %v11877_v51  ;;  %8850 = vmatmul.mubr.msk.f32.gmra.mrb[46].mxu1 %vm989_vm15, %v11782_v21  ;;  %8946 = vmatmul.mubr.msk.f32.gmra.mrb[78].mxu0 %vm989_vm15, %v11855_v45 }
 0x1b9   :  { %1328 = vmatprep.mubr.f32.mxu1 %v15736_v27  ;;  %5680 = vmatprep.mubr.f32.mxu0 %v15736_v27 }
 0x1ba   :  { %v11885_v52 = vpop.f32.mrb[48].mxu0 }
 0x1bb   :  { %15917 = vst [vmem:[#allocation11_spill] sm:$0xff] %v11885_v52  ;;  %v11887_v53 = vpop.f32.mrb[49].mxu0 }
 0x1bc   :  { %15918 = vst [vmem:[#allocation12_spill] sm:$0xff] %v11887_v53  ;;  %8851 = vmatmul.mubr.msk.f32.gmra.mrb[48].mxu1 %vm989_vm15, %v11791_v25  ;;  %8947 = vmatmul.mubr.msk.f32.gmra.mrb[80].mxu0 %vm989_vm15, %v11867_v48 }
 0x1bd   :  { %1334 = vmatprep.mubr.f32.mxu1 %v15736_v27  ;;  %5686 = vmatprep.mubr.f32.mxu0 %v15736_v27 }
 0x1be   :  { %v11895_v54 = vpop.f32.mrb[50].mxu0 }
 0x1bf   :  { %15919 = vst [vmem:[#allocation13_spill] sm:$0xff] %v11895_v54  ;;  %v11897_v55 = vpop.f32.mrb[51].mxu0 }
 0x1c0   :  { %15920 = vst [vmem:[#allocation14_spill] sm:$0xff] %v11897_v55  ;;  %8852 = vmatmul.mubr.msk.f32.gmra.mrb[50].mxu1 %vm989_vm15, %v11789_v24  ;;  %8948 = vmatmul.mubr.msk.f32.gmra.mrb[82].mxu0 %vm989_vm15, %v11865_v47 }
 0x1c1   :  { %1340 = vmatprep.mubr.f32.mxu1 %v15736_v27  ;;  %5692 = vmatprep.mubr.f32.mxu0 %v15736_v27 }
 0x1c2   :  { %v11905_v56 = vpop.f32.mrb[52].mxu0 }
 0x1c3   :  { %15921 = vst [vmem:[#allocation15_spill] sm:$0xff] %v11905_v56  ;;  %v11907_v57 = vpop.f32.mrb[53].mxu0 }
 0x1c4   :  { %15922 = vst [vmem:[#allocation16_spill] sm:$0xff] %v11907_v57  ;;  %8853 = vmatmul.mubr.msk.f32.gmra.mrb[52].mxu1 %vm989_vm15, %v11798_v29  ;;  %8949 = vmatmul.mubr.msk.f32.gmra.mrb[84].mxu0 %vm989_vm15, %v11877_v51 }
 0x1c5   :  { %1346 = vmatprep.mubr.f32.mxu1 %v15736_v27  ;;  %5698 = vmatprep.mubr.f32.mxu0 %v15736_v27 }
 0x1c6   :  { %v11915_v58 = vpop.f32.mrb[54].mxu0 }
 0x1c7   :  { %v11917_v59 = vpop.f32.mrb[55].mxu0 }
 0x1c8   :  { %8854 = vmatmul.mubr.msk.f32.gmra.mrb[54].mxu1 %vm989_vm15, %v11796_v28  ;;  %8950 = vmatmul.mubr.msk.f32.gmra.mrb[86].mxu0 %vm989_vm15, %v11875_v49 }
 0x1c9   :  { %1352 = vmatprep.mubr.f32.mxu1 %v15736_v27  ;;  %5704 = vmatprep.mubr.f32.mxu0 %v15736_v27 }
 0x1ca   :  { %v11925_v60 = vpop.f32.mrb[56].mxu0 }
 0x1cb   :  { %15923 = vst [vmem:[#allocation17_spill] sm:$0xff] %v11925_v60  ;;  %v11927_v61 = vpop.f32.mrb[57].mxu0 }
 0x1cc   :  { %15924 = vst [vmem:[#allocation18_spill] sm:$0xff] %v11927_v61  ;;  %8855 = vmatmul.mubr.msk.f32.gmra.mrb[56].mxu1 %vm989_vm15, %v11805_v32  ;;  %8951 = vmatmul.mubr.msk.f32.gmra.mrb[88].mxu0 %vm989_vm15, %v11887_v53 }
 0x1cd   :  { %1358 = vmatprep.mubr.f32.mxu1 %v15736_v27  ;;  %5710 = vmatprep.mubr.f32.mxu0 %v15736_v27 }
 0x1ce   :  { %v11935_v62 = vpop.f32.mrb[58].mxu0 }
 0x1cf   :  { %v11937_v26 = vpop.f32.mrb[59].mxu0 }
 0x1d0   :  { %15925 = vst [vmem:[#allocation19_spill] sm:$0xff] %v11937_v26  ;;  %8856 = vmatmul.mubr.msk.f32.gmra.mrb[58].mxu1 %vm989_vm15, %v11803_v30  ;;  %8952 = vmatmul.mubr.msk.f32.gmra.mrb[90].mxu0 %vm989_vm15, %v11885_v52 }
 0x1d1   :  { %1364 = vmatprep.mubr.f32.mxu1 %v15736_v27  ;;  %5716 = vmatprep.mubr.f32.mxu0 %v15736_v27 }
 0x1d2   :  { %v11945_v23 = vpop.f32.mrb[60].mxu0 }
 0x1d3   :  { %v11947_v53 = vpop.f32.mrb[61].mxu0 }
 0x1d4   :  { %8857 = vmatmul.mubr.msk.f32.gmra.mrb[60].mxu1 %vm989_vm15, %v11812_v34  ;;  %8953 = vmatmul.mubr.msk.f32.gmra.mrb[92].mxu0 %vm989_vm15, %v11897_v55 }
 0x1d5   :  { %1370 = vmatprep.mubr.f32.mxu1 %v15736_v27  ;;  %5722 = vmatprep.mubr.f32.mxu0 %v15736_v27 }
 0x1d6   :  { %v11955_v49 = vpop.f32.mrb[62].mxu0 }
 0x1d7   :  { %v11957_v52 = vpop.f32.mrb[63].mxu0 }
 0x1d8   :  { %8858 = vmatmul.mubr.msk.f32.gmra.mrb[62].mxu1 %vm989_vm15, %v11810_v33  ;;  %8954 = vmatmul.mubr.msk.f32.gmra.mrb[94].mxu0 %vm989_vm15, %v11895_v54 }
 0x1d9   :  { %1376 = vmatprep.mubr.f32.mxu1 %v15736_v27  ;;  %5728 = vmatprep.mubr.f32.mxu0 %v15736_v27 }
 0x1da   :  { %v11965_v51 = vpop.f32.mrb[64].mxu0 }
 0x1db   :  { %v11967_v55 = vpop.f32.mrb[65].mxu0 }
 0x1dc   :  { %8859 = vmatmul.mubr.msk.f32.gmra.mrb[64].mxu1 %vm989_vm15, %v11819_v36  ;;  %8955 = vmatmul.mubr.msk.f32.gmra.mrb[96].mxu0 %vm989_vm15, %v11907_v57 }
 0x1dd   :  { %1382 = vmatprep.mubr.f32.mxu1 %v15736_v27  ;;  %5734 = vmatprep.mubr.f32.mxu0 %v15736_v27 }
 0x1de   :  { %v11975_v47 = vpop.f32.mrb[66].mxu0 }
 0x1df   :  { %v11977_v54 = vpop.f32.mrb[67].mxu0 }
 0x1e0   :  { %8860 = vmatmul.mubr.msk.f32.gmra.mrb[66].mxu1 %vm989_vm15, %v11817_v35  ;;  %8956 = vmatmul.mubr.msk.f32.gmra.mrb[98].mxu0 %vm989_vm15, %v11905_v56 }
 0x1e1   :  { %1388 = vmatprep.mubr.f32.mxu1 %v15736_v27  ;;  %5740 = vmatprep.mubr.f32.mxu0 %v15736_v27 }
 0x1e2   :  { %v11985_v48 = vpop.f32.mrb[68].mxu0 }
 0x1e3   :  { %v11987_v57 = vpop.f32.mrb[69].mxu0 }
 0x1e4   :  { %8861 = vmatmul.mubr.msk.f32.gmra.mrb[68].mxu1 %vm989_vm15, %v11826_v38  ;;  %8957 = vmatmul.mubr.msk.f32.gmra.mrb[100].mxu0 %vm989_vm15, %v11917_v59 }
 0x1e5   :  { %1394 = vmatprep.mubr.f32.mxu1 %v15736_v27  ;;  %5746 = vmatprep.mubr.f32.mxu0 %v15736_v27 }
 0x1e6   :  { %v11995_v45 = vpop.f32.mrb[70].mxu0 }
 0x1e7   :  { %v11997_v56 = vpop.f32.mrb[71].mxu0 }
 0x1e8   :  { %8862 = vmatmul.mubr.msk.f32.gmra.mrb[70].mxu1 %vm989_vm15, %v11824_v37  ;;  %8958 = vmatmul.mubr.msk.f32.gmra.mrb[102].mxu0 %vm989_vm15, %v11915_v58 }
 0x1e9   :  { %1400 = vmatprep.mubr.f32.mxu1 %v15736_v27  ;;  %5752 = vmatprep.mubr.f32.mxu0 %v15736_v27 }
 0x1ec   :  { %8863 = vmatmul.mubr.msk.f32.gmra.mrb[72].mxu1 %vm989_vm15, %v11833_v40  ;;  %8959 = vmatmul.mubr.msk.f32.gmra.mrb[104].mxu0 %vm989_vm15, %v11927_v61  ;;  %v5469_v61 = vld [vmem:[%s15714_s4 + $0x28] sm:$0x3] }
 0x1ed   :  { %1406 = vmatprep.mubr.f32.mxu1 %v15736_v27  ;;  %5758 = vmatprep.mubr.f32.mxu0 %v15736_v27 }
 0x1f0   :  { %8864 = vmatmul.mubr.msk.f32.gmra.mrb[74].mxu1 %vm989_vm15, %v11831_v39  ;;  %8960 = vmatmul.mubr.msk.f32.gmra.mrb[106].mxu0 %vm989_vm15, %v11925_v60  ;;  %v5466_v60 = vld [vmem:[%s15714_s4 + $0x10] sm:$0xff] }
 0x1f1   :  { %1412 = vmatprep.mubr.f32.mxu1 %v15736_v27  ;;  %5764 = vmatprep.mubr.f32.mxu0 %v15736_v27 }
 0x1f4   :  { %8865 = vmatmul.mubr.msk.f32.gmra.mrb[76].mxu1 %vm989_vm15, %v11840_v42  ;;  %8961 = vmatmul.mubr.msk.f32.gmra.mrb[108].mxu0 %vm989_vm15, %v11937_v26  ;;  %v12036_v26 = vpack.c.bf16 %v5469_v61, %v5466_v60 }
 0x1f5   :  { %1418 = vmatprep.mubr.f32.mxu1 %v15736_v27  ;;  %5770 = vmatprep.mubr.f32.mxu0 %v15736_v27 }
 0x1f8   :  { %8866 = vmatmul.mubr.msk.f32.gmra.mrb[78].mxu1 %vm989_vm15, %v11838_v41  ;;  %8962 = vmatmul.mubr.msk.f32.gmra.mrb[110].mxu0 %vm989_vm15, %v11935_v62 }
 0x1f9   :  { %9590 = vmatprep.mubr.msk.f32.mxu1 %vm989_vm15, %v11702_v0  ;;  %5776 = vmatprep.mubr.f32.mxu0 %v15736_v27 }
 0x1fc   :  { %9591 = vmatmul.mubr.msk.f32.vlgmr.msra.gmra.mrb[80].mxu1 %vm989_vm15, %v11700_v63  ;;  %8963 = vmatmul.mubr.msk.f32.gmra.mrb[112].mxu0 %vm989_vm15, %v11947_v53 }
 0x1fd   :  { %9593 = vmatprep.mubr.msk.f32.mxu1 %vm989_vm15, %v11714_v2  ;;  %5782 = vmatprep.mubr.f32.mxu0 %v15736_v27 }
 0x1fe   :  { %10687 = vmatpush1.bf16.msk.msra.mxu1 %vm11531_vm11, %v11693_v31 }
 0x1ff   :  { %10138 = vmatprep.subr.msk.bf16.mxu1 %vm11531_vm11, %v12036_v26 }
 0x200   :  { %9594 = vmatmul.mubr.msk.f32.gmra.mrb[82].mxu1 %vm989_vm15, %v11710_v1  ;;  %8964 = vmatmul.mubr.msk.f32.gmra.mrb[114].mxu0 %vm989_vm15, %v11945_v23  ;;  %v15938_v1 = vld [vmem:[#allocation14_spill] sm:$0xff] }
 0x201   :  { %9596 = vmatprep.mubr.msk.f32.mxu1 %vm989_vm15, %v11721_v4  ;;  %6283 = vmatprep.mubr.f32.mxu0 %v15736_v27 }
 0x204   :  { %9597 = vmatmul.mubr.msk.f32.gmra.mrb[84].mxu1 %vm989_vm15, %v11719_v3 }
 0x205   :  { %9599 = vmatprep.mubr.msk.f32.mxu1 %vm989_vm15, %v11728_v6 }
 0x208   :  { %9600 = vmatmul.mubr.msk.f32.gmra.mrb[86].mxu1 %vm989_vm15, %v11726_v5  ;;  %v15934_v5 = vld [vmem:[#allocation12_spill] sm:$0xff] }
 0x209   :  { %9602 = vmatprep.mubr.msk.f32.mxu1 %vm989_vm15, %v11735_v8 }
 0x20c   :  { %9603 = vmatmul.mubr.msk.f32.gmra.mrb[88].mxu1 %vm989_vm15, %v11733_v7 }
 0x20d   :  { %9605 = vmatprep.mubr.msk.f32.mxu1 %vm989_vm15, %v11742_v10 }
 0x210   :  { %9606 = vmatmul.mubr.msk.f32.gmra.mrb[90].mxu1 %vm989_vm15, %v11740_v9  ;;  %v15930_v9 = vld [vmem:[#allocation10_spill] sm:$0xff] }
 0x211   :  { %9608 = vmatprep.mubr.msk.f32.mxu1 %vm989_vm15, %v11749_v12 }
 0x214   :  { %9609 = vmatmul.mubr.msk.f32.gmra.mrb[92].mxu1 %vm989_vm15, %v11747_v11 }
 0x215   :  { %9611 = vmatprep.mubr.msk.f32.mxu1 %vm989_vm15, %v11756_v14 }
 0x218   :  { %9612 = vmatmul.mubr.msk.f32.gmra.mrb[94].mxu1 %vm989_vm15, %v11754_v13 }
 0x219   :  { %9614 = vmatprep.mubr.msk.f32.mxu1 %vm989_vm15, %v11763_v16 }
 0x21c   :  { %9615 = vmatmul.mubr.msk.f32.gmra.mrb[96].mxu1 %vm989_vm15, %v11761_v15 }
 0x21d   :  { %9617 = vmatprep.mubr.msk.f32.mxu1 %vm989_vm15, %v11770_v18 }
 0x220   :  { %9618 = vmatmul.mubr.msk.f32.gmra.mrb[98].mxu1 %vm989_vm15, %v11768_v17 }
 0x221   :  { %9620 = vmatprep.mubr.msk.f32.mxu1 %vm989_vm15, %v11777_v20 }
 0x224   :  { %9621 = vmatmul.mubr.msk.f32.gmra.mrb[100].mxu1 %vm989_vm15, %v11775_v19 }
 0x225   :  { %9623 = vmatprep.mubr.msk.f32.mxu1 %vm989_vm15, %v11784_v22 }
 0x228   :  { %9624 = vmatmul.mubr.msk.f32.gmra.mrb[102].mxu1 %vm989_vm15, %v11782_v21 }
 0x229   :  { %9626 = vmatprep.mubr.msk.f32.mxu1 %vm989_vm15, %v11791_v25 }
 0x22c   :  { %9627 = vmatmul.mubr.msk.f32.gmra.mrb[104].mxu1 %vm989_vm15, %v11789_v24 }
 0x22d   :  { %9629 = vmatprep.mubr.msk.f32.mxu1 %vm989_vm15, %v11798_v29 }
 0x22f   :  { %v12102_v31 = vpop.f32.mrb[0].mxu1 }
 0x230   :  { %v12104_v63 = vpop.f32.mrb[1].mxu1  ;;  %9630 = vmatmul.mubr.msk.f32.gmra.mrb[106].mxu1 %vm989_vm15, %v11796_v28 }
 0x231   :  { %9632 = vmatprep.mubr.msk.f32.mxu1 %vm989_vm15, %v11805_v32 }
 0x233   :  { %v12114_v2 = vpop.f32.mrb[2].mxu1 }
 0x234   :  { %v12116_v3 = vpop.f32.mrb[3].mxu1  ;;  %9633 = vmatmul.mubr.msk.f32.gmra.mrb[108].mxu1 %vm989_vm15, %v11803_v30 }
 0x235   :  { %9635 = vmatprep.mubr.msk.f32.mxu1 %vm989_vm15, %v11812_v34 }
 0x237   :  { %v12126_v6 = vpop.f32.mrb[4].mxu1 }
 0x238   :  { %v12128_v7 = vpop.f32.mrb[5].mxu1  ;;  %9636 = vmatmul.mubr.msk.f32.gmra.mrb[110].mxu1 %vm989_vm15, %v11810_v33 }
 0x239   :  { %9638 = vmatprep.mubr.msk.f32.mxu1 %vm989_vm15, %v11819_v36 }
 0x23b   :  { %v12138_v10 = vpop.f32.mrb[6].mxu1 }
 0x23c   :  { %v12140_v11 = vpop.f32.mrb[7].mxu1  ;;  %9639 = vmatmul.mubr.msk.f32.gmra.mrb[112].mxu1 %vm989_vm15, %v11817_v35 }
 0x23d   :  { %9641 = vmatprep.mubr.msk.f32.mxu1 %vm989_vm15, %v11826_v38 }
 0x23f   :  { %v12150_v14 = vpop.f32.mrb[8].mxu1 }
 0x240   :  { %v12152_v15 = vpop.f32.mrb[9].mxu1  ;;  %9642 = vmatmul.mubr.msk.f32.gmra.mrb[114].mxu1 %vm989_vm15, %v11824_v37 }
 0x241   :  { %9644 = vmatprep.mubr.msk.f32.mxu1 %vm989_vm15, %v11833_v40 }
 0x243   :  { %v12162_v18 = vpop.f32.mrb[10].mxu1 }
 0x244   :  { %v12164_v19 = vpop.f32.mrb[11].mxu1  ;;  %9645 = vmatmul.mubr.msk.f32.gmra.mrb[116].mxu1 %vm989_vm15, %v11831_v39 }
 0x245   :  { %9647 = vmatprep.mubr.msk.f32.mxu1 %vm989_vm15, %v11840_v42 }
 0x247   :  { %v12174_v22 = vpop.f32.mrb[12].mxu1 }
 0x248   :  { %v12176_v24 = vpop.f32.mrb[13].mxu1  ;;  %9648 = vmatmul.mubr.msk.f32.gmra.mrb[118].mxu1 %vm989_vm15, %v11838_v41 }
 0x249   :  { %5788 = vmatprep.mubr.f32.mxu1 %v15736_v27 }
 0x24b   :  { %v12185_v29 = vpop.f32.mrb[14].mxu1 }
 0x24c   :  { %v12187_v30 = vpop.f32.mrb[15].mxu1  ;;  %8965 = vmatmul.mubr.msk.f32.vlgmr.msra.gmra.mrb[120].mxu1 %vm989_vm15, %v11957_v52 }
 0x24d   :  { %5794 = vmatprep.mubr.f32.mxu1 %v15736_v27  ;;  %10141 = vmatpush3.bf16.msk.msra.mxu1 %vm11531_vm11, %v12036_v26  ;;  %vm3338_vm11 = vcmask 1040384  }
 0x24e   :  { %vm3340_vm3 = vmor %vm3338_vm11, %vm3339_vm0 }
 0x24f   :  { %v12199_v34 = vpop.f32.mrb[16].mxu1  ;;  %vm3342_vm4 = vmor %vm3340_vm3, %vm3341_vm1 }
 0x250   :  { %v12201_v35 = vpop.f32.mrb[17].mxu1  ;;  %8966 = vmatmul.mubr.msk.f32.gmra.mrb[122].mxu1 %vm989_vm15, %v11955_v49  ;;  %vm12962_vm5 = vmor %vm3342_vm4, %vm3343_vm2 }
 0x251   :  { %5800 = vmatprep.mubr.f32.mxu1 %v15736_v27 }
 0x253   :  { %v12210_v38 = vpop.f32.mrb[18].mxu1 }
 0x254   :  { %v12212_v39 = vpop.f32.mrb[19].mxu1  ;;  %8967 = vmatmul.mubr.msk.f32.gmra.mrb[124].mxu1 %vm989_vm15, %v11967_v55 }
 0x255   :  { %5806 = vmatprep.mubr.f32.mxu1 %v15736_v27 }
 0x257   :  { %v12221_v41 = vpop.f32.mrb[20].mxu1 }
 0x258   :  { %v12223_v42 = vpop.f32.mrb[21].mxu1  ;;  %8968 = vmatmul.mubr.msk.f32.gmra.mrb[126].mxu1 %vm989_vm15, %v11965_v51 }
 0x259   :  { %5812 = vmatprep.mubr.f32.mxu1 %v15736_v27 }
 0x25b   :  { %v12232_v26 = vpop.f32.mrb[22].mxu1 }
 0x25c   :  { %v12234_v40 = vpop.f32.mrb[23].mxu1  ;;  %8969 = vmatmul.mubr.msk.f32.gmra.mrb[128].mxu1 %vm989_vm15, %v11977_v54 }
 0x25d   :  { %5818 = vmatprep.mubr.f32.mxu1 %v15736_v27 }
 0x25f   :  { %v12243_v60 = vpop.f32.mrb[24].mxu1 }
 0x260   :  { %v12245_v61 = vpop.f32.mrb[25].mxu1  ;;  %8970 = vmatmul.mubr.msk.f32.gmra.mrb[130].mxu1 %vm989_vm15, %v11975_v47 }
 0x261   :  { %5824 = vmatprep.mubr.f32.mxu1 %v15736_v27 }
 0x263   :  { %v12254_v50 = vpop.f32.mrb[26].mxu1 }
 0x264   :  { %v12256_v37 = vpop.f32.mrb[27].mxu1  ;;  %8971 = vmatmul.mubr.msk.f32.gmra.mrb[132].mxu1 %vm989_vm15, %v11987_v57 }
 0x265   :  { %5830 = vmatprep.mubr.f32.mxu1 %v15736_v27 }
 0x267   :  { %v12265_v36 = vpop.f32.mrb[28].mxu1 }
 0x268   :  { %v12267_v33 = vpop.f32.mrb[29].mxu1  ;;  %8972 = vmatmul.mubr.msk.f32.gmra.mrb[134].mxu1 %vm989_vm15, %v11985_v48 }
 0x269   :  { %5836 = vmatprep.mubr.f32.mxu1 %v15736_v27 }
 0x26b   :  { %v12276_v32 = vpop.f32.mrb[30].mxu1 }
 0x26c   :  { %v12278_v28 = vpop.f32.mrb[31].mxu1  ;;  %8973 = vmatmul.mubr.msk.f32.gmra.mrb[136].mxu1 %vm989_vm15, %v11997_v56 }
 0x26d   :  { %5842 = vmatprep.mubr.f32.mxu1 %v15736_v27  ;;  %v15927_v27 = vld [vmem:[#allocation8_spill] sm:$0xff] }
 0x26f   :  { %v12287_v25 = vpop.f32.mrb[32].mxu1 }
 0x270   :  { %v12289_v21 = vpop.f32.mrb[33].mxu1  ;;  %8974 = vmatmul.mubr.msk.f32.gmra.mrb[138].mxu1 %vm989_vm15, %v11995_v45 }
 0x271   :  { %9654 = vmatprep.mubr.msk.f32.mxu1 %vm989_vm15, %v11847_v44  ;;  %v15926_v44 = vld [vmem:[#allocation6_spill] sm:$0xff] }
 0x273   :  { %v12299_v20 = vpop.f32.mrb[34].mxu1 }
 0x274   :  { %v12301_v17 = vpop.f32.mrb[35].mxu1  ;;  %9655 = vmatmul.mubr.msk.f32.vlgmr.msra.gmra.mrb[140].mxu1 %vm989_vm15, %v11845_v43 }
 0x275   :  { %9657 = vmatprep.mubr.msk.f32.mxu1 %vm989_vm15, %v11857_v46  ;;  %v15929_v46 = vld [vmem:[#allocation7_spill] sm:$0xff] }
 0x277   :  { %v12311_v13 = vpop.f32.mrb[36].mxu1 }
 0x278   :  { %v12313_v16 = vpop.f32.mrb[37].mxu1  ;;  %9658 = vmatmul.mubr.msk.f32.gmra.mrb[142].mxu1 %vm989_vm15, %v15926_v44 }
 0x279   :  { %9660 = vmatprep.mubr.msk.f32.mxu1 %vm989_vm15, %v15927_v27  ;;  %v15933_v27 = vld [vmem:[#allocation9_spill] sm:$0xff] }
 0x27b   :  { %v12323_v12 = vpop.f32.mrb[38].mxu1 }
 0x27c   :  { %v12325_v8 = vpop.f32.mrb[39].mxu1  ;;  %9661 = vmatmul.mubr.msk.f32.gmra.mrb[144].mxu1 %vm989_vm15, %v15929_v46 }
 0x27d   :  { %15928 = vst [vmem:[#allocation6_spill] sm:$0xff] %v12325_v8  ;;  %9663 = vmatprep.mubr.msk.f32.mxu1 %vm989_vm15, %v15930_v9  ;;  %v15937_v9 = vld [vmem:[#allocation11_spill] sm:$0xff]  ;;  %v15940_v8 = vld [vmem:[#allocation16_spill] sm:$0xff] }
 0x27f   :  { %v12335_v43 = vpop.f32.mrb[40].mxu1 }
 0x280   :  { %15931 = vst [vmem:[#allocation8_spill] sm:$0xff] %v12335_v43  ;;  %v12337_v4 = vpop.f32.mrb[41].mxu1  ;;  %9664 = vmatmul.mubr.msk.f32.gmra.mrb[146].mxu1 %vm989_vm15, %v15933_v27 }
 0x281   :  { %15932 = vst [vmem:[#allocation7_spill] sm:$0xff] %v12337_v4  ;;  %9666 = vmatprep.mubr.msk.f32.mxu1 %vm989_vm15, %v15934_v5  ;;  %v15939_v5 = vld [vmem:[#allocation13_spill] sm:$0xff] }
 0x283   :  { %v12347_v44 = vpop.f32.mrb[42].mxu1 }
 0x284   :  { %15935 = vst [vmem:[#allocation10_spill] sm:$0xff] %v12347_v44  ;;  %v12349_v0 = vpop.f32.mrb[43].mxu1  ;;  %9667 = vmatmul.mubr.msk.f32.gmra.mrb[148].mxu1 %vm989_vm15, %v15937_v9  ;;  %v15945_v44 = vld [vmem:[#allocation18_spill] sm:$0xff] }
 0x285   :  { %15936 = vst [vmem:[#allocation9_spill] sm:$0xff] %v12349_v0  ;;  %9669 = vmatprep.mubr.msk.f32.mxu1 %vm989_vm15, %v15938_v1  ;;  %v15943_v1 = vld [vmem:[#allocation15_spill] sm:$0xff] }
 0x287   :  { %v12359_v46 = vpop.f32.mrb[44].mxu1 }
 0x288   :  { %v12361_v4 = vpop.f32.mrb[45].mxu1  ;;  %9670 = vmatmul.mubr.msk.f32.gmra.mrb[150].mxu1 %vm989_vm15, %v15939_v5 }
 0x289   :  { %9672 = vmatprep.mubr.msk.f32.mxu1 %vm989_vm15, %v15940_v8  ;;  %v15947_v8 = vld [vmem:[#allocation19_spill] sm:$0xff] }
 0x28b   :  { %v12371_v27 = vpop.f32.mrb[46].mxu1 }
 0x28c   :  { %15941 = vst [vmem:[#allocation12_spill] sm:$0xff] %v12371_v27  ;;  %v12373_v0 = vpop.f32.mrb[47].mxu1  ;;  %9673 = vmatmul.mubr.msk.f32.gmra.mrb[152].mxu1 %vm989_vm15, %v15943_v1 }
 0x28d   :  { %15942 = vst [vmem:[#allocation11_spill] sm:$0xff] %v12373_v0  ;;  %9675 = vmatprep.mubr.msk.f32.mxu1 %vm989_vm15, %v11917_v59  ;;  %v15946_v59 = vld [vmem:[#allocation17_spill] sm:$0xff] }
 0x28f   :  { %v12383_v9 = vpop.f32.mrb[48].mxu1 }
 0x290   :  { %v12385_v43 = vpop.f32.mrb[49].mxu1  ;;  %9676 = vmatmul.mubr.msk.f32.gmra.mrb[154].mxu1 %vm989_vm15, %v11915_v58 }
 0x291   :  { %15944 = vst [vmem:[#allocation14_spill] sm:$0xff] %v12385_v43  ;;  %9678 = vmatprep.mubr.msk.f32.mxu1 %vm989_vm15, %v15945_v44 }
 0x293   :  { %v12395_v5 = vpop.f32.mrb[50].mxu1 }
 0x294   :  { %v12397_v0 = vpop.f32.mrb[51].mxu1  ;;  %9679 = vmatmul.mubr.msk.f32.gmra.mrb[156].mxu1 %vm989_vm15, %v15946_v59  ;;  %v6078_v59 = vld [vmem:[%s15715_s5 + $0x20] sm:$0xff] }
 0x295   :  { %9681 = vmatprep.mubr.msk.f32.mxu1 %vm989_vm15, %v15947_v8 }
 0x297   :  { %v12407_v1 = vpop.f32.mrb[52].mxu1 }
 0x298   :  { %v12409_v43 = vpop.f32.mrb[53].mxu1  ;;  %9682 = vmatmul.mubr.msk.f32.gmra.mrb[158].mxu1 %vm989_vm15, %v11935_v62 }
 0x299   :  { %15948 = vst [vmem:[#allocation13_spill] sm:$0xff] %v12409_v43  ;;  %9684 = vmatprep.mubr.msk.f32.mxu1 %vm989_vm15, %v11947_v53  ;;  %v6075_v53 = vld [vmem:[%s15715_s5 + $0x8] sm:$0xff] }
 0x29b   :  { %v12419_v58 = vpop.f32.mrb[54].mxu1 }
 0x29c   :  { %v12421_v27 = vpop.f32.mrb[55].mxu1  ;;  %9685 = vmatmul.mubr.msk.f32.gmra.mrb[160].mxu1 %vm989_vm15, %v11945_v23  ;;  %v12439_v23 = vpack.c.bf16 %v6078_v59, %v6075_v53  ;;  %v6077_v53 = vld [vmem:[%s15715_s5 + $0x18] sm:$0xff] }
 0x29d   :  { %9687 = vmatprep.mubr.msk.f32.mxu1 %vm989_vm15, %v11957_v52  ;;  %v15964_v52 = vcombine.low %v12102_v31, %v12104_v63 }
 0x29e   :  { %15949 = vst [vmem:[#allocation16_spill] sm:$0xff] %v12439_v23  ;;  %10143 = vmatprep.subr.bf16.mxu0 %v12439_v23 }
 0x29f   :  { %v12437_v44 = vpop.f32.mrb[56].mxu1 }
 0x2a0   :  { %v12441_v43 = vpop.f32.mrb[57].mxu1  ;;  %9688 = vmatmul.mubr.msk.f32.gmra.mrb[162].mxu1 %vm989_vm15, %v11955_v49 }
 0x2a1   :  { %9690 = vmatprep.mubr.msk.f32.mxu1 %vm989_vm15, %v11967_v55 }
 0x2a3   :  { %v12452_v8 = vpop.f32.mrb[58].mxu1 }
 0x2a4   :  { %v12454_v59 = vpop.f32.mrb[59].mxu1  ;;  %9691 = vmatmul.mubr.msk.f32.gmra.mrb[164].mxu1 %vm989_vm15, %v11965_v51 }
 0x2a5   :  { %15950 = vst [vmem:[#allocation15_spill] sm:$0xff] %v12454_v59  ;;  %9693 = vmatprep.mubr.msk.f32.mxu1 %vm989_vm15, %v11977_v54  ;;  %v6074_v54 = vld [vmem:[%s15715_s5] sm:$0xff] }
 0x2a6   :  { %v12482_v49 = vpack.c.bf16 %v6077_v53, %v6074_v54 }
 0x2a7   :  { %v12464_v62 = vpop.f32.mrb[60].mxu1 }
 0x2a8   :  { %15951 = vst [vmem:[#allocation18_spill] sm:$0xff] %v12464_v62  ;;  %v12466_v55 = vpop.f32.mrb[61].mxu1  ;;  %9694 = vmatmul.mubr.msk.f32.gmra.mrb[166].mxu1 %vm989_vm15, %v11975_v47  ;;  %15953 = vst [vmem:[#allocation19_spill] sm:$0xff] %v12482_v49  ;;  %10145 = vmatpush1.bf16.msra.mxu0 %v12482_v49  ;;  %v11178_v49 = vmov 1983009808   ;;  %v15959_v62 = vlaneseq }
 0x2a9   :  { %15952 = vst [vmem:[#allocation17_spill] sm:$0xff] %v12466_v55  ;;  %9696 = vmatprep.mubr.msk.f32.mxu1 %vm989_vm15, %v11987_v57  ;;  %v1814_v51 = vunpack.c.l.s4 %v11178_v49 }
 0x2ab   :  { %v12484_v47 = vpop.f32.mrb[62].mxu1 }
 0x2ac   :  { %15954 = vst [vmem:[#allocation20_spill] sm:$0xff] %v12484_v47  ;;  %v12486_v23 = vpop.f32.mrb[63].mxu1  ;;  %9697 = vmatmul.mubr.msk.f32.gmra.mrb[168].mxu1 %vm989_vm15, %v11985_v48  ;;  %v12518_v48 = vshrl.u32 %v15959_v62, 7  ;;  %v15967_v62 = vcombine.high %v12114_v2, %v12116_v3 }
 0x2ad   :  { %15955 = vst [vmem:[#allocation21_spill] sm:$0xff] %v12486_v23  ;;  %9699 = vmatprep.mubr.msk.f32.mxu1 %vm989_vm15, %v11997_v56 }
 0x2ae   :  { %15960 = vst [vmem:[#allocation25_spill] sm:$0xff] %v12518_v48 }
 0x2af   :  { %v12497_v53 = vpop.f32.mrb[64].mxu1 }
 0x2b0   :  { %v12499_v54 = vpop.f32.mrb[65].mxu1  ;;  %9700 = vmatmul.mubr.msk.f32.gmra.mrb[170].mxu1 %vm989_vm15, %v11995_v45  ;;  %v1815_v45 = vunpack.c.0.s8 %v1814_v51  ;;  %v15966_v51 = vcombine.low %v12114_v2, %v12116_v3  ;;  %v15970_v3 = vcombine.low %v12138_v10, %v12140_v11 }
 0x2b1   :  { %15956 = vst [vmem:[#allocation22_spill] sm:$0xff] %v12499_v54 }
 0x2b2   :  { %v12529_v56 = vsub.s32 %v1815_v45, %v12518_v48  ;;  %v15965_v45 = vcombine.high %v12102_v31, %v12104_v63  ;;  %v15968_v31 = vcombine.low %v12126_v6, %v12128_v7 }
 0x2b3   :  { %v12507_v57 = vpop.f32.mrb[66].mxu1 }
 0x2b4   :  { %v12509_v23 = vpop.f32.mrb[67].mxu1  ;;  %v12543_v49 = vrot.slane %v15964_v52, %v12529_v56  ;;  %v12549_v48 = vrot.slane %v15965_v45, %v12529_v56  ;;  %v12569_v63 = vrot.slane %v15968_v31, %v12529_v56  ;;  %v15969_v45 = vcombine.high %v12126_v6, %v12128_v7 }
 0x2b5   :  { %15957 = vst [vmem:[#allocation23_spill] sm:$0xff] %v12509_v23  ;;  %v15971_v31 = vcombine.high %v12138_v10, %v12140_v11  ;;  %v15972_v6 = vcombine.low %v12150_v14, %v12152_v15  ;;  %v15975_v10 = vcombine.high %v12162_v18, %v12164_v19 }
 0x2b7   :  { %v12515_v55 = vpop.f32.mrb[68].mxu1  ;;  %v12597_v7 = vrot.slane %v15972_v6, %v12529_v56  ;;  %v12615_v11 = vrot.slane %v15975_v10, %v12529_v56 }
 0x2b8   :  { %15958 = vst [vmem:[#allocation24_spill] sm:$0xff] %v12515_v55  ;;  %v12520_v59 = vpop.f32.mrb[69].mxu1  ;;  %v12591_v55 = vrot.slane %v15971_v31, %v12529_v56  ;;  %v15976_v31 = vcombine.low %v12174_v22, %v12176_v24 }
 0x2b9   :  { %15961 = vst [vmem:[#allocation26_spill] sm:$0xff] %v12520_v59  ;;  %v12555_v59 = vrot.slane %v15966_v51, %v12529_v56  ;;  %v12575_v51 = vrot.slane %v15969_v45, %v12529_v56  ;;  %v15973_v45 = vcombine.high %v12150_v14, %v12152_v15  ;;  %v15978_v14 = vcombine.high %v12174_v22, %v12176_v24 }
 0x2ba   :  { %v12621_v6 = vrot.slane %v15976_v31, %v12529_v56  ;;  %v15982_v22 = vcombine.high %v12185_v29, %v12187_v30  ;;  %v15983_v31 = vcombine.low %v12199_v34, %v12201_v35 }
 0x2bb   :  { %v12526_v54 = vpop.f32.mrb[70].mxu1  ;;  %v12603_v2 = vrot.slane %v15973_v45, %v12529_v56  ;;  %v12627_v15 = vrot.slane %v15978_v14, %v12529_v56 }
 0x2bc   :  { %15962 = vst [vmem:[#allocation27_spill] sm:$0xff] %v12526_v54  ;;  %v12531_v47 = vpop.f32.mrb[71].mxu1  ;;  %15977 = vst [vmem:[#allocation29_spill] sm:$0xff] %v12621_v6  ;;  %v12647_v24 = vrot.slane %v15982_v22, %v12529_v56  ;;  %v12653_v14 = vrot.slane %v15983_v31, %v12529_v56  ;;  %v15987_v22 = vcombine.low %v12210_v38, %v12212_v39 }
 0x2bd   :  { %15963 = vst [vmem:[#allocation28_spill] sm:$0xff] %v12531_v47  ;;  %v12561_v47 = vrot.slane %v15967_v62, %v12529_v56  ;;  %v12585_v62 = vrot.slane %v15970_v3, %v12529_v56  ;;  %v15974_v3 = vcombine.low %v12162_v18, %v12164_v19  ;;  %15979 = vst [vmem:[#allocation30_spill] sm:$0xff] %v12627_v15  ;;  %v6081_v18 = vld [vmem:[%s15715_s5 + $0x38] sm:$0xff]  ;;  %v6084_v19 = vld [vmem:[%s15715_s5 + $0x50] sm:$0xff] }
 0x2be   :  { %v12657_v6 = vpack.c.bf16 %v6084_v19, %v6081_v18  ;;  %v12673_v31 = vrot.slane %v15987_v22, %v12529_v56  ;;  %v15988_v18 = vcombine.high %v12210_v38, %v12212_v39  ;;  %v15993_v38 = vcombine.low %v12232_v26, %v12234_v40 }
 0x2bf   :  { %v12537_v23 = vpop.f32.mrb[72].mxu1  ;;  %v12609_v54 = vrot.slane %v15974_v3, %v12529_v56  ;;  %v15980_v3 = vcombine.low %v12185_v29, %v12187_v30  ;;  %v15997_v30 = vcombine.low %v12243_v60, %v12245_v61 }
 0x2c0   :  { %v12563_v52 = vpop.f32.mrb[73].mxu1  ;;  %15984 = vst [vmem:[#allocation32_spill] sm:$0xff] %v12657_v6  ;;  %10147 = vmatprep.subr.bf16.mxu0 %v12657_v6  ;;  %v12698_v39 = vrot.slane %v15993_v38, %v12529_v56 }
 0x2c1   :  { %v12641_v10 = vrot.slane %v15980_v3, %v12529_v56  ;;  %v15985_v3 = vcombine.high %v12199_v34, %v12201_v35  ;;  %v12679_v34 = vrot.slane %v15988_v18, %v12529_v56  ;;  %v15989_v35 = vcombine.low %v12221_v41, %v12223_v42 }
 0x2c2   :  { %15994 = vst [vmem:[#allocation36_spill] sm:$0xff] %v12698_v39  ;;  %v15995_v18 = vcombine.high %v12232_v26, %v12234_v40  ;;  %v12710_v29 = vrot.slane %v15997_v30, %v12529_v56  ;;  %v16001_v40 = vcombine.low %v12254_v50, %v12256_v37  ;;  %v16003_v30 = vcombine.high %v12254_v50, %v12256_v37 }
 0x2c3   :  { %v12629_v45 = vpop.f32.mrb[74].mxu1  ;;  %15981 = vst [vmem:[#allocation31_spill] sm:$0xff] %v12641_v10  ;;  %v12663_v10 = vrot.slane %v15985_v3, %v12529_v56  ;;  %v12685_v19 = vrot.slane %v15989_v35, %v12529_v56  ;;  %v15991_v3 = vcombine.high %v12221_v41, %v12223_v42  ;;  %v15999_v42 = vcombine.high %v12243_v60, %v12245_v61 }
 0x2c4   :  { %v12655_v15 = vpop.f32.mrb[75].mxu1  ;;  %v12704_v35 = vrot.slane %v15995_v18, %v12529_v56  ;;  %15998 = vst [vmem:[#allocation38_spill] sm:$0xff] %v12710_v29  ;;  %v12724_v26 = vrot.slane %v16001_v40, %v12529_v56  ;;  %v12730_v38 = vrot.slane %v16003_v30, %v12529_v56  ;;  %v16005_v18 = vcombine.low %v12265_v36, %v12267_v33 }
 0x2c5   :  { %15986 = vst [vmem:[#allocation33_spill] sm:$0xff] %v12663_v10  ;;  %15990 = vst [vmem:[#allocation34_spill] sm:$0xff] %v12685_v19  ;;  %v12692_v22 = vrot.slane %v15991_v3, %v12529_v56  ;;  %v12718_v3 = vrot.slane %v15999_v42, %v12529_v56  ;;  %v16007_v61 = vcombine.high %v12265_v36, %v12267_v33 }
 0x2c6   :  { %15996 = vst [vmem:[#allocation37_spill] sm:$0xff] %v12704_v35  ;;  %16002 = vst [vmem:[#allocation40_spill] sm:$0xff] %v12724_v26  ;;  %v12736_v6 = vrot.slane %v16005_v18, %v12529_v56  ;;  %v16009_v37 = vcombine.low %v12276_v32, %v12278_v28  ;;  %v16011_v18 = vcombine.high %v12276_v32, %v12278_v28 }
 0x2c7   :  { %15992 = vst [vmem:[#allocation35_spill] sm:$0xff] %v12692_v22  ;;  %v12712_v41 = vpop.f32.mrb[76].mxu1  ;;  %16000 = vst [vmem:[#allocation39_spill] sm:$0xff] %v12718_v3  ;;  %v12744_v42 = vrot.slane %v16007_v61, %v12529_v56  ;;  %v16013_v33 = vcombine.low %v12287_v25, %v12289_v21  ;;  %v16015_v61 = vcombine.high %v12287_v25, %v12289_v21 }
 0x2c8   :  { %16004 = vst [vmem:[#allocation41_spill] sm:$0xff] %v12730_v38  ;;  %16006 = vst [vmem:[#allocation42_spill] sm:$0xff] %v12736_v6  ;;  %v12738_v60 = vpop.f32.mrb[77].mxu1  ;;  %v12750_v50 = vrot.slane %v16009_v37, %v12529_v56  ;;  %v12760_v6 = vrot.slane %v16011_v18, %v12529_v56  ;;  %v16017_v30 = vcombine.low %v12299_v20, %v12301_v17 }
 0x2c9   :  { %16008 = vst [vmem:[#allocation43_spill] sm:$0xff] %v12744_v42  ;;  %v12766_v36 = vrot.slane %v16013_v33, %v12529_v56  ;;  %v12772_v37 = vrot.slane %v16015_v61, %v12529_v56  ;;  %v16019_v28 = vcombine.high %v12299_v20, %v12301_v17  ;;  %v16021_v18 = vcombine.low %v12311_v13, %v12313_v16  ;;  %v6080_v20 = vld [vmem:[%s15715_s5 + $0x30] sm:$0xff] }
 0x2ca   :  { %16010 = vst [vmem:[#allocation44_spill] sm:$0xff] %v12750_v50  ;;  %16012 = vst [vmem:[#allocation45_spill] sm:$0xff] %v12760_v6  ;;  %v12778_v40 = vrot.slane %v16017_v30, %v12529_v56  ;;  %v16023_v25 = vcombine.high %v12311_v13, %v12313_v16  ;;  %v16025_v30 = vld [vmem:[#allocation6_spill] sm:$0xff] }
 0x2cb   :  { %16014 = vst [vmem:[#allocation46_spill] sm:$0xff] %v12766_v36  ;;  %16016 = vst [vmem:[#allocation47_spill] sm:$0xff] %v12772_v37  ;;  %v12784_v32 = vrot.slane %v16019_v28, %v12529_v56  ;;  %v12790_v21 = vrot.slane %v16021_v18, %v12529_v56  ;;  %v16026_v61 = vcombine.low %v12323_v12, %v16025_v30  ;;  %v12804_v17 = vpop.f32.mrb[78].mxu1  ;;  %v6083_v28 = vld [vmem:[%s15715_s5 + $0x48] sm:$0xff]  ;;  %v16030_v18 = vld [vmem:[#allocation8_spill] sm:$0xff] }
 0x2cc   :  { %16018 = vst [vmem:[#allocation48_spill] sm:$0xff] %v12778_v40  ;;  %v12796_v33 = vrot.slane %v16023_v25, %v12529_v56  ;;  %v16028_v13 = vcombine.high %v12323_v12, %v16025_v30  ;;  %v16031_v25 = vld [vmem:[#allocation7_spill] sm:$0xff]  ;;  %v12832_v36 = vpack.c.bf16 %v6083_v28, %v6080_v20  ;;  %v16038_v12 = vld [vmem:[#allocation10_spill] sm:$0xff]  ;;  %v16039_v30 = vld [vmem:[#allocation9_spill] sm:$0xff]  ;;  %v16044_v20 = vcombine.low %v12359_v46, %v12361_v4 }
 0x2cd   :  { %16020 = vst [vmem:[#allocation49_spill] sm:$0xff] %v12784_v32  ;;  %16022 = vst [vmem:[#allocation50_spill] sm:$0xff] %v12790_v21  ;;  %v12802_v37 = vrot.slane %v16026_v61, %v12529_v56  ;;  %v16032_v61 = vcombine.low %v16030_v18, %v16031_v25  ;;  %v16034_v21 = vcombine.high %v16030_v18, %v16031_v25  ;;  %v12830_v32 = vpop.f32.mrb[79].mxu1 }
 0x2ce   :  { %16024 = vst [vmem:[#allocation51_spill] sm:$0xff] %v12796_v33  ;;  %v12816_v16 = vrot.slane %v16028_v13, %v12529_v56  ;;  %16036 = vst [vmem:[#allocation53_spill] sm:$0xff] %v12830_v32  ;;  %v16040_v13 = vcombine.low %v16038_v12, %v16039_v30  ;;  %v12854_v28 = vrot.slane %v16044_v20, %v12529_v56  ;;  %10149 = vmatpush1.bf16.msra.mxu0 %v12832_v36  ;;  %v16054_v20 = vld [vmem:[#allocation14_spill] sm:$0xff] }
 0x2cf   :  { %16027 = vst [vmem:[#allocation6_spill] sm:$0xff] %v12802_v37  ;;  %v12822_v33 = vrot.slane %v16032_v61, %v12529_v56  ;;  %v12828_v37 = vrot.slane %v16034_v21, %v12529_v56  ;;  %16037 = vst [vmem:[#allocation54_spill] sm:$0xff] %v12832_v36  ;;  %v16042_v61 = vcombine.high %v16038_v12, %v16039_v30  ;;  %v16048_v12 = vld [vmem:[#allocation12_spill] sm:$0xff]  ;;  %v16049_v30 = vld [vmem:[#allocation11_spill] sm:$0xff] }
 0x2d0   :  { %16029 = vst [vmem:[#allocation52_spill] sm:$0xff] %v12816_v16  ;;  %v12838_v16 = vrot.slane %v16040_v13, %v12529_v56  ;;  %16045 = vst [vmem:[#allocation55_spill] sm:$0xff] %v12854_v28  ;;  %v16046_v25 = vcombine.high %v12359_v46, %v12361_v4  ;;  %v16052_v18 = vcombine.high %v16048_v12, %v16049_v30 }
 0x2d1   :  { %16033 = vst [vmem:[#allocation8_spill] sm:$0xff] %v12822_v33  ;;  %16035 = vst [vmem:[#allocation7_spill] sm:$0xff] %v12828_v37  ;;  %v12844_v33 = vrot.slane %v16042_v61, %v12529_v56  ;;  %v16050_v61 = vcombine.low %v16048_v12, %v16049_v30  ;;  %v16055_v4 = vcombine.low %v12383_v9, %v16054_v20 }
 0x2d2   :  { %16041 = vst [vmem:[#allocation10_spill] sm:$0xff] %v12838_v16  ;;  %v12860_v13 = vrot.slane %v16046_v25, %v12529_v56  ;;  %v12872_v37 = vrot.slane %v16052_v18, %v12529_v56  ;;  %v16057_v25 = vcombine.high %v12383_v9, %v16054_v20  ;;  %v16059_v12 = vcombine.low %v12395_v5, %v12397_v0  ;;  %v16063_v9 = vld [vmem:[#allocation13_spill] sm:$0xff] }
 0x2d3   :  { %16043 = vst [vmem:[#allocation9_spill] sm:$0xff] %v12844_v33  ;;  %v12866_v21 = vrot.slane %v16050_v61, %v12529_v56  ;;  %v12879_v46 = vrot.slane %v16055_v4, %v12529_v56  ;;  %v16061_v30 = vcombine.high %v12395_v5, %v12397_v0  ;;  %v9592_v4 = vpop.f32.mrb[80].mxu1  ;;  %v16064_v20 = vcombine.low %v12407_v1, %v16063_v9 }
 0x2d4   :  { %16047 = vst [vmem:[#allocation56_spill] sm:$0xff] %v12860_v13  ;;  %16053 = vst [vmem:[#allocation11_spill] sm:$0xff] %v12872_v37  ;;  %v12885_v61 = vrot.slane %v16057_v25, %v12529_v56  ;;  %v12891_v18 = vrot.slane %v16059_v12, %v12529_v56  ;;  %v16066_v12 = vcombine.high %v12407_v1, %v16063_v9  ;;  %v1491_v5 = vpop.f32.mrb[81].mxu1 }
 0x2d5   :  { %16051 = vst [vmem:[#allocation12_spill] sm:$0xff] %v12866_v21  ;;  %16056 = vst [vmem:[#allocation14_spill] sm:$0xff] %v12879_v46  ;;  %v12897_v36 = vrot.slane %v16061_v30, %v12529_v56  ;;  %v12905_v25 = vrot.slane %v16064_v20, %v12529_v56  ;;  %v1847_v46 = vcombine.high %v9592_v4, %v9592_v4 }
 0x2d6   :  { %16058 = vst [vmem:[#allocation57_spill] sm:$0xff] %v12885_v61  ;;  %16060 = vst [vmem:[#allocation58_spill] sm:$0xff] %v12891_v18  ;;  %v12911_v61 = vrot.slane %v16066_v12, %v12529_v56  ;;  %v1868_v0 = vrot.slane %v9592_v4, %v12529_v56  ;;  %v16068_v30 = vcombine.low %v12419_v58, %v12421_v27 }
 0x2d7   :  { %16062 = vst [vmem:[#allocation59_spill] sm:$0xff] %v12897_v36  ;;  %16065 = vst [vmem:[#allocation13_spill] sm:$0xff] %v12905_v25  ;;  %v16070_v20 = vcombine.high %v12419_v58, %v12421_v27  ;;  %v1812_v18 = vcombine.high %v1491_v5, %v1491_v5  ;;  %v1833_v1 = vrot.slane %v1491_v5, %v12529_v56 }
 0x2d8   :  { %16067 = vst [vmem:[#allocation60_spill] sm:$0xff] %v12911_v61  ;;  %v12918_v36 = vrot.slane %v16068_v30, %v12529_v56  ;;  %v16072_v4 = vcombine.low %v12437_v44, %v12441_v43  ;;  %v1875_v12 = vrot.slane %v1847_v46, %v12529_v56  ;;  %v12935_v30 = vcombine.low %v12555_v59, %v1868_v0  ;;  %v9595_v46 = vpop.f32.mrb[82].mxu1 }
 0x2d9   :  { %v12924_v25 = vrot.slane %v16070_v20, %v12529_v56  ;;  %v1877_v61 = vcombine.high %v12555_v59, %v1868_v0  ;;  %v16074_v27 = vcombine.high %v12437_v44, %v12441_v43  ;;  %v1840_v5 = vrot.slane %v1812_v18, %v12529_v56  ;;  %v12959_v44 = vpop.f32.mrb[83].mxu1 }
 0x2da   :  { %16069 = vst [vmem:[#allocation61_spill] sm:$0xff] %v12918_v36  ;;  %v12931_v9 = vrot.slane %v16072_v4, %v12529_v56  ;;  %v1841_v20 = vcombine.low %v12543_v49, %v1833_v1  ;;  %v1842_v4 = vcombine.high %v12543_v49, %v1833_v1  ;;  %v1878_v0 = vcombine.low %v12561_v47, %v1875_v12  ;;  %v12971_v33 = vpop.f32.mrb[84].mxu1 }
 0x2db   :  { %16071 = vst [vmem:[#allocation62_spill] sm:$0xff] %v12924_v25  ;;  %v12943_v58 = vrot.slane %v16074_v27, %v12529_v56  ;;  %v12956_v36 = vcombine.high %v12561_v47, %v1875_v12  ;;  %v3356_v43 = vrot.slane %v12935_v30, 7  ;;  %v8909_v49 = vrot.slane %v1877_v61, 9 }
 0x2dc   :  { %16073 = vst [vmem:[#allocation63_spill] sm:$0xff] %v12931_v9  ;;  %v16076_v9 = vld [vmem:[#allocation15_spill] sm:$0xff]  ;;  %v1843_v1 = vcombine.low %v12549_v48, %v1840_v5  ;;  %v8908_v27 = vrot.slane %v1841_v20, 9  ;;  %v4148_v47 = vrot.slane %v12935_v30, 4  ;;  %v4149_v12 = vrot.slane %v1878_v0, 4 }
 0x2dd   :  { %16075 = vst [vmem:[#allocation64_spill] sm:$0xff] %v12943_v58  ;;  %v16077_v25 = vcombine.low %v12452_v8, %v16076_v9  ;;  %v3360_v58 = vrot.slane %v1878_v0, 7  ;;  %v4150_v13 = vrot.slane %v12956_v36, 4  ;;  %v3347_v28 = vrot.slane %v1842_v4, 7 }
 0x2de   :  { %v3350_v37 = vrot.slane %v1843_v1, 7  ;;  %v4145_v42 = vrot.slane %v1842_v4, 4  ;;  %v16081_v3 = vrot.slane %v12956_v36, 7 }
 0x2df   :  { %v12952_v59 = vrot.slane %v16077_v25, %v12529_v56  ;;  %v1844_v25 = vcombine.high %v12549_v48, %v1840_v5  ;;  %v3361_v16 = vsel %vm12962_vm5, %v8909_v49, %v3360_v58  ;;  %v3362_v40 = vrot.slane %v3360_v58, 2  ;;  %v12975_v5 = vpop.f32.mrb[85].mxu1 }
 0x2e0   :  { %v4146_v48 = vrot.slane %v1843_v1, 4  ;;  %v3765_v6 = vrot.slane %v3361_v16, 2  ;;  %v3348_v30 = vsel %vm12962_vm5, %v8908_v27, %v3347_v28  ;;  %v3352_v50 = vrot.slane %v3350_v37, 2  ;;  %v12987_v35 = vpop.f32.mrb[86].mxu1 }
 0x2e1   :  { %16078 = vst [vmem:[#allocation15_spill] sm:$0xff] %v12952_v59  ;;  %v3353_v21 = vrot.slane %v1844_v25, 7  ;;  %v3349_v59 = vrot.slane %v3347_v28, 2  ;;  %v3364_v29 = vsel %vm12962_vm5, %v3362_v40, %v16081_v3  ;;  %v3761_v26 = vrot.slane %v3348_v30, 2  ;;  %v12991_v3 = vpop.f32.mrb[87].mxu1 }
 0x2e2   :  { %v4147_v22 = vrot.slane %v1844_v25, 4  ;;  %v3766_v49 = vrot.slane %v3364_v29, 2  ;;  %v4021_v58 = vadd.f32 %v3765_v6, %v1877_v61  ;;  %v1917_v29 = vcombine.high %v9595_v46, %v9595_v46 }
 0x2e3   :  { %v3355_v38 = vrot.slane %v3353_v21, 2  ;;  %v3351_v19 = vsel %vm12962_vm5, %v3349_v59, %v3350_v37  ;;  %v3354_v16 = vsel %vm12962_vm5, %v3352_v50, %v3353_v21  ;;  %v4017_v10 = vadd.f32 %v3761_v26, %v1841_v20  ;;  %v13001_v26 = vpop.f32.mrb[88].mxu1 }
 0x2e4   :  { %v3762_v27 = vrot.slane %v3351_v19, 2  ;;  %v3763_v39 = vrot.slane %v3354_v16, 2  ;;  %v4022_v40 = vadd.f32 %v3766_v49, %v1878_v0  ;;  %v12993_v30 = vadd.f32 %v4149_v12, %v4021_v58  ;;  %v16084_v49 = vld [vmem:[#allocation17_spill] sm:$0xff] }
 0x2e5   :  { %v3357_v28 = vsel %vm12962_vm5, %v3355_v38, %v3356_v43  ;;  %v4401_v59 = vadd.f32 %v4145_v42, %v4017_v10  ;;  %v1938_v50 = vrot.slane %v9595_v46, %v12529_v56  ;;  %v1945_v38 = vrot.slane %v1917_v29, %v12529_v56  ;;  %v13007_v10 = vpop.f32.mrb[89].mxu1 }
 0x2e6   :  { %v3764_v6 = vrot.slane %v3357_v28, 2  ;;  %v4018_v61 = vadd.f32 %v3762_v27, %v1842_v4  ;;  %v4019_v37 = vadd.f32 %v3763_v39, %v1843_v1  ;;  %v12996_v21 = vadd.f32 %v4150_v13, %v4022_v40  ;;  %v16089_v28 = vld [vmem:[#allocation20_spill] sm:$0xff]  ;;  %v16090_v27 = vld [vmem:[#allocation21_spill] sm:$0xff] }
 0x2e7   :  { %v1882_v19 = vcombine.high %v12959_v44, %v12959_v44  ;;  %v13004_v43 = vcombine.low %v12585_v62, %v1938_v50  ;;  %v1947_v39 = vcombine.high %v12585_v62, %v1938_v50  ;;  %v1948_v4 = vcombine.low %v12591_v55, %v1945_v38 }
 0x2e8   :  { %v4020_v32 = vadd.f32 %v3764_v6, %v1844_v25  ;;  %v4402_v20 = vadd.f32 %v4146_v48, %v4018_v61  ;;  %v4403_v0 = vadd.f32 %v4147_v22, %v4019_v37  ;;  %v13013_v46 = vcombine.high %v12591_v55, %v1945_v38  ;;  %v16083_v48 = vld [vmem:[#allocation18_spill] sm:$0xff] }
 0x2e9   :  { %v16082_v22 = vcombine.high %v12452_v8, %v16076_v9  ;;  %v3376_v62 = vrot.slane %v13004_v43, 7  ;;  %v3379_v12 = vrot.slane %v1947_v39, 7  ;;  %v16085_v58 = vcombine.low %v16083_v48, %v16084_v49  ;;  %v13034_v9 = vpop.f32.mrb[90].mxu1 }
 0x2ea   :  { %v4404_v13 = vadd.f32 %v4148_v47, %v4020_v32  ;;  %v4657_v25 = vcombine.low %v4401_v59, %v4402_v20  ;;  %v16087_v55 = vcombine.high %v16083_v48, %v16084_v49  ;;  %v3382_v8 = vrot.slane %v1948_v4, 7  ;;  %v13048_v50 = vpop.f32.mrb[91].mxu1 }
 0x2eb   :  { %v13019_v1 = vrot.slane %v16082_v22, %v12529_v56  ;;  %v13026_v32 = vrot.slane %v16085_v58, %v12529_v56  ;;  %v16091_v40 = vcombine.low %v16089_v28, %v16090_v27  ;;  %v16093_v29 = vcombine.high %v16089_v28, %v16090_v27 }
 0x2ec   :  { %v13032_v47 = vrot.slane %v16087_v55, %v12529_v56  ;;  %v4658_v16 = vcombine.low %v4403_v0, %v4404_v13  ;;  %v3378_v37 = vrot.slane %v3376_v62, 2  ;;  %v3381_v59 = vrot.slane %v3379_v12, 2 }
 0x2ed   :  { %16086 = vst [vmem:[#allocation18_spill] sm:$0xff] %v13026_v32  ;;  %v13040_v6 = vrot.slane %v16091_v40, %v12529_v56  ;;  %v13046_v61 = vrot.slane %v16093_v29, %v12529_v56  ;;  %v4665_v38 = vrot.slane %v4657_v25, %v12529_v56  ;;  %v1903_v0 = vrot.slane %v12959_v44, %v12529_v56  ;;  %v13064_v40 = vpop.f32.mrb[92].mxu1 }
 0x2ee   :  { %16088 = vst [vmem:[#allocation17_spill] sm:$0xff] %v13032_v47  ;;  %v4672_v20 = vrot.slane %v4658_v16, %v12529_v56  ;;  %v1910_v13 = vrot.slane %v1882_v19, %v12529_v56  ;;  %v16095_v22 = vrot.slane %v12956_v36, 7  ;;  %v3380_v49 = vsel %vm12962_vm5, %v3378_v37, %v3379_v12  ;;  %v13069_v12 = vpop.f32.mrb[93].mxu1 }
 0x2ef   :  { %16092 = vst [vmem:[#allocation20_spill] sm:$0xff] %v13040_v6  ;;  %16094 = vst [vmem:[#allocation21_spill] sm:$0xff] %v13046_v61  ;;  %v3383_v58 = vsel %vm12962_vm5, %v3381_v59, %v3382_v8  ;;  %v4155_v55 = vrot.slane %v1947_v39, 4  ;;  %v3771_v25 = vrot.slane %v3380_v49, 2  ;;  %v1911_v16 = vcombine.low %v12569_v63, %v1903_v0 }
 0x2f0   :  { %v3365_v48 = vrot.slane %v16095_v22, 2  ;;  %v13061_v28 = vcombine.low %v4665_v38, %v4672_v20  ;;  %v3772_v27 = vrot.slane %v3383_v58, 2  ;;  %v4156_v44 = vrot.slane %v1948_v4, 4  ;;  %v16096_v20 = vld [vmem:[#allocation22_spill] sm:$0xff] }
 0x2f1   :  { %v1912_v19 = vcombine.high %v12569_v63, %v1903_v0  ;;  %v1913_v29 = vcombine.low %v12575_v51, %v1910_v13  ;;  %v1914_v22 = vcombine.high %v12575_v51, %v1910_v13  ;;  %v4027_v8 = vadd.f32 %v3771_v25, %v13004_v43 }
 0x2f2   :  { %v4028_v37 = vadd.f32 %v3772_v27, %v1947_v39  ;;  %v3366_v59 = vrot.slane %v1911_v16, 7  ;;  %v1987_v38 = vcombine.high %v12971_v33, %v12971_v33  ;;  %v16097_v49 = vcombine.low %v12497_v53, %v16096_v20  ;;  %v13084_v27 = vpop.f32.mrb[94].mxu1 }
 0x2f3   :  { %v8910_v63 = vrot.slane %v1913_v29, 9  ;;  %v3373_v0 = vrot.slane %v1914_v22, 7  ;;  %v2008_v51 = vrot.slane %v12971_v33, %v12529_v56  ;;  %v4411_v13 = vadd.f32 %v4155_v55, %v4027_v8 }
 0x2f4   :  { %v13078_v4 = vrot.slane %v16097_v49, %v12529_v56  ;;  %v4412_v58 = vadd.f32 %v4156_v44, %v4028_v37  ;;  %v3367_v39 = vsel %vm12962_vm5, %v3365_v48, %v3366_v59  ;;  %v3369_v25 = vrot.slane %v1912_v19, 7 }
 0x2f5   :  { %v3368_v42 = vrot.slane %v3366_v59, 2  ;;  %v3374_v47 = vsel %vm12962_vm5, %v8910_v63, %v3373_v0  ;;  %v3375_v61 = vrot.slane %v3373_v0, 2  ;;  %v3767_v49 = vrot.slane %v3367_v39, 2 }
 0x2f6   :  { %16098 = vst [vmem:[#allocation22_spill] sm:$0xff] %v13078_v4  ;;  %v13088_v4 = vpop.f32.mrb[95].mxu1  ;;  %v16099_v33 = vcombine.high %v12497_v53, %v16096_v20  ;;  %v4692_v44 = vcombine.low %v4411_v13, %v4412_v58  ;;  %v3769_v8 = vrot.slane %v3374_v47, 2  ;;  %v2015_v48 = vrot.slane %v1987_v38, %v12529_v56 }
 0x2f7   :  { %v3370_v37 = vsel %vm12962_vm5, %v3368_v42, %v3369_v25  ;;  %v3377_v59 = vsel %vm12962_vm5, %v3375_v61, %v3376_v62  ;;  %v4023_v63 = vadd.f32 %v3767_v49, %v12956_v36  ;;  %v4151_v0 = vrot.slane %v1911_v16, 4  ;;  %v13103_v20 = vpop.f32.mrb[96].mxu1 }
 0x2f8   :  { %v13094_v55 = vrot.slane %v16099_v33, %v12529_v56  ;;  %v4154_v39 = vrot.slane %v13004_v43, 4  ;;  %v3768_v32 = vrot.slane %v3370_v37, 2  ;;  %v3770_v6 = vrot.slane %v3377_v59, 2  ;;  %v13107_v42 = vpop.f32.mrb[97].mxu1 }
 0x2f9   :  { %v4153_v53 = vrot.slane %v1914_v22, 4  ;;  %v4025_v13 = vadd.f32 %v3769_v8, %v1913_v29  ;;  %v4407_v47 = vadd.f32 %v4151_v0, %v4023_v63  ;;  %v2016_v38 = vcombine.low %v12609_v54, %v2008_v51  ;;  %v16101_v29 = vld [vmem:[#allocation23_spill] sm:$0xff] }
 0x2fa   :  { %16100 = vst [vmem:[#allocation65_spill] sm:$0xff] %v13094_v55  ;;  %v2017_v58 = vcombine.high %v12609_v54, %v2008_v51  ;;  %v4024_v25 = vadd.f32 %v3768_v32, %v1911_v16  ;;  %v4026_v62 = vadd.f32 %v3770_v6, %v1914_v22  ;;  %v4152_v61 = vrot.slane %v1912_v19, 4 }
 0x2fb   :  { %v2018_v36 = vcombine.low %v12615_v11, %v2015_v48  ;;  %v4409_v49 = vadd.f32 %v4153_v53, %v4025_v13  ;;  %v13111_v43 = vcombine.high %v12615_v11, %v2015_v48  ;;  %v8912_v33 = vrot.slane %v2016_v38, 9 }
 0x2fc   :  { %v3399_v37 = vrot.slane %v2017_v58, 7  ;;  %v16102_v8 = vcombine.low %v12507_v57, %v16101_v29  ;;  %v4408_v54 = vadd.f32 %v4152_v61, %v4024_v25  ;;  %v4410_v51 = vadd.f32 %v4154_v39, %v4026_v62 }
 0x2fd   :  { %v3402_v63 = vrot.slane %v2018_v36, 7  ;;  %v16104_v32 = vcombine.low %v12993_v30, %v12996_v21  ;;  %v5233_v16 = vrot.slane %v13061_v28, 4  ;;  %v15838_v53 = vrot.slane %v13111_v43, 7  ;;  %v13130_v30 = vpop.f32.mrb[98].mxu1 }
 0x2fe   :  { %v13117_v59 = vrot.slane %v16102_v8, %v12529_v56  ;;  %v3400_v11 = vsel %vm12962_vm5, %v8912_v33, %v3399_v37  ;;  %v3401_v19 = vrot.slane %v3399_v37, 2  ;;  %v4675_v22 = vcombine.low %v4407_v47, %v4408_v54  ;;  %v13138_v33 = vpop.f32.mrb[99].mxu1 }
 0x2ff   :  { %v4682_v6 = vrot.slane %v16104_v32, %v12529_v56  ;;  %v4691_v48 = vcombine.low %v4409_v49, %v4410_v51  ;;  %v3404_v0 = vrot.slane %v3402_v63, 2  ;;  %v4706_v13 = vrot.slane %v4692_v44, %v12529_v56 }
 0x300   :  { %16103 = vst [vmem:[#allocation23_spill] sm:$0xff] %v13117_v59  ;;  %v3403_v39 = vsel %vm12962_vm5, %v3401_v19, %v3402_v63  ;;  %v3777_v25 = vrot.slane %v3400_v11, 2  ;;  %v4161_v62 = vrot.slane %v2017_v58, 4  ;;  %v4689_v21 = vrot.slane %v4675_v22, %v12529_v56 }
 0x301   :  { %v4699_v61 = vrot.slane %v4691_v48, %v12529_v56  ;;  %v3406_v47 = vsel %vm12962_vm5, %v3404_v0, %v15838_v53  ;;  %v3778_v49 = vrot.slane %v3403_v39, 2  ;;  %v4162_v8 = vrot.slane %v2018_v36, 4 }
 0x302   :  { %v3779_v44 = vrot.slane %v3406_v47, 2  ;;  %v4033_v37 = vadd.f32 %v3777_v25, %v2016_v38  ;;  %v1952_v54 = vcombine.high %v12975_v5, %v12975_v5  ;;  %v13142_v51 = vcombine.low %v4682_v6, %v4689_v21  ;;  %v16107_v6 = vld [vmem:[#allocation24_spill] sm:$0xff]  ;;  %v16113_v47 = vld [vmem:[#allocation27_spill] sm:$0xff] }
 0x303   :  { %v13144_v63 = vcombine.low %v4699_v61, %v4706_v13  ;;  %v4034_v32 = vadd.f32 %v3778_v49, %v2017_v58  ;;  %v1973_v11 = vrot.slane %v12975_v5, %v12529_v56  ;;  %v16105_v19 = vcombine.high %v12507_v57, %v16101_v29  ;;  %v16108_v13 = vld [vmem:[#allocation26_spill] sm:$0xff]  ;;  %v16114_v49 = vld [vmem:[#allocation28_spill] sm:$0xff] }
 0x304   :  { %v13154_v48 = vadd.f32 %v3779_v44, %v2018_v36  ;;  %v13156_v38 = vadd.f32 %v4161_v62, %v4033_v37  ;;  %v1980_v0 = vrot.slane %v1952_v54, %v12529_v56  ;;  %v16109_v39 = vcombine.low %v16107_v6, %v16108_v13 }
 0x305   :  { %v13152_v22 = vrot.slane %v16105_v19, %v12529_v56  ;;  %v5234_v5 = vmax.f32 %v13061_v28, %v5233_v16  ;;  %v13166_v25 = vadd.f32 %v4162_v8, %v4034_v32  ;;  %v1981_v57 = vcombine.low %v12597_v7, %v1973_v11 }
 0x306   :  { %v13163_v58 = vrot.slane %v16109_v39, %v12529_v56  ;;  %v16111_v36 = vcombine.high %v16107_v6, %v16108_v13  ;;  %v1982_v62 = vcombine.high %v12597_v7, %v1973_v11  ;;  %v1983_v21 = vcombine.low %v12603_v2, %v1980_v0 }
 0x307   :  { %16106 = vst [vmem:[#allocation66_spill] sm:$0xff] %v13152_v22  ;;  %v1984_v61 = vcombine.high %v12603_v2, %v1980_v0  ;;  %v16115_v28 = vcombine.low %v16113_v47, %v16114_v49  ;;  %v8911_v44 = vrot.slane %v13013_v46, 9  ;;  %v3386_v8 = vrot.slane %v1981_v57, 7 }
 0x308   :  { %16110 = vst [vmem:[#allocation24_spill] sm:$0xff] %v13163_v58  ;;  %v13173_v29 = vrot.slane %v16111_v36, %v12529_v56  ;;  %v16117_v7 = vcombine.high %v16113_v47, %v16114_v49  ;;  %v16119_v2 = vcombine.low %v12537_v23, %v12563_v52  ;;  %v3389_v11 = vrot.slane %v1982_v62, 7 }
 0x309   :  { %v13182_v16 = vrot.slane %v16115_v28, %v12529_v56  ;;  %v3392_v19 = vrot.slane %v1983_v21, 7  ;;  %v5235_v0 = vrot.slane %v5234_v5, 2  ;;  %v3387_v6 = vsel %vm12962_vm5, %v8911_v44, %v3386_v8 }
 0x30a   :  { %16112 = vst [vmem:[#allocation26_spill] sm:$0xff] %v13173_v29  ;;  %v13191_v54 = vrot.slane %v16117_v7, %v12529_v56  ;;  %v13197_v32 = vrot.slane %v16119_v2, %v12529_v56  ;;  %v3395_v13 = vrot.slane %v1984_v61, 7  ;;  %v2057_v39 = vcombine.high %v12987_v35, %v12987_v35 }
 0x30b   :  { %16116 = vst [vmem:[#allocation27_spill] sm:$0xff] %v13182_v16  ;;  %v3388_v36 = vrot.slane %v3386_v8, 2  ;;  %v3391_v47 = vrot.slane %v3389_v11, 2  ;;  %v3394_v49 = vrot.slane %v3392_v19, 2  ;;  %v3773_v28 = vrot.slane %v3387_v6, 2 }
 0x30c   :  { %16118 = vst [vmem:[#allocation28_spill] sm:$0xff] %v13191_v54  ;;  %16120 = vst [vmem:[#allocation67_spill] sm:$0xff] %v13197_v32  ;;  %v16121_v7 = vcombine.high %v12537_v23, %v12563_v52  ;;  %v16123_v37 = vcombine.low %v12629_v45, %v12655_v15  ;;  %v4157_v44 = vrot.slane %v1981_v57, 4  ;;  %v2078_v32 = vrot.slane %v12987_v35, %v12529_v56 }
 0x30d   :  { %v3390_v8 = vsel %vm12962_vm5, %v3388_v36, %v3389_v11  ;;  %v3393_v6 = vsel %vm12962_vm5, %v3391_v47, %v3392_v19  ;;  %v3396_v23 = vsel %vm12962_vm5, %v3394_v49, %v3395_v13  ;;  %v4029_v52 = vadd.f32 %v3773_v28, %v13013_v46  ;;  %v16127_v28 = vld [vmem:[#allocation31_spill] sm:$0xff] }
 0x30e   :  { %v13207_v2 = vrot.slane %v16121_v7, %v12529_v56  ;;  %v13213_v53 = vrot.slane %v16123_v37, %v12529_v56  ;;  %v16125_v37 = vcombine.high %v12629_v45, %v12655_v15  ;;  %v3774_v35 = vrot.slane %v3390_v8, 2 }
 0x30f   :  { %v3776_v29 = vrot.slane %v3396_v23, 2  ;;  %v4158_v11 = vrot.slane %v1982_v62, 4  ;;  %v4413_v36 = vadd.f32 %v4157_v44, %v4029_v52  ;;  %v2085_v19 = vrot.slane %v2057_v39, %v12529_v56 }
 0x310   :  { %16122 = vst [vmem:[#allocation68_spill] sm:$0xff] %v13207_v2  ;;  %16124 = vst [vmem:[#allocation69_spill] sm:$0xff] %v13213_v53  ;;  %v13228_v7 = vrot.slane %v16125_v37, %v12529_v56  ;;  %v13230_v2 = vmax.f32 %v5234_v5, %v5235_v0  ;;  %v3775_v53 = vrot.slane %v3393_v6, 2  ;;  %v4030_v47 = vadd.f32 %v3774_v35, %v1981_v57 }
 0x311   :  { %v4159_v13 = vrot.slane %v1983_v21, 4  ;;  %v4160_v49 = vrot.slane %v1984_v61, 4  ;;  %v4032_v46 = vadd.f32 %v3776_v29, %v1983_v21  ;;  %v13234_v54 = vcombine.low %v16127_v28, %v2078_v32 }
 0x312   :  { %16126 = vst [vmem:[#allocation70_spill] sm:$0xff] %v13228_v7  ;;  %v4031_v58 = vadd.f32 %v3775_v53, %v1982_v62  ;;  %v2087_v15 = vcombine.high %v16127_v28, %v2078_v32  ;;  %v2088_v45 = vcombine.low %v12647_v24, %v2085_v19  ;;  %v16128_v5 = vcombine.low %v12712_v41, %v12738_v60 }
 0x313   :  { %v4414_v44 = vadd.f32 %v4158_v11, %v4030_v47  ;;  %v13245_v53 = vcombine.high %v12647_v24, %v2085_v19  ;;  %v16130_v57 = vcombine.high %v12712_v41, %v12738_v60  ;;  %v4416_v62 = vadd.f32 %v4160_v49, %v4032_v46  ;;  %v13258_v24 = vpop.f32.mrb[100].mxu1 }
 0x314   :  { %v13242_v0 = vrot.slane %v16128_v5, %v12529_v56  ;;  %v4415_v39 = vadd.f32 %v4159_v13, %v4031_v58  ;;  %v3418_v21 = vrot.slane %v13234_v54, 7  ;;  %v8914_v61 = vrot.slane %v2088_v45, 9  ;;  %v13261_v35 = vpop.f32.mrb[101].mxu1 }
 0x315   :  { %v13251_v29 = vrot.slane %v16130_v57, %v12529_v56  ;;  %v16132_v8 = vrot.slane %v13111_v43, 7  ;;  %v4708_v23 = vcombine.low %v4413_v36, %v4414_v44  ;;  %v15845_v58 = vrot.slane %v13245_v53, 7 }
 0x316   :  { %16129 = vst [vmem:[#allocation31_spill] sm:$0xff] %v13242_v0  ;;  %v4163_v52 = vrot.slane %v13111_v43, 4  ;;  %v4709_v37 = vcombine.low %v4415_v39, %v4416_v62  ;;  %v3420_v41 = vrot.slane %v3418_v21, 2  ;;  %v3421_v60 = vrot.slane %v2087_v15, 7  ;;  %v13312_v0 = vpop.f32.mrb[102].mxu1 }
 0x317   :  { %16131 = vst [vmem:[#allocation71_spill] sm:$0xff] %v13251_v29  ;;  %v3407_v6 = vrot.slane %v16132_v8, 2  ;;  %v5239_v11 = vrot.slane %v13142_v51, 4  ;;  %v4716_v19 = vrot.slane %v4708_v23, %v12529_v56  ;;  %v3426_v36 = vsel %vm12962_vm5, %v8914_v61, %v15845_v58  ;;  %v16133_v8 = vld [vmem:[#allocation29_spill] sm:$0xff] }
 0x318   :  { %v2022_v47 = vcombine.high %v12991_v3, %v12991_v3  ;;  %v4723_v13 = vrot.slane %v4709_v37, %v12529_v56  ;;  %v3422_v49 = vsel %vm12962_vm5, %v3420_v41, %v3421_v60  ;;  %v3785_v46 = vrot.slane %v3426_v36, 2  ;;  %v16134_v36 = vld [vmem:[#allocation30_spill] sm:$0xff] }
 0x319   :  { %v2043_v28 = vrot.slane %v12991_v3, %v12529_v56  ;;  %v3784_v5 = vrot.slane %v3422_v49, 2  ;;  %v4169_v44 = vrot.slane %v13245_v53, 4  ;;  %v4419_v57 = vadd.f32 %v4163_v52, %v13154_v48 }
 0x31a   :  { %v2050_v39 = vrot.slane %v2022_v47, %v12529_v56  ;;  %v13279_v62 = vcombine.low %v4716_v19, %v4723_v13  ;;  %v4041_v61 = vadd.f32 %v3785_v46, %v2088_v45  ;;  %v4168_v60 = vrot.slane %v2087_v15, 4 }
 0x31b   :  { %v2051_v23 = vcombine.low %v16133_v8, %v2043_v28  ;;  %v2052_v37 = vcombine.high %v16133_v8, %v2043_v28  ;;  %v4040_v41 = vadd.f32 %v3784_v5, %v13234_v54  ;;  %v2127_v48 = vcombine.high %v13001_v26, %v13001_v26 }
 0x31c   :  { %v2053_v32 = vcombine.low %v16134_v36, %v2050_v39  ;;  %v2054_v3 = vcombine.high %v16134_v36, %v2050_v39  ;;  %v13286_v49 = vadd.f32 %v4169_v44, %v4041_v61  ;;  %v2148_v45 = vrot.slane %v13001_v26, %v12529_v56 }
 0x31d   :  { %v3408_v58 = vrot.slane %v2051_v23, 7  ;;  %v4424_v52 = vadd.f32 %v4168_v60, %v4040_v41  ;;  %v8913_v19 = vrot.slane %v2052_v37, 9  ;;  %v5240_v46 = vmax.f32 %v13142_v51, %v5239_v11 }
 0x31e   :  { %v3412_v47 = vrot.slane %v2053_v32, 7  ;;  %v3415_v13 = vrot.slane %v2054_v3, 7  ;;  %v5245_v15 = vrot.slane %v13144_v63, 4  ;;  %v4167_v28 = vrot.slane %v13234_v54, 4 }
 0x31f   :  { %v3409_v5 = vsel %vm12962_vm5, %v3407_v6, %v3408_v58  ;;  %v4164_v41 = vrot.slane %v2051_v23, 4  ;;  %v2155_v60 = vrot.slane %v2127_v48, %v12529_v56  ;;  %v13301_v36 = vcombine.low %v12673_v31, %v2148_v45 }
 0x320   :  { %v3413_v44 = vsel %vm12962_vm5, %v8913_v19, %v3412_v47  ;;  %v3414_v39 = vrot.slane %v3412_v47, 2  ;;  %v3417_v61 = vrot.slane %v3415_v13, 2  ;;  %v3780_v8 = vrot.slane %v3409_v5, 2 }
 0x321   :  { %v3781_v26 = vrot.slane %v3413_v44, 2  ;;  %v2157_v58 = vcombine.high %v12673_v31, %v2148_v45  ;;  %v4165_v5 = vrot.slane %v2053_v32, 4  ;;  %v2158_v48 = vcombine.low %v12679_v34, %v2155_v60 }
 0x322   :  { %v3416_v51 = vsel %vm12962_vm5, %v3414_v39, %v3415_v13  ;;  %v3419_v54 = vsel %vm12962_vm5, %v3417_v61, %v3418_v21  ;;  %v4036_v6 = vadd.f32 %v3780_v8, %v13111_v43  ;;  %v2159_v44 = vcombine.high %v12679_v34, %v2155_v60  ;;  %v13314_v43 = vpop.f32.mrb[103].mxu1 }
 0x323   :  { %v3782_v11 = vrot.slane %v3416_v51, 2  ;;  %v3783_v19 = vrot.slane %v3419_v54, 2  ;;  %v4037_v47 = vadd.f32 %v3781_v26, %v2052_v37  ;;  %v3438_v29 = vrot.slane %v13301_v36, 7 }
 0x324   :  { %v4420_v23 = vadd.f32 %v4164_v41, %v4036_v6  ;;  %v4166_v21 = vrot.slane %v2054_v3, 4  ;;  %v3441_v45 = vrot.slane %v2157_v58, 7  ;;  %v3444_v8 = vrot.slane %v2158_v48, 7 }
 0x325   :  { %v4038_v13 = vadd.f32 %v3782_v11, %v2053_v32  ;;  %v4039_v39 = vadd.f32 %v3783_v19, %v2054_v3  ;;  %v4421_v61 = vadd.f32 %v4165_v5, %v4037_v47  ;;  %v3440_v37 = vrot.slane %v3438_v29, 2 }
 0x326   :  { %v4726_v31 = vcombine.low %v4419_v57, %v4420_v23  ;;  %v16135_v34 = vcombine.low %v13156_v38, %v13166_v25  ;;  %v3447_v51 = vrot.slane %v2159_v44, 7  ;;  %v3443_v54 = vrot.slane %v3441_v45, 2 }
 0x327   :  { %v4422_v41 = vadd.f32 %v4166_v21, %v4038_v13  ;;  %v4423_v60 = vadd.f32 %v4167_v28, %v4039_v39  ;;  %v3442_v3 = vsel %vm12962_vm5, %v3440_v37, %v3441_v45  ;;  %v3446_v57 = vrot.slane %v3444_v8, 2 }
 0x328   :  { %v4733_v26 = vrot.slane %v16135_v34, %v12529_v56  ;;  %v4740_v32 = vrot.slane %v4726_v31, %v12529_v56  ;;  %v5241_v6 = vrot.slane %v5240_v46, 2  ;;  %v3790_v47 = vrot.slane %v3442_v3, 2 }
 0x329   :  { %v4742_v11 = vcombine.low %v4421_v61, %v4422_v41  ;;  %v4743_v19 = vcombine.low %v4423_v60, %v4424_v52  ;;  %v3445_v38 = vsel %vm12962_vm5, %v3443_v54, %v3444_v8  ;;  %v3448_v25 = vsel %vm12962_vm5, %v3446_v57, %v3447_v51 }
 0x32a   :  { %v13325_v5 = vcombine.low %v4733_v26, %v4740_v32  ;;  %v4174_v28 = vrot.slane %v2157_v58, 4  ;;  %v3791_v39 = vrot.slane %v3445_v38, 2  ;;  %v3792_v21 = vrot.slane %v3448_v25, 2 }
 0x32b   :  { %v4750_v23 = vrot.slane %v4742_v11, %v12529_v56  ;;  %v4757_v13 = vrot.slane %v4743_v19, %v12529_v56  ;;  %v4046_v31 = vadd.f32 %v3790_v47, %v13301_v36  ;;  %v4175_v61 = vrot.slane %v2158_v48, 4 }
 0x32c   :  { %v4176_v52 = vrot.slane %v2159_v44, 4  ;;  %v2092_v37 = vcombine.high %v13007_v10, %v13007_v10  ;;  %v4047_v8 = vadd.f32 %v3791_v39, %v2157_v58  ;;  %v4048_v34 = vadd.f32 %v3792_v21, %v2158_v48  ;;  %v16137_v58 = vld [vmem:[#allocation53_spill] sm:$0xff] }
 0x32d   :  { %v13336_v45 = vcombine.low %v4750_v23, %v4757_v13  ;;  %v2113_v26 = vrot.slane %v13007_v10, %v12529_v56  ;;  %v5242_v41 = vmax.f32 %v5240_v46, %v5241_v6  ;;  %v5246_v60 = vmax.f32 %v13144_v63, %v5245_v15  ;;  %v16140_v63 = vld [vmem:[#allocation33_spill] sm:$0xff] }
 0x32e   :  { %v13341_v51 = vadd.f32 %v4174_v28, %v4046_v31  ;;  %v2120_v32 = vrot.slane %v2092_v37, %v12529_v56  ;;  %v16136_v3 = vrot.slane %v13245_v53, 7  ;;  %v4431_v54 = vadd.f32 %v4175_v61, %v4047_v8 }
 0x32f   :  { %v4432_v57 = vadd.f32 %v4176_v52, %v4048_v34  ;;  %v2121_v11 = vcombine.low %v12653_v14, %v2113_v26  ;;  %v16138_v48 = vcombine.low %v12804_v17, %v16137_v58  ;;  %v2122_v10 = vcombine.high %v12653_v14, %v2113_v26 }
 0x330   :  { %v3427_v44 = vrot.slane %v16136_v3, 2  ;;  %v2123_v46 = vcombine.low %v16140_v63, %v2120_v32  ;;  %v2124_v15 = vcombine.high %v16140_v63, %v2120_v32  ;;  %v16141_v6 = vcombine.high %v12804_v17, %v16137_v58  ;;  %v13382_v63 = vpop.f32.mrb[104].mxu1 }
 0x331   :  { %v13351_v19 = vrot.slane %v16138_v48, %v12529_v56  ;;  %v16143_v38 = vrot.slane %v13230_v2, 1  ;;  %v4777_v28 = vcombine.low %v4431_v54, %v4432_v57  ;;  %v3428_v23 = vrot.slane %v2121_v11, 7 }
 0x332   :  { %v13360_v47 = vrot.slane %v16141_v6, %v12529_v56  ;;  %v5247_v13 = vrot.slane %v5246_v60, 2  ;;  %v3431_v39 = vrot.slane %v2122_v10, 7  ;;  %v3434_v14 = vrot.slane %v2123_v46, 7 }
 0x333   :  { %16139 = vst [vmem:[#allocation29_spill] sm:$0xff] %v13351_v19  ;;  %v13365_v25 = vmax.f32 %v13230_v2, %v16143_v38  ;;  %v8915_v21 = vrot.slane %v2124_v15, 9  ;;  %v5243_v31 = vrot.slane %v5242_v41, 1  ;;  %v3429_v61 = vsel %vm12962_vm5, %v3427_v44, %v3428_v23 }
 0x334   :  { %16142 = vst [vmem:[#allocation30_spill] sm:$0xff] %v13360_v47  ;;  %v3430_v52 = vrot.slane %v3428_v23, 2  ;;  %v2197_v17 = vcombine.high %v13034_v9, %v13034_v9  ;;  %v5251_v37 = vrot.slane %v13279_v62, 4  ;;  %v3433_v8 = vrot.slane %v3431_v39, 2  ;;  %v13387_v23 = vpop.f32.mrb[105].mxu1 }
 0x335   :  { %v3439_v2 = vsel %vm12962_vm5, %v8915_v21, %v3438_v29  ;;  %v3786_v34 = vrot.slane %v3429_v61, 2  ;;  %v4173_v26 = vrot.slane %v13301_v36, 4  ;;  %v4170_v44 = vrot.slane %v2121_v11, 4 }
 0x336   :  { %v3432_v32 = vsel %vm12962_vm5, %v3430_v52, %v3431_v39  ;;  %v3789_v3 = vrot.slane %v3439_v2, 2  ;;  %v3435_v54 = vsel %vm12962_vm5, %v3433_v8, %v3434_v14  ;;  %v4171_v48 = vrot.slane %v2122_v10, 4  ;;  %v16144_v8 = vld [vmem:[#allocation36_spill] sm:$0xff] }
 0x337   :  { %v3787_v57 = vrot.slane %v3432_v32, 2  ;;  %v4042_v58 = vadd.f32 %v3786_v34, %v13245_v53  ;;  %v3788_v6 = vrot.slane %v3435_v54, 2  ;;  %v2218_v29 = vrot.slane %v13034_v9, %v12529_v56  ;;  %v16145_v32 = vld [vmem:[#allocation37_spill] sm:$0xff] }
 0x338   :  { %v4045_v38 = vadd.f32 %v3789_v3, %v2124_v15  ;;  %v2225_v36 = vrot.slane %v2197_v17, %v12529_v56  ;;  %v4172_v21 = vrot.slane %v2123_v46, 4  ;;  %v2162_v14 = vcombine.high %v13048_v50, %v13048_v50 }
 0x339   :  { %v4043_v39 = vadd.f32 %v3787_v57, %v2121_v11  ;;  %v4426_v61 = vadd.f32 %v4170_v44, %v4042_v58  ;;  %v4044_v52 = vadd.f32 %v3788_v6, %v2122_v10  ;;  %v13392_v2 = vcombine.low %v16144_v8, %v2218_v29 }
 0x33a   :  { %v4429_v53 = vadd.f32 %v4173_v26, %v4045_v38  ;;  %v2227_v15 = vcombine.high %v16144_v8, %v2218_v29  ;;  %v2228_v17 = vcombine.low %v16145_v32, %v2225_v36  ;;  %v13398_v3 = vcombine.high %v16145_v32, %v2225_v36 }
 0x33b   :  { %v4427_v34 = vadd.f32 %v4171_v48, %v4043_v39  ;;  %v4759_v9 = vcombine.low %v13286_v49, %v4426_v61  ;;  %v4791_v11 = vrot.slane %v4777_v28, %v12529_v56  ;;  %v4428_v46 = vadd.f32 %v4172_v21, %v4044_v52  ;;  %v16147_v39 = vld [vmem:[#allocation35_spill] sm:$0xff] }
 0x33c   :  { %v4776_v44 = vcombine.low %v4429_v53, %v13341_v51  ;;  %v2183_v10 = vrot.slane %v13048_v50, %v12529_v56  ;;  %v13404_v26 = vmax.f32 %v5242_v41, %v5243_v31  ;;  %v13406_v54 = vmax.f32 %v5246_v60, %v5247_v13 }
 0x33d   :  { %v8917_v57 = vrot.slane %v2227_v15, 9  ;;  %v3464_v58 = vrot.slane %v2228_v17, 7  ;;  %v13409_v49 = vmax.f32 %v13279_v62, %v5251_v37  ;;  %v4760_v48 = vcombine.low %v4427_v34, %v4428_v46  ;;  %v16146_v62 = vld [vmem:[#allocation34_spill] sm:$0xff] }
 0x33e   :  { %v4767_v6 = vrot.slane %v4759_v9, %v12529_v56  ;;  %v4784_v28 = vrot.slane %v4776_v44, %v12529_v56  ;;  %v3467_v50 = vrot.slane %v13398_v3, 7  ;;  %v2190_v41 = vrot.slane %v2162_v14, %v12529_v56 }
 0x33f   :  { %v3465_v51 = vsel %vm12962_vm5, %v8917_v57, %v3464_v58  ;;  %v3466_v38 = vrot.slane %v3464_v58, 2  ;;  %v4774_v60 = vrot.slane %v4760_v48, %v12529_v56  ;;  %v2191_v37 = vcombine.low %v16146_v62, %v2183_v10 }
 0x340   :  { %v13418_v13 = vcombine.low %v4784_v28, %v4791_v11  ;;  %v3797_v31 = vrot.slane %v3465_v51, 2  ;;  %v2192_v36 = vcombine.high %v16146_v62, %v2183_v10  ;;  %v2193_v21 = vcombine.low %v16147_v39, %v2190_v41 }
 0x341   :  { %v3468_v29 = vsel %vm12962_vm5, %v3466_v38, %v3467_v50  ;;  %v2194_v61 = vcombine.high %v16147_v39, %v2190_v41  ;;  %v13428_v52 = vcombine.low %v4767_v6, %v4774_v60  ;;  %v4181_v8 = vrot.slane %v2228_v17, 4 }
 0x342   :  { %v3798_v14 = vrot.slane %v3468_v29, 2  ;;  %v4053_v53 = vadd.f32 %v3797_v31, %v2227_v15  ;;  %v8916_v34 = vrot.slane %v2191_v37, 9  ;;  %v3451_v9 = vrot.slane %v2192_v36, 7 }
 0x343   :  { %v3454_v32 = vrot.slane %v2193_v21, 7  ;;  %v3457_v11 = vrot.slane %v2194_v61, 7  ;;  %v3460_v46 = vrot.slane %v13392_v2, 7  ;;  %v4182_v57 = vrot.slane %v13398_v3, 4 }
 0x344   :  { %v4054_v44 = vadd.f32 %v3798_v14, %v2228_v17  ;;  %v13432_v58 = vadd.f32 %v4181_v8, %v4053_v53  ;;  %v3452_v10 = vsel %vm12962_vm5, %v8916_v34, %v3451_v9  ;;  %v3453_v48 = vrot.slane %v3451_v9, 2 }
 0x345   :  { %v3456_v6 = vrot.slane %v3454_v32, 2  ;;  %v3459_v28 = vrot.slane %v3457_v11, 2  ;;  %v4180_v15 = vrot.slane %v13392_v2, 4  ;;  %v3793_v38 = vrot.slane %v3452_v10, 2 }
 0x346   :  { %v13437_v51 = vadd.f32 %v4182_v57, %v4054_v44  ;;  %v4177_v41 = vrot.slane %v2192_v36, 4  ;;  %v3455_v60 = vsel %vm12962_vm5, %v3453_v48, %v3454_v32  ;;  %v4178_v62 = vrot.slane %v2193_v21, 4  ;;  %v16148_v48 = vld [vmem:[#allocation40_spill] sm:$0xff] }
 0x347   :  { %v3458_v17 = vsel %vm12962_vm5, %v3456_v6, %v3457_v11  ;;  %v3461_v31 = vsel %vm12962_vm5, %v3459_v28, %v3460_v46  ;;  %v3794_v39 = vrot.slane %v3455_v60, 2  ;;  %v4049_v53 = vadd.f32 %v3793_v38, %v2191_v37 }
 0x348   :  { %v3795_v14 = vrot.slane %v3458_v17, 2  ;;  %v3796_v2 = vrot.slane %v3461_v31, 2  ;;  %v4179_v8 = vrot.slane %v2194_v61, 4  ;;  %v2267_v34 = vcombine.high %v13064_v40, %v13064_v40 }
 0x349   :  { %v2288_v9 = vrot.slane %v13064_v40, %v12529_v56  ;;  %v4050_v32 = vadd.f32 %v3794_v39, %v2192_v36  ;;  %v2232_v46 = vcombine.high %v13069_v12, %v13069_v12  ;;  %v4433_v57 = vadd.f32 %v4177_v41, %v4049_v53  ;;  %v13463_v36 = vld [vmem:[%s15713_s3] ss:$0 sm:$0xff] }
 0x34a   :  { %v4051_v11 = vadd.f32 %v3795_v14, %v2193_v21  ;;  %v4052_v44 = vadd.f32 %v3796_v2, %v2194_v61  ;;  %v2295_v10 = vrot.slane %v2267_v34, %v12529_v56  ;;  %v2253_v40 = vrot.slane %v13069_v12, %v12529_v56  ;;  %v16149_v21 = vld [vmem:[#allocation41_spill] sm:$0xff] }
 0x34b   :  { %v13455_v6 = vcombine.low %v16148_v48, %v2288_v9  ;;  %v2297_v37 = vcombine.high %v16148_v48, %v2288_v9  ;;  %v4434_v28 = vadd.f32 %v4178_v62, %v4050_v32  ;;  %v5253_v14 = vrot.slane %v13409_v49, 2 }
 0x34c   :  { %v4435_v38 = vadd.f32 %v4179_v8, %v4051_v11  ;;  %v4436_v60 = vadd.f32 %v4180_v15, %v4052_v44  ;;  %v2298_v61 = vcombine.low %v16149_v21, %v2295_v10  ;;  %v13467_v41 = vcombine.high %v16149_v21, %v2295_v10  ;;  %v13481_v44 = vpop.f32.mrb[106].mxu1  ;;  %v16150_v10 = vld [vmem:[#allocation38_spill] sm:$0xff] }
 0x34d   :  { %v3480_v17 = vrot.slane %v13455_v6, 7  ;;  %v3483_v31 = vrot.slane %v2297_v37, 7  ;;  %v13473_v15 = vadd.f32 %v13463_v36, %v13404_v26  ;;  %v4793_v12 = vcombine.low %v4433_v57, %v4434_v28 }
 0x34e   :  { %v4794_v39 = vcombine.low %v4435_v38, %v4436_v60  ;;  %v3486_v8 = vrot.slane %v2298_v61, 7  ;;  %v3469_v34 = vrot.slane %v3467_v50, 2  ;;  %v2260_v11 = vrot.slane %v2232_v46, %v12529_v56  ;;  %v13489_v38 = vpop.f32.mrb[107].mxu1 }
 0x34f   :  { %v3482_v2 = vrot.slane %v3480_v17, 2  ;;  %v3485_v53 = vrot.slane %v3483_v31, 2  ;;  %v4801_v9 = vrot.slane %v4793_v12, %v12529_v56  ;;  %v2261_v48 = vcombine.low %v16150_v10, %v2253_v40  ;;  %v16151_v12 = vld [vmem:[#allocation39_spill] sm:$0xff] }
 0x350   :  { %v4808_v32 = vrot.slane %v4794_v39, %v12529_v56  ;;  %v2262_v28 = vcombine.high %v16150_v10, %v2253_v40  ;;  %v2263_v46 = vcombine.low %v16151_v12, %v2260_v11  ;;  %v5257_v39 = vrot.slane %v13325_v5, 4 }
 0x351   :  { %v3484_v26 = vsel %vm12962_vm5, %v3482_v2, %v3483_v31  ;;  %v3487_v57 = vsel %vm12962_vm5, %v3485_v53, %v3486_v8  ;;  %v4187_v62 = vrot.slane %v2297_v37, 4  ;;  %v2264_v31 = vcombine.high %v16151_v12, %v2260_v11 }
 0x352   :  { %v13491_v50 = vcombine.low %v4801_v9, %v4808_v32  ;;  %v3803_v60 = vrot.slane %v3484_v26, 2  ;;  %v3804_v21 = vrot.slane %v3487_v57, 2  ;;  %v3470_v2 = vrot.slane %v2261_v48, 7 }
 0x353   :  { %v4188_v29 = vrot.slane %v2298_v61, 4  ;;  %v8918_v47 = vrot.slane %v2263_v46, 9  ;;  %v3473_v32 = vrot.slane %v2262_v28, 7  ;;  %v3477_v26 = vrot.slane %v2264_v31, 7 }
 0x354   :  { %v4059_v53 = vadd.f32 %v3803_v60, %v13455_v6  ;;  %v4060_v8 = vadd.f32 %v3804_v21, %v2297_v37  ;;  %v3471_v40 = vsel %vm12962_vm5, %v3469_v34, %v3470_v2  ;;  %v3472_v9 = vrot.slane %v3470_v2, 2 }
 0x355   :  { %v13500_v57 = vmax.f32 %v13409_v49, %v5253_v14  ;;  %v3799_v7 = vrot.slane %v3471_v40, 2  ;;  %v13503_v11 = vmax.f32 %v13325_v5, %v5257_v39  ;;  %v3478_v61 = vsel %vm12962_vm5, %v8918_v47, %v3477_v26 }
 0x356   :  { %v4443_v10 = vadd.f32 %v4187_v62, %v4059_v53  ;;  %v4444_v19 = vadd.f32 %v4188_v29, %v4060_v8  ;;  %v3474_v37 = vsel %vm12962_vm5, %v3472_v9, %v3473_v32  ;;  %v3479_v60 = vrot.slane %v3477_v26, 2  ;;  %v16152_v9 = vld [vmem:[#allocation44_spill] sm:$0xff] }
 0x357   :  { %v3800_v21 = vrot.slane %v3474_v37, 2  ;;  %v3801_v12 = vrot.slane %v3478_v61, 2  ;;  %v4183_v2 = vrot.slane %v2261_v48, 4  ;;  %v4055_v29 = vadd.f32 %v3799_v7, %v13398_v3  ;;  %v16153_v37 = vld [vmem:[#allocation45_spill] sm:$0xff] }
 0x358   :  { %v4828_v34 = vcombine.low %v4443_v10, %v4444_v19  ;;  %v3481_v49 = vsel %vm12962_vm5, %v3479_v60, %v3480_v17  ;;  %v2337_v5 = vcombine.high %v13084_v27, %v13084_v27  ;;  %v2358_v62 = vrot.slane %v13084_v27, %v12529_v56 }
 0x359   :  { %v3802_v14 = vrot.slane %v3481_v49, 2  ;;  %v4056_v39 = vadd.f32 %v3800_v21, %v2261_v48  ;;  %v4184_v53 = vrot.slane %v2262_v28, 4  ;;  %v4185_v47 = vrot.slane %v2264_v31, 4 }
 0x35a   :  { %v4057_v8 = vadd.f32 %v3801_v12, %v2263_v46  ;;  %v4439_v19 = vadd.f32 %v4183_v2, %v4055_v29  ;;  %v2365_v40 = vrot.slane %v2337_v5, %v12529_v56  ;;  %v2366_v32 = vcombine.low %v16152_v9, %v2358_v62 }
 0x35b   :  { %v4186_v17 = vrot.slane %v13455_v6, 4  ;;  %v4058_v26 = vadd.f32 %v3802_v14, %v2264_v31  ;;  %v4440_v7 = vadd.f32 %v4184_v53, %v4056_v39  ;;  %v2367_v3 = vcombine.high %v16152_v9, %v2358_v62 }
 0x35c   :  { %v4441_v10 = vadd.f32 %v4185_v47, %v4057_v8  ;;  %v2368_v61 = vcombine.low %v16153_v37, %v2365_v40  ;;  %v13522_v27 = vcombine.high %v16153_v37, %v2365_v40  ;;  %v8920_v48 = vrot.slane %v2366_v32, 9  ;;  %v13542_v40 = vpop.f32.mrb[108].mxu1 }
 0x35d   :  { %v5263_v28 = vrot.slane %v13336_v45, 4  ;;  %v4442_v46 = vadd.f32 %v4186_v17, %v4058_v26  ;;  %v4811_v60 = vcombine.low %v4439_v19, %v4440_v7  ;;  %v3503_v21 = vrot.slane %v2367_v3, 7 }
 0x35e   :  { %v5259_v12 = vrot.slane %v13503_v11, 2  ;;  %v16154_v6 = vcombine.low %v13432_v58, %v13437_v51  ;;  %v4842_v2 = vrot.slane %v4828_v34, %v12529_v56  ;;  %v3506_v49 = vrot.slane %v2368_v61, 7 }
 0x35f   :  { %v4825_v29 = vrot.slane %v4811_v60, %v12529_v56  ;;  %v4827_v5 = vcombine.low %v4441_v10, %v4442_v46  ;;  %v3504_v62 = vsel %vm12962_vm5, %v8920_v48, %v3503_v21  ;;  %v3505_v14 = vrot.slane %v3503_v21, 2  ;;  %v13550_v10 = vpop.f32.mrb[109].mxu1 }
 0x360   :  { %v4818_v31 = vrot.slane %v16154_v6, %v12529_v56  ;;  %v3508_v39 = vrot.slane %v3506_v49, 2  ;;  %v3509_v53 = vrot.slane %v13522_v27, 7  ;;  %v3809_v47 = vrot.slane %v3504_v62, 2  ;;  %v16156_v62 = vld [vmem:[#allocation43_spill] sm:$0xff] }
 0x361   :  { %v4193_v8 = vrot.slane %v2367_v3, 4  ;;  %v4835_v58 = vrot.slane %v4827_v5, %v12529_v56  ;;  %v3507_v51 = vsel %vm12962_vm5, %v3505_v14, %v3506_v49  ;;  %v2302_v34 = vcombine.high %v13088_v4, %v13088_v4 }
 0x362   :  { %v13535_v19 = vcombine.low %v4818_v31, %v4825_v29  ;;  %v3510_v9 = vsel %vm12962_vm5, %v3508_v39, %v3509_v53  ;;  %v3810_v17 = vrot.slane %v3507_v51, 2  ;;  %v4065_v26 = vadd.f32 %v3809_v47, %v2366_v32  ;;  %v16155_v31 = vld [vmem:[#allocation42_spill] sm:$0xff] }
 0x363   :  { %v2323_v7 = vrot.slane %v13088_v4, %v12529_v56  ;;  %v13552_v37 = vcombine.low %v4835_v58, %v4842_v2  ;;  %v3811_v48 = vrot.slane %v3510_v9, 2  ;;  %v4194_v46 = vrot.slane %v2368_v61, 4 }
 0x364   :  { %v2330_v60 = vrot.slane %v2302_v34, %v12529_v56  ;;  %v4066_v21 = vadd.f32 %v3810_v17, %v2367_v3  ;;  %v13555_v6 = vadd.f32 %v4193_v8, %v4065_v26  ;;  %v5264_v32 = vmax.f32 %v13336_v45, %v5263_v28 }
 0x365   :  { %v2331_v49 = vcombine.low %v16155_v31, %v2323_v7  ;;  %v2332_v29 = vcombine.high %v16155_v31, %v2323_v7  ;;  %v8919_v5 = vrot.slane %v13467_v41, 9  ;;  %v4067_v4 = vadd.f32 %v3811_v48, %v2368_v61 }
 0x366   :  { %v2333_v14 = vcombine.low %v16156_v62, %v2330_v60  ;;  %v13562_v2 = vadd.f32 %v4194_v46, %v4066_v21  ;;  %v2334_v39 = vcombine.high %v16156_v62, %v2330_v60  ;;  %v13567_v3 = vadd.f32 %v13463_v36, %v13365_v25 }
 0x367   :  { %v3490_v47 = vrot.slane %v2331_v49, 7  ;;  %v3493_v58 = vrot.slane %v2332_v29, 7  ;;  %v16157_v8 = vrot.slane %v13406_v54, 1  ;;  %v13575_v45 = vmax.f32 %v13503_v11, %v5259_v12 }
 0x368   :  { %v3496_v61 = vrot.slane %v2333_v14, 7  ;;  %v4861_v28 = vcombine.low %v13555_v6, %v13562_v2  ;;  %v3499_v7 = vrot.slane %v2334_v39, 7  ;;  %v5281_v60 = vrot.slane %v13491_v50, 4 }
 0x369   :  { %v13572_v51 = vmax.f32 %v13406_v54, %v16157_v8  ;;  %v3491_v34 = vsel %vm12962_vm5, %v8919_v5, %v3490_v47  ;;  %v3492_v9 = vrot.slane %v3490_v47, 2  ;;  %v3495_v17 = vrot.slane %v3493_v58, 2 }
 0x36a   :  { %v3498_v26 = vrot.slane %v3496_v61, 2  ;;  %v5265_v54 = vrot.slane %v5264_v32, 2  ;;  %v3805_v48 = vrot.slane %v3491_v34, 2  ;;  %v4189_v2 = vrot.slane %v2331_v49, 4 }
 0x36b   :  { %v3494_v11 = vsel %vm12962_vm5, %v3492_v9, %v3493_v58  ;;  %v3497_v12 = vsel %vm12962_vm5, %v3495_v17, %v3496_v61  ;;  %v4195_v47 = vrot.slane %v13522_v27, 4  ;;  %v4190_v8 = vrot.slane %v2332_v29, 4 }
 0x36c   :  { %v3500_v21 = vsel %vm12962_vm5, %v3498_v26, %v3499_v7  ;;  %v3806_v6 = vrot.slane %v3494_v11, 2  ;;  %v3807_v31 = vrot.slane %v3497_v12, 2  ;;  %v4061_v62 = vadd.f32 %v3805_v48, %v13467_v41 }
 0x36d   :  { %v3808_v5 = vrot.slane %v3500_v21, 2  ;;  %v4191_v9 = vrot.slane %v2333_v14, 4  ;;  %v4192_v17 = vrot.slane %v2334_v39, 4  ;;  %v2407_v36 = vcombine.high %v13103_v20, %v13103_v20  ;;  %v16158_v39 = vld [vmem:[#allocation48_spill] sm:$0xff] }
 0x36e   :  { %v4062_v58 = vadd.f32 %v3806_v6, %v2331_v49  ;;  %v4063_v61 = vadd.f32 %v3807_v31, %v2332_v29  ;;  %v4445_v25 = vadd.f32 %v4189_v2, %v4061_v62  ;;  %v2428_v26 = vrot.slane %v13103_v20, %v12529_v56  ;;  %v16159_v31 = vld [vmem:[#allocation46_spill] sm:$0xff] }
 0x36f   :  { %v4064_v34 = vadd.f32 %v3808_v5, %v2333_v14  ;;  %v2372_v41 = vcombine.high %v13107_v42, %v13107_v42  ;;  %v2393_v49 = vrot.slane %v13107_v42, %v12529_v56  ;;  %v13601_v12 = vadd.f32 %v4195_v47, %v4067_v4  ;;  %v16160_v42 = vld [vmem:[#allocation49_spill] sm:$0xff] }
 0x370   :  { %v4446_v46 = vadd.f32 %v4190_v8, %v4062_v58  ;;  %v4447_v7 = vadd.f32 %v4191_v9, %v4063_v61  ;;  %v2435_v14 = vrot.slane %v2407_v36, %v12529_v56  ;;  %v13605_v48 = vcombine.low %v16158_v39, %v2428_v26 }
 0x371   :  { %v4448_v11 = vadd.f32 %v4192_v17, %v4064_v34  ;;  %v2437_v21 = vcombine.high %v16158_v39, %v2428_v26  ;;  %v2400_v20 = vrot.slane %v2372_v41, %v12529_v56  ;;  %v2401_v5 = vcombine.low %v16159_v31, %v2393_v49  ;;  %v16161_v17 = vld [vmem:[#allocation47_spill] sm:$0xff] }
 0x372   :  { %v4844_v29 = vcombine.low %v4445_v25, %v4446_v46  ;;  %v2402_v62 = vcombine.high %v16159_v31, %v2393_v49  ;;  %v13612_v2 = vmax.f32 %v13491_v50, %v5281_v60  ;;  %v2438_v4 = vcombine.low %v16160_v42, %v2435_v14 }
 0x373   :  { %v4845_v6 = vcombine.low %v4447_v7, %v4448_v11  ;;  %v13616_v25 = vcombine.high %v16160_v42, %v2435_v14  ;;  %v3522_v36 = vrot.slane %v13605_v48, 7  ;;  %v13619_v46 = vmax.f32 %v5264_v32, %v5265_v54 }
 0x374   :  { %v3511_v47 = vrot.slane %v3509_v53, 2  ;;  %v4852_v58 = vrot.slane %v4844_v29, %v12529_v56  ;;  %v3525_v61 = vrot.slane %v2437_v21, 7  ;;  %v8922_v50 = vrot.slane %v2438_v4, 9 }
 0x375   :  { %v4859_v8 = vrot.slane %v4845_v6, %v12529_v56  ;;  %v3524_v9 = vrot.slane %v3522_v36, 2  ;;  %v15851_v60 = vrot.slane %v13616_v25, 7  ;;  %v2403_v26 = vcombine.low %v16161_v17, %v2400_v20 }
 0x376   :  { %v2404_v41 = vcombine.high %v16161_v17, %v2400_v20  ;;  %v3512_v32 = vrot.slane %v2401_v5, 7  ;;  %v5283_v54 = vrot.slane %v13612_v2, 2  ;;  %v4869_v53 = vrot.slane %v4861_v28, %v12529_v56 }
 0x377   :  { %v13626_v34 = vcombine.low %v4852_v58, %v4859_v8  ;;  %v3526_v7 = vsel %vm12962_vm5, %v3524_v9, %v3525_v61  ;;  %v3530_v11 = vsel %vm12962_vm5, %v8922_v50, %v15851_v60  ;;  %v4200_v14 = vrot.slane %v2437_v21, 4 }
 0x378   :  { %v3816_v49 = vrot.slane %v3526_v7, 2  ;;  %v3817_v29 = vrot.slane %v3530_v11, 2  ;;  %v3513_v39 = vsel %vm12962_vm5, %v3511_v47, %v3512_v32  ;;  %v8921_v6 = vrot.slane %v2402_v62, 9  ;;  %v6087_v47 = vld [vmem:[%s15715_s5 + $0x68] sm:$0xff]  ;;  %v6090_v32 = vld [vmem:[%s15715_s5 + $0x80] sm:$0xff] }
 0x379   :  { %v3516_v20 = vrot.slane %v2403_v26, 7  ;;  %v3519_v31 = vrot.slane %v2404_v41, 7  ;;  %v3812_v42 = vrot.slane %v3513_v39, 2  ;;  %v4201_v8 = vrot.slane %v13616_v25, 4 }
 0x37a   :  { %v4072_v28 = vadd.f32 %v3816_v49, %v13605_v48  ;;  %v4073_v58 = vadd.f32 %v3817_v29, %v2438_v4  ;;  %v4196_v9 = vrot.slane %v2401_v5, 4  ;;  %v4199_v4 = vrot.slane %v13605_v48, 4  ;;  %v6086_v49 = vld [vmem:[%s15715_s5 + $0x60] sm:$0xff] }
 0x37b   :  { %v3517_v61 = vsel %vm12962_vm5, %v8921_v6, %v3516_v20  ;;  %v3518_v50 = vrot.slane %v3516_v20, 2  ;;  %v3521_v17 = vrot.slane %v3519_v31, 2  ;;  %v4068_v21 = vadd.f32 %v3812_v42, %v13522_v27  ;;  %v6089_v27 = vld [vmem:[%s15715_s5 + $0x78] sm:$0xff] }
 0x37c   :  { %v4456_v7 = vadd.f32 %v4200_v14, %v4072_v28  ;;  %v13652_v11 = vadd.f32 %v4201_v8, %v4073_v58  ;;  %v3813_v5 = vrot.slane %v3517_v61, 2  ;;  %v4197_v6 = vrot.slane %v2403_v26, 4 }
 0x37d   :  { %v3520_v29 = vsel %vm12962_vm5, %v3518_v50, %v3519_v31  ;;  %v3523_v39 = vsel %vm12962_vm5, %v3521_v17, %v3522_v36  ;;  %v4452_v48 = vadd.f32 %v4196_v9, %v4068_v21  ;;  %v13664_v28 = vpack.c.bf16 %v6090_v32, %v6087_v47  ;;  %v16164_v9 = vld [vmem:[#allocation6_spill] sm:$0xff]  ;;  %v13681_v32 = vpop.f32.mrb[110].mxu1 }
 0x37e   :  { %v3814_v14 = vrot.slane %v3520_v29, 2  ;;  %v3815_v20 = vrot.slane %v3523_v39, 2  ;;  %v4069_v42 = vadd.f32 %v3813_v5, %v2402_v62  ;;  %v13667_v8 = vpack.c.bf16 %v6089_v27, %v6086_v49  ;;  %v16165_v27 = vld [vmem:[#allocation52_spill] sm:$0xff] }
 0x37f   :  { %16162 = vst [vmem:[#allocation53_spill] sm:$0xff] %v13664_v28  ;;  %v4862_v58 = vcombine.low %v13601_v12, %v4452_v48  ;;  %v2477_v61 = vcombine.high %v13130_v30, %v13130_v30  ;;  %v2498_v31 = vrot.slane %v13130_v30, %v12529_v56  ;;  %v4198_v36 = vrot.slane %v2404_v41, 4  ;;  %10151 = vmatprep.subr.bf16.mxu0 %v13664_v28 }
 0x380   :  { %16163 = vst [vmem:[#allocation33_spill] sm:$0xff] %v13667_v8  ;;  %v4070_v50 = vadd.f32 %v3814_v14, %v2403_v26  ;;  %v4071_v60 = vadd.f32 %v3815_v20, %v2404_v41  ;;  %v4453_v17 = vadd.f32 %v4197_v6, %v4069_v42  ;;  %10153 = vmatpush1.bf16.msra.mxu0 %v13667_v8  ;;  %v5287_v30 = vrot.slane %v13535_v19, 4 }
 0x381   :  { %v4876_v62 = vrot.slane %v4862_v58, %v12529_v56  ;;  %v2505_v12 = vrot.slane %v2477_v61, %v12529_v56  ;;  %v13678_v21 = vcombine.low %v16164_v9, %v2498_v31  ;;  %v2507_v47 = vcombine.high %v16164_v9, %v2498_v31 }
 0x382   :  { %v4454_v26 = vadd.f32 %v4198_v36, %v4070_v50  ;;  %v4455_v41 = vadd.f32 %v4199_v4, %v4071_v60  ;;  %v2442_v5 = vcombine.high %v13138_v33, %v13138_v33  ;;  %v13695_v60 = vmax.f32 %v13612_v2, %v5283_v54  ;;  %v13707_v54 = vpop.f32.mrb[111].mxu1 }
 0x383   :  { %v13686_v49 = vcombine.low %v4869_v53, %v4876_v62  ;;  %v2508_v29 = vcombine.low %v16165_v27, %v2505_v12  ;;  %v2509_v39 = vcombine.high %v16165_v27, %v2505_v12  ;;  %v3542_v6 = vrot.slane %v13678_v21, 7 }
 0x384   :  { %v4878_v14 = vcombine.low %v4453_v17, %v4454_v26  ;;  %v4879_v20 = vcombine.low %v4455_v41, %v4456_v7  ;;  %v3545_v42 = vrot.slane %v2507_v47, 7  ;;  %v2463_v53 = vrot.slane %v13138_v33, %v12529_v56 }
 0x385   :  { %v3544_v4 = vrot.slane %v3542_v6, 2  ;;  %v3548_v58 = vrot.slane %v2508_v29, 7  ;;  %v13700_v61 = vmax.f32 %v13535_v19, %v5287_v30  ;;  %v3551_v62 = vrot.slane %v2509_v39, 7 }
 0x386   :  { %v4886_v31 = vrot.slane %v4878_v14, %v12529_v56  ;;  %v4893_v50 = vrot.slane %v4879_v20, %v12529_v56  ;;  %v3547_v36 = vrot.slane %v3545_v42, 2  ;;  %v2470_v2 = vrot.slane %v2442_v5, %v12529_v56  ;;  %v16167_v14 = vld [vmem:[#allocation50_spill] sm:$0xff] }
 0x387   :  { %v3546_v7 = vsel %vm12962_vm5, %v3544_v4, %v3545_v42  ;;  %v3550_v17 = vrot.slane %v3548_v58, 2  ;;  %v16166_v12 = vrot.slane %v13616_v25, 7  ;;  %v4206_v27 = vrot.slane %v2507_v47, 4 }
 0x388   :  { %v13711_v9 = vcombine.low %v4886_v31, %v4893_v50  ;;  %v3549_v19 = vsel %vm12962_vm5, %v3547_v36, %v3548_v58  ;;  %v3822_v30 = vrot.slane %v3546_v7, 2  ;;  %v2471_v20 = vcombine.low %v16167_v14, %v2463_v53  ;;  %v16169_v50 = vld [vmem:[#allocation51_spill] sm:$0xff] }
 0x389   :  { %v3531_v33 = vrot.slane %v16166_v12, 2  ;;  %v3552_v26 = vsel %vm12962_vm5, %v3550_v17, %v3551_v62  ;;  %v3823_v41 = vrot.slane %v3549_v19, 2  ;;  %v4207_v4 = vrot.slane %v2508_v29, 4  ;;  %v13720_v12 = vpop.f32.mrb[112].mxu1 }
 0x38a   :  { %v3824_v42 = vrot.slane %v3552_v26, 2  ;;  %v4078_v5 = vadd.f32 %v3822_v30, %v13678_v21  ;;  %v2472_v48 = vcombine.high %v16167_v14, %v2463_v53  ;;  %16168 = vst [vmem:[#allocation36_spill] sm:$0xff] %v13720_v12  ;;  %v2473_v16 = vcombine.low %v16169_v50, %v2470_v2  ;;  %v13724_v7 = vpop.f32.mrb[113].mxu1 }
 0x38b   :  { %v4079_v31 = vadd.f32 %v3823_v41, %v2507_v47  ;;  %v2474_v58 = vcombine.high %v16169_v50, %v2470_v2  ;;  %v3532_v36 = vrot.slane %v2471_v20, 7  ;;  %16170 = vst [vmem:[#allocation37_spill] sm:$0xff] %v13724_v7  ;;  %v4208_v62 = vrot.slane %v2509_v39, 4  ;;  %v6096_v39 = vld [vmem:[%s15715_s5 + $0xb0] sm:$0xff] }
 0x38c   :  { %v4080_v17 = vadd.f32 %v3824_v42, %v2508_v29  ;;  %v13726_v19 = vadd.f32 %v4206_v27, %v4078_v5  ;;  %v3535_v26 = vrot.slane %v2472_v48, 7  ;;  %v3538_v14 = vrot.slane %v2473_v16, 7  ;;  %v6093_v29 = vld [vmem:[%s15715_s5 + $0x98] sm:$0xff] }
 0x38d   :  { %v13728_v55 = vadd.f32 %v4207_v4, %v4079_v31  ;;  %v3533_v53 = vsel %vm12962_vm5, %v3531_v33, %v3532_v36  ;;  %v3534_v30 = vrot.slane %v3532_v36, 2  ;;  %v8923_v22 = vrot.slane %v2474_v58, 9  ;;  %v6092_v4 = vld [vmem:[%s15715_s5 + $0x90] sm:$0xff]  ;;  %v6095_v31 = vld [vmem:[%s15715_s5 + $0xa8] sm:$0xff] }
 0x38e   :  { %v13732_v47 = vadd.f32 %v4208_v62, %v4080_v17  ;;  %v3537_v41 = vrot.slane %v3535_v26, 2  ;;  %v3818_v2 = vrot.slane %v3533_v53, 2  ;;  %v4205_v27 = vrot.slane %v13678_v21, 4 }
 0x38f   :  { %v3536_v33 = vsel %vm12962_vm5, %v3534_v30, %v3535_v26  ;;  %v4202_v42 = vrot.slane %v2471_v20, 4  ;;  %v4203_v5 = vrot.slane %v2472_v48, 4  ;;  %v3543_v21 = vsel %vm12962_vm5, %v8923_v22, %v3542_v6 }
 0x390   :  { %v3539_v36 = vsel %vm12962_vm5, %v3537_v41, %v3538_v14  ;;  %v3819_v17 = vrot.slane %v3536_v33, 2  ;;  %v3821_v26 = vrot.slane %v3543_v21, 2  ;;  %v4074_v53 = vadd.f32 %v3818_v2, %v13616_v25 }
 0x391   :  { %v3820_v62 = vrot.slane %v3539_v36, 2  ;;  %v13756_v30 = vpack.c.bf16 %v6096_v39, %v6093_v29  ;;  %v4204_v8 = vrot.slane %v2473_v16, 4  ;;  %v13758_v7 = vpack.c.bf16 %v6095_v31, %v6092_v4  ;;  %v16174_v39 = vld [vmem:[#allocation9_spill] sm:$0xff] }
 0x392   :  { %v4075_v59 = vadd.f32 %v3819_v17, %v2471_v20  ;;  %v2547_v50 = vcombine.high %v13258_v24, %v13258_v24  ;;  %v4077_v12 = vadd.f32 %v3821_v26, %v2474_v58  ;;  %v4458_v14 = vadd.f32 %v4202_v42, %v4074_v53  ;;  %v16173_v58 = vld [vmem:[#allocation10_spill] sm:$0xff]  ;;  %v6099_v17 = vld [vmem:[%s15715_s5 + $0xc8] sm:$0xff] }
 0x393   :  { %16171 = vst [vmem:[#allocation34_spill] sm:$0xff] %v13756_v30  ;;  %16172 = vst [vmem:[#allocation35_spill] sm:$0xff] %v13758_v7  ;;  %v4076_v28 = vadd.f32 %v3820_v62, %v2472_v48  ;;  %10155 = vmatprep.subr.bf16.mxu0 %v13756_v30  ;;  %v2568_v22 = vrot.slane %v13258_v24, %v12529_v56  ;;  %v5293_v6 = vrot.slane %v13552_v37, 4 }
 0x394   :  { %v4459_v25 = vadd.f32 %v4203_v5, %v4075_v59  ;;  %10157 = vmatpush1.bf16.msra.mxu0 %v13758_v7  ;;  %v2575_v16 = vrot.slane %v2547_v50, %v12529_v56  ;;  %v2512_v20 = vcombine.high %v13261_v35, %v13261_v35  ;;  %v13770_v2 = vadd.f32 %v4205_v27, %v4077_v12 }
 0x395   :  { %v4460_v41 = vadd.f32 %v4204_v8, %v4076_v28  ;;  %v4895_v48 = vcombine.low %v13652_v11, %v4458_v14  ;;  %v13774_v29 = vcombine.low %v16173_v58, %v2568_v22  ;;  %v2577_v24 = vcombine.high %v16173_v58, %v2568_v22  ;;  %v16175_v14 = vld [vmem:[#allocation8_spill] sm:$0xff] }
 0x396   :  { %v2578_v33 = vcombine.low %v16174_v39, %v2575_v16  ;;  %v13779_v59 = vcombine.high %v16174_v39, %v2575_v16  ;;  %v2533_v42 = vrot.slane %v13261_v35, %v12529_v56  ;;  %v2540_v11 = vrot.slane %v2512_v20, %v12529_v56  ;;  %v16177_v20 = vld [vmem:[#allocation7_spill] sm:$0xff] }
 0x397   :  { %v4896_v28 = vcombine.low %v4459_v25, %v4460_v41  ;;  %v13788_v12 = vmax.f32 %v13552_v37, %v5293_v6  ;;  %v4903_v27 = vrot.slane %v4895_v48, %v12529_v56  ;;  %v8925_v4 = vrot.slane %v2577_v24, 9  ;;  %v6102_v37 = vld [vmem:[%s15715_s5 + $0xe0] sm:$0xff] }
 0x398   :  { %v3568_v31 = vrot.slane %v2578_v33, 7  ;;  %v3564_v36 = vrot.slane %v13774_v29, 7  ;;  %v15862_v35 = vrot.slane %v13779_v59, 7  ;;  %v4213_v53 = vrot.slane %v2578_v33, 4 }
 0x399   :  { %v4910_v50 = vrot.slane %v4896_v28, %v12529_v56  ;;  %v2541_v22 = vcombine.low %v16175_v14, %v2533_v42  ;;  %v2542_v16 = vcombine.high %v16175_v14, %v2533_v42  ;;  %v2543_v41 = vcombine.low %v16177_v20, %v2540_v11  ;;  %v6098_v42 = vld [vmem:[%s15715_s5 + $0xc0] sm:$0xff] }
 0x39a   :  { %v3569_v62 = vsel %vm12962_vm5, %v8925_v4, %v3568_v31  ;;  %v3570_v26 = vrot.slane %v3568_v31, 2  ;;  %v2544_v58 = vcombine.high %v16177_v20, %v2540_v11  ;;  %v13813_v28 = vpack.c.bf16 %v6102_v37, %v6099_v17  ;;  %v13827_v20 = vpop.f32.mrb[114].mxu1 }
 0x39b   :  { %v13804_v6 = vcombine.low %v4903_v27, %v4910_v50  ;;  %v3829_v25 = vrot.slane %v3569_v62, 2  ;;  %v8924_v39 = vrot.slane %v2541_v22, 9  ;;  %v3555_v8 = vrot.slane %v2542_v16, 7  ;;  %v6101_v50 = vld [vmem:[%s15715_s5 + $0xd8] sm:$0xff]  ;;  %16179 = vst [vmem:[#allocation38_spill] sm:$0xff] %v13827_v20 }
 0x39c   :  { %v3572_v48 = vsel %vm12962_vm5, %v3570_v26, %v15862_v35  ;;  %16178 = vst [vmem:[#allocation41_spill] sm:$0xff] %v13813_v28  ;;  %v3558_v27 = vrot.slane %v2543_v41, 7  ;;  %v4214_v62 = vrot.slane %v13779_v59, 4  ;;  %v3561_v26 = vrot.slane %v2544_v58, 7  ;;  %10159 = vmatprep.subr.bf16.mxu0 %v13813_v28 }
 0x39d   :  { %16176 = vst [vmem:[#allocation40_spill] sm:$0xff] %v13804_v6  ;;  %v3830_v4 = vrot.slane %v3572_v48, 2  ;;  %v4085_v31 = vadd.f32 %v3829_v25, %v2577_v24  ;;  %v4209_v14 = vrot.slane %v2542_v16, 4  ;;  %v4210_v11 = vrot.slane %v2543_v41, 4  ;;  %v13831_v6 = vpop.f32.mrb[115].mxu1 }
 0x39e   :  { %v3556_v24 = vsel %vm12962_vm5, %v8924_v39, %v3555_v8  ;;  %v3557_v25 = vrot.slane %v3555_v8, 2  ;;  %v3560_v48 = vrot.slane %v3558_v27, 2  ;;  %v3563_v35 = vrot.slane %v3561_v26, 2  ;;  %16181 = vst [vmem:[#allocation44_spill] sm:$0xff] %v13831_v6 }
 0x39f   :  { %v4086_v17 = vadd.f32 %v3830_v4, %v2578_v33  ;;  %v13823_v37 = vadd.f32 %v4213_v53, %v4085_v31  ;;  %v3825_v21 = vrot.slane %v3556_v24, 2  ;;  %v13829_v5 = vpack.c.bf16 %v6101_v50, %v6098_v42 }
 0x3a0   :  { %v3559_v33 = vsel %vm12962_vm5, %v3557_v25, %v3558_v27  ;;  %v2617_v53 = vcombine.high %v13312_v0, %v13312_v0  ;;  %v2638_v8 = vrot.slane %v13312_v0, %v12529_v56  ;;  %v3562_v39 = vsel %vm12962_vm5, %v3560_v48, %v3561_v26  ;;  %v16182_v0 = vld [vmem:[#allocation12_spill] sm:$0xff] }
 0x3a1   :  { %16180 = vst [vmem:[#allocation39_spill] sm:$0xff] %v13829_v5  ;;  %v13833_v7 = vadd.f32 %v4214_v62, %v4086_v17  ;;  %v3565_v4 = vsel %vm12962_vm5, %v3563_v35, %v3564_v36  ;;  %v3826_v31 = vrot.slane %v3559_v33, 2  ;;  %v4081_v42 = vadd.f32 %v3825_v21, %v2541_v22  ;;  %10161 = vmatpush1.bf16.msra.mxu0 %v13829_v5  ;;  %v16183_v21 = vld [vmem:[#allocation11_spill] sm:$0xff] }
 0x3a2   :  { %v3827_v27 = vrot.slane %v3562_v39, 2  ;;  %v3828_v62 = vrot.slane %v3565_v4, 2  ;;  %v2645_v17 = vrot.slane %v2617_v53, %v12529_v56  ;;  %v13850_v6 = vcombine.low %v16182_v0, %v2638_v8 }
 0x3a3   :  { %v4082_v24 = vadd.f32 %v3826_v31, %v2542_v16  ;;  %v4465_v25 = vadd.f32 %v4209_v14, %v4081_v42  ;;  %v2647_v26 = vcombine.high %v16182_v0, %v2638_v8  ;;  %v4211_v35 = vrot.slane %v2544_v58, 4 }
 0x3a4   :  { %v4083_v48 = vadd.f32 %v3827_v27, %v2543_v41  ;;  %v4084_v36 = vadd.f32 %v3828_v62, %v2544_v58  ;;  %v2648_v22 = vcombine.low %v16183_v21, %v2645_v17  ;;  %v13855_v20 = vcombine.high %v16183_v21, %v2645_v17  ;;  %v6105_v17 = vld [vmem:[%s15715_s5 + $0xf8] sm:$0xff] }
 0x3a5   :  { %v4466_v33 = vadd.f32 %v4210_v11, %v4082_v24  ;;  %v15868_v39 = vrot.slane %v13850_v6, 7  ;;  %v3587_v4 = vrot.slane %v2647_v26, 7  ;;  %v16184_v16 = vrot.slane %v13700_v61, 2 }
 0x3a6   :  { %v4467_v53 = vadd.f32 %v4211_v35, %v4083_v48  ;;  %v16185_v8 = vrot.slane %v13774_v29, 4  ;;  %v3590_v31 = vrot.slane %v2648_v22, 7  ;;  %v16186_v58 = vrot.slane %v13779_v59, 7  ;;  %v6108_v48 = vld [vmem:[%s15715_s5 + $0x110] sm:$0xff] }
 0x3a7   :  { %v13861_v14 = vmax.f32 %v13700_v61, %v16184_v16  ;;  %v4929_v11 = vcombine.low %v4465_v25, %v4466_v33  ;;  %v3586_v27 = vrot.slane %v15868_v39, 2  ;;  %v3589_v62 = vrot.slane %v3587_v4, 2  ;;  %v6076_v25 = vld [vmem:[%s15715_s5 + $0x10] sm:$0xff] }
 0x3a8   :  { %v4468_v41 = vadd.f32 %v16185_v8, %v4084_v36  ;;  %v3573_v42 = vrot.slane %v16186_v58, 2  ;;  %v4219_v61 = vrot.slane %v2647_v26, 4  ;;  %v4220_v0 = vrot.slane %v2648_v22, 4  ;;  %v6079_v36 = vld [vmem:[%s15715_s5 + $0x28] sm:$0xff] }
 0x3a9   :  { %v2582_v29 = vcombine.high %v13314_v43, %v13314_v43  ;;  %v4937_v35 = vrot.slane %v4929_v11, %v12529_v56  ;;  %v3588_v21 = vsel %vm12962_vm5, %v3586_v27, %v3587_v4  ;;  %v3591_v22 = vsel %vm12962_vm5, %v3589_v62, %v3590_v31  ;;  %v16187_v58 = vld [vmem:[#allocation55_spill] sm:$0xff] }
 0x3aa   :  { %v4930_v24 = vcombine.low %v4467_v53, %v4468_v41  ;;  %v2603_v33 = vrot.slane %v13314_v43, %v12529_v56  ;;  %v3835_v53 = vrot.slane %v3588_v21, 2  ;;  %v3836_v8 = vrot.slane %v3591_v22, 2  ;;  %v16190_v43 = vld [vmem:[#allocation56_spill] sm:$0xff] }
 0x3ab   :  { %v2610_v41 = vrot.slane %v2582_v29, %v12529_v56  ;;  %v13894_v11 = vpack.c.bf16 %v6108_v48, %v6105_v17  ;;  %v13896_v5 = vpack.c.bf16 %v6079_v36, %v6076_v25 }
 0x3ac   :  { %v4944_v16 = vrot.slane %v4930_v24, %v12529_v56  ;;  %v2611_v50 = vcombine.low %v16187_v58, %v2603_v33  ;;  %v2612_v39 = vcombine.high %v16187_v58, %v2603_v33  ;;  %v4091_v31 = vadd.f32 %v3835_v53, %v13850_v6 }
 0x3ad   :  { %16188 = vst [vmem:[#allocation45_spill] sm:$0xff] %v13894_v11  ;;  %16189 = vst [vmem:[#allocation42_spill] sm:$0xff] %v13896_v5  ;;  %v4092_v27 = vadd.f32 %v3836_v8, %v2647_v26  ;;  %v2613_v62 = vcombine.low %v16190_v43, %v2610_v41  ;;  %v16191_v24 = vrot.slane %v13428_v52, 4  ;;  %v2614_v22 = vcombine.high %v16190_v43, %v2610_v41 }
 0x3ae   :  { %v13898_v4 = vcombine.low %v4937_v35, %v4944_v16  ;;  %v3574_v17 = vrot.slane %v2611_v50, 7  ;;  %10163 = vmatprep.subr.bf16.mxu0 %v13894_v11  ;;  %10175 = vmatprep.subr.bf16.mxu1 %v13896_v5  ;;  %v4475_v25 = vadd.f32 %v4219_v61, %v4091_v31  ;;  %v6104_v35 = vld [vmem:[%s15715_s5 + $0xf0] sm:$0xff]  ;;  %v3577_v53 = vrot.slane %v2612_v39, 7  ;;  %v16196_v11 = vld [vmem:[#allocation59_spill] sm:$0xff] }
 0x3af   :  { %v13905_v21 = vmax.f32 %v13428_v52, %v16191_v24  ;;  %v4476_v26 = vadd.f32 %v4220_v0, %v4092_v27  ;;  %v8926_v36 = vrot.slane %v2613_v62, 9  ;;  %v6107_v52 = vld [vmem:[%s15715_s5 + $0x108] sm:$0xff]  ;;  %10177 = vmatpush3.bf16.msra.mxu1 %v13896_v5  ;;  %v3581_v8 = vrot.slane %v2614_v22, 7 }
 0x3b0   :  { %v3575_v33 = vsel %vm12962_vm5, %v3573_v42, %v3574_v17  ;;  %v3576_v16 = vrot.slane %v3574_v17, 2  ;;  %v5295_v0 = vrot.slane %v13788_v12, 2  ;;  %v13927_v24 = vpack.c.bf16 %v6107_v52, %v6104_v35  ;;  %v13939_v35 = vpop.f32.mrb[116].mxu1 }
 0x3b1   :  { %v4964_v41 = vcombine.low %v4475_v25, %v4476_v26  ;;  %v3831_v58 = vrot.slane %v3575_v33, 2  ;;  %v3582_v27 = vsel %vm12962_vm5, %v8926_v36, %v3581_v8  ;;  %v3583_v43 = vrot.slane %v3581_v8, 2  ;;  %16194 = vst [vmem:[#allocation48_spill] sm:$0xff] %v13939_v35 }
 0x3b2   :  { %v3578_v31 = vsel %vm12962_vm5, %v3576_v16, %v3577_v53  ;;  %16192 = vst [vmem:[#allocation43_spill] sm:$0xff] %v13927_v24  ;;  %v3833_v42 = vrot.slane %v3582_v27, 2  ;;  %v4215_v17 = vrot.slane %v2611_v50, 4  ;;  %v4216_v48 = vrot.slane %v2612_v39, 4  ;;  %10165 = vmatpush1.bf16.msra.mxu0 %v13927_v24  ;;  %v13941_v53 = vpop.f32.mrb[117].mxu1 }
 0x3b3   :  { %v3832_v29 = vrot.slane %v3578_v31, 2  ;;  %v16193_v5 = vrot.slane %v13850_v6, 7  ;;  %v4087_v25 = vadd.f32 %v3831_v58, %v13779_v59  ;;  %v2687_v26 = vcombine.high %v13382_v63, %v13382_v63  ;;  %v16195_v59 = vld [vmem:[#allocation58_spill] sm:$0xff] }
 0x3b4   :  { %v2708_v36 = vrot.slane %v13382_v63, %v12529_v56  ;;  %v4089_v39 = vadd.f32 %v3833_v42, %v2613_v62  ;;  %v4217_v16 = vrot.slane %v2614_v22, 4  ;;  %v4218_v27 = vrot.slane %v13850_v6, 4 }
 0x3b5   :  { %v3585_v61 = vsel %vm12962_vm5, %v3583_v43, %v16193_v5  ;;  %v4088_v33 = vadd.f32 %v3832_v29, %v2611_v50  ;;  %v4471_v8 = vadd.f32 %v4215_v17, %v4087_v25  ;;  %v2715_v5 = vrot.slane %v2687_v26, %v12529_v56 }
 0x3b6   :  { %v3834_v52 = vrot.slane %v3585_v61, 2  ;;  %v2716_v58 = vcombine.low %v16195_v59, %v2708_v36  ;;  %v2717_v31 = vcombine.high %v16195_v59, %v2708_v36  ;;  %v4473_v63 = vadd.f32 %v4217_v16, %v4089_v39 }
 0x3b7   :  { %v4472_v24 = vadd.f32 %v4216_v48, %v4088_v33  ;;  %v2718_v35 = vcombine.low %v16196_v11, %v2715_v5  ;;  %v13949_v50 = vcombine.high %v16196_v11, %v2715_v5  ;;  %v13952_v61 = vmax.f32 %v13788_v12, %v5295_v0 }
 0x3b8   :  { %v4090_v43 = vadd.f32 %v3834_v52, %v2614_v22  ;;  %v8928_v62 = vrot.slane %v2716_v58, 9  ;;  %v3607_v29 = vrot.slane %v2717_v31, 7  ;;  %v5299_v42 = vrot.slane %v13626_v34, 4 }
 0x3b9   :  { %16197 = vst [vmem:[#allocation46_spill] sm:$0xff] %v13952_v61  ;;  %v4947_v25 = vcombine.low %v4471_v8, %v4472_v24  ;;  %v16198_v6 = vcombine.low %v13823_v37, %v13833_v7  ;;  %v3610_v11 = vrot.slane %v2718_v35, 7  ;;  %v4978_v36 = vrot.slane %v4964_v41, %v12529_v56  ;;  %v6111_v24 = vld [vmem:[%s15715_s5 + $0x128] sm:$0xff]  ;;  %v6114_v7 = vld [vmem:[%s15715_s5 + $0x140] sm:$0xff] }
 0x3ba   :  { %v4474_v17 = vadd.f32 %v4218_v27, %v4090_v43  ;;  %v3608_v48 = vsel %vm12962_vm5, %v8928_v62, %v3607_v29  ;;  %v3609_v26 = vrot.slane %v3607_v29, 2  ;;  %v15878_v39 = vrot.slane %v13949_v50, 7 }
 0x3bb   :  { %v4954_v22 = vrot.slane %v16198_v6, %v12529_v56  ;;  %v4961_v52 = vrot.slane %v4947_v25, %v12529_v56  ;;  %v3841_v0 = vrot.slane %v3608_v48, 2  ;;  %v3612_v33 = vrot.slane %v3610_v11, 2  ;;  %v16200_v48 = vld [vmem:[#allocation14_spill] sm:$0xff] }
 0x3bc   :  { %v4963_v12 = vcombine.low %v4473_v63, %v4474_v17  ;;  %v3611_v37 = vsel %vm12962_vm5, %v3609_v26, %v3610_v11  ;;  %v4225_v16 = vrot.slane %v2717_v31, 4  ;;  %v2652_v43 = vcombine.high %v13387_v23, %v13387_v23 }
 0x3bd   :  { %v13972_v41 = vcombine.low %v4954_v22, %v4961_v52  ;;  %v3842_v5 = vrot.slane %v3611_v37, 2  ;;  %v4097_v59 = vadd.f32 %v3841_v0, %v2716_v58  ;;  %v3614_v27 = vsel %vm12962_vm5, %v3612_v33, %v15878_v39 }
 0x3be   :  { %v4971_v8 = vrot.slane %v4963_v12, %v12529_v56  ;;  %v2673_v63 = vrot.slane %v13387_v23, %v12529_v56  ;;  %v13983_v62 = vpack.c.bf16 %v6114_v7, %v6111_v24  ;;  %v3843_v17 = vrot.slane %v3614_v27, 2 }
 0x3bf   :  { %v4098_v25 = vadd.f32 %v3842_v5, %v2717_v31  ;;  %v4226_v6 = vrot.slane %v2718_v35, 4  ;;  %v13987_v22 = vadd.f32 %v4225_v16, %v4097_v59  ;;  %v2680_v58 = vrot.slane %v2652_v43, %v12529_v56  ;;  %v16202_v31 = vld [vmem:[#allocation57_spill] sm:$0xff]  ;;  %v14014_v43 = vpop.f32.mrb[118].mxu1 }
 0x3c0   :  { %16199 = vst [vmem:[#allocation49_spill] sm:$0xff] %v13983_v62  ;;  %v13985_v29 = vcombine.low %v4971_v8, %v4978_v36  ;;  %v2681_v26 = vcombine.low %v16200_v48, %v2673_v63  ;;  %v2682_v11 = vcombine.high %v16200_v48, %v2673_v63  ;;  %10167 = vmatprep.subr.bf16.mxu0 %v13983_v62  ;;  %v8927_v23 = vrot.slane %v13855_v20, 9 }
 0x3c1   :  { %v13994_v52 = vmax.f32 %v13626_v34, %v5299_v42  ;;  %v13997_v36 = vadd.f32 %v3843_v17, %v2718_v35  ;;  %v13999_v12 = vadd.f32 %v4226_v6, %v4098_v25  ;;  %v2683_v0 = vcombine.low %v16202_v31, %v2680_v58  ;;  %v6082_v25 = vld [vmem:[%s15715_s5 + $0x40] sm:$0xff] }
 0x3c2   :  { %v2684_v24 = vcombine.high %v16202_v31, %v2680_v58  ;;  %v3594_v7 = vrot.slane %v2681_v26, 7  ;;  %v3597_v37 = vrot.slane %v2682_v11, 7  ;;  %v16203_v33 = vrot.slane %v13695_v60, 1  ;;  %v14023_v58 = vpop.f32.mrb[119].mxu1 }
 0x3c3   :  { %16201 = vst [vmem:[#allocation47_spill] sm:$0xff] %v13994_v52  ;;  %v5305_v34 = vrot.slane %v13686_v49, 4  ;;  %v5311_v42 = vrot.slane %v13711_v9, 4  ;;  %v3600_v27 = vrot.slane %v2683_v0, 7  ;;  %v16205_v63 = vrot.slane %v13861_v14, 1  ;;  %16207 = vst [vmem:[#allocation50_spill] sm:$0xff] %v14023_v58 }
 0x3c4   :  { %v14006_v16 = vmax.f32 %v13695_v60, %v16203_v33  ;;  %v3595_v8 = vsel %vm12962_vm5, %v8927_v23, %v3594_v7  ;;  %v3596_v5 = vrot.slane %v3594_v7, 2  ;;  %v3599_v59 = vrot.slane %v3597_v37, 2 }
 0x3c5   :  { %v14019_v60 = vmax.f32 %v13861_v14, %v16205_v63  ;;  %v3603_v6 = vrot.slane %v2684_v24, 7  ;;  %v3602_v31 = vrot.slane %v3600_v27, 2  ;;  %v3837_v7 = vrot.slane %v3595_v8, 2 }
 0x3c6   :  { %16204 = vst [vmem:[#allocation6_spill] sm:$0xff] %v14006_v16  ;;  %v3598_v48 = vsel %vm12962_vm5, %v3596_v5, %v3597_v37  ;;  %v3601_v23 = vsel %vm12962_vm5, %v3599_v59, %v3600_v27  ;;  %v14030_v33 = vmax.f32 %v13686_v49, %v5305_v34  ;;  %v14033_v14 = vmax.f32 %v13711_v9, %v5311_v42  ;;  %v6085_v37 = vld [vmem:[%s15715_s5 + $0x58] sm:$0xff]  ;;  %v6110_v9 = vld [vmem:[%s15715_s5 + $0x120] sm:$0xff] }
 0x3c7   :  { %16206 = vst [vmem:[#allocation52_spill] sm:$0xff] %v14019_v60  ;;  %v3838_v63 = vrot.slane %v3598_v48, 2  ;;  %v3839_v17 = vrot.slane %v3601_v23, 2  ;;  %v5329_v5 = vrot.slane %v13898_v4, 4  ;;  %v3604_v8 = vsel %vm12962_vm5, %v3602_v31, %v3603_v6  ;;  %v6113_v42 = vld [vmem:[%s15715_s5 + $0x138] sm:$0xff] }
 0x3c8   :  { %16208 = vst [vmem:[#allocation51_spill] sm:$0xff] %v14030_v33  ;;  %16209 = vst [vmem:[#allocation10_spill] sm:$0xff] %v14033_v14  ;;  %v4093_v49 = vadd.f32 %v3837_v7, %v13855_v20  ;;  %v4221_v34 = vrot.slane %v2681_v26, 4  ;;  %v3840_v59 = vrot.slane %v3604_v8, 2  ;;  %v4222_v48 = vrot.slane %v2682_v11, 4 }
 0x3c9   :  { %v4094_v27 = vadd.f32 %v3838_v63, %v2681_v26  ;;  %v4223_v23 = vrot.slane %v2683_v0, 4  ;;  %v4095_v35 = vadd.f32 %v3839_v17, %v2682_v11  ;;  %v4224_v39 = vrot.slane %v2684_v24, 4  ;;  %v16212_v63 = vld [vmem:[#allocation61_spill] sm:$0xff] }
 0x3ca   :  { %v4477_v60 = vadd.f32 %v4221_v34, %v4093_v49  ;;  %v14051_v16 = vpack.c.bf16 %v6085_v37, %v6082_v25  ;;  %v4096_v6 = vadd.f32 %v3840_v59, %v2683_v0  ;;  %v14053_v31 = vpack.c.bf16 %v6113_v42, %v6110_v9  ;;  %v16213_v49 = vld [vmem:[#allocation13_spill] sm:$0xff] }
 0x3cb   :  { %v4478_v20 = vadd.f32 %v4222_v48, %v4094_v27  ;;  %v2757_v7 = vcombine.high %v13481_v44, %v13481_v44  ;;  %v4479_v14 = vadd.f32 %v4223_v23, %v4095_v35  ;;  %v2778_v26 = vrot.slane %v13481_v44, %v12529_v56 }
 0x3cc   :  { %16210 = vst [vmem:[#allocation9_spill] sm:$0xff] %v14051_v16  ;;  %16211 = vst [vmem:[#allocation8_spill] sm:$0xff] %v14053_v31  ;;  %10179 = vmatprep.subr.bf16.mxu1 %v14051_v16  ;;  %v2722_v11 = vcombine.high %v13489_v38, %v13489_v38  ;;  %v2743_v24 = vrot.slane %v13489_v38, %v12529_v56  ;;  %v4480_v17 = vadd.f32 %v4224_v39, %v4096_v6 }
 0x3cd   :  { %v4980_v25 = vcombine.low %v4477_v60, %v4478_v20  ;;  %10169 = vmatpush1.bf16.msra.mxu0 %v14053_v31  ;;  %10181 = vmatpush3.bf16.msra.mxu1 %v14051_v16  ;;  %v2785_v35 = vrot.slane %v2757_v7, %v12529_v56  ;;  %v14069_v37 = vcombine.low %v16212_v63, %v2778_v26  ;;  %v16214_v60 = vld [vmem:[#allocation62_spill] sm:$0xff]  ;;  %v16215_v59 = vrot.slane %v13949_v50, 7 }
 0x3ce   :  { %v2787_v44 = vcombine.high %v16212_v63, %v2778_v26  ;;  %v2750_v8 = vrot.slane %v2722_v11, %v12529_v56  ;;  %v2751_v34 = vcombine.low %v16213_v49, %v2743_v24  ;;  %v14075_v38 = vmax.f32 %v13898_v4, %v5329_v5  ;;  %v16216_v11 = vld [vmem:[#allocation60_spill] sm:$0xff] }
 0x3cf   :  { %v4981_v39 = vcombine.low %v4479_v14, %v4480_v17  ;;  %v2788_v9 = vcombine.low %v16214_v60, %v2785_v35  ;;  %v14079_v42 = vcombine.high %v16214_v60, %v2785_v35  ;;  %v3615_v27 = vrot.slane %v16215_v59, 2 }
 0x3d0   :  { %v4227_v48 = vrot.slane %v13949_v50, 4  ;;  %v4988_v23 = vrot.slane %v4980_v25, %v12529_v56  ;;  %v3626_v6 = vrot.slane %v14069_v37, 7  ;;  %v3629_v7 = vrot.slane %v2787_v44, 7 }
 0x3d1   :  { %v4995_v20 = vrot.slane %v4981_v39, %v12529_v56  ;;  %v8930_v4 = vrot.slane %v2788_v9, 9  ;;  %v15882_v14 = vrot.slane %v14079_v42, 7  ;;  %v2752_v26 = vcombine.high %v16213_v49, %v2743_v24 }
 0x3d2   :  { %v3628_v5 = vrot.slane %v3626_v6, 2  ;;  %v2753_v17 = vcombine.low %v16216_v11, %v2750_v8  ;;  %v2754_v35 = vcombine.high %v16216_v11, %v2750_v8  ;;  %v16217_v63 = vcombine.low %v13987_v22, %v13999_v12 }
 0x3d3   :  { %v14097_v60 = vcombine.low %v4988_v23, %v4995_v20  ;;  %v3634_v39 = vsel %vm12962_vm5, %v8930_v4, %v15882_v14  ;;  %v3616_v59 = vrot.slane %v2751_v34, 7  ;;  %v8929_v0 = vrot.slane %v2752_v26, 9 }
 0x3d4   :  { %v14095_v25 = vrot.slane %v16217_v63, %v12529_v56  ;;  %v3630_v24 = vsel %vm12962_vm5, %v3628_v5, %v3629_v7  ;;  %v3849_v49 = vrot.slane %v3634_v39, 2  ;;  %v3620_v8 = vrot.slane %v2753_v17, 7 }
 0x3d5   :  { %v3848_v11 = vrot.slane %v3630_v24, 2  ;;  %v4233_v16 = vrot.slane %v14079_v42, 4  ;;  %v3617_v22 = vsel %vm12962_vm5, %v3615_v27, %v3616_v59  ;;  %v3623_v12 = vrot.slane %v2754_v35, 7 }
 0x3d6   :  { %v4105_v23 = vadd.f32 %v3849_v49, %v2788_v9  ;;  %v3621_v20 = vsel %vm12962_vm5, %v8929_v0, %v3620_v8  ;;  %v3622_v63 = vrot.slane %v3620_v8, 2  ;;  %v3844_v4 = vrot.slane %v3617_v22, 2  ;;  %v6117_v0 = vld [vmem:[%s15715_s5 + $0x158] sm:$0xff]  ;;  %v6120_v9 = vld [vmem:[%s15715_s5 + $0x170] sm:$0xff] }
 0x3d7   :  { %v4104_v14 = vadd.f32 %v3848_v11, %v14069_v37  ;;  %v4232_v33 = vrot.slane %v2787_v44, 4  ;;  %v3625_v7 = vrot.slane %v3623_v12, 2  ;;  %v3845_v5 = vrot.slane %v3621_v20, 2  ;;  %v6088_v44 = vld [vmem:[%s15715_s5 + $0x70] sm:$0xff]  ;;  %v6119_v11 = vld [vmem:[%s15715_s5 + $0x168] sm:$0xff] }
 0x3d8   :  { %v4231_v39 = vrot.slane %v14069_v37, 4  ;;  %v14112_v24 = vadd.f32 %v4233_v16, %v4105_v23  ;;  %v3624_v52 = vsel %vm12962_vm5, %v3622_v63, %v3623_v12  ;;  %v4100_v27 = vadd.f32 %v3844_v4, %v13949_v50  ;;  %v6091_v50 = vld [vmem:[%s15715_s5 + $0x88] sm:$0xff]  ;;  %v6116_v8 = vld [vmem:[%s15715_s5 + $0x150] sm:$0xff] }
 0x3d9   :  { %v4488_v37 = vadd.f32 %v4232_v33, %v4104_v14  ;;  %v3627_v16 = vsel %vm12962_vm5, %v3625_v7, %v3626_v6  ;;  %v3846_v59 = vrot.slane %v3624_v52, 2  ;;  %v4228_v49 = vrot.slane %v2751_v34, 4 }
 0x3da   :  { %v3847_v22 = vrot.slane %v3627_v16, 2  ;;  %v4101_v12 = vadd.f32 %v3845_v5, %v2752_v26  ;;  %v4229_v33 = vrot.slane %v2753_v17, 4  ;;  %v4230_v14 = vrot.slane %v2754_v35, 4 }
 0x3db   :  { %v4102_v23 = vadd.f32 %v3846_v59, %v2753_v17  ;;  %v4483_v52 = vadd.f32 %v4227_v48, %v13997_v36  ;;  %v4484_v34 = vadd.f32 %v4228_v49, %v4100_v27  ;;  %v14138_v6 = vpack.c.bf16 %v6120_v9, %v6117_v0  ;;  %v16221_v9 = vld [vmem:[#allocation15_spill] sm:$0xff] }
 0x3dc   :  { %v4103_v20 = vadd.f32 %v3847_v22, %v2754_v35  ;;  %v4485_v63 = vadd.f32 %v4229_v33, %v4101_v12  ;;  %v14140_v4 = vpack.c.bf16 %v6091_v50, %v6088_v44  ;;  %v14142_v7 = vpack.c.bf16 %v6119_v11, %v6116_v8 }
 0x3dd   :  { %16218 = vst [vmem:[#allocation7_spill] sm:$0xff] %v14138_v6  ;;  %v4486_v61 = vadd.f32 %v4230_v14, %v4102_v23  ;;  %v4998_v58 = vcombine.low %v4483_v52, %v4484_v34  ;;  %10171 = vmatprep.subr.bf16.mxu0 %v14138_v6  ;;  %v2827_v26 = vcombine.high %v13542_v40, %v13542_v40  ;;  %v5331_v36 = vrot.slane %v14075_v38, 2  ;;  %v14202_v14 = vpop.f32.mrb[120].mxu1 }
 0x3de   :  { %16219 = vst [vmem:[#allocation12_spill] sm:$0xff] %v14140_v4  ;;  %16220 = vst [vmem:[#allocation11_spill] sm:$0xff] %v14142_v7  ;;  %v2848_v17 = vrot.slane %v13542_v40, %v12529_v56  ;;  %v4487_v48 = vadd.f32 %v4231_v39, %v4103_v20  ;;  %10183 = vmatprep.subr.bf16.mxu1 %v14140_v4  ;;  %10173 = vmatpush1.bf16.msra.mxu0 %v14142_v7  ;;  %v5267_v23 = vrot.slane %v13619_v46, 1 }
 0x3df   :  { %v2792_v35 = vcombine.high %v13550_v10, %v13550_v10  ;;  %v2813_v5 = vrot.slane %v13550_v10, %v12529_v56  ;;  %v5012_v27 = vrot.slane %v4998_v58, %v12529_v56  ;;  %v5014_v0 = vcombine.low %v4485_v63, %v4486_v61  ;;  %10185 = vmatpush3.bf16.msra.mxu1 %v14140_v4  ;;  %v16224_v10 = vld [vmem:[#allocation63_spill] sm:$0xff]  ;;  %v16225_v61 = vld [vmem:[#allocation16_spill] sm:$0xff]  ;;  %v14205_v4 = vpop.f32.mrb[121].mxu1 }
 0x3e0   :  { %v2855_v40 = vrot.slane %v2827_v26, %v12529_v56  ;;  %v14160_v44 = vcombine.low %v16221_v9, %v2848_v17  ;;  %v16222_v39 = vcombine.low %v13728_v55, %v13732_v47  ;;  %v5015_v59 = vcombine.low %v4487_v48, %v4488_v37  ;;  %10207 = vmatprep.subr.bf16.mxu0 %v16225_v61 }
 0x3e1   :  { %v2857_v49 = vcombine.high %v16221_v9, %v2848_v17  ;;  %v14170_v50 = vcombine.low %v16224_v10, %v2813_v5  ;;  %v14174_v58 = vcombine.low %v14095_v25, %v5012_v27  ;;  %v5022_v8 = vrot.slane %v5014_v0, %v12529_v56  ;;  %v16227_v0 = vld [vmem:[#allocation64_spill] sm:$0xff]  ;;  %16228 = vst [vmem:[#allocation56_spill] sm:$0xff] %v14202_v14 }
 0x3e2   :  { %v14166_v16 = vrot.slane %v16222_v39, %v12529_v56  ;;  %v2858_v11 = vcombine.low %v13019_v1, %v2855_v40  ;;  %v2859_v22 = vcombine.high %v13019_v1, %v2855_v40  ;;  %v5029_v55 = vrot.slane %v5015_v59, %v12529_v56  ;;  %16229 = vst [vmem:[#allocation58_spill] sm:$0xff] %v14205_v4 }
 0x3e3   :  { %v3646_v47 = vrot.slane %v14160_v44, 7  ;;  %v3649_v37 = vrot.slane %v2857_v49, 7  ;;  %v2820_v12 = vrot.slane %v2792_v35, %v12529_v56  ;;  %v14183_v33 = vmax.f32 %v14075_v38, %v5331_v36 }
 0x3e4   :  { %16223 = vst [vmem:[#allocation55_spill] sm:$0xff] %v14166_v16  ;;  %v3652_v25 = vrot.slane %v2858_v11, 7  ;;  %v16226_v52 = vrot.slane %v14079_v42, 7  ;;  %v14189_v20 = vcombine.low %v5022_v8, %v5029_v55  ;;  %v3655_v17 = vrot.slane %v2859_v22, 7 }
 0x3e5   :  { %v3648_v1 = vrot.slane %v3646_v47, 2  ;;  %v3651_v63 = vrot.slane %v3649_v37, 2  ;;  %v2822_v48 = vcombine.high %v16224_v10, %v2813_v5  ;;  %v5271_v35 = vrot.slane %v13905_v21, 2 }
 0x3e6   :  { %v3635_v34 = vrot.slane %v16226_v52, 2  ;;  %v3654_v26 = vrot.slane %v3652_v25, 2  ;;  %v4238_v27 = vrot.slane %v2857_v49, 4  ;;  %v2823_v40 = vcombine.low %v16227_v0, %v2820_v12 }
 0x3e7   :  { %v3650_v38 = vsel %vm12962_vm5, %v3648_v1, %v3649_v37  ;;  %v3653_v36 = vsel %vm12962_vm5, %v3651_v63, %v3652_v25  ;;  %v4239_v8 = vrot.slane %v2858_v11, 4  ;;  %v4240_v52 = vrot.slane %v2859_v22, 4  ;;  %v14209_v22 = vpop.f32.mrb[122].mxu1 }
 0x3e8   :  { %v3656_v9 = vsel %vm12962_vm5, %v3654_v26, %v3655_v17  ;;  %v3854_v39 = vrot.slane %v3650_v38, 2  ;;  %v3855_v59 = vrot.slane %v3653_v36, 2  ;;  %v2824_v5 = vcombine.high %v16227_v0, %v2820_v12  ;;  %16230 = vst [vmem:[#allocation59_spill] sm:$0xff] %v14209_v22 }
 0x3e9   :  { %v3856_v55 = vrot.slane %v3656_v9, 2  ;;  %v3636_v10 = vrot.slane %v14170_v50, 7  ;;  %v3639_v1 = vrot.slane %v2822_v48, 7  ;;  %v3642_v63 = vrot.slane %v2823_v40, 7 }
 0x3ea   :  { %v4110_v37 = vadd.f32 %v3854_v39, %v14160_v44  ;;  %v4111_v25 = vadd.f32 %v3855_v59, %v2857_v49  ;;  %v8931_v38 = vrot.slane %v2824_v5, 9  ;;  %v14215_v39 = vpop.f32.mrb[123].mxu1  ;;  %v4234_v59 = vrot.slane %v14170_v50, 4 }
 0x3eb   :  { %v4112_v16 = vadd.f32 %v3856_v55, %v2858_v11  ;;  %v3637_v26 = vsel %vm12962_vm5, %v3635_v34, %v3636_v10  ;;  %v3638_v17 = vrot.slane %v3636_v10, 2  ;;  %v3641_v0 = vrot.slane %v3639_v1, 2  ;;  %16231 = vst [vmem:[#allocation14_spill] sm:$0xff] %v14215_v39  ;;  %v14224_v55 = vpop.f32.mrb[124].mxu1 }
 0x3ec   :  { %v14211_v12 = vadd.f32 %v4238_v27, %v4110_v37  ;;  %v14213_v36 = vadd.f32 %v4239_v8, %v4111_v25  ;;  %v3850_v9 = vrot.slane %v3637_v26, 2  ;;  %v3647_v34 = vsel %vm12962_vm5, %v8931_v38, %v3646_v47  ;;  %16232 = vst [vmem:[#allocation57_spill] sm:$0xff] %v14224_v55  ;;  %v14229_v25 = vpop.f32.mrb[125].mxu1 }
 0x3ed   :  { %v14217_v49 = vadd.f32 %v4240_v52, %v4112_v16  ;;  %v3640_v11 = vsel %vm12962_vm5, %v3638_v17, %v3639_v1  ;;  %v3643_v27 = vsel %vm12962_vm5, %v3641_v0, %v3642_v63  ;;  %v3853_v10 = vrot.slane %v3647_v34, 2  ;;  %16233 = vst [vmem:[#allocation61_spill] sm:$0xff] %v14229_v25  ;;  %v14234_v26 = vpop.f32.mrb[126].mxu1 }
 0x3ee   :  { %v3851_v8 = vrot.slane %v3640_v11, 2  ;;  %v4106_v37 = vadd.f32 %v3850_v9, %v14079_v42  ;;  %v4237_v16 = vrot.slane %v14160_v44, 4  ;;  %v3852_v1 = vrot.slane %v3643_v27, 2  ;;  %16234 = vst [vmem:[#allocation13_spill] sm:$0xff] %v14234_v26  ;;  %v14240_v42 = vpop.f32.mrb[127].mxu1 }
 0x3ef   :  { %v4235_v47 = vrot.slane %v2822_v48, 4  ;;  %v4109_v38 = vadd.f32 %v3853_v10, %v2824_v5  ;;  %v16235_v63 = vrot.slane %v13500_v57, 1  ;;  %16236 = vst [vmem:[#allocation62_spill] sm:$0xff] %v14240_v42  ;;  %v4236_v11 = vrot.slane %v2823_v40, 4  ;;  %v14246_v52 = vpop.f32.mrb[128].mxu1 }
 0x3f0   :  { %v4107_v17 = vadd.f32 %v3851_v8, %v14170_v50  ;;  %v4490_v55 = vadd.f32 %v4234_v59, %v4106_v37  ;;  %v4108_v9 = vadd.f32 %v3852_v1, %v2822_v48  ;;  %v16237_v44 = vrot.slane %v13575_v45, 1  ;;  %16238 = vst [vmem:[#allocation60_spill] sm:$0xff] %v14246_v52 }
 0x3f1   :  { %v5256_v0 = vmax.f32 %v13500_v57, %v16235_v63  ;;  %v5268_v27 = vmax.f32 %v13619_v46, %v5267_v23  ;;  %v14248_v50 = vadd.f32 %v4237_v16, %v4109_v38  ;;  %v5272_v59 = vmax.f32 %v13905_v21, %v5271_v35  ;;  %v14252_v57 = vpop.f32.mrb[129].mxu1 }
 0x3f2   :  { %v5262_v34 = vmax.f32 %v13575_v45, %v16237_v44  ;;  %v4491_v26 = vadd.f32 %v4235_v47, %v4107_v17  ;;  %v5031_v5 = vcombine.low %v14112_v24, %v4490_v55  ;;  %16239 = vst [vmem:[#allocation15_spill] sm:$0xff] %v14252_v57  ;;  %v4492_v8 = vadd.f32 %v4236_v11, %v4108_v9  ;;  %v14260_v45 = vld [vmem:[%s15713_s3] ss:$0 sm:$0xff]  ;;  %v6097_v9 = vld [vmem:[%s15715_s5 + $0xb8] sm:$0xff]  ;;  %v16261_v57 = vld [vmem:[#allocation32_spill] sm:$0xff] }
 0x3f3   :  { %v16240_v48 = vrot.slane %v13418_v13, 4  ;;  %v5434_v46 = vadd.f32 %v14260_v45, %v13572_v51  ;;  %v5435_v23 = vadd.f32 %v14260_v45, %v5256_v0  ;;  %v16241_v24 = vrot.slane %v13972_v41, 4 }
 0x3f4   :  { %v5273_v55 = vrot.slane %v5272_v59, 1  ;;  %v5032_v10 = vcombine.low %v4491_v26, %v4492_v8  ;;  %v5437_v16 = vadd.f32 %v14260_v45, %v5268_v27  ;;  %v5039_v51 = vrot.slane %v5031_v5, %v12529_v56  ;;  %v6094_v26 = vld [vmem:[%s15715_s5 + $0xa0] sm:$0xff]  ;;  %v6103_v8 = vld [vmem:[%s15715_s5 + $0xe8] sm:$0xff] }
 0x3f5   :  { %v5276_v40 = vmax.f32 %v13418_v13, %v16240_v48  ;;  %v14268_v21 = vmax.f32 %v13972_v41, %v16241_v24  ;;  %v5436_v13 = vadd.f32 %v14260_v45, %v5262_v34  ;;  %v16242_v47 = vrot.slane %v13473_v15, 7  ;;  %v14297_v48 = vpop.f32.mrb[130].mxu1 }
 0x3f6   :  { %v5274_v1 = vmax.f32 %v5272_v59, %v5273_v55  ;;  %v6158_v17 = vrot.slane %v5434_v46, 6  ;;  %v5046_v38 = vrot.slane %v5032_v10, %v12529_v56  ;;  %v6160_v0 = vrot.slane %v5435_v23, 5  ;;  %v6100_v59 = vld [vmem:[%s15715_s5 + $0xd0] sm:$0xff]  ;;  %16243 = vst [vmem:[#allocation63_spill] sm:$0xff] %v14297_v48  ;;  %v14303_v55 = vpop.f32.mrb[131].mxu1 }
 0x3f7   :  { %v5277_v37 = vrot.slane %v5276_v40, 2  ;;  %v6157_v41 = vsel %vm6156_vm6, %v16242_v47, %v13567_v3  ;;  %v6163_v44 = vrot.slane %v5436_v13, 4  ;;  %v6165_v3 = vrot.slane %v5437_v16, 3  ;;  %16244 = vst [vmem:[#allocation64_spill] sm:$0xff] %v14303_v55 }
 0x3f8   :  { %v5438_v11 = vadd.f32 %v14260_v45, %v5274_v1  ;;  %v6159_v15 = vsel %vm3339_vm0, %v6158_v17, %v6157_v41  ;;  %v14288_v34 = vcombine.low %v5039_v51, %v5046_v38  ;;  %v14301_v24 = vpack.c.bf16 %v6097_v9, %v6094_v26  ;;  %v14310_v51 = vpop.f32.mrb[132].mxu1 }
 0x3f9   :  { %v5278_v63 = vmax.f32 %v5276_v40, %v5277_v37  ;;  %v6162_v5 = vsel %vm6161_vm7, %v6160_v0, %v6159_v15  ;;  %v2897_v37 = vcombine.high %v13681_v32, %v13681_v32  ;;  %v2918_v16 = vrot.slane %v13681_v32, %v12529_v56  ;;  %16245 = vst [vmem:[#allocation72_spill] sm:$0xff] %v14310_v51  ;;  %v14320_v38 = vpop.f32.mrb[133].mxu1  ;;  %v16247_v0 = vld [vmem:[#allocation20_spill] sm:$0xff]  ;;  %v16249_v15 = vld [vmem:[#allocation18_spill] sm:$0xff] }
 0x3fa   :  { %v6164_v46 = vsel %vm3341_vm1, %v6163_v44, %v6162_v5  ;;  %v6168_v23 = vrot.slane %v5438_v11, 2  ;;  %10187 = vmatprep.subr.bf16.mxu1 %v14301_v24  ;;  %v2862_v47 = vcombine.high %v13707_v54, %v13707_v54  ;;  %v2883_v41 = vrot.slane %v13707_v54, %v12529_v56  ;;  %16246 = vst [vmem:[#allocation73_spill] sm:$0xff] %v14320_v38  ;;  %v14329_v11 = vpop.f32.mrb[134].mxu1 }
 0x3fb   :  { %v5279_v27 = vrot.slane %v5278_v63, 1  ;;  %v6167_v10 = vsel %vm6166_vm8, %v6165_v3, %v6164_v46  ;;  %v14318_v17 = vpack.c.bf16 %v6103_v8, %v6100_v59  ;;  %10189 = vmatpush3.bf16.msra.mxu1 %v14301_v24  ;;  %v2925_v32 = vrot.slane %v2897_v37, %v12529_v56  ;;  %16248 = vst [vmem:[#allocation20_spill] sm:$0xff] %v14329_v11  ;;  %v16251_v59 = vld [vmem:[#allocation21_spill] sm:$0xff] }
 0x3fc   :  { %v6169_v1 = vsel %vm3343_vm2, %v6168_v23, %v6167_v10  ;;  %v14326_v26 = vcombine.low %v16247_v0, %v2918_v16  ;;  %v2927_v9 = vcombine.high %v16247_v0, %v2918_v16  ;;  %v2890_v54 = vrot.slane %v2862_v47, %v12529_v56  ;;  %v16252_v23 = vld [vmem:[#allocation36_spill] sm:$0xff]  ;;  %v16254_v47 = vld [vmem:[#allocation17_spill] sm:$0xff] }
 0x3fd   :  { %v5280_v13 = vmax.f32 %v5278_v63, %v5279_v27  ;;  %v2891_v44 = vcombine.low %v16249_v15, %v2883_v41  ;;  %v2892_v3 = vcombine.high %v16249_v15, %v2883_v41  ;;  %10191 = vmatprep.subr.bf16.mxu1 %v14318_v17  ;;  %v14335_v27 = vpop.f32.mrb[135].mxu1  ;;  %v2928_v8 = vcombine.low %v16251_v59, %v2925_v32 }
 0x3fe   :  { %16250 = vst [vmem:[#allocation18_spill] sm:$0xff] %v14335_v27  ;;  %v14339_v46 = vcombine.high %v16251_v59, %v2925_v32  ;;  %v14343_v10 = vpop.f32.mrb[136].mxu1  ;;  %v3668_v37 = vrot.slane %v14326_v26, 7  ;;  %v8933_v16 = vrot.slane %v2927_v9, 9  ;;  %v2893_v41 = vcombine.low %v16254_v47, %v2890_v54 }
 0x3ff   :  { %v5439_v63 = vadd.f32 %v14260_v45, %v5280_v13  ;;  %v2967_v13 = vcombine.high %v16252_v23, %v16252_v23  ;;  %16253 = vst [vmem:[#allocation21_spill] sm:$0xff] %v14343_v10  ;;  %v2894_v0 = vcombine.high %v16254_v47, %v2890_v54  ;;  %v14348_v15 = vpop.f32.mrb[137].mxu1  ;;  %v3672_v35 = vrot.slane %v2928_v8, 7  ;;  %10193 = vmatpush3.bf16.msra.mxu1 %v14318_v17 }
 0x400   :  { %16255 = vst [vmem:[#allocation36_spill] sm:$0xff] %v14348_v15  ;;  %v4244_v59 = vrot.slane %v14326_v26, 4  ;;  %v14356_v40 = vpop.f32.mrb[138].mxu1  ;;  %v4245_v10 = vrot.slane %v2928_v8, 4  ;;  %v8932_v54 = vrot.slane %v2891_v44, 9  ;;  %v3659_v47 = vrot.slane %v2892_v3, 7 }
 0x401   :  { %v6170_v5 = vrot.slane %v5439_v63, 1  ;;  %16257 = vst [vmem:[#allocation74_spill] sm:$0xff] %v14356_v40  ;;  %v3662_v15 = vrot.slane %v2893_v41, 7  ;;  %v14360_v27 = vpop.f32.mrb[139].mxu1  ;;  %v4246_v26 = vrot.slane %v14339_v46, 4  ;;  %v3665_v32 = vrot.slane %v2894_v0, 7 }
 0x402   :  { %16258 = vst [vmem:[#allocation75_spill] sm:$0xff] %v14360_v27  ;;  %v16259_v11 = vmov 0.0   ;;  %v16260_v40 = vld [vmem:[#allocation19_spill] sm:$0xff]  ;;  %v3660_v51 = vsel %vm12962_vm5, %v8932_v54, %v3659_v47  ;;  %v3661_v55 = vrot.slane %v3659_v47, 2  ;;  %v16262_v27 = vrot.slane %v14339_v46, 7  ;;  %v14378_v47 = vpop.f32.mrb[140].mxu1 }
 0x403   :  { %v14351_v63 = vsel %vm6171_vm9, %v6170_v5, %v6169_v1  ;;  %v3673_v1 = vsel %vm12962_vm5, %v8933_v16, %v3672_v35  ;;  %v3674_v5 = vrot.slane %v3672_v35, 2  ;;  %v3664_v48 = vrot.slane %v3662_v15, 2  ;;  %16263 = vst [vmem:[#allocation76_spill] sm:$0xff] %v14378_v47 }
 0x404   :  { %16256 = vst [vmem:[#allocation17_spill] sm:$0xff] %v14351_v63  ;;  %6284 = vmatmul.mubr.f32.vlgmr.msra.gmra.mrb[72].mxu0 %v14351_v63  ;;  %9734 = vmatprep.mubr.f32.mxu1 %v14351_v63  ;;  %v3861_v38 = vrot.slane %v3673_v1, 2  ;;  %v3667_v16 = vrot.slane %v3665_v32, 2  ;;  %v3857_v52 = vrot.slane %v3660_v51, 2  ;;  %v4241_v42 = vrot.slane %v2892_v3, 4  ;;  %v16265_v51 = vld [vmem:[#allocation54_spill] sm:$0xff] }
 0x405   :  { %6289 = vmatprep.mubr.f32.mxu0 %v16259_v11  ;;  %10209 = vmatpush1.bf16.msra.mxu0 %v16260_v40  ;;  %v3676_v35 = vsel %vm12962_vm5, %v3674_v5, %v16262_v27  ;;  %v3663_v1 = vsel %vm12962_vm5, %v3661_v55, %v3662_v15  ;;  %v3666_v54 = vsel %vm12962_vm5, %v3664_v48, %v3665_v32  ;;  %v14382_v27 = vpop.f32.mrb[141].mxu1  ;;  %v4242_v55 = vrot.slane %v2893_v41, 4  ;;  %v16267_v48 = vld [vmem:[#allocation53_spill] sm:$0xff] }
 0x406   :  { %10211 = vmatprep.subr.bf16.mxu0 %v16261_v57  ;;  %v3862_v25 = vrot.slane %v3676_v35, 2  ;;  %v4117_v39 = vadd.f32 %v3861_v38, %v2927_v9  ;;  %v3669_v22 = vsel %vm12962_vm5, %v3667_v16, %v3668_v37  ;;  %v3858_v4 = vrot.slane %v3663_v1, 2  ;;  %16264 = vst [vmem:[#allocation77_spill] sm:$0xff] %v14382_v27  ;;  %v14387_v15 = vpop.f32.mrb[142].mxu1  ;;  %v16269_v1 = vld [vmem:[#allocation37_spill] sm:$0xff] }
 0x407   :  { %v3859_v14 = vrot.slane %v3666_v54, 2  ;;  %v4113_v57 = vadd.f32 %v3857_v52, %v2891_v44  ;;  %v3860_v9 = vrot.slane %v3669_v22, 2  ;;  %16266 = vst [vmem:[#allocation78_spill] sm:$0xff] %v14387_v15  ;;  %v4243_v47 = vrot.slane %v2894_v0, 4  ;;  %v14390_v16 = vpop.f32.mrb[143].mxu1 }
 0x408   :  { %v4118_v5 = vadd.f32 %v3862_v25, %v2928_v8  ;;  %v14385_v38 = vadd.f32 %v4245_v10, %v4117_v39  ;;  %v4114_v32 = vadd.f32 %v3858_v4, %v2892_v3  ;;  %16268 = vst [vmem:[#allocation79_spill] sm:$0xff] %v14390_v16  ;;  %v2988_v25 = vrot.slane %v16252_v23, %v12529_v56  ;;  %v14397_v22 = vpop.f32.mrb[144].mxu1 }
 0x409   :  { %10213 = vmatpush1.bf16.msra.mxu0 %v16265_v51  ;;  %v4115_v35 = vadd.f32 %v3859_v14, %v2893_v41  ;;  %v4497_v37 = vadd.f32 %v4241_v42, %v4113_v57  ;;  %v4116_v44 = vadd.f32 %v3860_v9, %v2894_v0  ;;  %v2995_v39 = vrot.slane %v2967_v13, %v12529_v56  ;;  %v14403_v42 = vpop.f32.mrb[145].mxu1  ;;  %v16270_v57 = vld [vmem:[#allocation33_spill] sm:$0xff]  ;;  %v16271_v41 = vld [vmem:[#allocation23_spill] sm:$0xff] }
 0x40a   :  { %10215 = vmatprep.subr.bf16.mxu0 %v16267_v48  ;;  %v14392_v52 = vadd.f32 %v4246_v26, %v4118_v5  ;;  %v4498_v8 = vadd.f32 %v4242_v55, %v4114_v32  ;;  %v2932_v4 = vcombine.high %v16269_v1, %v16269_v1  ;;  %v2953_v14 = vrot.slane %v16269_v1, %v12529_v56  ;;  %v14412_v26 = vpop.f32.mrb[146].mxu1 }
 0x40b   :  { %v4499_v10 = vadd.f32 %v4243_v47, %v4115_v35  ;;  %v4500_v23 = vadd.f32 %v4244_v59, %v4116_v44  ;;  %v14409_v13 = vcombine.low %v16271_v41, %v2988_v25  ;;  %v2997_v0 = vcombine.high %v16271_v41, %v2988_v25  ;;  %v16272_v47 = vld [vmem:[#allocation66_spill] sm:$0xff]  ;;  %v14420_v32 = vpop.f32.mrb[147].mxu1 }
 0x40c   :  { %v5065_v54 = vcombine.low %v4497_v37, %v4498_v8  ;;  %v2998_v5 = vcombine.low %v16272_v47, %v2995_v39  ;;  %v14417_v9 = vcombine.high %v16272_v47, %v2995_v39  ;;  %v2960_v55 = vrot.slane %v2932_v4, %v12529_v56  ;;  %v14429_v37 = vpop.f32.mrb[148].mxu1 }
 0x40d   :  { %10217 = vmatpush1.bf16.msra.mxu0 %v16270_v57  ;;  %v16273_v59 = vcombine.low %v13770_v2, %v13726_v19  ;;  %v5066_v44 = vcombine.low %v4499_v10, %v4500_v23  ;;  %v3688_v25 = vrot.slane %v14409_v13, 7  ;;  %v3691_v1 = vrot.slane %v2997_v0, 7  ;;  %v14438_v3 = vpop.f32.mrb[149].mxu1  ;;  %v16276_v19 = vld [vmem:[#allocation35_spill] sm:$0xff]  ;;  %v16280_v57 = vld [vmem:[#allocation65_spill] sm:$0xff] }
 0x40e   :  { %10219 = vmatprep.subr.bf16.mxu0 %v13756_v30  ;;  %v5337_v39 = vrot.slane %v14268_v21, 2  ;;  %v16274_v4 = vrot.slane %v13985_v29, 4  ;;  %v3694_v47 = vrot.slane %v2998_v5, 7  ;;  %16275 = vst [vmem:[#allocation37_spill] sm:$0xff] %v14438_v3  ;;  %v5073_v2 = vrot.slane %v5065_v54, %v12529_v56  ;;  %v14443_v15 = vpop.f32.mrb[150].mxu1 }
 0x40f   :  { %v14426_v35 = vrot.slane %v16273_v59, %v12529_v56  ;;  %v5080_v10 = vrot.slane %v5066_v44, %v12529_v56  ;;  %v3690_v23 = vrot.slane %v3688_v25, 2  ;;  %v3693_v59 = vrot.slane %v3691_v1, 2  ;;  %16277 = vst [vmem:[#allocation23_spill] sm:$0xff] %v14443_v15  ;;  %v16284_v15 = vld [vmem:[#allocation39_spill] sm:$0xff] }
 0x410   :  { %v14436_v41 = vmax.f32 %v13985_v29, %v16274_v4  ;;  %v16278_v8 = vrot.slane %v14339_v46, 7  ;;  %v16279_v29 = vld [vmem:[#allocation22_spill] sm:$0xff]  ;;  %v2963_v48 = vcombine.low %v16280_v57, %v2960_v55  ;;  %v4251_v27 = vrot.slane %v2997_v0, 4 }
 0x411   :  { %10221 = vmatpush1.bf16.msra.mxu0 %v16276_v19  ;;  %v2961_v4 = vcombine.low %v16279_v29, %v2953_v14  ;;  %v2962_v30 = vcombine.high %v16279_v29, %v2953_v14  ;;  %v14451_v19 = vpop.f32.mrb[151].mxu1  ;;  %v14453_v54 = vcombine.low %v5073_v2, %v5080_v10  ;;  %v3692_v44 = vsel %vm12962_vm5, %v3690_v23, %v3691_v1  ;;  %v16286_v23 = vld [vmem:[#allocation45_spill] sm:$0xff] }
 0x412   :  { %10223 = vmatprep.subr.bf16.mxu0 %v13813_v28  ;;  %v3677_v16 = vrot.slane %v16278_v8, 2  ;;  %16281 = vst [vmem:[#allocation66_spill] sm:$0xff] %v14451_v19  ;;  %v3695_v51 = vsel %vm12962_vm5, %v3693_v59, %v3694_v47  ;;  %v2964_v28 = vcombine.high %v16280_v57, %v2960_v55  ;;  %v14460_v40 = vpop.f32.mrb[152].mxu1  ;;  %v3867_v8 = vrot.slane %v3692_v44, 2 }
 0x413   :  { %16282 = vst [vmem:[#allocation22_spill] sm:$0xff] %v14460_v40  ;;  %v3868_v63 = vrot.slane %v3695_v51, 2  ;;  %v3678_v14 = vrot.slane %v2961_v4, 7  ;;  %v14462_v29 = vpop.f32.mrb[153].mxu1  ;;  %v4252_v2 = vrot.slane %v2998_v5, 4  ;;  %v3681_v10 = vrot.slane %v2962_v30, 7 }
 0x414   :  { %16283 = vst [vmem:[#allocation65_spill] sm:$0xff] %v14462_v29  ;;  %v8934_v19 = vrot.slane %v2963_v48, 9  ;;  %v3685_v3 = vrot.slane %v2964_v28, 7  ;;  %v14465_v1 = vpop.f32.mrb[154].mxu1  ;;  %v4123_v57 = vadd.f32 %v3867_v8, %v14409_v13  ;;  %v14474_v44 = vmax.f32 %v14268_v21, %v5337_v39  ;;  %v16290_v8 = vld [vmem:[#allocation43_spill] sm:$0xff] }
 0x415   :  { %10225 = vmatpush1.bf16.msra.mxu0 %v16284_v15  ;;  %16285 = vst [vmem:[#allocation80_spill] sm:$0xff] %v14465_v1  ;;  %v4124_v55 = vadd.f32 %v3868_v63, %v2997_v0  ;;  %v3679_v51 = vsel %vm12962_vm5, %v3677_v16, %v3678_v14  ;;  %v3680_v47 = vrot.slane %v3678_v14, 2  ;;  %v14471_v59 = vpop.f32.mrb[155].mxu1  ;;  %v6109_v14 = vld [vmem:[%s15715_s5 + $0x118] sm:$0xff] }
 0x416   :  { %10227 = vmatprep.subr.bf16.mxu0 %v16286_v23  ;;  %16287 = vst [vmem:[#allocation81_spill] sm:$0xff] %v14471_v59  ;;  %v3686_v5 = vsel %vm12962_vm5, %v8934_v19, %v3685_v3  ;;  %v3687_v15 = vrot.slane %v3685_v3, 2  ;;  %v3863_v29 = vrot.slane %v3679_v51, 2  ;;  %v14478_v1 = vpop.f32.mrb[156].mxu1  ;;  %v4507_v23 = vadd.f32 %v4251_v27, %v4123_v57  ;;  %v6106_v27 = vld [vmem:[%s15715_s5 + $0x100] sm:$0xff] }
 0x417   :  { %16288 = vst [vmem:[#allocation82_spill] sm:$0xff] %v14478_v1  ;;  %v4508_v40 = vadd.f32 %v4252_v2, %v4124_v55  ;;  %v3682_v63 = vsel %vm12962_vm5, %v3680_v47, %v3681_v10  ;;  %v3865_v0 = vrot.slane %v3686_v5, 2  ;;  %v14482_v16 = vpop.f32.mrb[157].mxu1  ;;  %v4247_v3 = vrot.slane %v2961_v4, 4 }
 0x418   :  { %16289 = vst [vmem:[#allocation83_spill] sm:$0xff] %v14482_v16  ;;  %v3689_v21 = vsel %vm12962_vm5, %v3687_v15, %v3688_v25  ;;  %v3864_v39 = vrot.slane %v3682_v63, 2  ;;  %v4119_v19 = vadd.f32 %v3863_v29, %v14339_v46  ;;  %v14494_v2 = vpop.f32.mrb[158].mxu1  ;;  %v5343_v10 = vrot.slane %v14436_v41, 2 }
 0x419   :  { %10229 = vmatpush1.bf16.msra.mxu0 %v16290_v8  ;;  %16291 = vst [vmem:[#allocation84_spill] sm:$0xff] %v14494_v2  ;;  %v5100_v57 = vcombine.low %v4507_v23, %v4508_v40  ;;  %v3866_v15 = vrot.slane %v3689_v21, 2  ;;  %v4121_v25 = vadd.f32 %v3865_v0, %v2963_v48  ;;  %v14498_v55 = vpop.f32.mrb[159].mxu1  ;;  %v4248_v29 = vrot.slane %v2962_v30, 4  ;;  %v16294_v2 = vld [vmem:[#allocation38_spill] sm:$0xff] }
 0x41a   :  { %10231 = vmatprep.subr.bf16.mxu0 %v13983_v62  ;;  %16292 = vst [vmem:[#allocation85_spill] sm:$0xff] %v14498_v55  ;;  %v4120_v46 = vadd.f32 %v3864_v39, %v2961_v4  ;;  %v4249_v51 = vrot.slane %v2964_v28, 4  ;;  %v4503_v47 = vadd.f32 %v4247_v3, %v4119_v19  ;;  %v14500_v5 = vpop.f32.mrb[160].mxu1  ;;  %v4250_v63 = vrot.slane %v14409_v13, 4  ;;  %v16298_v3 = vld [vmem:[#allocation27_spill] sm:$0xff] }
 0x41b   :  { %16293 = vst [vmem:[#allocation86_spill] sm:$0xff] %v14500_v5  ;;  %v4122_v8 = vadd.f32 %v3866_v15, %v2964_v28  ;;  %v14503_v16 = vpack.c.bf16 %v6109_v14, %v6106_v27  ;;  %v3037_v62 = vcombine.high %v16294_v2, %v16294_v2  ;;  %v14507_v1 = vpop.f32.mrb[161].mxu1  ;;  %v3058_v4 = vrot.slane %v16294_v2, %v12529_v56  ;;  %v16299_v2 = vld [vmem:[#allocation44_spill] sm:$0xff]  ;;  %v16328_v5 = vld [vmem:[#allocation71_spill] sm:$0xff] }
 0x41c   :  { %16295 = vst [vmem:[#allocation38_spill] sm:$0xff] %v14507_v1  ;;  %v4504_v48 = vadd.f32 %v4248_v29, %v4120_v46  ;;  %v4505_v30 = vadd.f32 %v4249_v51, %v4121_v25  ;;  %v14513_v23 = vpop.f32.mrb[162].mxu1  ;;  %v14517_v28 = vmax.f32 %v14436_v41, %v5343_v10  ;;  %v5347_v13 = vrot.slane %v14097_v60, 4  ;;  %v16302_v25 = vld [vmem:[#allocation28_spill] sm:$0xff] }
 0x41d   :  { %10233 = vmatpush1.bf16.msra.mxu0 %v14053_v31  ;;  %16296 = vst [vmem:[#allocation87_spill] sm:$0xff] %v14513_v23  ;;  %v4506_v0 = vadd.f32 %v4250_v63, %v4122_v8  ;;  %10195 = vmatprep.subr.bf16.mxu1 %v14503_v16  ;;  %v3065_v21 = vrot.slane %v3037_v62, %v12529_v56  ;;  %v14522_v39 = vpop.f32.mrb[163].mxu1 }
 0x41e   :  { %10235 = vmatprep.subr.bf16.mxu0 %v14138_v6  ;;  %16297 = vst [vmem:[#allocation88_spill] sm:$0xff] %v14522_v39  ;;  %v5083_v19 = vcombine.low %v4503_v47, %v4504_v48  ;;  %10197 = vmatpush3.bf16.msra.mxu1 %v14503_v16  ;;  %v3066_v27 = vcombine.low %v16298_v3, %v3058_v4  ;;  %v14529_v10 = vpop.f32.mrb[164].mxu1 }
 0x41f   :  { %v3067_v14 = vcombine.high %v16298_v3, %v3058_v4  ;;  %v3002_v41 = vcombine.high %v16299_v2, %v16299_v2  ;;  %16300 = vst [vmem:[#allocation27_spill] sm:$0xff] %v14529_v10  ;;  %v16301_v8 = vcombine.low %v14385_v38, %v14392_v52  ;;  %v5099_v62 = vcombine.low %v4505_v30, %v4506_v0  ;;  %v14539_v51 = vpop.f32.mrb[165].mxu1 }
 0x420   :  { %v3068_v46 = vcombine.low %v16302_v25, %v3065_v21  ;;  %v14537_v29 = vcombine.high %v16302_v25, %v3065_v21  ;;  %16303 = vst [vmem:[#allocation44_spill] sm:$0xff] %v14539_v51  ;;  %v5097_v47 = vrot.slane %v5083_v19, %v12529_v56  ;;  %v8936_v63 = vrot.slane %v3066_v27, 9  ;;  %v14545_v3 = vpop.f32.mrb[166].mxu1 }
 0x421   :  { %v5090_v15 = vrot.slane %v16301_v8, %v12529_v56  ;;  %10237 = vmatpush1.bf16.msra.mxu0 %v14142_v7  ;;  %v3711_v48 = vrot.slane %v3067_v14, 7  ;;  %v3023_v4 = vrot.slane %v16299_v2, %v12529_v56  ;;  %16304 = vst [vmem:[#allocation28_spill] sm:$0xff] %v14545_v3  ;;  %v14549_v38 = vmax.f32 %v14097_v60, %v5347_v13  ;;  %v14553_v21 = vpop.f32.mrb[167].mxu1 }
 0x422   :  { %10271 = vmatprep.subr.bf16.mxu0 %v16225_v61  ;;  %v5114_v52 = vrot.slane %v5100_v57, %v12529_v56  ;;  %v5107_v30 = vrot.slane %v5099_v62, %v12529_v56  ;;  %v3714_v0 = vrot.slane %v3068_v46, 7  ;;  %16305 = vst [vmem:[#allocation89_spill] sm:$0xff] %v14553_v21  ;;  %v3030_v25 = vrot.slane %v3002_v41, %v12529_v56  ;;  %v14560_v40 = vpop.f32.mrb[168].mxu1 }
 0x423   :  { %v14555_v19 = vcombine.low %v5090_v15, %v5097_v47  ;;  %v3712_v8 = vsel %vm12962_vm5, %v8936_v63, %v3711_v48  ;;  %v3713_v2 = vrot.slane %v3711_v48, 2  ;;  %16306 = vst [vmem:[#allocation90_spill] sm:$0xff] %v14560_v40  ;;  %v15906_v57 = vrot.slane %v14537_v29, 7  ;;  %v14565_v62 = vpop.f32.mrb[169].mxu1  ;;  %v16308_v47 = vld [vmem:[#allocation24_spill] sm:$0xff] }
 0x424   :  { %v14562_v61 = vcombine.low %v5107_v30, %v5114_v52  ;;  %v3716_v60 = vrot.slane %v3714_v0, 2  ;;  %v3873_v13 = vrot.slane %v3712_v8, 2  ;;  %16307 = vst [vmem:[#allocation91_spill] sm:$0xff] %v14565_v62  ;;  %v5377_v7 = vrot.slane %v14453_v54, 4  ;;  %v14572_v41 = vpop.f32.mrb[170].mxu1 }
 0x425   :  { %v3715_v15 = vsel %vm12962_vm5, %v3713_v2, %v3714_v0  ;;  %v3031_v63 = vcombine.low %v16308_v47, %v3023_v4  ;;  %v3032_v48 = vcombine.high %v16308_v47, %v3023_v4  ;;  %16309 = vst [vmem:[#allocation24_spill] sm:$0xff] %v14572_v41  ;;  %v4257_v6 = vrot.slane %v3067_v14, 4  ;;  %v14578_v31 = vpop.f32.mrb[171].mxu1  ;;  %v16311_v0 = vld [vmem:[#allocation26_spill] sm:$0xff] }
 0x426   :  { %v3718_v52 = vsel %vm12962_vm5, %v3716_v60, %v15906_v57  ;;  %v3874_v30 = vrot.slane %v3715_v15, 2  ;;  %v4129_v8 = vadd.f32 %v3873_v13, %v3066_v27  ;;  %16310 = vst [vmem:[#allocation92_spill] sm:$0xff] %v14578_v31  ;;  %v8935_v62 = vrot.slane %v14417_v9, 9 }
 0x427   :  { %v3875_v40 = vrot.slane %v3718_v52, 2  ;;  %v3033_v2 = vcombine.low %v16311_v0, %v3030_v25  ;;  %v3034_v21 = vcombine.high %v16311_v0, %v3030_v25  ;;  %v4258_v47 = vrot.slane %v3068_v46, 4 }
 0x428   :  { %v4130_v4 = vadd.f32 %v3874_v30, %v3067_v14  ;;  %v14583_v41 = vadd.f32 %v4257_v6, %v4129_v8  ;;  %v3698_v3 = vrot.slane %v3031_v63, 7  ;;  %v5353_v51 = vrot.slane %v14174_v58, 4 }
 0x429   :  { %v4131_v60 = vadd.f32 %v3875_v40, %v3068_v46  ;;  %v3701_v15 = vrot.slane %v3032_v48, 7  ;;  %v3704_v27 = vrot.slane %v3033_v2, 7  ;;  %v14587_v13 = vmax.f32 %v14453_v54, %v5377_v7  ;;  %v16312_v40 = vld [vmem:[#allocation48_spill] sm:$0xff] }
 0x42a   :  { %v14589_v57 = vadd.f32 %v4258_v47, %v4130_v4  ;;  %v3699_v52 = vsel %vm12962_vm5, %v8935_v62, %v3698_v3  ;;  %v3700_v31 = vrot.slane %v3698_v3, 2  ;;  %v3707_v30 = vrot.slane %v3034_v21, 7 }
 0x42b   :  { %v3703_v25 = vrot.slane %v3701_v15, 2  ;;  %v3706_v6 = vrot.slane %v3704_v27, 2  ;;  %v3869_v54 = vrot.slane %v3699_v52, 2  ;;  %v14600_v46 = vmax.f32 %v14174_v58, %v5353_v51  ;;  %v6115_v58 = vld [vmem:[%s15715_s5 + $0x148] sm:$0xff] }
 0x42c   :  { %v3702_v7 = vsel %vm12962_vm5, %v3700_v31, %v3701_v15  ;;  %v5379_v47 = vrot.slane %v14587_v13, 2  ;;  %v6112_v31 = vld [vmem:[%s15715_s5 + $0x130] sm:$0xff]  ;;  %v4259_v51 = vrot.slane %v14537_v29, 4  ;;  %v4253_v52 = vrot.slane %v3031_v63, 4 }
 0x42d   :  { %v3705_v3 = vsel %vm12962_vm5, %v3703_v25, %v3704_v27  ;;  %v3708_v62 = vsel %vm12962_vm5, %v3706_v6, %v3707_v30  ;;  %v3870_v0 = vrot.slane %v3702_v7, 2  ;;  %v4125_v15 = vadd.f32 %v3869_v54, %v14417_v9 }
 0x42e   :  { %v3871_v14 = vrot.slane %v3705_v3, 2  ;;  %v3872_v8 = vrot.slane %v3708_v62, 2  ;;  %v4254_v30 = vrot.slane %v3032_v48, 4  ;;  %v4255_v7 = vrot.slane %v3033_v2, 4 }
 0x42f   :  { %v4126_v27 = vadd.f32 %v3870_v0, %v3031_v63  ;;  %v4256_v3 = vrot.slane %v3034_v21, 4  ;;  %v4509_v62 = vadd.f32 %v4253_v52, %v4125_v15  ;;  %v14616_v4 = vpack.c.bf16 %v6115_v58, %v6112_v31  ;;  %v16314_v58 = vld [vmem:[#allocation70_spill] sm:$0xff] }
 0x430   :  { %v4127_v25 = vadd.f32 %v3871_v14, %v3032_v48  ;;  %v4128_v6 = vadd.f32 %v3872_v8, %v3033_v2  ;;  %v3107_v10 = vcombine.high %v16312_v40, %v16312_v40  ;;  %v3128_v1 = vrot.slane %v16312_v40, %v12529_v56  ;;  %v16313_v8 = vld [vmem:[#allocation69_spill] sm:$0xff] }
 0x431   :  { %v4510_v39 = vadd.f32 %v4254_v30, %v4126_v27  ;;  %v3072_v9 = vcombine.high %v13941_v53, %v13941_v53  ;;  %10199 = vmatprep.subr.bf16.mxu1 %v14616_v4  ;;  %v3093_v21 = vrot.slane %v13941_v53, %v12529_v56  ;;  %v14628_v2 = vadd.f32 %v4259_v51, %v4131_v60  ;;  %v16315_v27 = vld [vmem:[#allocation67_spill] sm:$0xff] }
 0x432   :  { %v4511_v23 = vadd.f32 %v4255_v7, %v4127_v25  ;;  %v4512_v63 = vadd.f32 %v4256_v3, %v4128_v6  ;;  %v3135_v48 = vrot.slane %v3107_v10, %v12529_v56  ;;  %10201 = vmatpush3.bf16.msra.mxu1 %v14616_v4  ;;  %v14632_v54 = vcombine.low %v16313_v8, %v3128_v1 }
 0x433   :  { %v5116_v14 = vcombine.low %v4509_v62, %v4510_v39  ;;  %v3137_v40 = vcombine.high %v16313_v8, %v3128_v1  ;;  %v3100_v0 = vrot.slane %v3072_v9, %v12529_v56  ;;  %v3101_v53 = vcombine.low %v16315_v27, %v3093_v21  ;;  %v16319_v9 = vld [vmem:[#allocation68_spill] sm:$0xff] }
 0x434   :  { %v5117_v31 = vcombine.low %v4511_v23, %v4512_v63  ;;  %v3138_v15 = vcombine.low %v16314_v58, %v3135_v48  ;;  %v14638_v10 = vcombine.high %v16314_v58, %v3135_v48  ;;  %v16316_v39 = vcombine.low %v14213_v36, %v14217_v49 }
 0x435   :  { %v16317_v1 = vcombine.low %v14248_v50, %v14211_v12  ;;  %v16318_v23 = vrot.slane %v14537_v29, 7  ;;  %v3730_v25 = vrot.slane %v14632_v54, 7  ;;  %v5124_v6 = vrot.slane %v5116_v14, %v12529_v56 }
 0x436   :  { %v14645_v60 = vrot.slane %v16316_v39, %v12529_v56  ;;  %v5131_v30 = vrot.slane %v5117_v31, %v12529_v56  ;;  %v8938_v7 = vrot.slane %v3138_v15, 9  ;;  %v15907_v36 = vrot.slane %v14638_v10, 7 }
 0x437   :  { %v14651_v51 = vrot.slane %v16317_v1, %v12529_v56  ;;  %v3719_v52 = vrot.slane %v16318_v23, 2  ;;  %v3732_v49 = vrot.slane %v3730_v25, 2  ;;  %v3733_v3 = vrot.slane %v3137_v40, 7 }
 0x438   :  { %v3102_v62 = vcombine.high %v16315_v27, %v3093_v21  ;;  %v3103_v12 = vcombine.low %v16319_v9, %v3100_v0  ;;  %v14662_v50 = vmax.f32 %v14587_v13, %v5379_v47  ;;  %v14664_v63 = vcombine.low %v5124_v6, %v5131_v30 }
 0x439   :  { %v3738_v48 = vsel %vm12962_vm5, %v8938_v7, %v15907_v36  ;;  %v3104_v14 = vcombine.high %v16319_v9, %v3100_v0  ;;  %v3734_v31 = vsel %vm12962_vm5, %v3732_v49, %v3733_v3  ;;  %v3720_v58 = vrot.slane %v3101_v53, 7 }
 0x43a   :  { %v3881_v21 = vrot.slane %v3738_v48, 2  ;;  %v3880_v27 = vrot.slane %v3734_v31, 2  ;;  %v8937_v39 = vrot.slane %v3102_v62, 9  ;;  %v3724_v13 = vrot.slane %v3103_v12, 7 }
 0x43b   :  { %v3727_v47 = vrot.slane %v3104_v14, 7  ;;  %v4263_v23 = vrot.slane %v14632_v54, 4  ;;  %v4265_v6 = vrot.slane %v14638_v10, 4  ;;  %v3721_v30 = vsel %vm12962_vm5, %v3719_v52, %v3720_v58  ;;  %v6121_v52 = vld [vmem:[%s15715_s5 + $0x178] sm:$0xff] }
 0x43c   :  { %v4137_v1 = vadd.f32 %v3881_v21, %v3138_v15  ;;  %v4136_v0 = vadd.f32 %v3880_v27, %v14632_v54  ;;  %v4264_v7 = vrot.slane %v3137_v40, 4  ;;  %v3725_v49 = vsel %vm12962_vm5, %v8937_v39, %v3724_v13  ;;  %v6118_v15 = vld [vmem:[%s15715_s5 + $0x160] sm:$0xff] }
 0x43d   :  { %v3726_v3 = vrot.slane %v3724_v13, 2  ;;  %v3729_v48 = vrot.slane %v3727_v47, 2  ;;  %v3876_v31 = vrot.slane %v3721_v30, 2  ;;  %v3877_v36 = vrot.slane %v3725_v49, 2 }
 0x43e   :  { %v14681_v9 = vadd.f32 %v4265_v6, %v4137_v1  ;;  %v4520_v21 = vadd.f32 %v4264_v7, %v4136_v0  ;;  %v4260_v40 = vrot.slane %v3101_v53, 4  ;;  %v4261_v58 = vrot.slane %v3103_v12, 4 }
 0x43f   :  { %v3728_v54 = vsel %vm12962_vm5, %v3726_v3, %v3727_v47  ;;  %v3731_v27 = vsel %vm12962_vm5, %v3729_v48, %v3730_v25  ;;  %v4132_v13 = vadd.f32 %v3876_v31, %v14537_v29  ;;  %v4133_v1 = vadd.f32 %v3877_v36, %v3102_v62  ;;  %v16320_v29 = vld [vmem:[#allocation29_spill] sm:$0xff] }
 0x440   :  { %v3878_v39 = vrot.slane %v3728_v54, 2  ;;  %v3879_v6 = vrot.slane %v3731_v27, 2  ;;  %v14694_v30 = vpack.c.bf16 %v6121_v52, %v6118_v15  ;;  %v3177_v49 = vcombine.high %v14014_v43, %v14014_v43  ;;  %v16322_v52 = vld [vmem:[#allocation30_spill] sm:$0xff] }
 0x441   :  { %v3198_v0 = vrot.slane %v14014_v43, %v12529_v56  ;;  %v4262_v47 = vrot.slane %v3104_v14, 4  ;;  %v4516_v53 = vadd.f32 %v4260_v40, %v4132_v13  ;;  %v4517_v3 = vadd.f32 %v4261_v58, %v4133_v1  ;;  %v16321_v43 = vld [vmem:[#allocation50_spill] sm:$0xff] }
 0x442   :  { %v4134_v7 = vadd.f32 %v3878_v39, %v3103_v12  ;;  %v4135_v8 = vadd.f32 %v3879_v6, %v3104_v14  ;;  %10203 = vmatprep.subr.bf16.mxu1 %v14694_v30  ;;  %v3205_v25 = vrot.slane %v3177_v49, %v12529_v56  ;;  %v5389_v48 = vrot.slane %v14562_v61, 4  ;;  %v16323_v27 = vld [vmem:[#allocation42_spill] sm:$0xff] }
 0x443   :  { %v14703_v36 = vcombine.low %v16320_v29, %v3198_v0  ;;  %v3207_v62 = vcombine.high %v16320_v29, %v3198_v0  ;;  %v5134_v15 = vcombine.low %v14628_v2, %v4516_v53  ;;  %10205 = vmatpush3.bf16.msra.mxu1 %v14694_v30  ;;  %v3142_v12 = vcombine.high %v16321_v43, %v16321_v43 }
 0x444   :  { %v4518_v31 = vadd.f32 %v4262_v47, %v4134_v7  ;;  %v4519_v14 = vadd.f32 %v4263_v23, %v4135_v8  ;;  %v3208_v54 = vcombine.low %v16322_v52, %v3205_v25  ;;  %v3209_v40 = vcombine.high %v16322_v52, %v3205_v25  ;;  %10239 = vmatprep.subr.bf16.mxu1 %v16323_v27 }
 0x445   :  { %v3750_v58 = vrot.slane %v14703_v36, 7  ;;  %v16324_v39 = vcombine.low %v14583_v41, %v14589_v57  ;;  %v5148_v2 = vrot.slane %v5134_v15, %v12529_v56  ;;  %v3753_v6 = vrot.slane %v3207_v62, 7 }
 0x446   :  { %v5150_v1 = vcombine.low %v4517_v3, %v4518_v31  ;;  %v5151_v49 = vcombine.low %v4519_v14, %v4520_v21  ;;  %v3756_v8 = vrot.slane %v3208_v54, 7  ;;  %v3163_v23 = vrot.slane %v16321_v43, %v12529_v56 }
 0x447   :  { %v5141_v13 = vrot.slane %v16324_v39, %v12529_v56  ;;  %v3752_v0 = vrot.slane %v3750_v58, 2  ;;  %v3755_v53 = vrot.slane %v3753_v6, 2  ;;  %v3170_v25 = vrot.slane %v3142_v12, %v12529_v56 }
 0x448   :  { %v5158_v47 = vrot.slane %v5150_v1, %v12529_v56  ;;  %v5165_v57 = vrot.slane %v5151_v49, %v12529_v56  ;;  %v3758_v3 = vrot.slane %v3756_v8, 2  ;;  %v3759_v29 = vrot.slane %v3209_v40, 7 }
 0x449   :  { %v14722_v7 = vcombine.low %v5141_v13, %v5148_v2  ;;  %v3754_v41 = vsel %vm12962_vm5, %v3752_v0, %v3753_v6  ;;  %v16325_v21 = vrot.slane %v14555_v19, 4  ;;  %v16326_v15 = vrot.slane %v14638_v10, 7  ;;  %v16327_v2 = vld [vmem:[#allocation31_spill] sm:$0xff] }
 0x44a   :  { %v3757_v14 = vsel %vm12962_vm5, %v3755_v53, %v3756_v8  ;;  %v3886_v52 = vrot.slane %v3754_v41, 2  ;;  %v14738_v12 = vcombine.low %v5158_v47, %v5165_v57  ;;  %v3760_v39 = vsel %vm12962_vm5, %v3758_v3, %v3759_v29 }
 0x44b   :  { %v14732_v31 = vmax.f32 %v14555_v19, %v16325_v21  ;;  %v3739_v43 = vrot.slane %v16326_v15, 2  ;;  %v3887_v13 = vrot.slane %v3757_v14, 2  ;;  %v3171_v1 = vcombine.low %v16327_v2, %v3163_v23 }
 0x44c   :  { %v3888_v6 = vrot.slane %v3760_v39, 2  ;;  %v4142_v49 = vadd.f32 %v3886_v52, %v14703_v36  ;;  %v4270_v19 = vrot.slane %v3207_v62, 4  ;;  %v3172_v0 = vcombine.high %v16327_v2, %v3163_v23 }
 0x44d   :  { %v4143_v21 = vadd.f32 %v3887_v13, %v3207_v62  ;;  %v4271_v15 = vrot.slane %v3208_v54, 4  ;;  %v3173_v55 = vcombine.low %v16328_v5, %v3170_v25  ;;  %v3174_v8 = vcombine.high %v16328_v5, %v3170_v25 }
 0x44e   :  { %v4144_v47 = vadd.f32 %v3888_v6, %v3208_v54  ;;  %v4272_v53 = vrot.slane %v3209_v40, 4  ;;  %v14747_v57 = vadd.f32 %v4270_v19, %v4142_v49  ;;  %v3740_v41 = vrot.slane %v3171_v1, 7 }
 0x44f   :  { %v14750_v3 = vmax.f32 %v14562_v61, %v5389_v48  ;;  %v14752_v29 = vadd.f32 %v4271_v15, %v4143_v21  ;;  %v3743_v14 = vrot.slane %v3172_v0, 7  ;;  %v3746_v52 = vrot.slane %v3173_v55, 7 }
 0x450   :  { %v14754_v39 = vadd.f32 %v4272_v53, %v4144_v47  ;;  %v3741_v62 = vsel %vm12962_vm5, %v3739_v43, %v3740_v41  ;;  %v3742_v23 = vrot.slane %v3740_v41, 2  ;;  %v8939_v13 = vrot.slane %v3174_v8, 9  ;;  %v16329_v47 = vld [vmem:[#allocation55_spill] sm:$0xff]  ;;  %v16330_v41 = vld [vmem:[#allocation46_spill] sm:$0xff] }
 0x451   :  { %v4269_v5 = vrot.slane %v14703_v36, 4  ;;  %v3745_v54 = vrot.slane %v3743_v14, 2  ;;  %v3882_v40 = vrot.slane %v3741_v62, 2  ;;  %v4266_v25 = vrot.slane %v3171_v1, 4 }
 0x452   :  { %v3744_v48 = vsel %vm12962_vm5, %v3742_v23, %v3743_v14  ;;  %v3751_v2 = vsel %vm12962_vm5, %v8939_v13, %v3750_v58  ;;  %v4267_v6 = vrot.slane %v3172_v0, 4  ;;  %v4268_v15 = vrot.slane %v3173_v55, 4  ;;  %v16332_v13 = vld [vmem:[#allocation47_spill] sm:$0xff]  ;;  %v16336_v55 = vld [vmem:[#allocation10_spill] sm:$0xff] }
 0x453   :  { %v3747_v43 = vsel %vm12962_vm5, %v3745_v54, %v3746_v52  ;;  %v3883_v49 = vrot.slane %v3744_v48, 2  ;;  %v3885_v19 = vrot.slane %v3751_v2, 2  ;;  %v4138_v36 = vadd.f32 %v3882_v40, %v14638_v10  ;;  %v16334_v54 = vld [vmem:[#allocation51_spill] sm:$0xff]  ;;  %v16337_v2 = vld [vmem:[#allocation40_spill] sm:$0xff] }
 0x454   :  { %v3884_v21 = vrot.slane %v3747_v43, 2  ;;  %v4928_v53 = vcombine.low %v14426_v35, %v16329_v47  ;;  %v16331_v62 = vrot.slane %v16330_v41, 1  ;;  %v16333_v59 = vrot.slane %v16332_v13, 2 }
 0x455   :  { %v4139_v23 = vadd.f32 %v3883_v49, %v3171_v1  ;;  %v4141_v61 = vadd.f32 %v3885_v19, %v3174_v8  ;;  %v4522_v58 = vadd.f32 %v4266_v25, %v4138_v36  ;;  %v16335_v48 = vrot.slane %v16334_v54, 2 }
 0x456   :  { %v5298_v14 = vmax.f32 %v16330_v41, %v16331_v62  ;;  %v5302_v18 = vmax.f32 %v16332_v13, %v16333_v59  ;;  %v4140_v52 = vadd.f32 %v3884_v21, %v3172_v0  ;;  %v5313_v40 = vrot.slane %v16336_v55, 2  ;;  %v16339_v13 = vld [vmem:[#allocation52_spill] sm:$0xff] }
 0x457   :  { %v5308_v10 = vmax.f32 %v16334_v54, %v16335_v48  ;;  %v5317_v35 = vrot.slane %v16337_v2, 4  ;;  %v4523_v43 = vadd.f32 %v4267_v6, %v4139_v23  ;;  %v14781_v47 = vadd.f32 %v4269_v5, %v4141_v61 }
 0x458   :  { %v5167_v1 = vcombine.low %v14681_v9, %v4522_v58  ;;  %v5303_v8 = vrot.slane %v5302_v18, 1  ;;  %v4524_v25 = vadd.f32 %v4268_v15, %v4140_v52  ;;  %v5314_v19 = vmax.f32 %v16336_v55, %v5313_v40  ;;  %v16338_v15 = vld [vmem:[#allocation6_spill] sm:$0xff] }
 0x459   :  { %v5309_v49 = vrot.slane %v5308_v10, 1  ;;  %v5318_v59 = vmax.f32 %v16337_v2, %v5317_v35  ;;  %v5385_v0 = vrot.slane %v14732_v31, 2  ;;  %v5184_v36 = vcombine.low %v14781_v47, %v14747_v57 }
 0x45a   :  { %v5304_v21 = vmax.f32 %v5302_v18, %v5303_v8  ;;  %v5323_v41 = vrot.slane %v4928_v53, 4  ;;  %v5168_v62 = vcombine.low %v4523_v43, %v4524_v25  ;;  %v5315_v5 = vrot.slane %v5314_v19, 1 }
 0x45b   :  { %v5310_v6 = vmax.f32 %v5308_v10, %v5309_v49  ;;  %v5319_v61 = vrot.slane %v5318_v59, 2  ;;  %v5175_v9 = vrot.slane %v5167_v1, %v12529_v56  ;;  %v5440_v58 = vadd.f32 %v14260_v45, %v16338_v15  ;;  %v14815_v15 = vld [vmem:[%s15713_s3] ss:$0 sm:$0xff] }
 0x45c   :  { %v5324_v23 = vmax.f32 %v4928_v53, %v5323_v41  ;;  %v5441_v52 = vadd.f32 %v14260_v45, %v16339_v13  ;;  %v5182_v54 = vrot.slane %v5168_v62, %v12529_v56  ;;  %v5316_v48 = vmax.f32 %v5314_v19, %v5315_v5 }
 0x45d   :  { %v5320_v55 = vmax.f32 %v5318_v59, %v5319_v61  ;;  %v5442_v18 = vadd.f32 %v14260_v45, %v5298_v14  ;;  %v5443_v10 = vadd.f32 %v14260_v45, %v5304_v21  ;;  %v5444_v2 = vadd.f32 %v14260_v45, %v5310_v6 }
 0x45e   :  { %v5325_v40 = vrot.slane %v5324_v23, 2  ;;  %v6173_v35 = vrot.slane %v5441_v52, 7  ;;  %v14798_v43 = vcombine.low %v5175_v9, %v5182_v54  ;;  %v5445_v1 = vadd.f32 %v14260_v45, %v5316_v48 }
 0x45f   :  { %v5321_v53 = vrot.slane %v5320_v55, 1  ;;  %v6175_v8 = vrot.slane %v5442_v18, 6  ;;  %v6177_v41 = vrot.slane %v5443_v10, 5  ;;  %v6179_v19 = vrot.slane %v5444_v2, 4 }
 0x460   :  { %v5326_v25 = vmax.f32 %v5324_v23, %v5325_v40  ;;  %v6174_v49 = vsel %vm6156_vm6, %v6173_v35, %v5440_v58  ;;  %v5391_v59 = vrot.slane %v14750_v3, 2  ;;  %v6181_v21 = vrot.slane %v5445_v1, 3 }
 0x461   :  { %v5322_v14 = vmax.f32 %v5320_v55, %v5321_v53  ;;  %v6176_v62 = vsel %vm3339_vm0, %v6175_v8, %v6174_v49  ;;  %v14805_v6 = vmax.f32 %v14732_v31, %v5385_v0  ;;  %v5064_v45 = vcombine.low %v14651_v51, %v14645_v60 }
 0x462   :  { %v5327_v5 = vrot.slane %v5326_v25, 1  ;;  %v6178_v61 = vsel %vm6161_vm7, %v6177_v41, %v6176_v62  ;;  %v5395_v9 = vrot.slane %v14664_v63, 4  ;;  %v5401_v23 = vrot.slane %v14722_v7, 4 }
 0x463   :  { %v5446_v58 = vadd.f32 %v14815_v15, %v5322_v14  ;;  %v6180_v31 = vsel %vm3341_vm1, %v6179_v19, %v6178_v61  ;;  %v5355_v0 = vrot.slane %v14600_v46, 2  ;;  %v16340_v60 = vrot.slane %v14549_v38, 2 }
 0x464   :  { %v5328_v13 = vmax.f32 %v5326_v25, %v5327_v5  ;;  %v6182_v52 = vsel %vm6166_vm8, %v6181_v21, %v6180_v31  ;;  %v16341_v54 = vrot.slane %v14183_v33, 1  ;;  %v16342_v55 = vrot.slane %v14474_v44, 1 }
 0x465   :  { %v5350_v51 = vmax.f32 %v14549_v38, %v16340_v60  ;;  %v16343_v40 = vrot.slane %v14189_v20, 4  ;;  %v6183_v2 = vrot.slane %v5446_v58, 2  ;;  %v5381_v35 = vrot.slane %v14662_v50, 1 }
 0x466   :  { %v5334_v48 = vmax.f32 %v14183_v33, %v16341_v54  ;;  %v5340_v18 = vmax.f32 %v14474_v44, %v16342_v55  ;;  %v5387_v53 = vrot.slane %v14805_v6, 1  ;;  %v5392_v1 = vmax.f32 %v14750_v3, %v5391_v59 }
 0x467   :  { %v5360_v10 = vmax.f32 %v14189_v20, %v16343_v40  ;;  %v5447_v38 = vadd.f32 %v14815_v15, %v5328_v13  ;;  %v14838_v8 = vmax.f32 %v14664_v63, %v5395_v9  ;;  %v14841_v33 = vmax.f32 %v14722_v7, %v5401_v23 }
 0x468   :  { %v5407_v44 = vrot.slane %v14738_v12, 4  ;;  %v6184_v25 = vsel %vm3343_vm2, %v6183_v2, %v6182_v52  ;;  %v16344_v49 = vrot.slane %v14517_v28, 1  ;;  %v5351_v19 = vrot.slane %v5350_v51, 1 }
 0x469   :  { %v6185_v20 = vrot.slane %v5447_v38, 1  ;;  %v5356_v3 = vmax.f32 %v14600_v46, %v5355_v0  ;;  %v5361_v59 = vrot.slane %v5360_v10, 2  ;;  %v5365_v14 = vrot.slane %v14288_v34, 4 }
 0x46a   :  { %v5346_v41 = vmax.f32 %v14517_v28, %v16344_v49  ;;  %v5371_v63 = vrot.slane %v5064_v45, 4  ;;  %v5448_v62 = vadd.f32 %v14815_v15, %v5334_v48  ;;  %v5352_v21 = vmax.f32 %v5350_v51, %v5351_v19  ;;  %v16345_v48 = vld [vmem:[#allocation9_spill] sm:$0xff] }
 0x46b   :  { %v14852_v7 = vsel %vm6171_vm9, %v6185_v20, %v6184_v25  ;;  %v5357_v5 = vrot.slane %v5356_v3, 1  ;;  %v5449_v61 = vadd.f32 %v14815_v15, %v5340_v18  ;;  %v5393_v9 = vrot.slane %v5392_v1, 1 }
 0x46c   :  { %6290 = vmatmul.mubr.f32.gmra.mrb[74].mxu0 %v14852_v7  ;;  %9735 = vmatmul.mubr.f32.vlgmr.msra.gmra.mrb[172].mxu1 %v14852_v7  ;;  %v5362_v28 = vmax.f32 %v5360_v10, %v5361_v59  ;;  %v5366_v46 = vmax.f32 %v14288_v34, %v5365_v14  ;;  %v5372_v23 = vmax.f32 %v5064_v45, %v5371_v63  ;;  %v5397_v40 = vrot.slane %v14838_v8, 2  ;;  %v16347_v14 = vld [vmem:[#allocation12_spill] sm:$0xff] }
 0x46d   :  { %6295 = vmatprep.mubr.f32.mxu0 %v16259_v11  ;;  %v5358_v58 = vmax.f32 %v5356_v3, %v5357_v5  ;;  %v5450_v31 = vadd.f32 %v14815_v15, %v5346_v41  ;;  %v5451_v0 = vadd.f32 %v14815_v15, %v5352_v21  ;;  %v6187_v13 = vrot.slane %v5449_v61, 7  ;;  %10241 = vmatpush3.bf16.msra.mxu1 %v16323_v27 }
 0x46e   :  { %v5408_v52 = vmax.f32 %v14738_v12, %v5407_v44  ;;  %v5363_v60 = vrot.slane %v5362_v28, 1  ;;  %v5367_v51 = vrot.slane %v5366_v46, 2  ;;  %v5373_v54 = vrot.slane %v5372_v23, 2  ;;  %10243 = vmatprep.subr.bf16.mxu1 %v16345_v48 }
 0x46f   :  { %v5452_v34 = vadd.f32 %v14815_v15, %v5358_v58  ;;  %v6188_v45 = vsel %vm6156_vm6, %v6187_v13, %v5448_v62  ;;  %v6189_v55 = vrot.slane %v5450_v31, 6  ;;  %v6191_v18 = vrot.slane %v5451_v0, 5 }
 0x470   :  { %v5364_v10 = vmax.f32 %v5362_v28, %v5363_v60  ;;  %v5368_v2 = vmax.f32 %v5366_v46, %v5367_v51  ;;  %v5374_v38 = vmax.f32 %v5372_v23, %v5373_v54  ;;  %v16346_v12 = vcombine.low %v14752_v29, %v14754_v39 }
 0x471   :  { %v5192_v25 = vrot.slane %v5184_v36, %v12529_v56  ;;  %v6190_v20 = vsel %vm3339_vm0, %v6189_v55, %v6188_v45  ;;  %v6193_v49 = vrot.slane %v5452_v34, 4  ;;  %10245 = vmatpush3.bf16.msra.mxu1 %v16345_v48  ;;  %v5403_v29 = vrot.slane %v14841_v33, 2 }
 0x472   :  { %v5199_v44 = vrot.slane %v16346_v12, %v12529_v56  ;;  %v5369_v41 = vrot.slane %v5368_v2, 1  ;;  %v5375_v19 = vrot.slane %v5374_v38, 1  ;;  %v5453_v3 = vadd.f32 %v14815_v15, %v5364_v10  ;;  %10247 = vmatprep.subr.bf16.mxu1 %v16347_v14 }
 0x473   :  { %v6192_v59 = vsel %vm6161_vm7, %v6191_v18, %v6190_v20  ;;  %v5409_v63 = vrot.slane %v5408_v52, 2  ;;  %v5382_v56 = vmax.f32 %v14662_v50, %v5381_v35  ;;  %v5388_v62 = vmax.f32 %v14805_v6, %v5387_v53 }
 0x474   :  { %v6194_v39 = vsel %vm3341_vm1, %v6193_v49, %v6192_v59  ;;  %v5370_v57 = vmax.f32 %v5368_v2, %v5369_v41  ;;  %v5376_v47 = vmax.f32 %v5374_v38, %v5375_v19  ;;  %v6195_v36 = vrot.slane %v5453_v3, 3 }
 0x475   :  { %v5200_v21 = vcombine.low %v5192_v25, %v5199_v44  ;;  %v5394_v5 = vmax.f32 %v5392_v1, %v5393_v9  ;;  %10249 = vmatpush3.bf16.msra.mxu1 %v16347_v14  ;;  %v5398_v23 = vmax.f32 %v14838_v8, %v5397_v40  ;;  %v5404_v50 = vmax.f32 %v14841_v33, %v5403_v29  ;;  %v16348_v25 = vld [vmem:[#allocation25_spill] sm:$0xff] }
 0x476   :  { %v5454_v61 = vadd.f32 %v14815_v15, %v5370_v57  ;;  %v5455_v28 = vadd.f32 %v14815_v15, %v5376_v47  ;;  %v6196_v46 = vsel %vm6166_vm8, %v6195_v36, %v6194_v39  ;;  %10251 = vmatprep.subr.bf16.mxu1 %v14301_v24  ;;  %v5410_v35 = vmax.f32 %v5408_v52, %v5409_v63  ;;  %v5470_v63 = vld [vmem:[%s15716_s6] sm:$0x7] }
 0x477   :  { %v5413_v58 = vrot.slane %v14798_v43, 4  ;;  %v5419_v6 = vrot.slane %v5200_v21, 4  ;;  %v5399_v9 = vrot.slane %v5398_v23, 1  ;;  %v5456_v31 = vadd.f32 %v14815_v15, %v5382_v56 }
 0x478   :  { %v6197_v53 = vrot.slane %v5454_v61, 2  ;;  %v6199_v1 = vrot.slane %v5455_v28, 1  ;;  %v5405_v0 = vrot.slane %v5404_v50, 1  ;;  %v5411_v13 = vrot.slane %v5410_v35, 1 }
 0x479   :  { %v5414_v60 = vmax.f32 %v14798_v43, %v5413_v58  ;;  %v5420_v51 = vmax.f32 %v5200_v21, %v5419_v6  ;;  %10253 = vmatpush3.bf16.msra.mxu1 %v14301_v24  ;;  %v5400_v54 = vmax.f32 %v5398_v23, %v5399_v9  ;;  %v5457_v33 = vadd.f32 %v14815_v15, %v5388_v62  ;;  %v16352_v9 = vld [vmem:[#allocation22_spill] sm:$0xff] }
 0x47a   :  { %v6198_v8 = vsel %vm3343_vm2, %v6197_v53, %v6196_v46  ;;  %v5458_v52 = vadd.f32 %v14815_v15, %v5394_v5  ;;  %10255 = vmatprep.subr.bf16.mxu1 %v14318_v17  ;;  %v5406_v45 = vmax.f32 %v5404_v50, %v5405_v0  ;;  %v5412_v55 = vmax.f32 %v5410_v35, %v5411_v13 }
 0x47b   :  { %v14900_v34 = vsel %vm6171_vm9, %v6199_v1, %v6198_v8  ;;  %v5415_v18 = vrot.slane %v5414_v60, 2  ;;  %v5421_v43 = vrot.slane %v5420_v51, 2  ;;  %v5459_v40 = vadd.f32 %v14815_v15, %v5400_v54  ;;  %v16351_v1 = vld [vmem:[#allocation66_spill] sm:$0xff]  ;;  %v16355_v8 = vld [vmem:[#allocation81_spill] sm:$0xff] }
 0x47c   :  { %6296 = vmatmul.mubr.f32.gmra.mrb[76].mxu0 %v14900_v34  ;;  %9737 = vmatprep.mubr.f32.mxu1 %v14900_v34  ;;  %v6201_v10 = vrot.slane %v5457_v33, 7  ;;  %v6203_v2 = vrot.slane %v5458_v52, 6  ;;  %v5460_v12 = vadd.f32 %v14815_v15, %v5406_v45  ;;  %v5461_v44 = vadd.f32 %v14815_v15, %v5412_v55  ;;  %v16356_v33 = vld [vmem:[#allocation82_spill] sm:$0xff]  ;;  %v16357_v55 = vld [vmem:[#allocation83_spill] sm:$0xff] }
 0x47d   :  { %6301 = vmatprep.mubr.f32.mxu0 %v16259_v11  ;;  %v5416_v38 = vmax.f32 %v5414_v60, %v5415_v18  ;;  %v5482_v20 = vsub.s32 2, %v16348_v25  ;;  %10257 = vmatpush3.bf16.msra.mxu1 %v14318_v17  ;;  %v5422_v49 = vmax.f32 %v5420_v51, %v5421_v43  ;;  %v6205_v19 = vrot.slane %v5459_v40, 5  ;;  %v16354_v60 = vld [vmem:[#allocation80_spill] sm:$0xff] }
 0x47e   :  { %v6202_v41 = vsel %vm6156_vm6, %v6201_v10, %v5456_v31  ;;  %10259 = vmatprep.subr.bf16.mxu1 %v14503_v16  ;;  %v6207_v29 = vrot.slane %v5460_v12, 4  ;;  %v6209_v39 = vrot.slane %v5461_v44, 3  ;;  %v16358_v43 = vld [vmem:[#allocation84_spill] sm:$0xff]  ;;  %v16360_v10 = vld [vmem:[#allocation85_spill] sm:$0xff]  ;;  %v16364_v44 = vld [vmem:[#allocation38_spill] sm:$0xff] }
 0x47f   :  { %v5417_v3 = vrot.slane %v5416_v38, 1  ;;  %v6204_v59 = vsel %vm3339_vm0, %v6203_v2, %v6202_v41  ;;  %v5423_v56 = vrot.slane %v5422_v49, 1  ;;  %v14918_v62 = vrot.slane %v5470_v63, %v5482_v20 }
 0x480   :  { %v6206_v57 = vsel %vm6161_vm7, %v6205_v19, %v6204_v59  ;;  %v16368_v19 = vld [vmem:[#allocation88_spill] sm:$0xff]  ;;  %v16370_v59 = vld [vmem:[#allocation27_spill] sm:$0xff] }
 0x481   :  { %v5418_v47 = vmax.f32 %v5416_v38, %v5417_v3  ;;  %v6208_v36 = vsel %vm3341_vm1, %v6207_v29, %v6206_v57  ;;  %10261 = vmatpush3.bf16.msra.mxu1 %v14503_v16  ;;  %v5424_v21 = vmax.f32 %v5422_v49, %v5423_v56  ;;  %v14926_v28 = vadd.f32 %v14397_v22, %v14918_v62  ;;  %v16349_v22 = vld [vmem:[#allocation37_spill] sm:$0xff]  ;;  %v16362_v38 = vld [vmem:[#allocation86_spill] sm:$0xff]  ;;  %v16366_v49 = vld [vmem:[#allocation87_spill] sm:$0xff] }
 0x482   :  { %v6210_v5 = vsel %vm6166_vm8, %v6209_v39, %v6208_v36  ;;  %10263 = vmatprep.subr.bf16.mxu1 %v14616_v4  ;;  %v14931_v23 = vadd.f32 %v14403_v42, %v14918_v62  ;;  %v14935_v50 = vadd.f32 %v14412_v26, %v14918_v62  ;;  %v14939_v35 = vadd.f32 %v14420_v32, %v14918_v62  ;;  %v16350_v42 = vld [vmem:[#allocation23_spill] sm:$0xff]  ;;  %v16372_v39 = vld [vmem:[#allocation44_spill] sm:$0xff]  ;;  %v16376_v36 = vld [vmem:[#allocation89_spill] sm:$0xff] }
 0x483   :  { %v5462_v61 = vadd.f32 %v14815_v15, %v5418_v47  ;;  %v5463_v46 = vadd.f32 %v14815_v15, %v5424_v21  ;;  %v14943_v6 = vadd.f32 %v14429_v37, %v14918_v62  ;;  %v14947_v15 = vadd.f32 %v16349_v22, %v14918_v62  ;;  %v16353_v37 = vld [vmem:[#allocation65_spill] sm:$0xff]  ;;  %v16374_v57 = vld [vmem:[#allocation28_spill] sm:$0xff] }
 0x484   :  { %v14951_v53 = vadd.f32 %v16350_v42, %v14918_v62  ;;  %v14956_v32 = vadd.f32 %v16351_v1, %v14918_v62  ;;  %v14960_v31 = vadd.f32 %v16352_v9, %v14918_v62  ;;  %v14964_v0 = vadd.f32 %v16353_v37, %v14918_v62  ;;  %v16382_v22 = vld [vmem:[#allocation24_spill] sm:$0xff] }
 0x485   :  { %v6211_v58 = vrot.slane %v5462_v61, 2  ;;  %10265 = vmatpush3.bf16.msra.mxu1 %v14616_v4  ;;  %v6213_v26 = vrot.slane %v5463_v46, 1  ;;  %v14970_v51 = vadd.f32 %v16354_v60, %v14918_v62  ;;  %v14974_v54 = vadd.f32 %v16355_v8, %v14918_v62  ;;  %v16380_v46 = vld [vmem:[#allocation91_spill] sm:$0xff] }
 0x486   :  { %10267 = vmatprep.subr.bf16.mxu1 %v14694_v30  ;;  %v14978_v52 = vadd.f32 %v16356_v33, %v14918_v62  ;;  %v14985_v18 = vadd.f32 %v16357_v55, %v14918_v62  ;;  %v14989_v40 = vadd.f32 %v16358_v43, %v14918_v62  ;;  %v14993_v2 = vadd.f32 %v16360_v10, %v14918_v62 }
 0x487   :  { %v6212_v13 = vsel %vm3343_vm2, %v6211_v58, %v6210_v5  ;;  %v14999_v12 = vadd.f32 %v16362_v38, %v14918_v62  ;;  %v15003_v20 = vadd.f32 %v16364_v44, %v14918_v62  ;;  %v15007_v41 = vadd.f32 %v16366_v49, %v14918_v62  ;;  %v16378_v5 = vld [vmem:[#allocation90_spill] sm:$0xff] }
 0x488   :  { %v14981_v45 = vsel %vm6171_vm9, %v6213_v26, %v6212_v13  ;;  %16359 = vst [vmem:[#allocation26_spill] sm:$0xff] %v14989_v40  ;;  %16361 = vst [vmem:[#allocation48_spill] sm:$0xff] %v14993_v2  ;;  %v15011_v3 = vadd.f32 %v16368_v19, %v14918_v62  ;;  %v15015_v29 = vadd.f32 %v16370_v59, %v14918_v62  ;;  %v16384_v26 = vld [vmem:[#allocation92_spill] sm:$0xff]  ;;  %v5474_v13 = vsub.s32 0, %v16348_v25  ;;  %v15059_v59 = vld [vmem:[%s15717_s7] ss:$0 sm:$0xff] }
 0x489   :  { %6302 = vmatmul.mubr.f32.gmra.mrb[78].mxu0 %v14981_v45  ;;  %9738 = vmatmul.mubr.f32.gmra.mrb[174].mxu1 %v14981_v45  ;;  %16363 = vst [vmem:[#allocation69_spill] sm:$0xff] %v14999_v12  ;;  %16365 = vst [vmem:[#allocation70_spill] sm:$0xff] %v15003_v20  ;;  %v15019_v56 = vadd.f32 %v16372_v39, %v14918_v62  ;;  %v15023_v47 = vadd.f32 %v16374_v57, %v14918_v62  ;;  %v5478_v55 = vsub.s32 1, %v16348_v25 }
 0x48a   :  { %16367 = vst [vmem:[#allocation67_spill] sm:$0xff] %v15007_v41  ;;  %16369 = vst [vmem:[#allocation68_spill] sm:$0xff] %v15011_v3  ;;  %6555 = vmatprep.mubr.f32.mxu0 %v16259_v11  ;;  %v15028_v21 = vadd.f32 %v16376_v36, %v14918_v62  ;;  %v15032_v61 = vadd.f32 %v16378_v5, %v14918_v62  ;;  %v15036_v58 = vadd.f32 %v16380_v46, %v14918_v62 }
 0x48b   :  { %16371 = vst [vmem:[#allocation29_spill] sm:$0xff] %v15015_v29  ;;  %16373 = vst [vmem:[#allocation50_spill] sm:$0xff] %v15019_v56  ;;  %v15040_v42 = vadd.f32 %v16382_v22, %v14918_v62  ;;  %10269 = vmatpush3.bf16.msra.mxu1 %v14694_v30  ;;  %v15045_v1 = vadd.f32 %v16384_v26, %v14918_v62  ;;  %v15049_v60 = vrot.slane %v5470_v63, %v5474_v13  ;;  %v16401_v56 = vld [vmem:[#allocation49_spill] sm:$0xff] }
 0x48c   :  { %16375 = vst [vmem:[#allocation30_spill] sm:$0xff] %v15023_v47  ;;  %16377 = vst [vmem:[#allocation42_spill] sm:$0xff] %v15028_v21  ;;  %10303 = vmatprep.subr.bf16.mxu1 %v16323_v27  ;;  %v15053_v43 = vrot.slane %v5470_v63, %v5478_v55  ;;  %v16399_v47 = vld [vmem:[#allocation43_spill] sm:$0xff] }
 0x48d   :  { %16379 = vst [vmem:[#allocation31_spill] sm:$0xff] %v15032_v61  ;;  %16381 = vst [vmem:[#allocation71_spill] sm:$0xff] %v15036_v58  ;;  %v16394_v61 = vld [vmem:[#allocation34_spill] sm:$0xff]  ;;  %v16397_v58 = vld [vmem:[#allocation39_spill] sm:$0xff] }
 0x48e   :  { %16383 = vst [vmem:[#allocation55_spill] sm:$0xff] %v15040_v42  ;;  %16385 = vst [vmem:[#allocation46_spill] sm:$0xff] %v15045_v1  ;;  %v16387_v42 = vld [vmem:[#allocation17_spill] sm:$0xff]  ;;  %v16400_v21 = vld [vmem:[#allocation79_spill] sm:$0xff] }
 0x48f   :  { %v16393_v1 = vld [vmem:[#allocation33_spill] sm:$0xff] }
 0x4d7   :  { %v6285_v9 = vpop.f32.mrb[72].mxu0 }
 0x4d8   :  { %v6287_v37 = vpop.f32.mrb[73].mxu0  ;;  %v10688_v8 = vadd.f32 %v6285_v9, %v15049_v60  ;;  %v16386_v9 = vld [vmem:[#allocation77_spill] sm:$0xff] }
 0x4d9   :  { %v10689_v10 = vadd.f32 %v6287_v37, %v15053_v43  ;;  %v5916_v37 = vadd.f32 %v16386_v9, %v14918_v62 }
 0x4da   :  { %v9008_v33 = vmul.f32 -1.442695, %v10688_v8 }
 0x4db   :  { %v9012_v38 = vmul.f32 -1.442695, %v10689_v10 }
 0x4dc   :  { %10826 = vpow2.f32 %v9008_v33 }
 0x4dd   :  { %10828 = vpow2.f32 %v9012_v38 }
 0x4e6   :  { %v10827_v44 = vpop.eup %10826 }
 0x4e7   :  { %v6409_v49 = vadd.f32 1.0, %v10827_v44  ;;  %v10829_v19 = vpop.eup %10828 }
 0x4e8   :  { %v6437_v39 = vadd.f32 1.0, %v10829_v19 }
 0x4e9   :  { %10830 = vrcp.f32 %v6409_v49 }
 0x4ea   :  { %10832 = vrcp.f32 %v6437_v39 }
 0x4f3   :  { %v10831_v25 = vpop.eup %10830 }
 0x4f4   :  { %v10833_v10 = vpop.eup %10832 }
 0x4f5   :  { %v6471_v19 = vsub.f32 1.0, %v10833_v10 }
 0x53f   :  { %v6291_v57 = vpop.f32.mrb[74].mxu0  ;;  %v9736_v36 = vpop.f32.mrb[172].mxu1 }
 0x540   :  { %v10690_v63 = vadd.f32 %v6291_v57, %v15049_v60  ;;  %v6293_v5 = vpop.f32.mrb[75].mxu0  ;;  %v6374_v46 = vpop.f32.mrb[173].mxu1 }
 0x541   :  { %v6455_v22 = vadd.f32 %v15059_v59, %v6374_v46  ;;  %v10691_v13 = vadd.f32 %v6293_v5, %v15053_v43  ;;  %v6479_v5 = vmul.f32 %v10833_v10, %v16387_v42  ;;  %v6456_v42 = vadd.f32 %v9736_v36, %v15059_v59  ;;  %v16390_v10 = vld [vmem:[#allocation54_spill] sm:$0xff] }
 0x542   :  { %v9009_v26 = vmul.f32 -1.442695, %v10690_v63 }
 0x543   :  { %v6459_v8 = vmul.f32 %v10831_v25, %v6455_v22  ;;  %v9013_v55 = vmul.f32 -1.442695, %v10691_v13 }
 0x544   :  { %10834 = vpow2.f32 %v9009_v26 }
 0x545   :  { %v6463_v33 = vadd.f32 %v6459_v8, %v5916_v37  ;;  %v16388_v37 = vld [vmem:[#allocation19_spill] sm:$0xff]  ;;  %v16389_v8 = vld [vmem:[#allocation32_spill] sm:$0xff] }
 0x547   :  { %10836 = vtanh.f32 %v6463_v33 }
 0x548   :  { %10838 = vpow2.f32 %v9013_v55 }
 0x54e   :  { %v10835_v38 = vpop.eup %10834 }
 0x54f   :  { %v6410_v44 = vadd.f32 1.0, %v10835_v38  ;;  %v6297_v49 = vpop.f32.mrb[76].mxu0  ;;  %v16391_v38 = vld [vmem:[#allocation76_spill] sm:$0xff] }
 0x550   :  { %v10692_v57 = vadd.f32 %v6297_v49, %v15049_v60  ;;  %v6299_v63 = vpop.f32.mrb[77].mxu0 }
 0x551   :  { %v10837_v46 = vpop.eup %10836  ;;  %10840 = vrcp.f32 %v6410_v44  ;;  %v10693_v26 = vadd.f32 %v6299_v63, %v15053_v43  ;;  %v5921_v44 = vadd.f32 %v16391_v38, %v14918_v62  ;;  %v16392_v63 = vld [vmem:[#allocation53_spill] sm:$0xff] }
 0x552   :  { %v9010_v9 = vmul.f32 -1.442695, %v10692_v57  ;;  %v6475_v39 = vmul.f32 %v10837_v46, %v6471_v19  ;;  %v10839_v22 = vpop.eup %10838 }
 0x553   :  { %v6438_v13 = vadd.f32 1.0, %v10839_v22  ;;  %v9014_v33 = vmul.f32 -1.442695, %v10693_v26 }
 0x554   :  { %10842 = vpow2.f32 %v9010_v9  ;;  %v15068_v25 = vadd.f32 %v6479_v5, %v6475_v39 }
 0x555   :  { %10844 = vrcp.f32 %v6438_v13 }
 0x556   :  { %6556 = vmatmul.mubr.f32.vlgmr.msra.gmra.mrb[80].mxu0 %v15068_v25  ;;  %9772 = vmatprep.mubr.f32.mxu1 %v15068_v25  ;;  %10846 = vpow2.f32 %v9014_v33  ;;  %v16396_v33 = vld [vmem:[#allocation41_spill] sm:$0xff] }
 0x557   :  { %6561 = vmatprep.mubr.f32.mxu0 %v16259_v11  ;;  %10273 = vmatpush1.bf16.msra.mxu0 %v16388_v37 }
 0x558   :  { %10275 = vmatprep.subr.bf16.mxu0 %v16389_v8 }
 0x55b   :  { %v10841_v55 = vpop.eup %10840  ;;  %10277 = vmatpush1.bf16.msra.mxu0 %v16390_v10 }
 0x55c   :  { %v6460_v49 = vmul.f32 %v10841_v55, %v6456_v42  ;;  %v6303_v19 = vpop.f32.mrb[78].mxu0  ;;  %v9739_v57 = vpop.f32.mrb[174].mxu1  ;;  %10279 = vmatprep.subr.bf16.mxu0 %v16392_v63  ;;  %v16395_v42 = vld [vmem:[#allocation35_spill] sm:$0xff] }
 0x55d   :  { %v10694_v46 = vadd.f32 %v6303_v19, %v15049_v60  ;;  %v6305_v9 = vpop.f32.mrb[79].mxu0  ;;  %v6384_v39 = vpop.f32.mrb[175].mxu1 }
 0x55e   :  { %v10843_v5 = vpop.eup %10842  ;;  %v6464_v22 = vadd.f32 %v6460_v49, %v5921_v44  ;;  %v10695_v13 = vadd.f32 %v6305_v9, %v15053_v43  ;;  %v16398_v44 = vld [vmem:[#allocation45_spill] sm:$0xff] }
 0x55f   :  { %v6411_v36 = vadd.f32 1.0, %v10843_v5  ;;  %v9011_v26 = vmul.f32 -1.442695, %v10694_v46  ;;  %10281 = vmatpush1.bf16.msra.mxu0 %v16393_v1  ;;  %v10845_v55 = vpop.eup %10844 }
 0x560   :  { %10848 = vtanh.f32 %v6464_v22  ;;  %10283 = vmatprep.subr.bf16.mxu0 %v16394_v61  ;;  %v9015_v38 = vmul.f32 -1.442695, %v10695_v13  ;;  %v10847_v19 = vpop.eup %10846  ;;  %v6472_v49 = vsub.f32 1.0, %v10845_v55  ;;  %v6457_v22 = vadd.f32 %v15059_v59, %v6384_v39 }
 0x561   :  { %10850 = vrcp.f32 %v6411_v36  ;;  %v6439_v5 = vadd.f32 1.0, %v10847_v19  ;;  %v5926_v13 = vadd.f32 %v16400_v21, %v14918_v62  ;;  %v16403_v21 = vld [vmem:[#allocation7_spill] sm:$0xff] }
 0x562   :  { %10852 = vpow2.f32 %v9011_v26  ;;  %v6480_v26 = vmul.f32 %v10845_v55, %v14852_v7  ;;  %v16402_v7 = vld [vmem:[#allocation8_spill] sm:$0xff] }
 0x563   :  { %10285 = vmatpush1.bf16.msra.mxu0 %v16395_v42  ;;  %10854 = vpow2.f32 %v9015_v38 }
 0x564   :  { %10287 = vmatprep.subr.bf16.mxu0 %v16396_v33  ;;  %10856 = vrcp.f32 %v6439_v5 }
 0x567   :  { %10289 = vmatpush1.bf16.msra.mxu0 %v16397_v58 }
 0x568   :  { %10291 = vmatprep.subr.bf16.mxu0 %v16398_v44 }
 0x56a   :  { %v10849_v46 = vpop.eup %10848 }
 0x56b   :  { %v10851_v36 = vpop.eup %10850  ;;  %v6476_v9 = vmul.f32 %v10849_v46, %v6472_v49  ;;  %10293 = vmatpush1.bf16.msra.mxu0 %v16399_v47  ;;  %v6458_v46 = vadd.f32 %v9739_v57, %v15059_v59 }
 0x56c   :  { %v6461_v29 = vmul.f32 %v10851_v36, %v6457_v22  ;;  %10295 = vmatprep.subr.bf16.mxu0 %v16401_v56  ;;  %v10853_v41 = vpop.eup %10852  ;;  %v16406_v22 = vld [vmem:[#allocation78_spill] sm:$0xff] }
 0x56d   :  { %v15095_v3 = vadd.f32 %v6480_v26, %v6476_v9  ;;  %v6412_v19 = vadd.f32 1.0, %v10853_v41  ;;  %v10855_v39 = vpop.eup %10854  ;;  %v16404_v41 = vld [vmem:[#allocation11_spill] sm:$0xff]  ;;  %v5931_v36 = vadd.f32 %v16406_v22, %v14918_v62 }
 0x56e   :  { %v6465_v38 = vadd.f32 %v6461_v29, %v5926_v13  ;;  %v16405_v29 = vld [vmem:[#allocation16_spill] sm:$0xff]  ;;  %v6440_v55 = vadd.f32 1.0, %v10855_v39  ;;  %v10857_v49 = vpop.eup %10856 }
 0x56f   :  { %6562 = vmatmul.mubr.f32.gmra.mrb[82].mxu0 %v15095_v3  ;;  %9773 = vmatmul.mubr.f32.vlgmr.msra.gmra.mrb[176].mxu1 %v15095_v3  ;;  %10858 = vrcp.f32 %v6412_v19  ;;  %v6473_v26 = vsub.f32 1.0, %v10857_v49  ;;  %v6481_v39 = vmul.f32 %v10857_v49, %v14900_v34 }
 0x570   :  { %6567 = vmatprep.mubr.f32.mxu0 %v16259_v11  ;;  %10305 = vmatpush3.bf16.msra.mxu1 %v16323_v27  ;;  %10860 = vtanh.f32 %v6465_v38 }
 0x571   :  { %10307 = vmatprep.subr.bf16.mxu1 %v16345_v48  ;;  %10297 = vmatpush1.bf16.msra.mxu0 %v16402_v7  ;;  %10862 = vrcp.f32 %v6440_v55 }
 0x572   :  { %10299 = vmatprep.subr.bf16.mxu0 %v16403_v21 }
 0x574   :  { %10309 = vmatpush3.bf16.msra.mxu1 %v16345_v48 }
 0x575   :  { %10311 = vmatprep.subr.bf16.mxu1 %v16347_v14  ;;  %10301 = vmatpush1.bf16.msra.mxu0 %v16404_v41 }
 0x576   :  { %10335 = vmatprep.subr.bf16.mxu0 %v16405_v29 }
 0x578   :  { %10313 = vmatpush3.bf16.msra.mxu1 %v16347_v14 }
 0x579   :  { %10315 = vmatprep.subr.bf16.mxu1 %v14301_v24  ;;  %v10859_v5 = vpop.eup %10858 }
 0x57a   :  { %v6462_v9 = vmul.f32 %v10859_v5, %v6458_v46  ;;  %v10861_v13 = vpop.eup %10860 }
 0x57b   :  { %v6477_v38 = vmul.f32 %v10861_v13, %v6473_v26  ;;  %v10863_v62 = vpop.eup %10862 }
 0x57c   :  { %10317 = vmatpush3.bf16.msra.mxu1 %v14301_v24  ;;  %v6466_v19 = vadd.f32 %v6462_v9, %v5931_v36  ;;  %v6474_v34 = vsub.f32 1.0, %v10863_v62  ;;  %v6482_v46 = vmul.f32 %v10863_v62, %v14981_v45 }
 0x57d   :  { %10319 = vmatprep.subr.bf16.mxu1 %v14318_v17  ;;  %v15116_v57 = vadd.f32 %v6481_v39, %v6477_v38 }
 0x57e   :  { %10864 = vtanh.f32 %v6466_v19 }
 0x57f   :  { %6568 = vmatmul.mubr.f32.gmra.mrb[84].mxu0 %v15116_v57  ;;  %9775 = vmatprep.mubr.f32.mxu1 %v15116_v57 }
 0x580   :  { %10321 = vmatpush3.bf16.msra.mxu1 %v14318_v17  ;;  %6573 = vmatprep.mubr.f32.mxu0 %v16259_v11 }
 0x581   :  { %10323 = vmatprep.subr.bf16.mxu1 %v14503_v16 }
 0x584   :  { %10325 = vmatpush3.bf16.msra.mxu1 %v14503_v16 }
 0x585   :  { %10327 = vmatprep.subr.bf16.mxu1 %v14616_v4 }
 0x588   :  { %10329 = vmatpush3.bf16.msra.mxu1 %v14616_v4  ;;  %v10865_v55 = vpop.eup %10864 }
 0x589   :  { %10331 = vmatprep.subr.bf16.mxu1 %v14694_v30  ;;  %v6478_v49 = vmul.f32 %v10865_v55, %v6474_v34 }
 0x58b   :  { %v15128_v5 = vadd.f32 %v6482_v46, %v6478_v49 }
 0x58c   :  { %10333 = vmatpush3.bf16.msra.mxu1 %v14694_v30 }
 0x58d   :  { %10367 = vmatprep.subr.bf16.mxu1 %v16323_v27  ;;  %6574 = vmatmul.mubr.f32.gmra.mrb[86].mxu0 %v15128_v5 }
 0x58e   :  { %9776 = vmatmul.mubr.f32.gmra.mrb[178].mxu1 %v15128_v5  ;;  %6821 = vmatprep.mubr.f32.mxu0 %v16259_v11 }
 0x629   :  { %v6557_v22 = vpop.f32.mrb[80].mxu0 }
 0x62a   :  { %v10696_v36 = vadd.f32 %v6557_v22, %v15049_v60  ;;  %v6559_v9 = vpop.f32.mrb[81].mxu0 }
 0x62b   :  { %v10697_v13 = vadd.f32 %v6559_v9, %v15053_v43 }
 0x62c   :  { %v9017_v26 = vmul.f32 -1.442695, %v10696_v36 }
 0x62d   :  { %v9021_v45 = vmul.f32 -1.442695, %v10697_v13 }
 0x62e   :  { %10866 = vpow2.f32 %v9017_v26 }
 0x62f   :  { %10868 = vpow2.f32 %v9021_v45 }
 0x638   :  { %v10867_v19 = vpop.eup %10866 }
 0x639   :  { %v6681_v38 = vadd.f32 1.0, %v10867_v19  ;;  %v10869_v39 = vpop.eup %10868 }
 0x63a   :  { %v6709_v62 = vadd.f32 1.0, %v10869_v39 }
 0x63b   :  { %10870 = vrcp.f32 %v6681_v38 }
 0x63c   :  { %10872 = vrcp.f32 %v6709_v62 }
 0x642   :  { %v6563_v34 = vpop.f32.mrb[82].mxu0  ;;  %v9774_v55 = vpop.f32.mrb[176].mxu1 }
 0x643   :  { %v10698_v49 = vadd.f32 %v6563_v34, %v15049_v60  ;;  %v6565_v46 = vpop.f32.mrb[83].mxu0  ;;  %v6646_v12 = vpop.f32.mrb[177].mxu1 }
 0x644   :  { %v6721_v22 = vadd.f32 %v15059_v59, %v6646_v12  ;;  %v10699_v9 = vadd.f32 %v6565_v46, %v15053_v43 }
 0x645   :  { %v10871_v20 = vpop.eup %10870  ;;  %v9018_v36 = vmul.f32 -1.442695, %v10698_v49 }
 0x646   :  { %v6725_v26 = vmul.f32 %v10871_v20, %v6721_v22  ;;  %v9022_v45 = vmul.f32 -1.442695, %v10699_v9  ;;  %v10873_v19 = vpop.eup %10872 }
 0x647   :  { %10874 = vpow2.f32 %v9018_v36  ;;  %v6737_v34 = vsub.f32 1.0, %v10873_v19  ;;  %v6745_v46 = vmul.f32 %v10873_v19, %v15068_v25 }
 0x648   :  { %v6729_v13 = vadd.f32 %v6725_v26, %v14931_v23 }
 0x64a   :  { %10876 = vtanh.f32 %v6729_v13 }
 0x64b   :  { %10878 = vpow2.f32 %v9022_v45 }
 0x651   :  { %v10875_v38 = vpop.eup %10874 }
 0x652   :  { %v6682_v39 = vadd.f32 1.0, %v10875_v38  ;;  %v6569_v2 = vpop.f32.mrb[84].mxu0 }
 0x653   :  { %v10700_v12 = vadd.f32 %v6569_v2, %v15049_v60  ;;  %v6571_v49 = vpop.f32.mrb[85].mxu0 }
 0x654   :  { %v10877_v40 = vpop.eup %10876  ;;  %10880 = vrcp.f32 %v6682_v39  ;;  %v10701_v36 = vadd.f32 %v6571_v49, %v15053_v43 }
 0x655   :  { %v6741_v62 = vmul.f32 %v10877_v40, %v6737_v34  ;;  %v9019_v20 = vmul.f32 -1.442695, %v10700_v12  ;;  %v10879_v23 = vpop.eup %10878  ;;  %v6722_v40 = vadd.f32 %v9774_v55, %v15059_v59 }
 0x656   :  { %v6710_v2 = vadd.f32 1.0, %v10879_v23  ;;  %v9023_v26 = vmul.f32 -1.442695, %v10701_v36 }
 0x657   :  { %v15143_v22 = vadd.f32 %v6745_v46, %v6741_v62  ;;  %10882 = vpow2.f32 %v9019_v20 }
 0x658   :  { %10884 = vrcp.f32 %v6710_v2 }
 0x659   :  { %6822 = vmatmul.mubr.f32.vlgmr.msra.gmra.mrb[88].mxu0 %v15143_v22  ;;  %9810 = vmatprep.mubr.f32.mxu1 %v15143_v22  ;;  %10886 = vpow2.f32 %v9023_v26 }
 0x65a   :  { %6827 = vmatprep.mubr.f32.mxu0 %v16259_v11  ;;  %10337 = vmatpush1.bf16.msra.mxu0 %v16388_v37 }
 0x65b   :  { %10339 = vmatprep.subr.bf16.mxu0 %v16389_v8 }
 0x65e   :  { %v10881_v9 = vpop.eup %10880  ;;  %10341 = vmatpush1.bf16.msra.mxu0 %v16390_v10 }
 0x65f   :  { %v6726_v13 = vmul.f32 %v10881_v9, %v6722_v40  ;;  %10343 = vmatprep.subr.bf16.mxu0 %v16392_v63 }
 0x660   :  { %v6575_v19 = vpop.f32.mrb[86].mxu0 }
 0x661   :  { %v6730_v45 = vadd.f32 %v6726_v13, %v14926_v28  ;;  %v9777_v38 = vpop.f32.mrb[178].mxu1  ;;  %v10702_v39 = vadd.f32 %v6575_v19, %v15049_v60  ;;  %v6577_v34 = vpop.f32.mrb[87].mxu0 }
 0x662   :  { %v6656_v12 = vpop.f32.mrb[179].mxu1  ;;  %10345 = vmatpush1.bf16.msra.mxu0 %v16393_v1  ;;  %v10883_v55 = vpop.eup %10882  ;;  %v10703_v28 = vadd.f32 %v6577_v34, %v15053_v43 }
 0x663   :  { %10888 = vtanh.f32 %v6730_v45  ;;  %10347 = vmatprep.subr.bf16.mxu0 %v16394_v61  ;;  %v6683_v49 = vadd.f32 1.0, %v10883_v55  ;;  %v9020_v62 = vmul.f32 -1.442695, %v10702_v39  ;;  %v10885_v46 = vpop.eup %10884  ;;  %v6723_v13 = vadd.f32 %v15059_v59, %v6656_v12 }
 0x664   :  { %v9024_v20 = vmul.f32 -1.442695, %v10703_v28  ;;  %v10887_v23 = vpop.eup %10886  ;;  %v6738_v36 = vsub.f32 1.0, %v10885_v46  ;;  %v6746_v9 = vmul.f32 %v10885_v46, %v15095_v3  ;;  %v6724_v28 = vadd.f32 %v9777_v38, %v15059_v59 }
 0x665   :  { %10890 = vrcp.f32 %v6683_v49  ;;  %v6711_v26 = vadd.f32 1.0, %v10887_v23 }
 0x666   :  { %10349 = vmatpush1.bf16.msra.mxu0 %v16395_v42  ;;  %10892 = vpow2.f32 %v9020_v62 }
 0x667   :  { %10351 = vmatprep.subr.bf16.mxu0 %v16396_v33  ;;  %10894 = vpow2.f32 %v9024_v20 }
 0x668   :  { %10896 = vrcp.f32 %v6711_v26 }
 0x66a   :  { %10353 = vmatpush1.bf16.msra.mxu0 %v16397_v58 }
 0x66b   :  { %10355 = vmatprep.subr.bf16.mxu0 %v16398_v44 }
 0x66d   :  { %v10889_v2 = vpop.eup %10888 }
 0x66e   :  { %v6742_v40 = vmul.f32 %v10889_v2, %v6738_v36  ;;  %10357 = vmatpush1.bf16.msra.mxu0 %v16399_v47 }
 0x66f   :  { %10359 = vmatprep.subr.bf16.mxu0 %v16401_v56  ;;  %v10891_v45 = vpop.eup %10890 }
 0x670   :  { %v15167_v19 = vadd.f32 %v6746_v9, %v6742_v40  ;;  %v6727_v39 = vmul.f32 %v10891_v45, %v6723_v13  ;;  %v10893_v34 = vpop.eup %10892 }
 0x671   :  { %v6684_v55 = vadd.f32 1.0, %v10893_v34  ;;  %v10895_v12 = vpop.eup %10894 }
 0x672   :  { %6828 = vmatmul.mubr.f32.gmra.mrb[90].mxu0 %v15167_v19  ;;  %9811 = vmatmul.mubr.f32.vlgmr.msra.gmra.mrb[180].mxu1 %v15167_v19  ;;  %v6731_v49 = vadd.f32 %v6727_v39, %v14939_v35  ;;  %v6712_v35 = vadd.f32 1.0, %v10895_v12  ;;  %v10897_v62 = vpop.eup %10896 }
 0x673   :  { %6833 = vmatprep.mubr.f32.mxu0 %v16259_v11  ;;  %10369 = vmatpush3.bf16.msra.mxu1 %v16323_v27  ;;  %10898 = vrcp.f32 %v6684_v55  ;;  %v6739_v23 = vsub.f32 1.0, %v10897_v62  ;;  %v6747_v9 = vmul.f32 %v10897_v62, %v15116_v57 }
 0x674   :  { %10371 = vmatprep.subr.bf16.mxu1 %v16345_v48  ;;  %10361 = vmatpush1.bf16.msra.mxu0 %v16402_v7  ;;  %10900 = vtanh.f32 %v6731_v49 }
 0x675   :  { %10363 = vmatprep.subr.bf16.mxu0 %v16403_v21  ;;  %10902 = vrcp.f32 %v6712_v35 }
 0x677   :  { %10373 = vmatpush3.bf16.msra.mxu1 %v16345_v48 }
 0x678   :  { %10375 = vmatprep.subr.bf16.mxu1 %v16347_v14  ;;  %10365 = vmatpush1.bf16.msra.mxu0 %v16404_v41 }
 0x679   :  { %10399 = vmatprep.subr.bf16.mxu0 %v16405_v29 }
 0x67b   :  { %10377 = vmatpush3.bf16.msra.mxu1 %v16347_v14 }
 0x67c   :  { %10379 = vmatprep.subr.bf16.mxu1 %v14301_v24 }
 0x67d   :  { %v10899_v46 = vpop.eup %10898 }
 0x67e   :  { %v6728_v20 = vmul.f32 %v10899_v46, %v6724_v28  ;;  %v10901_v36 = vpop.eup %10900 }
 0x67f   :  { %10381 = vmatpush3.bf16.msra.mxu1 %v14301_v24  ;;  %v6743_v40 = vmul.f32 %v10901_v36, %v6739_v23 }
 0x680   :  { %10383 = vmatprep.subr.bf16.mxu1 %v14318_v17  ;;  %v6732_v2 = vadd.f32 %v6728_v20, %v14935_v50  ;;  %v10903_v50 = vpop.eup %10902 }
 0x681   :  { %v15189_v26 = vadd.f32 %v6747_v9, %v6743_v40  ;;  %v6740_v38 = vsub.f32 1.0, %v10903_v50  ;;  %v6748_v39 = vmul.f32 %v10903_v50, %v15128_v5 }
 0x682   :  { %10904 = vtanh.f32 %v6732_v2 }
 0x683   :  { %10385 = vmatpush3.bf16.msra.mxu1 %v14318_v17  ;;  %6834 = vmatmul.mubr.f32.gmra.mrb[92].mxu0 %v15189_v26 }
 0x684   :  { %10387 = vmatprep.subr.bf16.mxu1 %v14503_v16  ;;  %9813 = vmatprep.mubr.f32.mxu1 %v15189_v26 }
 0x685   :  { %6839 = vmatprep.mubr.f32.mxu0 %v16259_v11 }
 0x687   :  { %10389 = vmatpush3.bf16.msra.mxu1 %v14503_v16 }
 0x688   :  { %10391 = vmatprep.subr.bf16.mxu1 %v14616_v4 }
 0x68b   :  { %10393 = vmatpush3.bf16.msra.mxu1 %v14616_v4 }
 0x68c   :  { %10395 = vmatprep.subr.bf16.mxu1 %v14694_v30  ;;  %v10905_v13 = vpop.eup %10904 }
 0x68d   :  { %v6744_v45 = vmul.f32 %v10905_v13, %v6740_v38 }
 0x68f   :  { %10397 = vmatpush3.bf16.msra.mxu1 %v14694_v30  ;;  %v15202_v34 = vadd.f32 %v6748_v39, %v6744_v45 }
 0x690   :  { %10431 = vmatprep.subr.bf16.mxu1 %v16323_v27 }
 0x691   :  { %6840 = vmatmul.mubr.f32.gmra.mrb[94].mxu0 %v15202_v34  ;;  %9814 = vmatmul.mubr.f32.gmra.mrb[182].mxu1 %v15202_v34 }
 0x692   :  { %7087 = vmatprep.mubr.f32.mxu0 %v16259_v11 }
 0x72c   :  { %v6823_v55 = vpop.f32.mrb[88].mxu0 }
 0x72d   :  { %v10704_v49 = vadd.f32 %v6823_v55, %v15049_v60  ;;  %v6825_v12 = vpop.f32.mrb[89].mxu0 }
 0x72e   :  { %v10705_v62 = vadd.f32 %v6825_v12, %v15053_v43 }
 0x72f   :  { %v9025_v35 = vmul.f32 -1.442695, %v10704_v49 }
 0x730   :  { %v9029_v28 = vmul.f32 -1.442695, %v10705_v62 }
 0x731   :  { %10906 = vpow2.f32 %v9025_v35 }
 0x732   :  { %10908 = vpow2.f32 %v9029_v28 }
 0x73b   :  { %v10907_v46 = vpop.eup %10906 }
 0x73c   :  { %v6947_v20 = vadd.f32 1.0, %v10907_v46  ;;  %v10909_v23 = vpop.eup %10908 }
 0x73d   :  { %v6975_v36 = vadd.f32 1.0, %v10909_v23 }
 0x73e   :  { %10910 = vrcp.f32 %v6947_v20 }
 0x73f   :  { %10912 = vrcp.f32 %v6975_v36 }
 0x745   :  { %v6829_v2 = vpop.f32.mrb[90].mxu0  ;;  %v9812_v40 = vpop.f32.mrb[180].mxu1 }
 0x746   :  { %v10706_v9 = vadd.f32 %v6829_v2, %v15049_v60  ;;  %v6831_v50 = vpop.f32.mrb[91].mxu0  ;;  %v6912_v38 = vpop.f32.mrb[181].mxu1 }
 0x747   :  { %v6987_v13 = vadd.f32 %v15059_v59, %v6912_v38  ;;  %v10707_v55 = vadd.f32 %v6831_v50, %v15053_v43 }
 0x748   :  { %v10911_v45 = vpop.eup %10910  ;;  %v9026_v39 = vmul.f32 -1.442695, %v10706_v9 }
 0x749   :  { %v6991_v49 = vmul.f32 %v10911_v45, %v6987_v13  ;;  %v9030_v35 = vmul.f32 -1.442695, %v10707_v55  ;;  %v10913_v62 = vpop.eup %10912 }
 0x74a   :  { %10914 = vpow2.f32 %v9026_v39  ;;  %v7003_v20 = vsub.f32 1.0, %v10913_v62  ;;  %v7011_v38 = vmul.f32 %v10913_v62, %v15143_v22 }
 0x74b   :  { %v6995_v12 = vadd.f32 %v6991_v49, %v14947_v15  ;;  %v6988_v49 = vadd.f32 %v9812_v40, %v15059_v59 }
 0x74d   :  { %10916 = vtanh.f32 %v6995_v12 }
 0x74e   :  { %10918 = vpow2.f32 %v9030_v35 }
 0x754   :  { %v10915_v28 = vpop.eup %10914 }
 0x755   :  { %v6948_v46 = vadd.f32 1.0, %v10915_v28 }
 0x756   :  { %v6835_v9 = vpop.f32.mrb[92].mxu0 }
 0x757   :  { %v10917_v23 = vpop.eup %10916  ;;  %10920 = vrcp.f32 %v6948_v46  ;;  %v10708_v36 = vadd.f32 %v6835_v9, %v15049_v60  ;;  %v6837_v50 = vpop.f32.mrb[93].mxu0 }
 0x758   :  { %v7007_v2 = vmul.f32 %v10917_v23, %v7003_v20  ;;  %v10919_v45 = vpop.eup %10918  ;;  %v10709_v55 = vadd.f32 %v6837_v50, %v15053_v43 }
 0x759   :  { %v9027_v15 = vmul.f32 -1.442695, %v10708_v36  ;;  %v6976_v39 = vadd.f32 1.0, %v10919_v45 }
 0x75a   :  { %v15215_v13 = vadd.f32 %v7011_v38, %v7007_v2  ;;  %v9031_v62 = vmul.f32 -1.442695, %v10709_v55 }
 0x75b   :  { %10922 = vpow2.f32 %v9027_v15 }
 0x75c   :  { %7088 = vmatmul.mubr.f32.vlgmr.msra.gmra.mrb[96].mxu0 %v15215_v13  ;;  %9848 = vmatprep.mubr.f32.mxu1 %v15215_v13  ;;  %10924 = vrcp.f32 %v6976_v39 }
 0x75d   :  { %7093 = vmatprep.mubr.f32.mxu0 %v16259_v11  ;;  %10401 = vmatpush1.bf16.msra.mxu0 %v16388_v37 }
 0x75e   :  { %10403 = vmatprep.subr.bf16.mxu0 %v16389_v8 }
 0x761   :  { %v10921_v12 = vpop.eup %10920  ;;  %10405 = vmatpush1.bf16.msra.mxu0 %v16390_v10 }
 0x762   :  { %v6992_v35 = vmul.f32 %v10921_v12, %v6988_v49  ;;  %10407 = vmatprep.subr.bf16.mxu0 %v16392_v63 }
 0x764   :  { %v6996_v28 = vadd.f32 %v6992_v35, %v14943_v6  ;;  %v6841_v46 = vpop.f32.mrb[94].mxu0  ;;  %v9815_v20 = vpop.f32.mrb[182].mxu1 }
 0x765   :  { %10409 = vmatpush1.bf16.msra.mxu0 %v16393_v1  ;;  %v10710_v40 = vadd.f32 %v6841_v46, %v15049_v60  ;;  %v6843_v23 = vpop.f32.mrb[95].mxu0  ;;  %v6922_v2 = vpop.f32.mrb[183].mxu1 }
 0x766   :  { %10926 = vtanh.f32 %v6996_v28  ;;  %10411 = vmatprep.subr.bf16.mxu0 %v16394_v61  ;;  %v10923_v38 = vpop.eup %10922  ;;  %v10711_v50 = vadd.f32 %v6843_v23, %v15053_v43  ;;  %v6989_v28 = vadd.f32 %v15059_v59, %v6922_v2 }
 0x767   :  { %10928 = vpow2.f32 %v9031_v62  ;;  %v6949_v9 = vadd.f32 1.0, %v10923_v38  ;;  %v9028_v36 = vmul.f32 -1.442695, %v10710_v40  ;;  %v10925_v6 = vpop.eup %10924 }
 0x768   :  { %v7004_v45 = vsub.f32 1.0, %v10925_v6  ;;  %v9032_v39 = vmul.f32 -1.442695, %v10711_v50  ;;  %v7012_v12 = vmul.f32 %v10925_v6, %v15167_v19 }
 0x769   :  { %10413 = vmatpush1.bf16.msra.mxu0 %v16395_v42  ;;  %10930 = vrcp.f32 %v6949_v9 }
 0x76a   :  { %10415 = vmatprep.subr.bf16.mxu0 %v16396_v33  ;;  %10932 = vpow2.f32 %v9028_v36 }
 0x76b   :  { %10934 = vpow2.f32 %v9032_v39 }
 0x76d   :  { %10417 = vmatpush1.bf16.msra.mxu0 %v16397_v58 }
 0x76e   :  { %10419 = vmatprep.subr.bf16.mxu0 %v16398_v44 }
 0x770   :  { %v10927_v15 = vpop.eup %10926 }
 0x771   :  { %v10929_v55 = vpop.eup %10928  ;;  %v7008_v49 = vmul.f32 %v10927_v15, %v7004_v45  ;;  %10421 = vmatpush1.bf16.msra.mxu0 %v16399_v47 }
 0x772   :  { %10423 = vmatprep.subr.bf16.mxu0 %v16401_v56  ;;  %v6977_v62 = vadd.f32 1.0, %v10929_v55 }
 0x773   :  { %v15238_v35 = vadd.f32 %v7012_v12, %v7008_v49  ;;  %v10931_v46 = vpop.eup %10930 }
 0x774   :  { %v6993_v40 = vmul.f32 %v10931_v46, %v6989_v28  ;;  %v10933_v23 = vpop.eup %10932  ;;  %10936 = vrcp.f32 %v6977_v62 }
 0x775   :  { %7094 = vmatmul.mubr.f32.gmra.mrb[98].mxu0 %v15238_v35  ;;  %9849 = vmatmul.mubr.f32.vlgmr.msra.gmra.mrb[184].mxu1 %v15238_v35  ;;  %v6950_v38 = vadd.f32 1.0, %v10933_v23  ;;  %v10935_v2 = vpop.eup %10934 }
 0x776   :  { %7099 = vmatprep.mubr.f32.mxu0 %v16259_v11  ;;  %10433 = vmatpush3.bf16.msra.mxu1 %v16323_v27  ;;  %v6997_v9 = vadd.f32 %v6993_v40, %v14956_v32  ;;  %v6978_v36 = vadd.f32 1.0, %v10935_v2  ;;  %v6990_v32 = vadd.f32 %v9815_v20, %v15059_v59 }
 0x777   :  { %10435 = vmatprep.subr.bf16.mxu1 %v16345_v48  ;;  %10425 = vmatpush1.bf16.msra.mxu0 %v16402_v7  ;;  %10938 = vrcp.f32 %v6950_v38 }
 0x778   :  { %10427 = vmatprep.subr.bf16.mxu0 %v16403_v21  ;;  %10940 = vtanh.f32 %v6997_v9 }
 0x779   :  { %10942 = vrcp.f32 %v6978_v36 }
 0x77a   :  { %10437 = vmatpush3.bf16.msra.mxu1 %v16345_v48 }
 0x77b   :  { %10439 = vmatprep.subr.bf16.mxu1 %v16347_v14  ;;  %10429 = vmatpush1.bf16.msra.mxu0 %v16404_v41 }
 0x77c   :  { %10463 = vmatprep.subr.bf16.mxu0 %v16405_v29 }
 0x77e   :  { %10441 = vmatpush3.bf16.msra.mxu1 %v16347_v14  ;;  %v10937_v6 = vpop.eup %10936 }
 0x77f   :  { %10443 = vmatprep.subr.bf16.mxu1 %v14301_v24  ;;  %v7005_v15 = vsub.f32 1.0, %v10937_v6  ;;  %v7013_v12 = vmul.f32 %v10937_v6, %v15189_v26 }
 0x781   :  { %v10939_v50 = vpop.eup %10938 }
 0x782   :  { %10445 = vmatpush3.bf16.msra.mxu1 %v14301_v24  ;;  %v6994_v45 = vmul.f32 %v10939_v50, %v6990_v32  ;;  %v10941_v39 = vpop.eup %10940 }
 0x783   :  { %10447 = vmatprep.subr.bf16.mxu1 %v14318_v17  ;;  %v7009_v49 = vmul.f32 %v10941_v39, %v7005_v15 }
 0x784   :  { %v6998_v55 = vadd.f32 %v6994_v45, %v14951_v53  ;;  %v10943_v53 = vpop.eup %10942 }
 0x785   :  { %v15262_v62 = vadd.f32 %v7013_v12, %v7009_v49  ;;  %v7006_v20 = vsub.f32 1.0, %v10943_v53  ;;  %v7014_v40 = vmul.f32 %v10943_v53, %v15202_v34 }
 0x786   :  { %10449 = vmatpush3.bf16.msra.mxu1 %v14318_v17  ;;  %10944 = vtanh.f32 %v6998_v55 }
 0x787   :  { %10451 = vmatprep.subr.bf16.mxu1 %v14503_v16  ;;  %7100 = vmatmul.mubr.f32.gmra.mrb[100].mxu0 %v15262_v62 }
 0x788   :  { %9851 = vmatprep.mubr.f32.mxu1 %v15262_v62  ;;  %7105 = vmatprep.mubr.f32.mxu0 %v16259_v11 }
 0x78a   :  { %10453 = vmatpush3.bf16.msra.mxu1 %v14503_v16 }
 0x78b   :  { %10455 = vmatprep.subr.bf16.mxu1 %v14616_v4 }
 0x78e   :  { %10457 = vmatpush3.bf16.msra.mxu1 %v14616_v4 }
 0x78f   :  { %10459 = vmatprep.subr.bf16.mxu1 %v14694_v30 }
 0x790   :  { %v10945_v28 = vpop.eup %10944 }
 0x791   :  { %v7010_v46 = vmul.f32 %v10945_v28, %v7006_v20 }
 0x792   :  { %10461 = vmatpush3.bf16.msra.mxu1 %v14694_v30 }
 0x793   :  { %10495 = vmatprep.subr.bf16.mxu1 %v16323_v27  ;;  %v15274_v23 = vadd.f32 %v7014_v40, %v7010_v46 }
 0x795   :  { %16407 = vst [vmem:[#allocation47_spill] sm:$0xff] %v15274_v23  ;;  %7106 = vmatmul.mubr.f32.gmra.mrb[102].mxu0 %v15274_v23  ;;  %9852 = vmatmul.mubr.f32.gmra.mrb[186].mxu1 %v15274_v23 }
 0x796   :  { %7353 = vmatprep.mubr.f32.mxu0 %v16259_v11 }
 0x82f   :  { %v7089_v38 = vpop.f32.mrb[96].mxu0 }
 0x830   :  { %v10712_v9 = vadd.f32 %v7089_v38, %v15049_v60  ;;  %v7091_v2 = vpop.f32.mrb[97].mxu0 }
 0x831   :  { %v10713_v6 = vadd.f32 %v7091_v2, %v15053_v43 }
 0x832   :  { %v9033_v36 = vmul.f32 -1.442695, %v10712_v9 }
 0x833   :  { %v9037_v32 = vmul.f32 -1.442695, %v10713_v6 }
 0x834   :  { %10946 = vpow2.f32 %v9033_v36 }
 0x835   :  { %10948 = vpow2.f32 %v9037_v32 }
 0x83e   :  { %v10947_v50 = vpop.eup %10946 }
 0x83f   :  { %v7213_v45 = vadd.f32 1.0, %v10947_v50  ;;  %v10949_v15 = vpop.eup %10948 }
 0x840   :  { %v7241_v39 = vadd.f32 1.0, %v10949_v15 }
 0x841   :  { %10950 = vrcp.f32 %v7213_v45 }
 0x842   :  { %10952 = vrcp.f32 %v7241_v39 }
 0x848   :  { %v7095_v55 = vpop.f32.mrb[98].mxu0  ;;  %v9850_v49 = vpop.f32.mrb[184].mxu1 }
 0x849   :  { %v10714_v12 = vadd.f32 %v7095_v55, %v15049_v60  ;;  %v7097_v53 = vpop.f32.mrb[99].mxu0  ;;  %v7178_v20 = vpop.f32.mrb[185].mxu1 }
 0x84a   :  { %v7253_v28 = vadd.f32 %v15059_v59, %v7178_v20  ;;  %v10715_v38 = vadd.f32 %v7097_v53, %v15053_v43 }
 0x84b   :  { %v10951_v46 = vpop.eup %10950  ;;  %v9034_v40 = vmul.f32 -1.442695, %v10714_v12 }
 0x84c   :  { %v7257_v9 = vmul.f32 %v10951_v46, %v7253_v28  ;;  %v9038_v36 = vmul.f32 -1.442695, %v10715_v38  ;;  %v10953_v6 = vpop.eup %10952  ;;  %v7254_v38 = vadd.f32 %v9850_v49, %v15059_v59 }
 0x84d   :  { %10954 = vpow2.f32 %v9034_v40  ;;  %v7269_v45 = vsub.f32 1.0, %v10953_v6  ;;  %v7277_v20 = vmul.f32 %v10953_v6, %v15215_v13 }
 0x84e   :  { %v7261_v2 = vadd.f32 %v7257_v9, %v14964_v0 }
 0x850   :  { %10956 = vtanh.f32 %v7261_v2 }
 0x851   :  { %10958 = vpow2.f32 %v9038_v36 }
 0x857   :  { %v10955_v32 = vpop.eup %10954 }
 0x858   :  { %v7214_v50 = vadd.f32 1.0, %v10955_v32 }
 0x85a   :  { %v10957_v15 = vpop.eup %10956  ;;  %10960 = vrcp.f32 %v7214_v50  ;;  %v7101_v53 = vpop.f32.mrb[100].mxu0 }
 0x85b   :  { %v7273_v55 = vmul.f32 %v10957_v15, %v7269_v45  ;;  %v10959_v39 = vpop.eup %10958  ;;  %v10716_v28 = vadd.f32 %v7101_v53, %v15049_v60  ;;  %v7103_v46 = vpop.f32.mrb[101].mxu0 }
 0x85c   :  { %v7242_v0 = vadd.f32 1.0, %v10959_v39  ;;  %v10717_v2 = vadd.f32 %v7103_v46, %v15053_v43 }
 0x85d   :  { %v15286_v12 = vadd.f32 %v7277_v20, %v7273_v55  ;;  %v9035_v40 = vmul.f32 -1.442695, %v10716_v28 }
 0x85e   :  { %v9039_v32 = vmul.f32 -1.442695, %v10717_v2 }
 0x85f   :  { %7354 = vmatmul.mubr.f32.vlgmr.msra.gmra.mrb[104].mxu0 %v15286_v12  ;;  %9886 = vmatprep.mubr.f32.mxu1 %v15286_v12  ;;  %10962 = vpow2.f32 %v9035_v40 }
 0x860   :  { %7359 = vmatprep.mubr.f32.mxu0 %v16259_v11  ;;  %10465 = vmatpush1.bf16.msra.mxu0 %v16388_v37  ;;  %10964 = vrcp.f32 %v7242_v0 }
 0x861   :  { %10467 = vmatprep.subr.bf16.mxu0 %v16389_v8 }
 0x864   :  { %v10961_v9 = vpop.eup %10960  ;;  %10469 = vmatpush1.bf16.msra.mxu0 %v16390_v10 }
 0x865   :  { %v7258_v36 = vmul.f32 %v10961_v9, %v7254_v38  ;;  %10471 = vmatprep.subr.bf16.mxu0 %v16392_v63 }
 0x867   :  { %v7262_v6 = vadd.f32 %v7258_v36, %v14960_v31 }
 0x868   :  { %10473 = vmatpush1.bf16.msra.mxu0 %v16393_v1  ;;  %v7107_v50 = vpop.f32.mrb[102].mxu0  ;;  %v9853_v59 = vpop.f32.mrb[186].mxu1 }
 0x869   :  { %10966 = vtanh.f32 %v7262_v6  ;;  %10475 = vmatprep.subr.bf16.mxu0 %v16394_v61  ;;  %v10718_v49 = vadd.f32 %v7107_v50, %v15049_v60  ;;  %v7109_v45 = vpop.f32.mrb[103].mxu0  ;;  %v7188_v15 = vpop.f32.mrb[187].mxu1  ;;  %v15317_v6 = vld [vmem:[%s15717_s7] ss:$0 sm:$0xff] }
 0x86a   :  { %10968 = vpow2.f32 %v9039_v32  ;;  %v10963_v55 = vpop.eup %10962  ;;  %v10719_v53 = vadd.f32 %v7109_v45, %v15053_v43  ;;  %v7255_v32 = vadd.f32 %v15317_v6, %v7188_v15 }
 0x86b   :  { %v7215_v20 = vadd.f32 1.0, %v10963_v55  ;;  %v9036_v31 = vmul.f32 -1.442695, %v10718_v49  ;;  %v10965_v39 = vpop.eup %10964 }
 0x86c   :  { %10477 = vmatpush1.bf16.msra.mxu0 %v16395_v42  ;;  %v7270_v28 = vsub.f32 1.0, %v10965_v39  ;;  %v7278_v40 = vmul.f32 %v10965_v39, %v15238_v35  ;;  %v9040_v38 = vmul.f32 -1.442695, %v10719_v53  ;;  %v7256_v39 = vadd.f32 %v15317_v6, %v9853_v59 }
 0x86d   :  { %10479 = vmatprep.subr.bf16.mxu0 %v16396_v33  ;;  %10970 = vrcp.f32 %v7215_v20 }
 0x86e   :  { %10972 = vpow2.f32 %v9036_v31 }
 0x86f   :  { %10974 = vpow2.f32 %v9040_v38 }
 0x870   :  { %10481 = vmatpush1.bf16.msra.mxu0 %v16397_v58 }
 0x871   :  { %10483 = vmatprep.subr.bf16.mxu0 %v16398_v44 }
 0x873   :  { %v10967_v46 = vpop.eup %10966 }
 0x874   :  { %v7274_v0 = vmul.f32 %v10967_v46, %v7270_v28  ;;  %10485 = vmatpush1.bf16.msra.mxu0 %v16399_v47  ;;  %v10969_v9 = vpop.eup %10968 }
 0x875   :  { %10487 = vmatprep.subr.bf16.mxu0 %v16401_v56  ;;  %v7243_v36 = vadd.f32 1.0, %v10969_v9 }
 0x876   :  { %v15310_v2 = vadd.f32 %v7278_v40, %v7274_v0 }
 0x877   :  { %v10971_v50 = vpop.eup %10970  ;;  %10976 = vrcp.f32 %v7243_v36 }
 0x878   :  { %7360 = vmatmul.mubr.f32.gmra.mrb[106].mxu0 %v15310_v2  ;;  %9887 = vmatmul.mubr.f32.vlgmr.msra.gmra.mrb[188].mxu1 %v15310_v2  ;;  %v7259_v49 = vmul.f32 %v10971_v50, %v7255_v32  ;;  %v10973_v45 = vpop.eup %10972 }
 0x879   :  { %7365 = vmatprep.mubr.f32.mxu0 %v16259_v11  ;;  %10497 = vmatpush3.bf16.msra.mxu1 %v16323_v27  ;;  %v7216_v55 = vadd.f32 1.0, %v10973_v45  ;;  %v10975_v15 = vpop.eup %10974 }
 0x87a   :  { %10499 = vmatprep.subr.bf16.mxu1 %v16345_v48  ;;  %10489 = vmatpush1.bf16.msra.mxu0 %v16402_v7  ;;  %v7263_v20 = vadd.f32 %v7259_v49, %v14974_v54  ;;  %v7244_v31 = vadd.f32 1.0, %v10975_v15 }
 0x87b   :  { %10491 = vmatprep.subr.bf16.mxu0 %v16403_v21  ;;  %10978 = vrcp.f32 %v7216_v55 }
 0x87c   :  { %10980 = vtanh.f32 %v7263_v20 }
 0x87d   :  { %10501 = vmatpush3.bf16.msra.mxu1 %v16345_v48  ;;  %10982 = vrcp.f32 %v7244_v31 }
 0x87e   :  { %10503 = vmatprep.subr.bf16.mxu1 %v16347_v14  ;;  %10493 = vmatpush1.bf16.msra.mxu0 %v16404_v41 }
 0x87f   :  { %10527 = vmatprep.subr.bf16.mxu0 %v16405_v29 }
 0x881   :  { %10505 = vmatpush3.bf16.msra.mxu1 %v16347_v14  ;;  %v10977_v54 = vpop.eup %10976 }
 0x882   :  { %10507 = vmatprep.subr.bf16.mxu1 %v14301_v24  ;;  %v7271_v46 = vsub.f32 1.0, %v10977_v54  ;;  %v7279_v9 = vmul.f32 %v10977_v54, %v15262_v62 }
 0x885   :  { %10509 = vmatpush3.bf16.msra.mxu1 %v14301_v24  ;;  %v10979_v53 = vpop.eup %10978 }
 0x886   :  { %10511 = vmatprep.subr.bf16.mxu1 %v14318_v17  ;;  %v7260_v28 = vmul.f32 %v10979_v53, %v7256_v39  ;;  %v10981_v0 = vpop.eup %10980 }
 0x887   :  { %v7275_v38 = vmul.f32 %v10981_v0, %v7271_v46 }
 0x888   :  { %v7264_v40 = vadd.f32 %v7260_v28, %v14970_v51  ;;  %v10983_v51 = vpop.eup %10982 }
 0x889   :  { %10513 = vmatpush3.bf16.msra.mxu1 %v14318_v17  ;;  %v15340_v36 = vadd.f32 %v7279_v9, %v7275_v38  ;;  %v7272_v59 = vsub.f32 1.0, %v10983_v51  ;;  %v7280_v49 = vmul.f32 %v10983_v51, %v15274_v23 }
 0x88a   :  { %10515 = vmatprep.subr.bf16.mxu1 %v14503_v16  ;;  %10984 = vtanh.f32 %v7264_v40 }
 0x88b   :  { %7366 = vmatmul.mubr.f32.gmra.mrb[108].mxu0 %v15340_v36  ;;  %9889 = vmatprep.mubr.f32.mxu1 %v15340_v36 }
 0x88c   :  { %7371 = vmatprep.mubr.f32.mxu0 %v16259_v11 }
 0x88d   :  { %10517 = vmatpush3.bf16.msra.mxu1 %v14503_v16 }
 0x88e   :  { %10519 = vmatprep.subr.bf16.mxu1 %v14616_v4 }
 0x891   :  { %10521 = vmatpush3.bf16.msra.mxu1 %v14616_v4 }
 0x892   :  { %10523 = vmatprep.subr.bf16.mxu1 %v14694_v30 }
 0x894   :  { %v10985_v32 = vpop.eup %10984 }
 0x895   :  { %10525 = vmatpush3.bf16.msra.mxu1 %v14694_v30  ;;  %v7276_v50 = vmul.f32 %v10985_v32, %v7272_v59 }
 0x896   :  { %10559 = vmatprep.subr.bf16.mxu1 %v16323_v27 }
 0x897   :  { %v15351_v45 = vadd.f32 %v7280_v49, %v7276_v50 }
 0x899   :  { %16408 = vst [vmem:[#allocation51_spill] sm:$0xff] %v15351_v45  ;;  %7372 = vmatmul.mubr.f32.gmra.mrb[110].mxu0 %v15351_v45  ;;  %9890 = vmatmul.mubr.f32.gmra.mrb[190].mxu1 %v15351_v45 }
 0x89a   :  { %7619 = vmatprep.mubr.f32.mxu0 %v16259_v11 }
 0x932   :  { %v7355_v55 = vpop.f32.mrb[104].mxu0 }
 0x933   :  { %v10720_v20 = vadd.f32 %v7355_v55, %v15049_v60  ;;  %v7357_v15 = vpop.f32.mrb[105].mxu0 }
 0x934   :  { %v10721_v54 = vadd.f32 %v7357_v15, %v15053_v43 }
 0x935   :  { %v9041_v31 = vmul.f32 -1.442695, %v10720_v20 }
 0x936   :  { %v9045_v39 = vmul.f32 -1.442695, %v10721_v54 }
 0x937   :  { %10986 = vpow2.f32 %v9041_v31 }
 0x938   :  { %10988 = vpow2.f32 %v9045_v39 }
 0x941   :  { %v10987_v53 = vpop.eup %10986 }
 0x942   :  { %v7479_v28 = vadd.f32 1.0, %v10987_v53  ;;  %v10989_v46 = vpop.eup %10988 }
 0x943   :  { %v7507_v0 = vadd.f32 1.0, %v10989_v46 }
 0x944   :  { %10990 = vrcp.f32 %v7479_v28 }
 0x945   :  { %10992 = vrcp.f32 %v7507_v0 }
 0x94b   :  { %v7361_v40 = vpop.f32.mrb[106].mxu0  ;;  %v9888_v38 = vpop.f32.mrb[188].mxu1 }
 0x94c   :  { %v10722_v9 = vadd.f32 %v7361_v40, %v15049_v60  ;;  %v7363_v51 = vpop.f32.mrb[107].mxu0  ;;  %v7444_v59 = vpop.f32.mrb[189].mxu1 }
 0x94d   :  { %v7519_v32 = vadd.f32 %v15317_v6, %v7444_v59  ;;  %v10723_v55 = vadd.f32 %v7363_v51, %v15053_v43 }
 0x94e   :  { %v10991_v50 = vpop.eup %10990  ;;  %v9042_v49 = vmul.f32 -1.442695, %v10722_v9 }
 0x94f   :  { %v7523_v20 = vmul.f32 %v10991_v50, %v7519_v32  ;;  %v9046_v31 = vmul.f32 -1.442695, %v10723_v55  ;;  %v10993_v54 = vpop.eup %10992  ;;  %v7520_v50 = vadd.f32 %v15317_v6, %v9888_v38 }
 0x950   :  { %10994 = vpow2.f32 %v9042_v49  ;;  %v7535_v28 = vsub.f32 1.0, %v10993_v54  ;;  %v7543_v59 = vmul.f32 %v10993_v54, %v15286_v12 }
 0x951   :  { %v7527_v15 = vadd.f32 %v7523_v20, %v14985_v18 }
 0x953   :  { %10996 = vtanh.f32 %v7527_v15 }
 0x954   :  { %10998 = vpow2.f32 %v9046_v31 }
 0x95a   :  { %v10995_v39 = vpop.eup %10994 }
 0x95b   :  { %v7480_v53 = vadd.f32 1.0, %v10995_v39 }
 0x95d   :  { %v10997_v46 = vpop.eup %10996  ;;  %11000 = vrcp.f32 %v7480_v53 }
 0x95e   :  { %v7539_v40 = vmul.f32 %v10997_v46, %v7535_v28  ;;  %v10999_v9 = vpop.eup %10998  ;;  %v7367_v0 = vpop.f32.mrb[108].mxu0 }
 0x95f   :  { %v7508_v18 = vadd.f32 1.0, %v10999_v9  ;;  %v10724_v51 = vadd.f32 %v7367_v0, %v15049_v60  ;;  %v7369_v32 = vpop.f32.mrb[109].mxu0 }
 0x960   :  { %v15363_v23 = vadd.f32 %v7543_v59, %v7539_v40  ;;  %v10725_v15 = vadd.f32 %v7369_v32, %v15053_v43 }
 0x961   :  { %v9043_v49 = vmul.f32 -1.442695, %v10724_v51  ;;  %11002 = vrcp.f32 %v7508_v18 }
 0x962   :  { %7620 = vmatmul.mubr.f32.vlgmr.msra.gmra.mrb[112].mxu0 %v15363_v23  ;;  %9924 = vmatprep.mubr.f32.mxu1 %v15363_v23  ;;  %v9047_v54 = vmul.f32 -1.442695, %v10725_v15 }
 0x963   :  { %7625 = vmatprep.mubr.f32.mxu0 %v16259_v11  ;;  %10529 = vmatpush1.bf16.msra.mxu0 %v16388_v37  ;;  %11004 = vpow2.f32 %v9043_v49 }
 0x964   :  { %10531 = vmatprep.subr.bf16.mxu0 %v16389_v8 }
 0x967   :  { %v11001_v55 = vpop.eup %11000  ;;  %10533 = vmatpush1.bf16.msra.mxu0 %v16390_v10 }
 0x968   :  { %v7524_v20 = vmul.f32 %v11001_v55, %v7520_v50  ;;  %10535 = vmatprep.subr.bf16.mxu0 %v16392_v63 }
 0x96a   :  { %v7528_v31 = vadd.f32 %v7524_v20, %v14978_v52 }
 0x96b   :  { %10537 = vmatpush1.bf16.msra.mxu0 %v16393_v1  ;;  %v11003_v53 = vpop.eup %11002 }
 0x96c   :  { %11006 = vtanh.f32 %v7528_v31  ;;  %10539 = vmatprep.subr.bf16.mxu0 %v16394_v61  ;;  %v7373_v38 = vpop.f32.mrb[110].mxu0  ;;  %v9891_v39 = vpop.f32.mrb[190].mxu1  ;;  %v7536_v18 = vsub.f32 1.0, %v11003_v53  ;;  %v7544_v50 = vmul.f32 %v11003_v53, %v15310_v2 }
 0x96d   :  { %11008 = vpow2.f32 %v9047_v54  ;;  %v10726_v28 = vadd.f32 %v7373_v38, %v15049_v60  ;;  %v7375_v46 = vpop.f32.mrb[111].mxu0  ;;  %v7454_v40 = vpop.f32.mrb[191].mxu1 }
 0x96e   :  { %v11005_v59 = vpop.eup %11004  ;;  %v10727_v51 = vadd.f32 %v7375_v46, %v15053_v43  ;;  %v7521_v31 = vadd.f32 %v15317_v6, %v7454_v40  ;;  %v16409_v46 = vld [vmem:[#allocation48_spill] sm:$0xff] }
 0x96f   :  { %10541 = vmatpush1.bf16.msra.mxu0 %v16395_v42  ;;  %v7481_v52 = vadd.f32 1.0, %v11005_v59  ;;  %v9044_v9 = vmul.f32 -1.442695, %v10726_v28 }
 0x970   :  { %10543 = vmatprep.subr.bf16.mxu0 %v16396_v33  ;;  %v9048_v55 = vmul.f32 -1.442695, %v10727_v51 }
 0x971   :  { %11010 = vrcp.f32 %v7481_v52 }
 0x972   :  { %11012 = vpow2.f32 %v9044_v9 }
 0x973   :  { %10545 = vmatpush1.bf16.msra.mxu0 %v16397_v58  ;;  %11014 = vpow2.f32 %v9048_v55 }
 0x974   :  { %10547 = vmatprep.subr.bf16.mxu0 %v16398_v44 }
 0x976   :  { %v11007_v0 = vpop.eup %11006 }
 0x977   :  { %v7540_v32 = vmul.f32 %v11007_v0, %v7536_v18  ;;  %10549 = vmatpush1.bf16.msra.mxu0 %v16399_v47  ;;  %v11009_v20 = vpop.eup %11008  ;;  %v7522_v18 = vadd.f32 %v15317_v6, %v9891_v39 }
 0x978   :  { %10551 = vmatprep.subr.bf16.mxu0 %v16401_v56  ;;  %v7509_v15 = vadd.f32 1.0, %v11009_v20 }
 0x979   :  { %v15387_v49 = vadd.f32 %v7544_v50, %v7540_v32  ;;  %v16410_v50 = vld [vmem:[#allocation26_spill] sm:$0xff] }
 0x97a   :  { %11016 = vrcp.f32 %v7509_v15 }
 0x97b   :  { %7626 = vmatmul.mubr.f32.gmra.mrb[114].mxu0 %v15387_v49  ;;  %9925 = vmatmul.mubr.f32.vlgmr.msra.gmra.mrb[192].mxu1 %v15387_v49  ;;  %v11011_v54 = vpop.eup %11010 }
 0x97c   :  { %7631 = vmatprep.mubr.f32.mxu0 %v16259_v11  ;;  %10561 = vmatpush3.bf16.msra.mxu1 %v16323_v27  ;;  %v7525_v38 = vmul.f32 %v11011_v54, %v7521_v31  ;;  %v11013_v53 = vpop.eup %11012 }
 0x97d   :  { %10563 = vmatprep.subr.bf16.mxu1 %v16345_v48  ;;  %10553 = vmatpush1.bf16.msra.mxu0 %v16402_v7  ;;  %v7482_v28 = vadd.f32 1.0, %v11013_v53  ;;  %v11015_v40 = vpop.eup %11014 }
 0x97e   :  { %10555 = vmatprep.subr.bf16.mxu0 %v16403_v21  ;;  %v7529_v59 = vadd.f32 %v7525_v38, %v16409_v46  ;;  %v7510_v52 = vadd.f32 1.0, %v11015_v40 }
 0x97f   :  { %11018 = vrcp.f32 %v7482_v28 }
 0x980   :  { %10565 = vmatpush3.bf16.msra.mxu1 %v16345_v48  ;;  %11020 = vtanh.f32 %v7529_v59 }
 0x981   :  { %10567 = vmatprep.subr.bf16.mxu1 %v16347_v14  ;;  %10557 = vmatpush1.bf16.msra.mxu0 %v16404_v41  ;;  %11022 = vrcp.f32 %v7510_v52 }
 0x982   :  { %10591 = vmatprep.subr.bf16.mxu0 %v16405_v29 }
 0x984   :  { %10569 = vmatpush3.bf16.msra.mxu1 %v16347_v14  ;;  %v11017_v9 = vpop.eup %11016 }
 0x985   :  { %10571 = vmatprep.subr.bf16.mxu1 %v14301_v24  ;;  %v7537_v51 = vsub.f32 1.0, %v11017_v9  ;;  %v7545_v15 = vmul.f32 %v11017_v9, %v15340_v36 }
 0x988   :  { %10573 = vmatpush3.bf16.msra.mxu1 %v14301_v24 }
 0x989   :  { %10575 = vmatprep.subr.bf16.mxu1 %v14318_v17  ;;  %v11019_v29 = vpop.eup %11018 }
 0x98a   :  { %v7526_v0 = vmul.f32 %v11019_v29, %v7522_v18  ;;  %v11021_v32 = vpop.eup %11020 }
 0x98b   :  { %v7541_v20 = vmul.f32 %v11021_v32, %v7537_v51  ;;  %v11023_v39 = vpop.eup %11022 }
 0x98c   :  { %10577 = vmatpush3.bf16.msra.mxu1 %v14318_v17  ;;  %v7530_v55 = vadd.f32 %v7526_v0, %v16410_v50  ;;  %v7538_v54 = vsub.f32 1.0, %v11023_v39  ;;  %v7546_v28 = vmul.f32 %v11023_v39, %v15351_v45 }
 0x98d   :  { %10579 = vmatprep.subr.bf16.mxu1 %v14503_v16  ;;  %v15413_v31 = vadd.f32 %v7545_v15, %v7541_v20 }
 0x98e   :  { %11024 = vtanh.f32 %v7530_v55 }
 0x98f   :  { %7632 = vmatmul.mubr.f32.gmra.mrb[116].mxu0 %v15413_v31  ;;  %9927 = vmatprep.mubr.f32.mxu1 %v15413_v31 }
 0x990   :  { %10581 = vmatpush3.bf16.msra.mxu1 %v14503_v16  ;;  %7637 = vmatprep.mubr.f32.mxu0 %v16259_v11 }
 0x991   :  { %10583 = vmatprep.subr.bf16.mxu1 %v14616_v4 }
 0x994   :  { %10585 = vmatpush3.bf16.msra.mxu1 %v14616_v4 }
 0x995   :  { %10587 = vmatprep.subr.bf16.mxu1 %v14694_v30 }
 0x998   :  { %10589 = vmatpush3.bf16.msra.mxu1 %v14694_v30  ;;  %v11025_v38 = vpop.eup %11024 }
 0x999   :  { %10623 = vmatprep.subr.bf16.mxu1 %v16323_v27  ;;  %v7542_v53 = vmul.f32 %v11025_v38, %v7538_v54 }
 0x99b   :  { %v15423_v46 = vadd.f32 %v7546_v28, %v7542_v53 }
 0x99d   :  { %7638 = vmatmul.mubr.f32.gmra.mrb[118].mxu0 %v15423_v46  ;;  %9928 = vmatmul.mubr.f32.gmra.mrb[194].mxu1 %v15423_v46 }
 0x99e   :  { %7885 = vmatprep.mubr.f32.mxu0 %v16259_v11 }
 0xa35   :  { %v7621_v59 = vpop.f32.mrb[112].mxu0 }
 0xa36   :  { %v10728_v40 = vadd.f32 %v7621_v59, %v15049_v60  ;;  %v7623_v52 = vpop.f32.mrb[113].mxu0 }
 0xa37   :  { %v10729_v18 = vadd.f32 %v7623_v52, %v15053_v43  ;;  %v16411_v52 = vld [vmem:[#allocation70_spill] sm:$0xff] }
 0xa38   :  { %v9049_v9 = vmul.f32 -1.442695, %v10728_v40 }
 0xa39   :  { %v9053_v29 = vmul.f32 -1.442695, %v10729_v18 }
 0xa3a   :  { %11026 = vpow2.f32 %v9049_v9 }
 0xa3b   :  { %11028 = vpow2.f32 %v9053_v29 }
 0xa44   :  { %v11027_v0 = vpop.eup %11026 }
 0xa45   :  { %v7745_v51 = vadd.f32 1.0, %v11027_v0  ;;  %v11029_v32 = vpop.eup %11028 }
 0xa46   :  { %v7773_v50 = vadd.f32 1.0, %v11029_v32 }
 0xa47   :  { %11030 = vrcp.f32 %v7745_v51 }
 0xa48   :  { %11032 = vrcp.f32 %v7773_v50 }
 0xa4e   :  { %v7627_v55 = vpop.f32.mrb[114].mxu0  ;;  %v9926_v20 = vpop.f32.mrb[192].mxu1 }
 0xa4f   :  { %v10730_v15 = vadd.f32 %v7627_v55, %v15049_v60  ;;  %v7629_v39 = vpop.f32.mrb[115].mxu0  ;;  %v7710_v54 = vpop.f32.mrb[193].mxu1 }
 0xa50   :  { %v7785_v38 = vadd.f32 %v15317_v6, %v7710_v54  ;;  %v10731_v59 = vadd.f32 %v7629_v39, %v15053_v43  ;;  %v16412_v39 = vld [vmem:[#allocation56_spill] sm:$0xff] }
 0xa51   :  { %v11031_v53 = vpop.eup %11030  ;;  %v9050_v28 = vmul.f32 -1.442695, %v10730_v15 }
 0xa52   :  { %v7789_v40 = vmul.f32 %v11031_v53, %v7785_v38  ;;  %v9054_v18 = vmul.f32 -1.442695, %v10731_v59  ;;  %v11033_v29 = vpop.eup %11032  ;;  %v5791_v38 = vadd.f32 %v16412_v39, %v15049_v60 }
 0xa53   :  { %11034 = vpow2.f32 %v9050_v28  ;;  %v7801_v32 = vsub.f32 1.0, %v11033_v29  ;;  %v7809_v54 = vmul.f32 %v11033_v29, %v15363_v23  ;;  %v16413_v28 = vld [vmem:[#allocation58_spill] sm:$0xff] }
 0xa54   :  { %v7793_v9 = vadd.f32 %v7789_v40, %v16411_v52  ;;  %v5793_v59 = vadd.f32 %v16413_v28, %v15053_v43  ;;  %v7786_v40 = vadd.f32 %v15317_v6, %v9926_v20 }
 0xa56   :  { %11036 = vtanh.f32 %v7793_v9 }
 0xa57   :  { %11038 = vpow2.f32 %v9054_v18 }
 0xa5d   :  { %v11035_v0 = vpop.eup %11034 }
 0xa5e   :  { %v7746_v51 = vadd.f32 1.0, %v11035_v0 }
 0xa60   :  { %v11037_v55 = vpop.eup %11036  ;;  %11040 = vrcp.f32 %v7746_v51  ;;  %v16414_v51 = vld [vmem:[#allocation69_spill] sm:$0xff] }
 0xa61   :  { %v7805_v45 = vmul.f32 %v11037_v55, %v7801_v32  ;;  %v11039_v50 = vpop.eup %11038 }
 0xa62   :  { %v7774_v53 = vadd.f32 1.0, %v11039_v50 }
 0xa63   :  { %v15435_v15 = vadd.f32 %v7809_v54, %v7805_v45  ;;  %v7633_v45 = vpop.f32.mrb[116].mxu0  ;;  %v16416_v54 = vld [vmem:[#allocation14_spill] sm:$0xff] }
 0xa64   :  { %v7731_v52 = vadd.f32 %v7633_v45, %v5791_v38  ;;  %v7635_v9 = vpop.f32.mrb[117].mxu0  ;;  %11042 = vrcp.f32 %v7774_v53 }
 0xa65   :  { %7886 = vmatmul.mubr.f32.vlgmr.msra.gmra.mrb[120].mxu0 %v15435_v15  ;;  %9962 = vmatprep.mubr.f32.mxu1 %v15435_v15  ;;  %v7759_v29 = vadd.f32 %v7635_v9, %v5793_v59 }
 0xa66   :  { %7891 = vmatprep.mubr.f32.mxu0 %v16259_v11  ;;  %10593 = vmatpush1.bf16.msra.mxu0 %v16388_v37  ;;  %v9051_v37 = vmul.f32 -1.442695, %v7731_v52 }
 0xa67   :  { %10595 = vmatprep.subr.bf16.mxu0 %v16389_v8  ;;  %v9055_v8 = vmul.f32 -1.442695, %v7759_v29 }
 0xa68   :  { %11044 = vpow2.f32 %v9051_v37  ;;  %v16417_v37 = vld [vmem:[#allocation68_spill] sm:$0xff] }
 0xa6a   :  { %v11041_v18 = vpop.eup %11040  ;;  %10597 = vmatpush1.bf16.msra.mxu0 %v16390_v10  ;;  %v16415_v10 = vld [vmem:[#allocation59_spill] sm:$0xff] }
 0xa6b   :  { %v7790_v0 = vmul.f32 %v11041_v18, %v7786_v40  ;;  %10599 = vmatprep.subr.bf16.mxu0 %v16392_v63  ;;  %v5797_v20 = vadd.f32 %v16415_v10, %v15049_v60  ;;  %v5799_v63 = vadd.f32 %v16416_v54, %v15053_v43  ;;  %v16418_v10 = vld [vmem:[#allocation67_spill] sm:$0xff] }
 0xa6d   :  { %v7794_v32 = vadd.f32 %v7790_v0, %v16414_v51 }
 0xa6e   :  { %10601 = vmatpush1.bf16.msra.mxu0 %v16393_v1  ;;  %v11043_v55 = vpop.eup %11042 }
 0xa6f   :  { %11046 = vtanh.f32 %v7794_v32  ;;  %10603 = vmatprep.subr.bf16.mxu0 %v16394_v61  ;;  %v7802_v59 = vsub.f32 1.0, %v11043_v55  ;;  %v7810_v52 = vmul.f32 %v11043_v55, %v15387_v49 }
 0xa70   :  { %v7639_v50 = vpop.f32.mrb[118].mxu0  ;;  %v9929_v39 = vpop.f32.mrb[194].mxu1  ;;  %11048 = vpow2.f32 %v9055_v8 }
 0xa71   :  { %v7732_v38 = vadd.f32 %v7639_v50, %v5797_v20  ;;  %v7641_v1 = vpop.f32.mrb[119].mxu0  ;;  %v7720_v53 = vpop.f32.mrb[195].mxu1 }
 0xa72   :  { %10605 = vmatpush1.bf16.msra.mxu0 %v16395_v42  ;;  %v11045_v61 = vpop.eup %11044  ;;  %v7760_v28 = vadd.f32 %v7641_v1, %v5799_v63  ;;  %v8385_v1 = vld [vmem:[%s15718_s8] sm:$0xff] }
 0xa73   :  { %10607 = vmatprep.subr.bf16.mxu0 %v16396_v33  ;;  %v7747_v42 = vadd.f32 1.0, %v11045_v61  ;;  %v9052_v33 = vmul.f32 -1.442695, %v7732_v38  ;;  %v16419_v61 = vld [vmem:[#allocation57_spill] sm:$0xff] }
 0xa75   :  { %11050 = vrcp.f32 %v7747_v42  ;;  %v16420_v42 = vld [vmem:[#allocation61_spill] sm:$0xff] }
 0xa76   :  { %10609 = vmatpush1.bf16.msra.mxu0 %v16397_v58  ;;  %11052 = vpow2.f32 %v9052_v33  ;;  %v9056_v58 = vmul.f32 -1.442695, %v7760_v28  ;;  %v5803_v28 = vadd.f32 %v16419_v61, %v15049_v60  ;;  %v5805_v33 = vadd.f32 %v16420_v42, %v15053_v43  ;;  %v8388_v61 = vld [vmem:[%s15718_s8 + $0x18] sm:$0xff] }
 0xa77   :  { %10611 = vmatprep.subr.bf16.mxu0 %v16398_v44 }
 0xa78   :  { %11054 = vpow2.f32 %v9056_v58 }
 0xa79   :  { %v11047_v45 = vpop.eup %11046 }
 0xa7a   :  { %v7806_v40 = vmul.f32 %v11047_v45, %v7802_v59  ;;  %10613 = vmatpush1.bf16.msra.mxu0 %v16399_v47  ;;  %v11049_v44 = vpop.eup %11048  ;;  %v7787_v47 = vadd.f32 %v15317_v6, %v7720_v53 }
 0xa7b   :  { %10615 = vmatprep.subr.bf16.mxu0 %v16401_v56  ;;  %v7775_v56 = vadd.f32 1.0, %v11049_v44 }
 0xa7c   :  { %v15463_v9 = vadd.f32 %v7810_v52, %v7806_v40 }
 0xa7d   :  { %11056 = vrcp.f32 %v7775_v56 }
 0xa7e   :  { %7892 = vmatmul.mubr.f32.gmra.mrb[122].mxu0 %v15463_v9  ;;  %9963 = vmatmul.mubr.f32.vlgmr.msra.gmra.mrb[196].mxu1 %v15463_v9 }
 0xa7f   :  { %7897 = vmatprep.mubr.f32.mxu0 %v16259_v11  ;;  %10625 = vmatpush3.bf16.msra.mxu1 %v16323_v27  ;;  %v11051_v18 = vpop.eup %11050 }
 0xa80   :  { %10627 = vmatprep.subr.bf16.mxu1 %v16345_v48  ;;  %10617 = vmatpush1.bf16.msra.mxu0 %v16402_v7  ;;  %v7791_v29 = vmul.f32 %v11051_v18, %v7787_v47  ;;  %v11053_v27 = vpop.eup %11052 }
 0xa81   :  { %10619 = vmatprep.subr.bf16.mxu0 %v16403_v21  ;;  %v7748_v0 = vadd.f32 1.0, %v11053_v27 }
 0xa82   :  { %v7795_v51 = vadd.f32 %v7791_v29, %v16417_v37  ;;  %v16421_v29 = vld [vmem:[#allocation13_spill] sm:$0xff] }
 0xa83   :  { %10629 = vmatpush3.bf16.msra.mxu1 %v16345_v48  ;;  %11058 = vrcp.f32 %v7748_v0  ;;  %v11055_v48 = vpop.eup %11054  ;;  %v5809_v27 = vadd.f32 %v16421_v29, %v15049_v60  ;;  %v16422_v0 = vld [vmem:[#allocation62_spill] sm:$0xff] }
 0xa84   :  { %10631 = vmatprep.subr.bf16.mxu1 %v16347_v14  ;;  %10621 = vmatpush1.bf16.msra.mxu0 %v16404_v41  ;;  %11060 = vtanh.f32 %v7795_v51  ;;  %v7776_v7 = vadd.f32 1.0, %v11055_v48  ;;  %v7788_v41 = vadd.f32 %v15317_v6, %v9929_v39  ;;  %v5811_v37 = vadd.f32 %v16422_v0, %v15053_v43 }
 0xa86   :  { %11062 = vrcp.f32 %v7776_v7 }
 0xa87   :  { %10633 = vmatpush3.bf16.msra.mxu1 %v16347_v14  ;;  %v11057_v21 = vpop.eup %11056 }
 0xa88   :  { %10635 = vmatprep.subr.bf16.mxu1 %v14301_v24  ;;  %v7803_v8 = vsub.f32 1.0, %v11057_v21 }
 0xa8b   :  { %10637 = vmatpush3.bf16.msra.mxu1 %v14301_v24 }
 0xa8c   :  { %10639 = vmatprep.subr.bf16.mxu1 %v14318_v17 }
 0xa8d   :  { %v11059_v32 = vpop.eup %11058 }
 0xa8e   :  { %v7792_v14 = vmul.f32 %v11059_v32, %v7788_v41  ;;  %v11061_v24 = vpop.eup %11060 }
 0xa8f   :  { %10641 = vmatpush3.bf16.msra.mxu1 %v14318_v17  ;;  %v7807_v55 = vmul.f32 %v11061_v24, %v7803_v8  ;;  %v7811_v17 = vmul.f32 %v11057_v21, %v15413_v31 }
 0xa90   :  { %10643 = vmatprep.subr.bf16.mxu1 %v14503_v16  ;;  %v7796_v20 = vadd.f32 %v7792_v14, %v16418_v10 }
 0xa91   :  { %v15489_v54 = vadd.f32 %v7811_v17, %v7807_v55  ;;  %v16423_v55 = vld [vmem:[#allocation50_spill] sm:$0xff] }
 0xa92   :  { %11064 = vtanh.f32 %v7796_v20 }
 0xa93   :  { %10645 = vmatpush3.bf16.msra.mxu1 %v14503_v16  ;;  %7898 = vmatmul.mubr.f32.gmra.mrb[124].mxu0 %v15489_v54  ;;  %v11063_v16 = vpop.eup %11062 }
 0xa94   :  { %10647 = vmatprep.subr.bf16.mxu1 %v14616_v4  ;;  %9965 = vmatprep.mubr.f32.mxu1 %v15489_v54  ;;  %v7804_v63 = vsub.f32 1.0, %v11063_v16  ;;  %v7812_v38 = vmul.f32 %v11063_v16, %v15423_v46 }
 0xa95   :  { %7903 = vmatprep.mubr.f32.mxu0 %v16259_v11 }
 0xa97   :  { %10649 = vmatpush3.bf16.msra.mxu1 %v14616_v4 }
 0xa98   :  { %10651 = vmatprep.subr.bf16.mxu1 %v14694_v30 }
 0xa9b   :  { %10653 = vmatpush3.bf16.msra.mxu1 %v14694_v30  ;;  %v8386_v30 = vld [vmem:[%s15718_s8 + $0x8] sm:$0xff] }
 0xa9c   :  { %v11065_v50 = vpop.eup %11064  ;;  %v10654_v53 = vpack.c.bf16 %v8386_v30, %v8385_v1  ;;  %v8387_v30 = vld [vmem:[%s15718_s8 + $0x10] sm:$0xff] }
 0xa9d   :  { %v7808_v39 = vmul.f32 %v11065_v50, %v7804_v63 }
 0xa9e   :  { %10655 = vmatprep.subr.bf16.mxu0 %v10654_v53 }
 0xa9f   :  { %v15497_v4 = vadd.f32 %v7812_v38, %v7808_v39 }
 0xaa1   :  { %7904 = vmatmul.mubr.f32.gmra.mrb[126].mxu0 %v15497_v4  ;;  %9966 = vmatmul.mubr.f32.gmra.mrb[198].mxu1 %v15497_v4 }
 0xaa2   :  { %8151 = vmatprep.mubr.f32.mxu0 %v16259_v11 }
 0xb38   :  { %v7887_v59 = vpop.f32.mrb[120].mxu0 }
 0xb39   :  { %v7995_v45 = vadd.f32 %v7887_v59, %v5803_v28  ;;  %v7889_v40 = vpop.f32.mrb[121].mxu0  ;;  %v10658_v59 = vpack.c.bf16 %v8388_v61, %v8387_v30  ;;  %v16427_v30 = vld [vmem:[#allocation63_spill] sm:$0xff] }
 0xb3a   :  { %v8023_v52 = vadd.f32 %v7889_v40, %v5805_v33  ;;  %v8389_v40 = vld [vmem:[%s15718_s8 + $0x20] sm:$0xff]  ;;  %v5821_v61 = vadd.f32 %v16427_v30, %v15049_v60 }
 0xb3b   :  { %v9057_v58 = vmul.f32 -1.442695, %v7995_v45 }
 0xb3c   :  { %v9061_v44 = vmul.f32 -1.442695, %v8023_v52  ;;  %v8390_v52 = vld [vmem:[%s15718_s8 + $0x28] sm:$0xff] }
 0xb3d   :  { %11066 = vpow2.f32 %v9057_v58 }
 0xb3e   :  { %11068 = vpow2.f32 %v9061_v44  ;;  %v10662_v44 = vpack.c.bf16 %v8390_v52, %v8389_v40 }
 0xb47   :  { %v11067_v56 = vpop.eup %11066 }
 0xb48   :  { %v8011_v47 = vadd.f32 1.0, %v11067_v56  ;;  %v11069_v18 = vpop.eup %11068  ;;  %v8391_v56 = vld [vmem:[%s15718_s8 + $0x30] sm:$0xff] }
 0xb49   :  { %v8039_v51 = vadd.f32 1.0, %v11069_v18  ;;  %v16424_v18 = vld [vmem:[#allocation60_spill] sm:$0xff] }
 0xb4a   :  { %11070 = vrcp.f32 %v8011_v47  ;;  %v8392_v47 = vld [vmem:[%s15718_s8 + $0x38] sm:$0xff]  ;;  %v5815_v29 = vadd.f32 %v16424_v18, %v15049_v60 }
 0xb4b   :  { %11072 = vrcp.f32 %v8039_v51 }
 0xb51   :  { %v7893_v48 = vpop.f32.mrb[122].mxu0  ;;  %v9964_v7 = vpop.f32.mrb[196].mxu1 }
 0xb52   :  { %v7996_v21 = vadd.f32 %v7893_v48, %v5809_v27  ;;  %v7895_v41 = vpop.f32.mrb[123].mxu0  ;;  %v7976_v32 = vpop.f32.mrb[197].mxu1  ;;  %v8052_v27 = vadd.f32 %v15317_v6, %v9964_v7  ;;  %v8394_v7 = vld [vmem:[%s15718_s8 + $0x48] sm:$0xff] }
 0xb53   :  { %v8024_v14 = vadd.f32 %v7895_v41, %v5811_v37  ;;  %v8051_v8 = vadd.f32 %v15317_v6, %v7976_v32  ;;  %v16425_v37 = vld [vmem:[#allocation15_spill] sm:$0xff]  ;;  %v10666_v32 = vpack.c.bf16 %v8392_v47, %v8391_v56 }
 0xb54   :  { %v11071_v24 = vpop.eup %11070  ;;  %v9058_v10 = vmul.f32 -1.442695, %v7996_v21 }
 0xb55   :  { %v8055_v20 = vmul.f32 %v11071_v24, %v8051_v8  ;;  %v9062_v16 = vmul.f32 -1.442695, %v8024_v14  ;;  %v11073_v63 = vpop.eup %11072  ;;  %v8393_v8 = vld [vmem:[%s15718_s8 + $0x40] sm:$0xff]  ;;  %v16426_v24 = vld [vmem:[#allocation29_spill] sm:$0xff] }
 0xb56   :  { %11074 = vpow2.f32 %v9058_v10  ;;  %v8067_v38 = vsub.f32 1.0, %v11073_v63  ;;  %v8075_v42 = vmul.f32 %v11073_v63, %v15435_v15 }
 0xb57   :  { %v8059_v17 = vadd.f32 %v8055_v20, %v16423_v55  ;;  %v10670_v55 = vpack.c.bf16 %v8394_v7, %v8393_v8 }
 0xb59   :  { %11076 = vtanh.f32 %v8059_v17  ;;  %v8395_v17 = vld [vmem:[%s15718_s8 + $0x50] sm:$0xff] }
 0xb5a   :  { %11078 = vpow2.f32 %v9062_v16  ;;  %v8396_v16 = vld [vmem:[%s15718_s8 + $0x58] sm:$0xff] }
 0xb60   :  { %v11075_v50 = vpop.eup %11074 }
 0xb61   :  { %v8012_v39 = vadd.f32 1.0, %v11075_v50  ;;  %v10674_v50 = vpack.c.bf16 %v8396_v16, %v8395_v17  ;;  %v16429_v17 = vld [vmem:[#allocation42_spill] sm:$0xff] }
 0xb63   :  { %v11077_v1 = vpop.eup %11076  ;;  %11080 = vrcp.f32 %v8012_v39  ;;  %v8397_v39 = vld [vmem:[%s15718_s8 + $0x60] sm:$0xff] }
 0xb64   :  { %v8071_v28 = vmul.f32 %v11077_v1, %v8067_v38  ;;  %v11079_v45 = vpop.eup %11078  ;;  %v8398_v38 = vld [vmem:[%s15718_s8 + $0x68] sm:$0xff] }
 0xb65   :  { %v8040_v58 = vadd.f32 1.0, %v11079_v45  ;;  %v10678_v40 = vpack.c.bf16 %v8398_v38, %v8397_v39 }
 0xb66   :  { %v15525_v33 = vadd.f32 %v8075_v42, %v8071_v28  ;;  %v7899_v51 = vpop.f32.mrb[124].mxu0  ;;  %v16428_v28 = vld [vmem:[#allocation64_spill] sm:$0xff] }
 0xb67   :  { %11082 = vrcp.f32 %v8040_v58  ;;  %v7997_v21 = vadd.f32 %v7899_v51, %v5815_v29  ;;  %v7901_v41 = vpop.f32.mrb[125].mxu0  ;;  %v5823_v42 = vadd.f32 %v16428_v28, %v15053_v43  ;;  %v8399_v29 = vld [vmem:[%s15718_s8 + $0x70] sm:$0xff] }
 0xb68   :  { %8152 = vmatmul.mubr.f32.vlgmr.msra.gmra.mrb[128].mxu0 %v15525_v33  ;;  %10000 = vmatprep.mubr.f32.mxu1 %v15525_v33 }
 0xb69   :  { %8157 = vmatprep.mubr.f32.mxu0 %v16259_v11  ;;  %10657 = vmatpush3.bf16.msra.mxu0 %v10654_v53  ;;  %v5817_v53 = vadd.f32 %v16425_v37, %v15053_v43  ;;  %v9059_v20 = vmul.f32 -1.442695, %v7997_v21 }
 0xb6a   :  { %10659 = vmatprep.subr.bf16.mxu0 %v10658_v59 }
 0xb6b   :  { %v8025_v14 = vadd.f32 %v7901_v41, %v5817_v53 }
 0xb6d   :  { %v11081_v0 = vpop.eup %11080  ;;  %10661 = vmatpush3.bf16.msra.mxu0 %v10658_v59  ;;  %v9063_v63 = vmul.f32 -1.442695, %v8025_v14 }
 0xb6e   :  { %v8056_v48 = vmul.f32 %v11081_v0, %v8052_v27  ;;  %10663 = vmatprep.subr.bf16.mxu0 %v10662_v44  ;;  %v8400_v27 = vld [vmem:[%s15718_s8 + $0x78] sm:$0xff] }
 0xb6f   :  { %v10682_v41 = vpack.c.bf16 %v8400_v27, %v8399_v29 }
 0xb70   :  { %v8060_v10 = vadd.f32 %v8056_v48, %v16426_v24 }
 0xb71   :  { %10665 = vmatpush3.bf16.msra.mxu0 %v10662_v44  ;;  %v11083_v1 = vpop.eup %11082 }
 0xb72   :  { %11084 = vtanh.f32 %v8060_v10  ;;  %10667 = vmatprep.subr.bf16.mxu0 %v10666_v32  ;;  %v8068_v56 = vsub.f32 1.0, %v11083_v1  ;;  %v8076_v51 = vmul.f32 %v11083_v1, %v15463_v9 }
 0xb73   :  { %11086 = vpow2.f32 %v9059_v20 }
 0xb74   :  { %11088 = vpow2.f32 %v9063_v63  ;;  %v7905_v59 = vpop.f32.mrb[126].mxu0  ;;  %v9967_v45 = vpop.f32.mrb[198].mxu1 }
 0xb75   :  { %10669 = vmatpush3.bf16.msra.mxu0 %v10666_v32  ;;  %v7998_v52 = vadd.f32 %v7905_v59, %v5821_v61  ;;  %v7907_v58 = vpop.f32.mrb[127].mxu0  ;;  %v7986_v44 = vpop.f32.mrb[199].mxu1  ;;  %v8054_v38 = vadd.f32 %v15317_v6, %v9967_v45  ;;  %v16430_v61 = vld [vmem:[#allocation30_spill] sm:$0xff] }
 0xb76   :  { %10671 = vmatprep.subr.bf16.mxu0 %v10670_v55  ;;  %v8026_v18 = vadd.f32 %v7907_v58, %v5823_v42  ;;  %v8053_v24 = vadd.f32 %v15317_v6, %v7986_v44 }
 0xb77   :  { %v9060_v37 = vmul.f32 -1.442695, %v7998_v52 }
 0xb78   :  { %v9064_v32 = vmul.f32 -1.442695, %v8026_v18 }
 0xb79   :  { %10673 = vmatpush3.bf16.msra.mxu0 %v10670_v55  ;;  %11090 = vpow2.f32 %v9060_v37  ;;  %v15636_v37 = vld [vmem:[%s15717_s7] ss:$0 sm:$0xff] }
 0xb7a   :  { %10675 = vmatprep.subr.bf16.mxu0 %v10674_v50 }
 0xb7c   :  { %v11085_v47 = vpop.eup %11084 }
 0xb7d   :  { %v11087_v0 = vpop.eup %11086  ;;  %v8072_v53 = vmul.f32 %v11085_v47, %v8068_v56  ;;  %10677 = vmatpush3.bf16.msra.mxu0 %v10674_v50 }
 0xb7e   :  { %v8013_v48 = vadd.f32 1.0, %v11087_v0  ;;  %10679 = vmatprep.subr.bf16.mxu0 %v10678_v40  ;;  %v11089_v14 = vpop.eup %11088 }
 0xb7f   :  { %v15577_v21 = vadd.f32 %v8076_v51, %v8072_v53  ;;  %v8041_v8 = vadd.f32 1.0, %v11089_v14 }
 0xb80   :  { %11092 = vrcp.f32 %v8013_v48 }
 0xb81   :  { %8158 = vmatmul.mubr.f32.gmra.mrb[130].mxu0 %v15577_v21  ;;  %10001 = vmatmul.mubr.f32.vlgmr.msra.gmra.mrb[200].mxu1 %v15577_v21  ;;  %11094 = vpow2.f32 %v9064_v32  ;;  %v16437_v32 = vld [vmem:[#allocation71_spill] sm:$0xff] }
 0xb82   :  { %8163 = vmatprep.mubr.f32.mxu0 %v16259_v11  ;;  %10681 = vmatpush3.bf16.msra.mxu0 %v10678_v40  ;;  %11096 = vrcp.f32 %v8041_v8 }
 0xb83   :  { %10683 = vmatprep.subr.bf16.mxu0 %v10682_v41  ;;  %v11091_v7 = vpop.eup %11090 }
 0xb84   :  { %v8014_v20 = vadd.f32 1.0, %v11091_v7 }
 0xb86   :  { %10685 = vmatpush3.bf16.msra.mxu0 %v10682_v41  ;;  %11098 = vrcp.f32 %v8014_v20 }
 0xb8a   :  { %v11093_v10 = vpop.eup %11092 }
 0xb8b   :  { %v8057_v55 = vmul.f32 %v11093_v10, %v8053_v24  ;;  %v11095_v63 = vpop.eup %11094 }
 0xb8c   :  { %v8042_v50 = vadd.f32 1.0, %v11095_v63  ;;  %v11097_v39 = vpop.eup %11096 }
 0xb8d   :  { %v8061_v16 = vadd.f32 %v8057_v55, %v16429_v17  ;;  %v8069_v42 = vsub.f32 1.0, %v11097_v39  ;;  %v8077_v52 = vmul.f32 %v11097_v39, %v15489_v54 }
 0xb8f   :  { %11100 = vtanh.f32 %v8061_v16 }
 0xb90   :  { %v11099_v1 = vpop.eup %11098  ;;  %11102 = vrcp.f32 %v8042_v50 }
 0xb91   :  { %v8058_v30 = vmul.f32 %v11099_v1, %v8054_v38 }
 0xb93   :  { %v8062_v28 = vadd.f32 %v8058_v30, %v16430_v61  ;;  %v16438_v30 = vld [vmem:[#allocation21_spill] sm:$0xff] }
 0xb94   :  { %v5839_v61 = vadd.f32 %v16438_v30, %v15049_v60 }
 0xb95   :  { %11104 = vtanh.f32 %v8062_v28 }
 0xb99   :  { %v11101_v59 = vpop.eup %11100 }
 0xb9a   :  { %v8073_v40 = vmul.f32 %v11101_v59, %v8069_v42  ;;  %v11103_v6 = vpop.eup %11102  ;;  %v16439_v42 = vld [vmem:[#allocation36_spill] sm:$0xff] }
 0xb9b   :  { %v8070_v45 = vsub.f32 1.0, %v11103_v6  ;;  %v8078_v47 = vmul.f32 %v11103_v6, %v15497_v4  ;;  %v5841_v59 = vadd.f32 %v16439_v42, %v15053_v43 }
 0xb9c   :  { %v15587_v58 = vadd.f32 %v8077_v52, %v8073_v40  ;;  %v16440_v52 = vld [vmem:[#allocation31_spill] sm:$0xff] }
 0xb9e   :  { %8164 = vmatmul.mubr.f32.gmra.mrb[132].mxu0 %v15587_v58  ;;  %10003 = vmatprep.mubr.f32.mxu1 %v15587_v58 }
 0xb9f   :  { %8169 = vmatprep.mubr.f32.mxu0 %v16259_v11  ;;  %v11105_v44 = vpop.eup %11104  ;;  %v16431_v11 = vld [vmem:[#allocation47_spill] sm:$0xff] }
 0xba0   :  { %v8074_v56 = vmul.f32 %v11105_v44, %v8070_v45 }
 0xba2   :  { %v15593_v18 = vadd.f32 %v8078_v47, %v8074_v56 }
 0xba4   :  { %8170 = vmatmul.mubr.f32.gmra.mrb[134].mxu0 %v15593_v18  ;;  %10004 = vmatmul.mubr.f32.gmra.mrb[202].mxu1 %v15593_v18 }
 0xba5   :  { %10038 = vmatprep.mubr.f32.mxu0 %v15068_v25  ;;  %v16433_v25 = vld [vmem:[#allocation72_spill] sm:$0xff] }
 0xba8   :  { %10039 = vmatmul.mubr.f32.vlgmr.msra.gmra.mrb[136].mxu0 %v15095_v3  ;;  %v16432_v3 = vld [vmem:[#allocation51_spill] sm:$0xff] }
 0xba9   :  { %10041 = vmatprep.mubr.f32.mxu0 %v15116_v57  ;;  %v5827_v57 = vadd.f32 %v16433_v25, %v15049_v60 }
 0xbac   :  { %10042 = vmatmul.mubr.f32.gmra.mrb[138].mxu0 %v15128_v5  ;;  %v16434_v5 = vld [vmem:[#allocation73_spill] sm:$0xff] }
 0xbad   :  { %10044 = vmatprep.mubr.f32.mxu0 %v15143_v22  ;;  %v5829_v22 = vadd.f32 %v16434_v5, %v15053_v43 }
 0xbb0   :  { %10045 = vmatmul.mubr.f32.gmra.mrb[140].mxu0 %v15167_v19 }
 0xbb1   :  { %10047 = vmatprep.mubr.f32.mxu0 %v15189_v26 }
 0xbb4   :  { %10048 = vmatmul.mubr.f32.gmra.mrb[142].mxu0 %v15202_v34 }
 0xbb5   :  { %10050 = vmatprep.mubr.f32.mxu0 %v15215_v13 }
 0xbb8   :  { %10051 = vmatmul.mubr.f32.gmra.mrb[144].mxu0 %v15238_v35 }
 0xbb9   :  { %10053 = vmatprep.mubr.f32.mxu0 %v15262_v62 }
 0xbbc   :  { %10054 = vmatmul.mubr.f32.gmra.mrb[146].mxu0 %v16431_v11 }
 0xbbd   :  { %10056 = vmatprep.mubr.f32.mxu0 %v15286_v12 }
 0xbc0   :  { %10057 = vmatmul.mubr.f32.gmra.mrb[148].mxu0 %v15310_v2 }
 0xbc1   :  { %10059 = vmatprep.mubr.f32.mxu0 %v15340_v36  ;;  %v16435_v36 = vld [vmem:[#allocation20_spill] sm:$0xff] }
 0xbc4   :  { %10060 = vmatmul.mubr.f32.gmra.mrb[150].mxu0 %v16432_v3  ;;  %v16441_v3 = vld [vmem:[#allocation74_spill] sm:$0xff] }
 0xbc5   :  { %10062 = vmatprep.mubr.f32.mxu0 %v15363_v23  ;;  %v5845_v25 = vadd.f32 %v16441_v3, %v15049_v60 }
 0xbc8   :  { %10063 = vmatmul.mubr.f32.gmra.mrb[152].mxu0 %v15387_v49  ;;  %v5833_v49 = vadd.f32 %v16435_v36, %v15049_v60 }
 0xbc9   :  { %10065 = vmatprep.mubr.f32.mxu0 %v15413_v31  ;;  %v16436_v31 = vld [vmem:[#allocation18_spill] sm:$0xff] }
 0xbcc   :  { %10066 = vmatmul.mubr.f32.gmra.mrb[154].mxu0 %v15423_v46  ;;  %v5835_v46 = vadd.f32 %v16436_v31, %v15053_v43 }
 0xbcd   :  { %10068 = vmatprep.mubr.f32.mxu0 %v15435_v15 }
 0xbd0   :  { %10069 = vmatmul.mubr.f32.gmra.mrb[156].mxu0 %v15463_v9 }
 0xbd1   :  { %10071 = vmatprep.mubr.f32.mxu0 %v15489_v54 }
 0xbd4   :  { %10072 = vmatmul.mubr.f32.gmra.mrb[158].mxu0 %v15497_v4 }
 0xbd5   :  { %10074 = vmatprep.mubr.f32.mxu0 %v15525_v33 }
 0xbd8   :  { %10075 = vmatmul.mubr.f32.gmra.mrb[160].mxu0 %v15577_v21 }
 0xbd9   :  { %10077 = vmatprep.mubr.f32.mxu0 %v15587_v58 }
 0xbdc   :  { %10078 = vmatmul.mubr.f32.gmra.mrb[162].mxu0 %v15593_v18 }
 0xc3b   :  { %v8153_v19 = vpop.f32.mrb[128].mxu0 }
 0xc3c   :  { %v8261_v26 = vadd.f32 %v8153_v19, %v5827_v57  ;;  %v8155_v34 = vpop.f32.mrb[129].mxu0  ;;  %v16442_v57 = vld [vmem:[#allocation75_spill] sm:$0xff] }
 0xc3d   :  { %v8289_v13 = vadd.f32 %v8155_v34, %v5829_v22  ;;  %v5847_v5 = vadd.f32 %v16442_v57, %v15053_v43  ;;  %v16444_v57 = vld [vmem:[#allocation55_spill] sm:$0xff] }
 0xc3e   :  { %v9065_v35 = vmul.f32 -1.442695, %v8261_v26 }
 0xc3f   :  { %v9069_v62 = vmul.f32 -1.442695, %v8289_v13 }
 0xc40   :  { %11106 = vpow2.f32 %v9065_v35 }
 0xc41   :  { %11108 = vpow2.f32 %v9069_v62 }
 0xc4a   :  { %v11107_v23 = vpop.eup %11106 }
 0xc4b   :  { %v8277_v12 = vadd.f32 1.0, %v11107_v23  ;;  %v11109_v2 = vpop.eup %11108 }
 0xc4c   :  { %v8305_v15 = vadd.f32 1.0, %v11109_v2 }
 0xc4d   :  { %11110 = vrcp.f32 %v8277_v12  ;;  %v15656_v12 = vld [vmem:[%s15719_s9] ss:$0 sm:$0xff]  ;;  %s11179_s9 = smov [#allocation3]  }
 0xc4e   :  { %11112 = vrcp.f32 %v8305_v15  ;;  %s8670_s17 = sshll.u32 %s11179_s9, 4  ;;  %s8671_s17 = int_to_ptr.vmem [resolvable:$true] %s8670_s17 }
 0xc4f   :  { %s11150_s18 = scalar_lea.vmem %s8671_s17, 4096  ;;  %p11155_p1 = scmp.lt.s32.totalorder %s8671_s17, %s8671_s17 }
 0xc50   :  { %p11151_p0 = scmp.ne.s32.totalorder %s8671_s17, %s11150_s18  ;;  %p11156_p2 = scmp.lt.s32.totalorder %s11150_s18, %s11150_s18 }
 0xc52   :  { %p11157_p3 = por %p11156_p2, %p11155_p1 }
 0xc54   :  { %v8159_v9 = vpop.f32.mrb[130].mxu0  ;;  %v10002_v54 = vpop.f32.mrb[200].mxu1  ;;  %p11158_p4 = pnand %p11157_p3, %p11151_p0 }
 0xc55   :  { %v8262_v4 = vadd.f32 %v8159_v9, %v5833_v49  ;;  %v8161_v29 = vpop.f32.mrb[131].mxu0  ;;  %v8242_v27 = vpop.f32.mrb[201].mxu1  ;;  %v8318_v38 = vadd.f32 %v15636_v37, %v10002_v54 }
 0xc56   :  { %v8290_v0 = vadd.f32 %v8161_v29, %v5835_v46  ;;  %v8317_v53 = vadd.f32 %v15636_v37, %v8242_v27 }
 0xc57   :  { %v11111_v51 = vpop.eup %11110  ;;  %v9066_v48 = vmul.f32 -1.442695, %v8262_v4 }
 0xc58   :  { %v8321_v41 = vmul.f32 %v11111_v51, %v8317_v53  ;;  %v9070_v8 = vmul.f32 -1.442695, %v8290_v0  ;;  %v11113_v7 = vpop.eup %11112 }
 0xc59   :  { %11114 = vpow2.f32 %v9066_v48  ;;  %v8333_v20 = vsub.f32 1.0, %v11113_v7  ;;  %v8341_v16 = vmul.f32 %v11113_v7, %v15525_v33 }
 0xc5a   :  { %v8325_v14 = vadd.f32 %v8321_v41, %v16437_v32 }
 0xc5c   :  { %11116 = vtanh.f32 %v8325_v14 }
 0xc5d   :  { %11118 = vpow2.f32 %v9070_v8 }
 0xc63   :  { %v11115_v24 = vpop.eup %11114 }
 0xc64   :  { %v8278_v10 = vadd.f32 1.0, %v11115_v24 }
 0xc66   :  { %v11117_v55 = vpop.eup %11116  ;;  %11120 = vrcp.f32 %v8278_v10 }
 0xc67   :  { %v8337_v17 = vmul.f32 %v11117_v55, %v8333_v20  ;;  %v11119_v50 = vpop.eup %11118 }
 0xc68   :  { %v8306_v39 = vadd.f32 1.0, %v11119_v50  ;;  %v16443_v50 = vld [vmem:[#allocation46_spill] sm:$0xff] }
 0xc69   :  { %v8345_v63 = vadd.f32 %v8341_v16, %v8337_v17 }
 0xc6a   :  { %11122 = vrcp.f32 %v8306_v39 }
 0xc6b   :  { %10080 = vmatprep.mubr.f32.mxu0 %v8345_v63 }
 0xc70   :  { %v11121_v1 = vpop.eup %11120 }
 0xc71   :  { %v8322_v28 = vmul.f32 %v11121_v1, %v8318_v38  ;;  %v8165_v40 = vpop.f32.mrb[132].mxu0 }
 0xc72   :  { %v8263_v45 = vadd.f32 %v8165_v40, %v5839_v61  ;;  %v8167_v33 = vpop.f32.mrb[133].mxu0 }
 0xc73   :  { %v8326_v6 = vadd.f32 %v8322_v28, %v16440_v52  ;;  %v8291_v44 = vadd.f32 %v8167_v33, %v5841_v59 }
 0xc74   :  { %v9067_v56 = vmul.f32 -1.442695, %v8263_v45  ;;  %v11123_v11 = vpop.eup %11122 }
 0xc75   :  { %11124 = vtanh.f32 %v8326_v6  ;;  %v9071_v47 = vmul.f32 -1.442695, %v8291_v44  ;;  %v8334_v35 = vsub.f32 1.0, %v11123_v11  ;;  %v8342_v36 = vmul.f32 %v11123_v11, %v15577_v21 }
 0xc76   :  { %11126 = vpow2.f32 %v9067_v56 }
 0xc77   :  { %11128 = vpow2.f32 %v9071_v47  ;;  %v8171_v22 = vpop.f32.mrb[134].mxu0  ;;  %v15651_v19 = vpop.f32.mrb[202].mxu1 }
 0xc78   :  { %v8264_v26 = vadd.f32 %v8171_v22, %v5845_v25  ;;  %v8173_v34 = vpop.f32.mrb[135].mxu0  ;;  %v8252_v13 = vpop.f32.mrb[203].mxu1  ;;  %v8320_v33 = vadd.f32 %v15636_v37, %v15651_v19 }
 0xc79   :  { %v8292_v23 = vadd.f32 %v8173_v34, %v5847_v5  ;;  %v8319_v24 = vadd.f32 %v15636_v37, %v8252_v13 }
 0xc7a   :  { %v9068_v2 = vmul.f32 -1.442695, %v8264_v26 }
 0xc7b   :  { %v10040_v49 = vpop.f32.mrb[136].mxu0  ;;  %v9072_v4 = vmul.f32 -1.442695, %v8292_v23 }
 0xc7c   :  { %11130 = vpow2.f32 %v9068_v2  ;;  %v8480_v46 = vadd.f32 %v10040_v49, %v15656_v12  ;;  %v8474_v15 = vpop.f32.mrb[137].mxu0 }
 0xc7d   :  { %v8475_v54 = vadd.f32 %v15656_v12, %v8474_v15 }
 0xc7e   :  { %8634 = vst [vmem:[#allocation3 + $0x8] sm:$0xff] %v8480_v46 }
 0xc7f   :  { %v11125_v62 = vpop.eup %11124  ;;  %8633 = vst [vmem:[#allocation3] sm:$0xff] %v8475_v54  ;;  %v10043_v29 = vpop.f32.mrb[138].mxu0 }
 0xc80   :  { %v8338_v60 = vmul.f32 %v11125_v62, %v8334_v35  ;;  %v11127_v43 = vpop.eup %11126  ;;  %v8490_v27 = vadd.f32 %v10043_v29, %v15656_v12  ;;  %v8484_v0 = vpop.f32.mrb[139].mxu0 }
 0xc81   :  { %v8279_v31 = vadd.f32 1.0, %v11127_v43  ;;  %v11129_v21 = vpop.eup %11128  ;;  %v8485_v53 = vadd.f32 %v15656_v12, %v8484_v0 }
 0xc82   :  { %v8346_v9 = vadd.f32 %v8342_v36, %v8338_v60  ;;  %8636 = vst [vmem:[#allocation3 + $0x18] sm:$0xff] %v8490_v27  ;;  %v8307_v48 = vadd.f32 1.0, %v11129_v21 }
 0xc83   :  { %11132 = vrcp.f32 %v8279_v31  ;;  %8635 = vst [vmem:[#allocation3 + $0x10] sm:$0xff] %v8485_v53  ;;  %v10046_v51 = vpop.f32.mrb[140].mxu0 }
 0xc84   :  { %10081 = vmatmul.mubr.f32.gmra.mrb[164].mxu0 %v8346_v9  ;;  %11134 = vpow2.f32 %v9072_v4  ;;  %v8500_v41 = vadd.f32 %v10046_v51, %v15656_v12  ;;  %v8494_v32 = vpop.f32.mrb[141].mxu0 }
 0xc85   :  { %v8495_v14 = vadd.f32 %v15656_v12, %v8494_v32  ;;  %11136 = vrcp.f32 %v8307_v48 }
 0xc86   :  { %v11131_v8 = vpop.eup %11130  ;;  %8638 = vst [vmem:[#allocation3 + $0x28] sm:$0xff] %v8500_v41 }
 0xc87   :  { %v8280_v7 = vadd.f32 1.0, %v11131_v8  ;;  %8637 = vst [vmem:[#allocation3 + $0x20] sm:$0xff] %v8495_v14  ;;  %v10049_v10 = vpop.f32.mrb[142].mxu0 }
 0xc88   :  { %v8510_v55 = vadd.f32 %v10049_v10, %v15656_v12  ;;  %v8504_v17 = vpop.f32.mrb[143].mxu0 }
 0xc89   :  { %11138 = vrcp.f32 %v8280_v7  ;;  %v8505_v63 = vadd.f32 %v15656_v12, %v8504_v17 }
 0xc8a   :  { %8640 = vst [vmem:[#allocation3 + $0x38] sm:$0xff] %v8510_v55 }
 0xc8b   :  { %8639 = vst [vmem:[#allocation3 + $0x30] sm:$0xff] %v8505_v63  ;;  %v10052_v38 = vpop.f32.mrb[144].mxu0 }
 0xc8c   :  { %v8520_v1 = vadd.f32 %v10052_v38, %v15656_v12  ;;  %v8514_v30 = vpop.f32.mrb[145].mxu0 }
 0xc8d   :  { %v11133_v20 = vpop.eup %11132  ;;  %v8515_v28 = vadd.f32 %v15656_v12, %v8514_v30 }
 0xc8e   :  { %v8323_v16 = vmul.f32 %v11133_v20, %v8319_v24  ;;  %v11135_v61 = vpop.eup %11134  ;;  %8642 = vst [vmem:[#allocation3 + $0x48] sm:$0xff] %v8520_v1 }
 0xc8f   :  { %8641 = vst [vmem:[#allocation3 + $0x40] sm:$0xff] %v8515_v28  ;;  %v10055_v42 = vpop.f32.mrb[146].mxu0  ;;  %v8308_v59 = vadd.f32 1.0, %v11135_v61  ;;  %v11137_v45 = vpop.eup %11136 }
 0xc90   :  { %v8327_v39 = vadd.f32 %v8323_v16, %v16443_v50  ;;  %v8530_v40 = vadd.f32 %v10055_v42, %v15656_v12  ;;  %v8524_v52 = vpop.f32.mrb[147].mxu0  ;;  %v8335_v22 = vsub.f32 1.0, %v11137_v45  ;;  %v8343_v19 = vmul.f32 %v11137_v45, %v15587_v58 }
 0xc91   :  { %v8525_v6 = vadd.f32 %v15656_v12, %v8524_v52 }
 0xc92   :  { %11140 = vtanh.f32 %v8327_v39  ;;  %8644 = vst [vmem:[#allocation3 + $0x58] sm:$0xff] %v8530_v40 }
 0xc93   :  { %v11139_v44 = vpop.eup %11138  ;;  %8643 = vst [vmem:[#allocation3 + $0x50] sm:$0xff] %v8525_v6  ;;  %v10058_v56 = vpop.f32.mrb[148].mxu0  ;;  %11142 = vrcp.f32 %v8308_v59 }
 0xc94   :  { %v8324_v47 = vmul.f32 %v11139_v44, %v8320_v33  ;;  %v8540_v11 = vadd.f32 %v10058_v56, %v15656_v12  ;;  %v8534_v3 = vpop.f32.mrb[149].mxu0 }
 0xc95   :  { %v8535_v25 = vadd.f32 %v15656_v12, %v8534_v3 }
 0xc96   :  { %v8328_v5 = vadd.f32 %v8324_v47, %v16444_v57  ;;  %8646 = vst [vmem:[#allocation3 + $0x68] sm:$0xff] %v8540_v11 }
 0xc97   :  { %8645 = vst [vmem:[#allocation3 + $0x60] sm:$0xff] %v8535_v25  ;;  %v10061_v34 = vpop.f32.mrb[150].mxu0 }
 0xc98   :  { %11144 = vtanh.f32 %v8328_v5  ;;  %v8550_v13 = vadd.f32 %v10061_v34, %v15656_v12  ;;  %v8544_v35 = vpop.f32.mrb[151].mxu0 }
 0xc99   :  { %v8545_v62 = vadd.f32 %v15656_v12, %v8544_v35 }
 0xc9a   :  { %8648 = vst [vmem:[#allocation3 + $0x78] sm:$0xff] %v8550_v13 }
 0xc9b   :  { %8647 = vst [vmem:[#allocation3 + $0x70] sm:$0xff] %v8545_v62  ;;  %v10064_v2 = vpop.f32.mrb[152].mxu0 }
 0xc9c   :  { %v11141_v26 = vpop.eup %11140  ;;  %v8560_v60 = vadd.f32 %v10064_v2, %v15656_v12  ;;  %v8554_v36 = vpop.f32.mrb[153].mxu0 }
 0xc9d   :  { %v8339_v37 = vmul.f32 %v11141_v26, %v8335_v22  ;;  %v8555_v43 = vadd.f32 %v15656_v12, %v8554_v36  ;;  %v11143_v49 = vpop.eup %11142 }
 0xc9e   :  { %8650 = vst [vmem:[#allocation3 + $0x88] sm:$0xff] %v8560_v60  ;;  %v8336_v9 = vsub.f32 1.0, %v11143_v49  ;;  %v8344_v27 = vmul.f32 %v11143_v49, %v15593_v18 }
 0xc9f   :  { %v8347_v23 = vadd.f32 %v8343_v19, %v8339_v37  ;;  %8649 = vst [vmem:[#allocation3 + $0x80] sm:$0xff] %v8555_v43  ;;  %v10067_v31 = vpop.f32.mrb[154].mxu0 }
 0xca0   :  { %v8570_v58 = vadd.f32 %v10067_v31, %v15656_v12  ;;  %v8564_v46 = vpop.f32.mrb[155].mxu0 }
 0xca1   :  { %10083 = vmatprep.mubr.f32.mxu0 %v8347_v23  ;;  %v8565_v15 = vadd.f32 %v15656_v12, %v8564_v46 }
 0xca2   :  { %v11145_v54 = vpop.eup %11144  ;;  %8652 = vst [vmem:[#allocation3 + $0x98] sm:$0xff] %v8570_v58 }
 0xca3   :  { %8651 = vst [vmem:[#allocation3 + $0x90] sm:$0xff] %v8565_v15  ;;  %v10070_v4 = vpop.f32.mrb[156].mxu0  ;;  %v8340_v29 = vmul.f32 %v11145_v54, %v8336_v9 }
 0xca4   :  { %v8580_v0 = vadd.f32 %v10070_v4, %v15656_v12  ;;  %v8574_v21 = vpop.f32.mrb[157].mxu0 }
 0xca5   :  { %v8575_v53 = vadd.f32 %v15656_v12, %v8574_v21  ;;  %v8348_v51 = vadd.f32 %v8344_v27, %v8340_v29 }
 0xca6   :  { %8654 = vst [vmem:[#allocation3 + $0xa8] sm:$0xff] %v8580_v0 }
 0xca7   :  { %8653 = vst [vmem:[#allocation3 + $0xa0] sm:$0xff] %v8575_v53  ;;  %v10073_v48 = vpop.f32.mrb[158].mxu0  ;;  %10084 = vmatmul.mubr.f32.gmra.mrb[166].mxu0 %v8348_v51 }
 0xca8   :  { %v8590_v41 = vadd.f32 %v10073_v48, %v15656_v12  ;;  %v8584_v32 = vpop.f32.mrb[159].mxu0 }
 0xca9   :  { %v8585_v14 = vadd.f32 %v15656_v12, %v8584_v32 }
 0xcaa   :  { %8656 = vst [vmem:[#allocation3 + $0xb8] sm:$0xff] %v8590_v41 }
 0xcab   :  { %8655 = vst [vmem:[#allocation3 + $0xb0] sm:$0xff] %v8585_v14  ;;  %v10076_v8 = vpop.f32.mrb[160].mxu0 }
 0xcac   :  { %v8600_v18 = vadd.f32 %v10076_v8, %v15656_v12  ;;  %v8594_v7 = vpop.f32.mrb[161].mxu0 }
 0xcad   :  { %v8595_v24 = vadd.f32 %v15656_v12, %v8594_v7 }
 0xcae   :  { %8658 = vst [vmem:[#allocation3 + $0xc8] sm:$0xff] %v8600_v18 }
 0xcaf   :  { %8657 = vst [vmem:[#allocation3 + $0xc0] sm:$0xff] %v8595_v24  ;;  %v10079_v10 = vpop.f32.mrb[162].mxu0 }
 0xcb0   :  { %v8610_v20 = vadd.f32 %v10079_v10, %v15656_v12  ;;  %v8604_v55 = vpop.f32.mrb[163].mxu0 }
 0xcb1   :  { %v8605_v17 = vadd.f32 %v15656_v12, %v8604_v55 }
 0xcb2   :  { %8660 = vst [vmem:[#allocation3 + $0xd8] sm:$0xff] %v8610_v20 }
 0xcb3   :  { %8659 = vst [vmem:[#allocation3 + $0xd0] sm:$0xff] %v8605_v17 }
 0xd57   :  { %v10082_v16 = vpop.f32.mrb[164].mxu0 }
 0xd58   :  { %v8620_v63 = vadd.f32 %v10082_v16, %v15656_v12  ;;  %v8614_v50 = vpop.f32.mrb[165].mxu0 }
 0xd59   :  { %v8615_v39 = vadd.f32 %v15656_v12, %v8614_v50 }
 0xd5a   :  { %8662 = vst [vmem:[#allocation3 + $0xe8] sm:$0xff] %v8620_v63 }
 0xd5b   :  { %8661 = vst [vmem:[#allocation3 + $0xe0] sm:$0xff] %v8615_v39 }
 0xd7a   :  { %v10085_v38 = vpop.f32.mrb[166].mxu0 }
 0xd7b   :  { %v8630_v1 = vadd.f32 %v10085_v38, %v15656_v12  ;;  %v8624_v30 = vpop.f32.mrb[167].mxu0 }
 0xd7c   :  { %v8625_v61 = vadd.f32 %v15656_v12, %v8624_v30 }
 0xd7d   :  { %8664 = vst [vmem:[#allocation3 + $0xf8] sm:$0xff] %v8630_v1 }
 0xd7e   :  { %8663 = vst [vmem:[#allocation3 + $0xf0] sm:$0xff] %v8625_v61 }
 0xd7f   :  { %11161 = shalt.err (!%p11158_p4)
}
 0xd80   :  { %s11162_s21 = scalar_lea.hbm %s15720_s10, 4096 }
 0xd81   :  { %p11163_p5 = scmp.ne.s32.totalorder %s15720_s10, %s11162_s21  ;;  %p11166_p6 = scmp.lt.u32.totalorder %s11162_s21, %s15720_s10 }
 0xd83   :  { %p11168_p7 = pnand %p11166_p6, %p11163_p5 }
 0xd85   :  { %11171 = shalt.err (!%p11168_p7)
}
 0xd86   :  { %s11180_s24 = smov 128   ;;  %s11181_s25 = smov 8  }
 0xd87   :  { %8676 = dma.vmem_to_hbm [thread:$0]  %s8671_s17, 4096, %s15720_s10, [#allocation4], %s11180_s24, %s11180_s24, %s11181_s25  }
 0xd88   :  { %11172 = dma.done.wait [#allocation4], 4096  }
 0xd89   :  { %11173 = vsyncadd [#allocation4], 4294963200 }
 0xd8a   :  { %8680 = vsyncpa [#allocation4], 1 }

</bundles_post_ra>
